<compile_context>
chip_gen: v7x
topology: tpu7x:2x2x1
jax: 0.10.0
libtpu: 0.0.40
codegen_flags: <defaults>
</compile_context>

<pallas_src>
import functools

import jax
import jax.numpy as jnp
from jax.experimental import pallas as pl
from jax.experimental.pallas import tpu as pltpu


# ----------------------------------------------------------------------------- helpers

def _round_up(v, m):
    return ((v + m - 1) // m) * m


def _choose_tile(M, align, cap=1024):
    """Single grid step if M <= cap (1-TC chips); otherwise near-equal tiles <= cap."""
    Mr = _round_up(M, align)
    if Mr <= cap:
        return Mr
    steps = pl.cdiv(Mr, cap)
    return _round_up(pl.cdiv(Mr, steps), align)


# ----------------------------------------------------------------------------- kernels

def _mm_bias_act_kernel(x_ref, w_ref, b_ref, o_ref, *, act):
    # bf16 x bf16 -> f32 accumulate on the MXU; f32 bias/activation epilogue.
    acc = jnp.dot(x_ref[...], w_ref[...], preferred_element_type=jnp.float32)
    acc = acc + b_ref[...]                       # (tm, Np) + (1, Np)
    if act == "relu":
        acc = jnp.maximum(acc, 0.0)
    o_ref[...] = acc


def _maxpool_kernel(p_ref, o_ref, *, num_windows):
    r = p_ref[0]                                 # (tile_m, Cp)
    for k in range(1, num_windows):
        r = jnp.maximum(r, p_ref[k])
    o_ref[...] = r


# ----------------------------------------------------------------------------- pallas wrappers

def matmul_bias_act(x, w_packed, b_packed, act):
    """x: (M, K) f32.  w_packed: (Kp, Np) bf16, pre-padded/packed.  b_packed: (1, Np) f32.

    Returns (M, Np) f32 (lane-dense; callers slice real channels only where needed).
    """
    M, K = x.shape
    Kp, Np = w_packed.shape
    tile_m = _choose_tile(M, 16)                 # bf16 LHS -> keep sublane dim %16
    Mp = _round_up(M, tile_m)
    xp = jnp.pad(x, ((0, Mp - M), (0, Kp - K))).astype(jnp.bfloat16)

    # TODO(synk): on v7x verify the "parallel" axis really shards across the 2 TCs for
    # the grid>1 call; if not, switch to pltpu.CORE_PARALLEL / an explicit core axis.
    out = pl.pallas_call(
        functools.partial(_mm_bias_act_kernel, act=act),
        out_shape=jax.ShapeDtypeStruct((Mp, Np), jnp.float32),
        grid=(Mp // tile_m,),
        in_specs=[
            pl.BlockSpec((tile_m, Kp), lambda i: (i, 0)),
            pl.BlockSpec((Kp, Np), lambda i: (0, 0)),
            pl.BlockSpec((1, Np), lambda i: (0, 0)),
        ],
        out_specs=pl.BlockSpec((tile_m, Np), lambda i: (i, 0)),
        compiler_params=pltpu.CompilerParams(dimension_semantics=("parallel",)),
    )(xp, w_packed, b_packed)
    return out[:M]


def maxpool2d(x, k, s):
    """x: (B, H, W, Cp) NHWC with lane-dense (multiple-of-128) channel dim; floor mode."""
    # TODO(synk): at larger batch/spatial sizes, fuse the 3x3/s2 max into the preceding
    # conv's epilogue to avoid the k*k patch duplication in HBM.
    B, H, W, C = x.shape
    oh = (H - k) // s + 1
    ow = (W - k) // s + 1
    cols = [x[:, i:i + s * oh:s, j:j + s * ow:s, :] for i in range(k) for j in range(k)]
    patches = jnp.stack(cols, axis=0).reshape(k * k, B * oh * ow, C)
    M = B * oh * ow

    tile_m = _choose_tile(M, 8)
    Mp = _round_up(M, tile_m)
    patches = jnp.pad(patches, ((0, 0), (0, Mp - M), (0, 0)))

    out = pl.pallas_call(
        functools.partial(_maxpool_kernel, num_windows=k * k),
        out_shape=jax.ShapeDtypeStruct((Mp, C), jnp.float32),
        grid=(Mp // tile_m,),
        in_specs=[pl.BlockSpec((k * k, tile_m, C), lambda i: (0, i, 0))],
        out_specs=pl.BlockSpec((tile_m, C), lambda i: (i, 0)),
        compiler_params=pltpu.CompilerParams(dimension_semantics=("parallel",)),
    )(patches)
    return out[:M].reshape(B, oh, ow, C)


# ----------------------------------------------------------------------------- conv glue (im2col)

def _im2col(x, kh, kw, sh, sw):
    """x: padded NHWC -> ((B*oh*ow, kh*kw*C), oh, ow); column order (kh, kw, c)."""
    # TODO(synk): if batch/spatial sizes grow, fold this into the matmul kernel as a
    # K-reduction grid axis over window offsets instead of materializing patches in HBM.
    B, H, W, C = x.shape
    oh = (H - kh) // sh + 1
    ow = (W - kw) // sw + 1
    cols = [x[:, i:i + sh * oh:sh, j:j + sw * ow:sw, :] for i in range(kh) for j in range(kw)]
    patches = jnp.stack(cols, axis=3)                        # (B, oh, ow, kh*kw, C)
    return patches.reshape(B * oh * ow, kh * kw * C), oh, ow


def conv2d(x, w_packed, b_packed, *, kh, kw, stride, padding, act):
    """x NHWC (real channels); pre-packed weights; returns (B, oh, ow, Np) lane-padded."""
    xp = jnp.pad(x, ((0, 0), (padding, padding), (padding, padding), (0, 0)))
    patches, oh, ow = _im2col(xp, kh, kw, stride, stride)
    out = matmul_bias_act(patches, w_packed, b_packed, act)
    return out.reshape(x.shape[0], oh, ow, w_packed.shape[1])


def conv_transpose2d(x, w_packed, b_packed, *, kh, kw, stride, output_padding, oc, act):
    """x NHWC (real channels); padding=0; fused stride-phase transposed conv.

    All s*s stride phases (zero-padded to a common ceil(K/s)^2 window) share one im2col
    and one matmul (phases concatenated along N); the result is interleaved back onto
    the output grid with a reshape/transpose and cropped. Output-padding rows/cols get
    only bias (zero conv contribution), which the fused matmul produces naturally.
    """
    s = stride
    B, H, W, _ = x.shape
    kmax_h = -(-kh // s)
    kmax_w = -(-kw // s)
    OH = (H - 1) * s + kh + output_padding
    OW = (W - 1) * s + kw + output_padding
    # TODO(synk): general fallback (bias-fill) needed only if the interleaved phase grid
    # does not cover the output; holds for every layer of this module.
    assert s * kmax_h >= kh + output_padding and s * kmax_w >= kw + output_padding

    ocp = w_packed.shape[1] // (s * s)

    xp = jnp.pad(x, ((0, 0), (kmax_h - 1, kmax_h - 1), (kmax_w - 1, kmax_w - 1), (0, 0)))
    patches, ohm, owm = _im2col(xp, kmax_h, kmax_w, 1, 1)

    # Tanh is applied outside the kernel on the real channels only (EUP relief);
    # ReLU stays fused (cheap VPU epilogue, padded lanes are zero anyway).
    kernel_act = "relu" if act == "relu" else None
    out = matmul_bias_act(patches, w_packed, b_packed, kernel_act)     # (M, s*s*ocp)

    out = out.reshape(B, ohm, owm, s, s, ocp)
    out = jnp.transpose(out, (0, 1, 3, 2, 4, 5)).reshape(B, ohm * s, owm * s, ocp)
    out = out[:, :OH, :OW, :oc]
    if act == "tanh":
        out = jnp.tanh(out)
    return out


# ----------------------------------------------------------------------------- parameters

def init_params(key):
    """Deterministic synthetic weights (shapes match the PyTorch module).
    # TODO(synk): the original code loads pretrained AlexNet features; the encoder
    # weights here are synthetic (same shapes), not a checkpoint load.
    """
    ks = jax.random.split(key, 10)

    def _w(k, shape, fan_in):
        return jax.random.normal(k, shape, jnp.float32) / jnp.sqrt(float(fan_in))

    def _b(k, n):
        return jax.random.normal(k, (n,), jnp.float32) * 0.01

    return {
        # encoder = alexnet.features[:6]
        "e0_w": _w(ks[0], (64, 3, 11, 11), 3 * 11 * 11),     # Conv2d(3, 64, 11, s=4, p=2)
        "e0_b": _b(ks[1], 64),
        "e3_w": _w(ks[2], (192, 64, 5, 5), 64 * 5 * 5),      # Conv2d(64, 192, 5, p=2)
        "e3_b": _b(ks[3], 192),
        # decoder
        "d0_w": _w(ks[4], (8, 192, 13, 13), 8 * 13 * 13),    # ConvTranspose2d(8, 192, 13, s=2)
        "d0_b": _b(ks[5], 192),
        "d2_w": _w(ks[6], (192, 64, 3, 3), 192 * 3 * 3),     # ConvTranspose2d(192, 64, 3, s=2)
        "d2_b": _b(ks[7], 64),
        "d4_w": _w(ks[8], (64, 3, 3, 3), 64 * 3 * 3),        # ConvTranspose2d(64, 3, 3, s=2, op=1)
        "d4_b": _b(ks[9], 3),
    }


def prepare_params(p):
    """One-time packing: PyTorch-layout weights -> DMA-ready bf16 (Kp, Np) matrices.

    Runs once outside the jitted forward, so no per-forward transpose/flip/pad/cast ops.
    """
    def pack_conv(w, b):
        oc, ic, kh, kw = w.shape
        K = kh * kw * ic
        wm = jnp.transpose(w, (2, 3, 1, 0)).reshape(K, oc)            # (kh,kw,ic) x oc
        Kp, Np = _round_up(K, 128), _round_up(oc, 128)
        wm = jnp.pad(wm, ((0, Kp - K), (0, Np - oc))).astype(jnp.bfloat16)
        bm = jnp.pad(b, (0, Np - oc)).reshape(1, Np).astype(jnp.float32)
        return wm, bm

    def pack_convT(w, b, s):
        ic, oc, kh, kw = w.shape
        kmax_h, kmax_w = -(-kh // s), -(-kw // s)
        K = kmax_h * kmax_w * ic
        Np1 = _round_up(oc, 128)
        cols = []
        for ph in range(s):
            for pw in range(s):
                wsub = w[:, :, ph::s, pw::s]                           # (ic, oc, khp, kwp)
                khp, kwp = wsub.shape[2], wsub.shape[3]
                wsub = jnp.pad(wsub, ((0, 0), (0, 0), (0, kmax_h - khp), (0, kmax_w - kwp)))
                wsub = jnp.flip(wsub, (2, 3))                          # full-conv correlation form
                wm = jnp.transpose(wsub, (2, 3, 0, 1)).reshape(K, oc)
                cols.append(jnp.pad(wm, ((0, 0), (0, Np1 - oc))))
        wfused = jnp.concatenate(cols, axis=1)                         # (K, s*s*Np1)
        Kp = _round_up(K, 128)
        wfused = jnp.pad(wfused, ((0, Kp - K), (0, 0))).astype(jnp.bfloat16)
        bfused = jnp.tile(jnp.pad(b, (0, Np1 - oc)), s * s).reshape(1, s * s * Np1)
        return wfused, bfused.astype(jnp.float32)

    out = {}
    out["e0_w"], out["e0_b"] = pack_conv(p["e0_w"], p["e0_b"])
    out["e3_w"], out["e3_b"] = pack_conv(p["e3_w"], p["e3_b"])
    out["d0_w"], out["d0_b"] = pack_convT(p["d0_w"], p["d0_b"], 2)
    out["d2_w"], out["d2_b"] = pack_convT(p["d2_w"], p["d2_b"], 2)
    out["d4_w"], out["d4_b"] = pack_convT(p["d4_w"], p["d4_b"], 2)
    return out


# ----------------------------------------------------------------------------- forward

def autoencoder_forward(x_nchw, pk):
    # NOTE: bf16 MXU inputs with f32 accumulation; expect small divergence vs. an f32
    # PyTorch reference (largest through the K=1600 e3 reduction).
    x = jnp.transpose(x_nchw, (0, 2, 3, 1)).astype(jnp.float32)        # NCHW -> NHWC

    # ---- encoder (AlexNet features[:6]) ----
    x = conv2d(x, pk["e0_w"], pk["e0_b"], kh=11, kw=11, stride=4, padding=2, act="relu")
    x = maxpool2d(x, 3, 2)                                             # padded channels stay zero
    x = conv2d(x[..., :64], pk["e3_w"], pk["e3_b"], kh=5, kw=5, stride=1, padding=2, act="relu")
    x = maxpool2d(x, 3, 2)

    # ---- decoder ----
    # TODO(synk): the source module feeds the 192-channel encoder output into a
    # ConvTranspose2d declared with in_channels=8 (shape bug in the original code);
    # to keep the declared decoder weight shapes, only the first 8 channels are used.
    x = x[..., :8]
    x = conv_transpose2d(x, pk["d0_w"], pk["d0_b"], kh=13, kw=13, stride=2,
                         output_padding=0, oc=192, act="relu")
    x = conv_transpose2d(x, pk["d2_w"], pk["d2_b"], kh=3, kw=3, stride=2,
                         output_padding=0, oc=64, act="relu")
    x = conv_transpose2d(x, pk["d4_w"], pk["d4_b"], kh=3, kw=3, stride=2,
                         output_padding=1, oc=3, act="tanh")

    return jnp.transpose(x, (0, 3, 1, 2))                              # NHWC -> NCHW


# ----------------------------------------------------------------------------- main

if __name__ == "__main__":
    key = jax.random.PRNGKey(0)
    k_param, k_x = jax.random.split(key)
    raw_params = init_params(k_param)
    packed = prepare_params(raw_params)        # one-time weight packing (outside the jit)

    # Smallest input for which this encoder yields a non-empty feature map:
    # 47 -> conv(11,s4,p2) -> 11 -> pool -> 5 -> conv(5,p2) -> 5 -> pool -> 2
    # decoder: 2 -> 15 -> 31 -> 64  => output (B, 3, 64, 64)
    x = jax.random.normal(k_x, (2, 3, 47, 47), jnp.float32)

    out = jax.jit(autoencoder_forward)(x, packed)
    out = jax.block_until_ready(out)
    assert out.shape == (2, 3, 64, 64), out.shape
    assert bool(jnp.all(jnp.isfinite(out)))
    print("KERNEL_OK")
</pallas_src>

<mosaic_0001>
module attributes {stable_mosaic.version = 11 : i64} {
  func.func @_mm_bias_act_kernel(%arg0: i32, %arg1: memref<256x384xbf16, #tpu.memory_space<vmem>>, %arg2: memref<384x128xbf16, #tpu.memory_space<vmem>>, %arg3: memref<1x128xf32, #tpu.memory_space<vmem>>, %arg4: memref<256x128xf32, #tpu.memory_space<vmem>>) attributes {dimension_semantics = [#tpu.dimension_semantics<parallel>], iteration_bounds = array<i64: 1>, scalar_prefetch = 0 : i64, scratch_operands = 0 : i64, tpu.core_type = #tpu.core_type<tc>, window_params = [{transform_indices = @transform_0, window_bounds = array<i64: 256, 384>}, {pipeline_mode = #tpu.pipeline_mode<synchronous>, transform_indices = @transform_1, window_bounds = array<i64: 384, 128>}, {pipeline_mode = #tpu.pipeline_mode<synchronous>, transform_indices = @transform_2, window_bounds = array<i64: 1, 128>}, {transform_indices = @transform_3, window_bounds = array<i64: 256, 128>}]} {
    %c0 = arith.constant 0 : index
    %c0_0 = arith.constant 0 : index
    %0 = vector.load %arg1[%c0, %c0_0] : memref<256x384xbf16, #tpu.memory_space<vmem>>, vector<256x384xbf16>
    %c0_1 = arith.constant 0 : index
    %c0_2 = arith.constant 0 : index
    %1 = vector.load %arg2[%c0_1, %c0_2] : memref<384x128xbf16, #tpu.memory_space<vmem>>, vector<384x128xbf16>
    %cst = arith.constant dense<0.000000e+00> : vector<256x128xf32>
    %2 = tpu.matmul %0, %1, %cst {dimension_numbers = #tpu.dot_dimension_numbers<[1], [0], [0], [1], [0, 0, 1, 1], [], []>} : vector<256x384xbf16>, vector<384x128xbf16>, vector<256x128xf32> -> vector<256x128xf32>
    %c0_3 = arith.constant 0 : index
    %c0_4 = arith.constant 0 : index
    %3 = vector.load %arg3[%c0_3, %c0_4] : memref<1x128xf32, #tpu.memory_space<vmem>>, vector<1x128xf32>
    %4 = vector.broadcast %3 : vector<1x128xf32> to vector<256x128xf32>
    %5 = arith.addf %2, %4 : vector<256x128xf32>
    %cst_5 = arith.constant 0.000000e+00 : f32
    %6 = vector.broadcast %cst_5 : f32 to vector<256x128xf32>
    %7 = arith.maximumf %5, %6 : vector<256x128xf32>
    %c0_6 = arith.constant 0 : index
    %c0_7 = arith.constant 0 : index
    %8 = vector.load %arg4[%c0_6, %c0_7] : memref<256x128xf32, #tpu.memory_space<vmem>>, vector<256x128xf32>
    tpu.vector_store %arg4[%c0_6, %c0_7], %7 {strides = array<i32>} : memref<256x128xf32, #tpu.memory_space<vmem>>, vector<256x128xf32>,
    return
  }
  func.func @transform_0(%arg0: i32) -> (i32, i32) {
    %c0_i32 = arith.constant 0 : i32
    %c0_i32_0 = arith.constant 0 : i32
    return %arg0, %c0_i32 : i32, i32
  }
  func.func @transform_1(%arg0: i32) -> (i32, i32) {
    %c0_i32 = arith.constant 0 : i32
    %c0_i32_0 = arith.constant 0 : i32
    %c0_i32_1 = arith.constant 0 : i32
    return %c0_i32, %c0_i32_0 : i32, i32
  }
  func.func @transform_2(%arg0: i32) -> (i32, i32) {
    %c0_i32 = arith.constant 0 : i32
    %c0_i32_0 = arith.constant 0 : i32
    %c0_i32_1 = arith.constant 0 : i32
    return %c0_i32, %c0_i32_0 : i32, i32
  }
  func.func @transform_3(%arg0: i32) -> (i32, i32) {
    %c0_i32 = arith.constant 0 : i32
    %c0_i32_0 = arith.constant 0 : i32
    return %arg0, %c0_i32 : i32, i32
  }
}

module attributes {stable_mosaic.version = 11 : i64} {
  func.func @_maxpool_kernel(%arg0: i32, %arg1: memref<9x56x128xf32, #tpu.memory_space<vmem>>, %arg2: memref<56x128xf32, #tpu.memory_space<vmem>>) attributes {dimension_semantics = [#tpu.dimension_semantics<parallel>], iteration_bounds = array<i64: 1>, scalar_prefetch = 0 : i64, scratch_operands = 0 : i64, tpu.core_type = #tpu.core_type<tc>, window_params = [{transform_indices = @transform_0, window_bounds = array<i64: 9, 56, 128>}, {transform_indices = @transform_1, window_bounds = array<i64: 56, 128>}]} {
    %c0 = arith.constant 0 : index
    %c0_0 = arith.constant 0 : index
    %c0_1 = arith.constant 0 : index
    %0 = vector.load %arg1[%c0, %c0_0, %c0_1] : memref<9x56x128xf32, #tpu.memory_space<vmem>>, vector<1x56x128xf32>
    %1 = vector.shape_cast %0 : vector<1x56x128xf32> to vector<56x128xf32>
    %c1 = arith.constant 1 : index
    %c0_2 = arith.constant 0 : index
    %c0_3 = arith.constant 0 : index
    %2 = vector.load %arg1[%c1, %c0_2, %c0_3] : memref<9x56x128xf32, #tpu.memory_space<vmem>>, vector<1x56x128xf32>
    %3 = vector.shape_cast %2 : vector<1x56x128xf32> to vector<56x128xf32>
    %4 = arith.maximumf %1, %3 : vector<56x128xf32>
    %c2 = arith.constant 2 : index
    %c0_4 = arith.constant 0 : index
    %c0_5 = arith.constant 0 : index
    %5 = vector.load %arg1[%c2, %c0_4, %c0_5] : memref<9x56x128xf32, #tpu.memory_space<vmem>>, vector<1x56x128xf32>
    %6 = vector.shape_cast %5 : vector<1x56x128xf32> to vector<56x128xf32>
    %7 = arith.maximumf %4, %6 : vector<56x128xf32>
    %c3 = arith.constant 3 : index
    %c0_6 = arith.constant 0 : index
    %c0_7 = arith.constant 0 : index
    %8 = vector.load %arg1[%c3, %c0_6, %c0_7] : memref<9x56x128xf32, #tpu.memory_space<vmem>>, vector<1x56x128xf32>
    %9 = vector.shape_cast %8 : vector<1x56x128xf32> to vector<56x128xf32>
    %10 = arith.maximumf %7, %9 : vector<56x128xf32>
    %c4 = arith.constant 4 : index
    %c0_8 = arith.constant 0 : index
    %c0_9 = arith.constant 0 : index
    %11 = vector.load %arg1[%c4, %c0_8, %c0_9] : memref<9x56x128xf32, #tpu.memory_space<vmem>>, vector<1x56x128xf32>
    %12 = vector.shape_cast %11 : vector<1x56x128xf32> to vector<56x128xf32>
    %13 = arith.maximumf %10, %12 : vector<56x128xf32>
    %c5 = arith.constant 5 : index
    %c0_10 = arith.constant 0 : index
    %c0_11 = arith.constant 0 : index
    %14 = vector.load %arg1[%c5, %c0_10, %c0_11] : memref<9x56x128xf32, #tpu.memory_space<vmem>>, vector<1x56x128xf32>
    %15 = vector.shape_cast %14 : vector<1x56x128xf32> to vector<56x128xf32>
    %16 = arith.maximumf %13, %15 : vector<56x128xf32>
    %c6 = arith.constant 6 : index
    %c0_12 = arith.constant 0 : index
    %c0_13 = arith.constant 0 : index
    %17 = vector.load %arg1[%c6, %c0_12, %c0_13] : memref<9x56x128xf32, #tpu.memory_space<vmem>>, vector<1x56x128xf32>
    %18 = vector.shape_cast %17 : vector<1x56x128xf32> to vector<56x128xf32>
    %19 = arith.maximumf %16, %18 : vector<56x128xf32>
    %c7 = arith.constant 7 : index
    %c0_14 = arith.constant 0 : index
    %c0_15 = arith.constant 0 : index
    %20 = vector.load %arg1[%c7, %c0_14, %c0_15] : memref<9x56x128xf32, #tpu.memory_space<vmem>>, vector<1x56x128xf32>
    %21 = vector.shape_cast %20 : vector<1x56x128xf32> to vector<56x128xf32>
    %22 = arith.maximumf %19, %21 : vector<56x128xf32>
    %c8 = arith.constant 8 : index
    %c0_16 = arith.constant 0 : index
    %c0_17 = arith.constant 0 : index
    %23 = vector.load %arg1[%c8, %c0_16, %c0_17] : memref<9x56x128xf32, #tpu.memory_space<vmem>>, vector<1x56x128xf32>
    %24 = vector.shape_cast %23 : vector<1x56x128xf32> to vector<56x128xf32>
    %25 = arith.maximumf %22, %24 : vector<56x128xf32>
    %c0_18 = arith.constant 0 : index
    %c0_19 = arith.constant 0 : index
    %26 = vector.load %arg2[%c0_18, %c0_19] : memref<56x128xf32, #tpu.memory_space<vmem>>, vector<56x128xf32>
    tpu.vector_store %arg2[%c0_18, %c0_19], %25 {strides = array<i32>} : memref<56x128xf32, #tpu.memory_space<vmem>>, vector<56x128xf32>,
    return
  }
  func.func @transform_0(%arg0: i32) -> (i32, i32, i32) {
    %c0_i32 = arith.constant 0 : i32
    %c0_i32_0 = arith.constant 0 : i32
    %c0_i32_1 = arith.constant 0 : i32
    return %c0_i32, %arg0, %c0_i32_0 : i32, i32, i32
  }
  func.func @transform_1(%arg0: i32) -> (i32, i32) {
    %c0_i32 = arith.constant 0 : i32
    %c0_i32_0 = arith.constant 0 : i32
    return %arg0, %c0_i32 : i32, i32
  }
}

module attributes {stable_mosaic.version = 11 : i64} {
  func.func @_mm_bias_act_kernel(%arg0: i32, %arg1: memref<64x1664xbf16, #tpu.memory_space<vmem>>, %arg2: memref<1664x256xbf16, #tpu.memory_space<vmem>>, %arg3: memref<1x256xf32, #tpu.memory_space<vmem>>, %arg4: memref<64x256xf32, #tpu.memory_space<vmem>>) attributes {dimension_semantics = [#tpu.dimension_semantics<parallel>], iteration_bounds = array<i64: 1>, scalar_prefetch = 0 : i64, scratch_operands = 0 : i64, tpu.core_type = #tpu.core_type<tc>, window_params = [{transform_indices = @transform_0, window_bounds = array<i64: 64, 1664>}, {pipeline_mode = #tpu.pipeline_mode<synchronous>, transform_indices = @transform_1, window_bounds = array<i64: 1664, 256>}, {pipeline_mode = #tpu.pipeline_mode<synchronous>, transform_indices = @transform_2, window_bounds = array<i64: 1, 256>}, {transform_indices = @transform_3, window_bounds = array<i64: 64, 256>}]} {
    %c0 = arith.constant 0 : index
    %c0_0 = arith.constant 0 : index
    %0 = vector.load %arg1[%c0, %c0_0] : memref<64x1664xbf16, #tpu.memory_space<vmem>>, vector<64x1664xbf16>
    %c0_1 = arith.constant 0 : index
    %c0_2 = arith.constant 0 : index
    %1 = vector.load %arg2[%c0_1, %c0_2] : memref<1664x256xbf16, #tpu.memory_space<vmem>>, vector<1664x256xbf16>
    %cst = arith.constant dense<0.000000e+00> : vector<64x256xf32>
    %2 = tpu.matmul %0, %1, %cst {dimension_numbers = #tpu.dot_dimension_numbers<[1], [0], [0], [1], [0, 0, 1, 1], [], []>} : vector<64x1664xbf16>, vector<1664x256xbf16>, vector<64x256xf32> -> vector<64x256xf32>
    %c0_3 = arith.constant 0 : index
    %c0_4 = arith.constant 0 : index
    %3 = vector.load %arg3[%c0_3, %c0_4] : memref<1x256xf32, #tpu.memory_space<vmem>>, vector<1x256xf32>
    %4 = vector.broadcast %3 : vector<1x256xf32> to vector<64x256xf32>
    %5 = arith.addf %2, %4 : vector<64x256xf32>
    %cst_5 = arith.constant 0.000000e+00 : f32
    %6 = vector.broadcast %cst_5 : f32 to vector<64x256xf32>
    %7 = arith.maximumf %5, %6 : vector<64x256xf32>
    %c0_6 = arith.constant 0 : index
    %c0_7 = arith.constant 0 : index
    %8 = vector.load %arg4[%c0_6, %c0_7] : memref<64x256xf32, #tpu.memory_space<vmem>>, vector<64x256xf32>
    tpu.vector_store %arg4[%c0_6, %c0_7], %7 {strides = array<i32>} : memref<64x256xf32, #tpu.memory_space<vmem>>, vector<64x256xf32>,
    return
  }
  func.func @transform_0(%arg0: i32) -> (i32, i32) {
    %c0_i32 = arith.constant 0 : i32
    %c0_i32_0 = arith.constant 0 : i32
    return %arg0, %c0_i32 : i32, i32
  }
  func.func @transform_1(%arg0: i32) -> (i32, i32) {
    %c0_i32 = arith.constant 0 : i32
    %c0_i32_0 = arith.constant 0 : i32
    %c0_i32_1 = arith.constant 0 : i32
    return %c0_i32, %c0_i32_0 : i32, i32
  }
  func.func @transform_2(%arg0: i32) -> (i32, i32) {
    %c0_i32 = arith.constant 0 : i32
    %c0_i32_0 = arith.constant 0 : i32
    %c0_i32_1 = arith.constant 0 : i32
    return %c0_i32, %c0_i32_0 : i32, i32
  }
  func.func @transform_3(%arg0: i32) -> (i32, i32) {
    %c0_i32 = arith.constant 0 : i32
    %c0_i32_0 = arith.constant 0 : i32
    return %arg0, %c0_i32 : i32, i32
  }
}

module attributes {stable_mosaic.version = 11 : i64} {
  func.func @_maxpool_kernel(%arg0: i32, %arg1: memref<9x8x256xf32, #tpu.memory_space<vmem>>, %arg2: memref<8x256xf32, #tpu.memory_space<vmem>>) attributes {dimension_semantics = [#tpu.dimension_semantics<parallel>], iteration_bounds = array<i64: 1>, scalar_prefetch = 0 : i64, scratch_operands = 0 : i64, tpu.core_type = #tpu.core_type<tc>, window_params = [{transform_indices = @transform_0, window_bounds = array<i64: 9, 8, 256>}, {transform_indices = @transform_1, window_bounds = array<i64: 8, 256>}]} {
    %c0 = arith.constant 0 : index
    %c0_0 = arith.constant 0 : index
    %c0_1 = arith.constant 0 : index
    %0 = vector.load %arg1[%c0, %c0_0, %c0_1] : memref<9x8x256xf32, #tpu.memory_space<vmem>>, vector<1x8x256xf32>
    %1 = vector.shape_cast %0 : vector<1x8x256xf32> to vector<8x256xf32>
    %c1 = arith.constant 1 : index
    %c0_2 = arith.constant 0 : index
    %c0_3 = arith.constant 0 : index
    %2 = vector.load %arg1[%c1, %c0_2, %c0_3] : memref<9x8x256xf32, #tpu.memory_space<vmem>>, vector<1x8x256xf32>
    %3 = vector.shape_cast %2 : vector<1x8x256xf32> to vector<8x256xf32>
    %4 = arith.maximumf %1, %3 : vector<8x256xf32>
    %c2 = arith.constant 2 : index
    %c0_4 = arith.constant 0 : index
    %c0_5 = arith.constant 0 : index
    %5 = vector.load %arg1[%c2, %c0_4, %c0_5] : memref<9x8x256xf32, #tpu.memory_space<vmem>>, vector<1x8x256xf32>
    %6 = vector.shape_cast %5 : vector<1x8x256xf32> to vector<8x256xf32>
    %7 = arith.maximumf %4, %6 : vector<8x256xf32>
    %c3 = arith.constant 3 : index
    %c0_6 = arith.constant 0 : index
    %c0_7 = arith.constant 0 : index
    %8 = vector.load %arg1[%c3, %c0_6, %c0_7] : memref<9x8x256xf32, #tpu.memory_space<vmem>>, vector<1x8x256xf32>
    %9 = vector.shape_cast %8 : vector<1x8x256xf32> to vector<8x256xf32>
    %10 = arith.maximumf %7, %9 : vector<8x256xf32>
    %c4 = arith.constant 4 : index
    %c0_8 = arith.constant 0 : index
    %c0_9 = arith.constant 0 : index
    %11 = vector.load %arg1[%c4, %c0_8, %c0_9] : memref<9x8x256xf32, #tpu.memory_space<vmem>>, vector<1x8x256xf32>
    %12 = vector.shape_cast %11 : vector<1x8x256xf32> to vector<8x256xf32>
    %13 = arith.maximumf %10, %12 : vector<8x256xf32>
    %c5 = arith.constant 5 : index
    %c0_10 = arith.constant 0 : index
    %c0_11 = arith.constant 0 : index
    %14 = vector.load %arg1[%c5, %c0_10, %c0_11] : memref<9x8x256xf32, #tpu.memory_space<vmem>>, vector<1x8x256xf32>
    %15 = vector.shape_cast %14 : vector<1x8x256xf32> to vector<8x256xf32>
    %16 = arith.maximumf %13, %15 : vector<8x256xf32>
    %c6 = arith.constant 6 : index
    %c0_12 = arith.constant 0 : index
    %c0_13 = arith.constant 0 : index
    %17 = vector.load %arg1[%c6, %c0_12, %c0_13] : memref<9x8x256xf32, #tpu.memory_space<vmem>>, vector<1x8x256xf32>
    %18 = vector.shape_cast %17 : vector<1x8x256xf32> to vector<8x256xf32>
    %19 = arith.maximumf %16, %18 : vector<8x256xf32>
    %c7 = arith.constant 7 : index
    %c0_14 = arith.constant 0 : index
    %c0_15 = arith.constant 0 : index
    %20 = vector.load %arg1[%c7, %c0_14, %c0_15] : memref<9x8x256xf32, #tpu.memory_space<vmem>>, vector<1x8x256xf32>
    %21 = vector.shape_cast %20 : vector<1x8x256xf32> to vector<8x256xf32>
    %22 = arith.maximumf %19, %21 : vector<8x256xf32>
    %c8 = arith.constant 8 : index
    %c0_16 = arith.constant 0 : index
    %c0_17 = arith.constant 0 : index
    %23 = vector.load %arg1[%c8, %c0_16, %c0_17] : memref<9x8x256xf32, #tpu.memory_space<vmem>>, vector<1x8x256xf32>
    %24 = vector.shape_cast %23 : vector<1x8x256xf32> to vector<8x256xf32>
    %25 = arith.maximumf %22, %24 : vector<8x256xf32>
    %c0_18 = arith.constant 0 : index
    %c0_19 = arith.constant 0 : index
    %26 = vector.load %arg2[%c0_18, %c0_19] : memref<8x256xf32, #tpu.memory_space<vmem>>, vector<8x256xf32>
    tpu.vector_store %arg2[%c0_18, %c0_19], %25 {strides = array<i32>} : memref<8x256xf32, #tpu.memory_space<vmem>>, vector<8x256xf32>,
    return
  }
  func.func @transform_0(%arg0: i32) -> (i32, i32, i32) {
    %c0_i32 = arith.constant 0 : i32
    %c0_i32_0 = arith.constant 0 : i32
    %c0_i32_1 = arith.constant 0 : i32
    return %c0_i32, %arg0, %c0_i32_0 : i32, i32, i32
  }
  func.func @transform_1(%arg0: i32) -> (i32, i32) {
    %c0_i32 = arith.constant 0 : i32
    %c0_i32_0 = arith.constant 0 : i32
    return %arg0, %c0_i32 : i32, i32
  }
}

module attributes {stable_mosaic.version = 11 : i64} {
  func.func @_mm_bias_act_kernel(%arg0: i32, %arg1: memref<128x512xbf16, #tpu.memory_space<vmem>>, %arg2: memref<512x1024xbf16, #tpu.memory_space<vmem>>, %arg3: memref<1x1024xf32, #tpu.memory_space<vmem>>, %arg4: memref<128x1024xf32, #tpu.memory_space<vmem>>) attributes {dimension_semantics = [#tpu.dimension_semantics<parallel>], iteration_bounds = array<i64: 1>, scalar_prefetch = 0 : i64, scratch_operands = 0 : i64, tpu.core_type = #tpu.core_type<tc>, window_params = [{transform_indices = @transform_0, window_bounds = array<i64: 128, 512>}, {pipeline_mode = #tpu.pipeline_mode<synchronous>, transform_indices = @transform_1, window_bounds = array<i64: 512, 1024>}, {pipeline_mode = #tpu.pipeline_mode<synchronous>, transform_indices = @transform_2, window_bounds = array<i64: 1, 1024>}, {transform_indices = @transform_3, window_bounds = array<i64: 128, 1024>}]} {
    %c0 = arith.constant 0 : index
    %c0_0 = arith.constant 0 : index
    %0 = vector.load %arg1[%c0, %c0_0] : memref<128x512xbf16, #tpu.memory_space<vmem>>, vector<128x512xbf16>
    %c0_1 = arith.constant 0 : index
    %c0_2 = arith.constant 0 : index
    %1 = vector.load %arg2[%c0_1, %c0_2] : memref<512x1024xbf16, #tpu.memory_space<vmem>>, vector<512x1024xbf16>
    %cst = arith.constant dense<0.000000e+00> : vector<128x1024xf32>
    %2 = tpu.matmul %0, %1, %cst {dimension_numbers = #tpu.dot_dimension_numbers<[1], [0], [0], [1], [0, 0, 1, 1], [], []>} : vector<128x512xbf16>, vector<512x1024xbf16>, vector<128x1024xf32> -> vector<128x1024xf32>
    %c0_3 = arith.constant 0 : index
    %c0_4 = arith.constant 0 : index
    %3 = vector.load %arg3[%c0_3, %c0_4] : memref<1x1024xf32, #tpu.memory_space<vmem>>, vector<1x1024xf32>
    %4 = vector.broadcast %3 : vector<1x1024xf32> to vector<128x1024xf32>
    %5 = arith.addf %2, %4 : vector<128x1024xf32>
    %cst_5 = arith.constant 0.000000e+00 : f32
    %6 = vector.broadcast %cst_5 : f32 to vector<128x1024xf32>
    %7 = arith.maximumf %5, %6 : vector<128x1024xf32>
    %c0_6 = arith.constant 0 : index
    %c0_7 = arith.constant 0 : index
    %8 = vector.load %arg4[%c0_6, %c0_7] : memref<128x1024xf32, #tpu.memory_space<vmem>>, vector<128x1024xf32>
    tpu.vector_store %arg4[%c0_6, %c0_7], %7 {strides = array<i32>} : memref<128x1024xf32, #tpu.memory_space<vmem>>, vector<128x1024xf32>,
    return
  }
  func.func @transform_0(%arg0: i32) -> (i32, i32) {
    %c0_i32 = arith.constant 0 : i32
    %c0_i32_0 = arith.constant 0 : i32
    return %arg0, %c0_i32 : i32, i32
  }
  func.func @transform_1(%arg0: i32) -> (i32, i32) {
    %c0_i32 = arith.constant 0 : i32
    %c0_i32_0 = arith.constant 0 : i32
    %c0_i32_1 = arith.constant 0 : i32
    return %c0_i32, %c0_i32_0 : i32, i32
  }
  func.func @transform_2(%arg0: i32) -> (i32, i32) {
    %c0_i32 = arith.constant 0 : i32
    %c0_i32_0 = arith.constant 0 : i32
    %c0_i32_1 = arith.constant 0 : i32
    return %c0_i32, %c0_i32_0 : i32, i32
  }
  func.func @transform_3(%arg0: i32) -> (i32, i32) {
    %c0_i32 = arith.constant 0 : i32
    %c0_i32_0 = arith.constant 0 : i32
    return %arg0, %c0_i32 : i32, i32
  }
}

module attributes {stable_mosaic.version = 11 : i64} {
  func.func @_mm_bias_act_kernel(%arg0: i32, %arg1: memref<512x768xbf16, #tpu.memory_space<vmem>>, %arg2: memref<768x512xbf16, #tpu.memory_space<vmem>>, %arg3: memref<1x512xf32, #tpu.memory_space<vmem>>, %arg4: memref<512x512xf32, #tpu.memory_space<vmem>>) attributes {dimension_semantics = [#tpu.dimension_semantics<parallel>], iteration_bounds = array<i64: 1>, scalar_prefetch = 0 : i64, scratch_operands = 0 : i64, tpu.core_type = #tpu.core_type<tc>, window_params = [{transform_indices = @transform_0, window_bounds = array<i64: 512, 768>}, {pipeline_mode = #tpu.pipeline_mode<synchronous>, transform_indices = @transform_1, window_bounds = array<i64: 768, 512>}, {pipeline_mode = #tpu.pipeline_mode<synchronous>, transform_indices = @transform_2, window_bounds = array<i64: 1, 512>}, {transform_indices = @transform_3, window_bounds = array<i64: 512, 512>}]} {
    %c0 = arith.constant 0 : index
    %c0_0 = arith.constant 0 : index
    %0 = vector.load %arg1[%c0, %c0_0] : memref<512x768xbf16, #tpu.memory_space<vmem>>, vector<512x768xbf16>
    %c0_1 = arith.constant 0 : index
    %c0_2 = arith.constant 0 : index
    %1 = vector.load %arg2[%c0_1, %c0_2] : memref<768x512xbf16, #tpu.memory_space<vmem>>, vector<768x512xbf16>
    %cst = arith.constant dense<0.000000e+00> : vector<512x512xf32>
    %2 = tpu.matmul %0, %1, %cst {dimension_numbers = #tpu.dot_dimension_numbers<[1], [0], [0], [1], [0, 0, 1, 1], [], []>} : vector<512x768xbf16>, vector<768x512xbf16>, vector<512x512xf32> -> vector<512x512xf32>
    %c0_3 = arith.constant 0 : index
    %c0_4 = arith.constant 0 : index
    %3 = vector.load %arg3[%c0_3, %c0_4] : memref<1x512xf32, #tpu.memory_space<vmem>>, vector<1x512xf32>
    %4 = vector.broadcast %3 : vector<1x512xf32> to vector<512x512xf32>
    %5 = arith.addf %2, %4 : vector<512x512xf32>
    %cst_5 = arith.constant 0.000000e+00 : f32
    %6 = vector.broadcast %cst_5 : f32 to vector<512x512xf32>
    %7 = arith.maximumf %5, %6 : vector<512x512xf32>
    %c0_6 = arith.constant 0 : index
    %c0_7 = arith.constant 0 : index
    %8 = vector.load %arg4[%c0_6, %c0_7] : memref<512x512xf32, #tpu.memory_space<vmem>>, vector<512x512xf32>
    tpu.vector_store %arg4[%c0_6, %c0_7], %7 {strides = array<i32>} : memref<512x512xf32, #tpu.memory_space<vmem>>, vector<512x512xf32>,
    return
  }
  func.func @transform_0(%arg0: i32) -> (i32, i32) {
    %c0_i32 = arith.constant 0 : i32
    %c0_i32_0 = arith.constant 0 : i32
    return %arg0, %c0_i32 : i32, i32
  }
  func.func @transform_1(%arg0: i32) -> (i32, i32) {
    %c0_i32 = arith.constant 0 : i32
    %c0_i32_0 = arith.constant 0 : i32
    %c0_i32_1 = arith.constant 0 : i32
    return %c0_i32, %c0_i32_0 : i32, i32
  }
  func.func @transform_2(%arg0: i32) -> (i32, i32) {
    %c0_i32 = arith.constant 0 : i32
    %c0_i32_0 = arith.constant 0 : i32
    %c0_i32_1 = arith.constant 0 : i32
    return %c0_i32, %c0_i32_0 : i32, i32
  }
  func.func @transform_3(%arg0: i32) -> (i32, i32) {
    %c0_i32 = arith.constant 0 : i32
    %c0_i32_0 = arith.constant 0 : i32
    return %arg0, %c0_i32 : i32, i32
  }
}

module attributes {stable_mosaic.version = 11 : i64} {
  func.func @_mm_bias_act_kernel(%arg0: i32, %arg1: memref<1024x256xbf16, #tpu.memory_space<vmem>>, %arg2: memref<256x512xbf16, #tpu.memory_space<vmem>>, %arg3: memref<1x512xf32, #tpu.memory_space<vmem>>, %arg4: memref<1024x512xf32, #tpu.memory_space<vmem>>) attributes {dimension_semantics = [#tpu.dimension_semantics<parallel>], iteration_bounds = array<i64: 2>, scalar_prefetch = 0 : i64, scratch_operands = 0 : i64, tpu.core_type = #tpu.core_type<tc>, window_params = [{transform_indices = @transform_0, window_bounds = array<i64: 1024, 256>}, {pipeline_mode = #tpu.pipeline_mode<synchronous>, transform_indices = @transform_1, window_bounds = array<i64: 256, 512>}, {pipeline_mode = #tpu.pipeline_mode<synchronous>, transform_indices = @transform_2, window_bounds = array<i64: 1, 512>}, {transform_indices = @transform_3, window_bounds = array<i64: 1024, 512>}]} {
    %c0 = arith.constant 0 : index
    %c0_0 = arith.constant 0 : index
    %0 = vector.load %arg1[%c0, %c0_0] : memref<1024x256xbf16, #tpu.memory_space<vmem>>, vector<1024x256xbf16>
    %c0_1 = arith.constant 0 : index
    %c0_2 = arith.constant 0 : index
    %1 = vector.load %arg2[%c0_1, %c0_2] : memref<256x512xbf16, #tpu.memory_space<vmem>>, vector<256x512xbf16>
    %cst = arith.constant dense<0.000000e+00> : vector<1024x512xf32>
    %2 = tpu.matmul %0, %1, %cst {dimension_numbers = #tpu.dot_dimension_numbers<[1], [0], [0], [1], [0, 0, 1, 1], [], []>} : vector<1024x256xbf16>, vector<256x512xbf16>, vector<1024x512xf32> -> vector<1024x512xf32>
    %c0_3 = arith.constant 0 : index
    %c0_4 = arith.constant 0 : index
    %3 = vector.load %arg3[%c0_3, %c0_4] : memref<1x512xf32, #tpu.memory_space<vmem>>, vector<1x512xf32>
    %4 = vector.broadcast %3 : vector<1x512xf32> to vector<1024x512xf32>
    %5 = arith.addf %2, %4 : vector<1024x512xf32>
    %c0_5 = arith.constant 0 : index
    %c0_6 = arith.constant 0 : index
    %6 = vector.load %arg4[%c0_5, %c0_6] : memref<1024x512xf32, #tpu.memory_space<vmem>>, vector<1024x512xf32>
    tpu.vector_store %arg4[%c0_5, %c0_6], %5 {strides = array<i32>} : memref<1024x512xf32, #tpu.memory_space<vmem>>, vector<1024x512xf32>,
    return
  }
  func.func @transform_0(%arg0: i32) -> (i32, i32) {
    %c0_i32 = arith.constant 0 : i32
    %c0_i32_0 = arith.constant 0 : i32
    return %arg0, %c0_i32 : i32, i32
  }
  func.func @transform_1(%arg0: i32) -> (i32, i32) {
    %c0_i32 = arith.constant 0 : i32
    %c0_i32_0 = arith.constant 0 : i32
    %c0_i32_1 = arith.constant 0 : i32
    return %c0_i32, %c0_i32_0 : i32, i32
  }
  func.func @transform_2(%arg0: i32) -> (i32, i32) {
    %c0_i32 = arith.constant 0 : i32
    %c0_i32_0 = arith.constant 0 : i32
    %c0_i32_1 = arith.constant 0 : i32
    return %c0_i32, %c0_i32_0 : i32, i32
  }
  func.func @transform_3(%arg0: i32) -> (i32, i32) {
    %c0_i32 = arith.constant 0 : i32
    %c0_i32_0 = arith.constant 0 : i32
    return %arg0, %c0_i32 : i32, i32
  }
}

</mosaic_0001>

<bundles_post_ra>
// kernel: autoencoder_forward.7
= control target key start
LH: loop header
LB: loop body
LE: loop exit
PB: predicated region body
PF: predicated region fallthrough
CT: control target
= control target key end

     0   :  { %s1684_s1 = inlined_call_operand.vmem [shape: bf16[384,128], index: 1, kind: input, shape index: {}]   ;;  %s1685_s0 = inlined_call_operand.vmem [shape: bf16[256,384], index: 0, kind: input, shape index: {}]   ;;  %s1686_s2 = inlined_call_operand.vmem [shape: f32[1,128], index: 2, kind: input, shape index: {}]   ;;  %s1687_s3 = inlined_call_operand.vmem [shape: f32[256,128], index: 3, kind: output, shape index: {}]  }
   0x1   :  { %v1197_v0 = vld [vmem:[%s1684_s1 + $0x40] sm:$0xff]   ;;  %v1199_v2 = vld [vmem:[%s1684_s1 + $0x48] sm:$0xff]   ;;  %v1201_v4 = vld [vmem:[%s1684_s1 + $0x50] sm:$0xff]  }
   0x2   :  { %v1198_v1 = vld [vmem:[%s1684_s1] sm:$0xff]   ;;  %997 = vmatprep.subr.bf16.mxu0 %v1197_v0  ;;  %1181 = vmatprep.subr.bf16.mxu1 %v1197_v0  ;;  %v1200_v3 = vld [vmem:[%s1684_s1 + $0x8] sm:$0xff]   ;;  %v1202_v5 = vld [vmem:[%s1684_s1 + $0x10] sm:$0xff]  }
   0x3   :  { %998 = vmatpush3.bf16.msra.mxu0 %v1198_v1  ;;  %1189 = vmatpush3.bf16.msra.mxu1 %v1198_v1  ;;  %v1203_v6 = vld [vmem:[%s1684_s1 + $0x58] sm:$0xff]   ;;  %v1205_v8 = vld [vmem:[%s1684_s1 + $0x60] sm:$0xff]   ;;  %v1207_v10 = vld [vmem:[%s1684_s1 + $0x68] sm:$0xff]  }
   0x4   :  { %999 = vmatprep.subr.bf16.mxu0 %v1199_v2  ;;  %1182 = vmatprep.subr.bf16.mxu1 %v1199_v2  ;;  %v1204_v7 = vld [vmem:[%s1684_s1 + $0x18] sm:$0xff]   ;;  %v1206_v9 = vld [vmem:[%s1684_s1 + $0x20] sm:$0xff]   ;;  %v1208_v13 = vld [vmem:[%s1684_s1 + $0x28] sm:$0xff]  }
   0x5   :  { %v1215_v11 = vld [vmem:[%s1685_s0 + $0x4] ss:$12 sps:$4 sm:$0xff]   ;;  %v1211_v16 = vld [vmem:[%s1684_s1 + $0x78] sm:$0xff]   ;;  %v1213_v19 = vld [vmem:[%s1685_s0] ss:$12 sps:$4 sm:$0xff]  }
   0x6   :  { %v1218_v12 = vld [vmem:[%s1685_s0 + $0x124] ss:$12 sps:$4 sm:$0xff]   ;;  %566 = vmatprep.mubr.bf16.mxu0 %v1215_v11  ;;  %v1212_v17 = vld [vmem:[%s1684_s1 + $0x38] sm:$0xff]   ;;  %v1216_v20 = vld [vmem:[%s1685_s0 + $0x120] ss:$12 sps:$4 sm:$0xff]  }
   0x7   :  { %1000 = vmatpush3.bf16.msra.mxu0 %v1200_v3  ;;  %1190 = vmatpush3.bf16.msra.mxu1 %v1200_v3  ;;  %v1209_v14 = vld [vmem:[%s1684_s1 + $0x70] sm:$0xff]   ;;  %v1219_v18 = vld [vmem:[%s1684_s1 + $0x80] sm:$0xff]   ;;  %v1221_v21 = vld [vmem:[%s1685_s0 + $0x1c] ss:$12 sps:$4 sm:$0xff]  }
   0x8   :  { %1001 = vmatprep.subr.bf16.mxu0 %v1201_v4  ;;  %1183 = vmatprep.subr.bf16.mxu1 %v1201_v4  ;;  %v1210_v15 = vld [vmem:[%s1684_s1 + $0x30] sm:$0xff]   ;;  %v1220_v22 = vld [vmem:[%s1684_s1 + $0x88] sm:$0xff]   ;;  %v1225_v24 = vld [vmem:[%s1685_s0 + $0x18] ss:$12 sps:$4 sm:$0xff]  }
   0x9   :  { %662 = vmatprep.mubr.bf16.mxu1 %v1218_v12  ;;  %v1223_v23 = vld [vmem:[%s1685_s0 + $0x13c] ss:$12 sps:$4 sm:$0xff]   ;;  %v1227_v25 = vld [vmem:[%s1684_s1 + $0x90] sm:$0xff]   ;;  %v1226_v26 = vld [vmem:[%s1685_s0 + $0x138] ss:$12 sps:$4 sm:$0xff]  }
   0xa   :  { %v1228_v27 = vld [vmem:[%s1684_s1 + $0x98] sm:$0xff]   ;;  %v1229_v28 = vld [vmem:[%s1685_s0 + $0x34] ss:$12 sps:$4 sm:$0xff]   ;;  %v1236_v33 = vld [vmem:[%s1684_s1 + $0xa8] sm:$0xff]  }
   0xb   :  { %1002 = vmatpush3.bf16.msra.mxu0 %v1202_v5  ;;  %1191 = vmatpush3.bf16.msra.mxu1 %v1202_v5  ;;  %v1231_v29 = vld [vmem:[%s1685_s0 + $0x154] ss:$12 sps:$4 sm:$0xff]   ;;  %v1233_v31 = vld [vmem:[%s1685_s0 + $0x30] ss:$12 sps:$4 sm:$0xff]   ;;  %v1237_v34 = vld [vmem:[%s1685_s0 + $0x4c] ss:$12 sps:$4 sm:$0xff]  }
   0xc   :  { %1003 = vmatprep.subr.bf16.mxu0 %v1203_v6  ;;  %1184 = vmatprep.subr.bf16.mxu1 %v1203_v6  ;;  %v1235_v30 = vld [vmem:[%s1684_s1 + $0xa0] sm:$0xff]   ;;  %v1234_v32 = vld [vmem:[%s1685_s0 + $0x150] ss:$12 sps:$4 sm:$0xff]   ;;  %v1239_v35 = vld [vmem:[%s1685_s0 + $0x16c] ss:$12 sps:$4 sm:$0xff]  }
   0xd   :  { %v1243_v36 = vld [vmem:[%s1684_s1 + $0xb0] sm:$0xff]   ;;  %v1244_v40 = vld [vmem:[%s1684_s1 + $0xb8] sm:$0xff]   ;;  %v1248_v42 = vld [vmem:[%s1685_s0 + $0x60] ss:$12 sps:$4 sm:$0xff]  }
   0xe   :  { %v1241_v37 = vld [vmem:[%s1685_s0 + $0x48] ss:$12 sps:$4 sm:$0xff]   ;;  %v1245_v39 = vld [vmem:[%s1685_s0 + $0x64] ss:$12 sps:$4 sm:$0xff]   ;;  %v1249_v43 = vld [vmem:[%s1685_s0 + $0x20] ss:$12 sps:$4 sm:$0xff]  }
   0xf   :  { %1004 = vmatpush3.bf16.msra.mxu0 %v1204_v7  ;;  %1192 = vmatpush3.bf16.msra.mxu1 %v1204_v7  ;;  %v1242_v38 = vld [vmem:[%s1685_s0 + $0x168] ss:$12 sps:$4 sm:$0xff]   ;;  %v1252_v45 = vld [vmem:[%s1685_s0 + $0x38] ss:$12 sps:$4 sm:$0xff]   ;;  %v1254_v47 = vld [vmem:[%s1685_s0 + $0x50] ss:$12 sps:$4 sm:$0xff]  }
  0x10   :  { %1005 = vmatprep.subr.bf16.mxu0 %v1205_v8  ;;  %1185 = vmatprep.subr.bf16.mxu1 %v1205_v8  ;;  %v1247_v41 = vld [vmem:[%s1685_s0 + $0x8] ss:$12 sps:$4 sm:$0xff]   ;;  %v1253_v46 = vld [vmem:[%s1685_s0 + $0x78] ss:$12 sps:$4 sm:$0xff]   ;;  %v1258_v50 = vld [vmem:[%s1685_s0 + $0x90] ss:$12 sps:$4 sm:$0xff]  }
  0x11   :  { %v1250_v44 = vld [vmem:[%s1685_s0 + $0x7c] ss:$12 sps:$4 sm:$0xff]   ;;  %v1255_v48 = vld [vmem:[%s1685_s0 + $0x94] ss:$12 sps:$4 sm:$0xff]   ;;  %v1260_v52 = vld [vmem:[%s1685_s0 + $0xac] ss:$12 sps:$4 sm:$0xff]  }
  0x12   :  { %v1257_v49 = vld [vmem:[%s1685_s0 + $0x68] ss:$12 sps:$4 sm:$0xff]   ;;  %v1259_v51 = vld [vmem:[%s1685_s0 + $0x80] ss:$12 sps:$4 sm:$0xff]   ;;  %v1262_v53 = vld [vmem:[%s1685_s0 + $0x98] ss:$12 sps:$4 sm:$0xff]  }
  0x13   :  { %1006 = vmatpush3.bf16.msra.mxu0 %v1206_v9  ;;  %1193 = vmatpush3.bf16.msra.mxu1 %v1206_v9  ;;  %v1263_v54 = vld [vmem:[%s1685_s0 + $0xa8] ss:$12 sps:$4 sm:$0xff]   ;;  %v1264_v55 = vld [vmem:[%s1685_s0 + $0xb0] ss:$12 sps:$4 sm:$0xff]   ;;  %v1268_v58 = vld [vmem:[%s1685_s0 + $0xc0] ss:$12 sps:$4 sm:$0xff]  }
  0x14   :  { %1007 = vmatprep.subr.bf16.mxu0 %v1207_v10  ;;  %1186 = vmatprep.subr.bf16.mxu1 %v1207_v10  ;;  %v1265_v56 = vld [vmem:[%s1685_s0 + $0xc4] ss:$12 sps:$4 sm:$0xff]   ;;  %v1267_v57 = vld [vmem:[%s1685_s0 + $0xc8] ss:$12 sps:$4 sm:$0xff]   ;;  %v1269_v59 = vld [vmem:[%s1685_s0 + $0xe0] ss:$12 sps:$4 sm:$0xff]  }
  0x15   :  { %v1270_v60 = vld [vmem:[%s1685_s0 + $0xdc] ss:$12 sps:$4 sm:$0xff]   ;;  %v1272_v61 = vld [vmem:[%s1685_s0 + $0xf8] ss:$12 sps:$4 sm:$0xff]   ;;  %v1275_v0 = vld [vmem:[%s1685_s0 + $0xf4] ss:$12 sps:$4 sm:$0xff]  }
  0x16   :  { %v1273_v62 = vld [vmem:[%s1685_s0 + $0xd8] ss:$12 sps:$4 sm:$0xff]   ;;  %v1274_v63 = vld [vmem:[%s1685_s0 + $0x110] ss:$12 sps:$4 sm:$0xff]   ;;  %v1277_v1 = vld [vmem:[%s1685_s0 + $0x128] ss:$12 sps:$4 sm:$0xff]  }
  0x17   :  { %1008 = vmatpush3.bf16.msra.mxu0 %v1208_v13  ;;  %1194 = vmatpush3.bf16.msra.mxu1 %v1208_v13  ;;  %v1278_v2 = vld [vmem:[%s1685_s0 + $0xf0] ss:$12 sps:$4 sm:$0xff]   ;;  %v1279_v3 = vld [vmem:[%s1685_s0 + $0x140] ss:$12 sps:$4 sm:$0xff]   ;;  %v1282_v5 = vld [vmem:[%s1685_s0 + $0x158] ss:$12 sps:$4 sm:$0xff]  }
  0x18   :  { %1009 = vmatprep.subr.bf16.mxu0 %v1209_v14  ;;  %1187 = vmatprep.subr.bf16.mxu1 %v1209_v14  ;;  %v1280_v4 = vld [vmem:[%s1685_s0 + $0x10c] ss:$12 sps:$4 sm:$0xff]   ;;  %v1283_v6 = vld [vmem:[%s1685_s0 + $0x108] ss:$12 sps:$4 sm:$0xff]   ;;  %v1284_v7 = vld [vmem:[%s1685_s0 + $0x170] ss:$12 sps:$4 sm:$0xff]  }
  0x1b   :  { %1010 = vmatpush3.bf16.msra.mxu0 %v1210_v15  ;;  %1195 = vmatpush3.bf16.msra.mxu1 %v1210_v15 }
  0x1c   :  { %1011 = vmatprep.subr.bf16.mxu0 %v1211_v16  ;;  %1188 = vmatprep.subr.bf16.mxu1 %v1211_v16 }
  0x1f   :  { %1012 = vmatpush3.bf16.msra.mxu0 %v1212_v17  ;;  %1196 = vmatpush3.bf16.msra.mxu1 %v1212_v17 }
  0x20   :  { %1133 = vmatprep.subr.bf16.mxu1 %v1219_v18 }
  0x22   :  { %567 = vmatmul.mubr.bf16.vlgmr.msra.gmra.mrb[0].mxu0 %v1213_v19  ;;  %663 = vmatmul.mubr.bf16.vlgmr.msra.gmra.mrb[0].mxu1 %v1216_v20 }
  0x23   :  { %1134 = vmatpush3.bf16.msra.mxu1 %v1219_v18  ;;  %574 = vmatprep.mubr.bf16.mxu0 %v1221_v21 }
  0x24   :  { %1135 = vmatprep.subr.bf16.mxu1 %v1220_v22  ;;  %670 = vmatprep.mubr.bf16.mxu1 %v1223_v23 }
  0x27   :  { %1136 = vmatpush3.bf16.msra.mxu1 %v1220_v22 }
  0x28   :  { %1137 = vmatprep.subr.bf16.mxu1 %v1227_v25 }
  0x2a   :  { %575 = vmatmul.mubr.bf16.gmra.mrb[4].mxu0 %v1225_v24  ;;  %671 = vmatmul.mubr.bf16.gmra.mrb[4].mxu1 %v1226_v26 }
  0x2b   :  { %1138 = vmatpush3.bf16.msra.mxu1 %v1227_v25  ;;  %582 = vmatprep.mubr.bf16.mxu0 %v1229_v28 }
  0x2c   :  { %1139 = vmatprep.subr.bf16.mxu1 %v1228_v27  ;;  %678 = vmatprep.mubr.bf16.mxu1 %v1231_v29 }
  0x2f   :  { %1140 = vmatpush3.bf16.msra.mxu1 %v1228_v27 }
  0x30   :  { %1141 = vmatprep.subr.bf16.mxu1 %v1235_v30 }
  0x32   :  { %583 = vmatmul.mubr.bf16.gmra.mrb[8].mxu0 %v1233_v31  ;;  %679 = vmatmul.mubr.bf16.gmra.mrb[8].mxu1 %v1234_v32 }
  0x33   :  { %1142 = vmatpush3.bf16.msra.mxu1 %v1235_v30  ;;  %590 = vmatprep.mubr.bf16.mxu0 %v1237_v34 }
  0x34   :  { %1143 = vmatprep.subr.bf16.mxu1 %v1236_v33  ;;  %686 = vmatprep.mubr.bf16.mxu1 %v1239_v35 }
  0x37   :  { %1144 = vmatpush3.bf16.msra.mxu1 %v1236_v33 }
  0x38   :  { %1145 = vmatprep.subr.bf16.mxu1 %v1243_v36 }
  0x3a   :  { %591 = vmatmul.mubr.bf16.gmra.mrb[12].mxu0 %v1241_v37  ;;  %687 = vmatmul.mubr.bf16.gmra.mrb[12].mxu1 %v1242_v38 }
  0x3b   :  { %1146 = vmatpush3.bf16.msra.mxu1 %v1243_v36  ;;  %598 = vmatprep.mubr.bf16.mxu0 %v1245_v39 }
  0x3c   :  { %1147 = vmatprep.subr.bf16.mxu1 %v1244_v40  ;;  %1149 = vmatprep.mubr.bf16.mxu1 %v1247_v41 }
  0x3f   :  { %1148 = vmatpush3.bf16.msra.mxu1 %v1244_v40 }
  0x42   :  { %599 = vmatmul.mubr.bf16.gmra.mrb[16].mxu0 %v1248_v42  ;;  %1150 = vmatmul.mubr.bf16.vlgmr.msra.gmra.mrb[16].mxu1 %v1249_v43 }
  0x43   :  { %606 = vmatprep.mubr.bf16.mxu0 %v1250_v44  ;;  %1153 = vmatprep.mubr.bf16.mxu1 %v1252_v45 }
  0x4a   :  { %607 = vmatmul.mubr.bf16.gmra.mrb[20].mxu0 %v1253_v46  ;;  %1154 = vmatmul.mubr.bf16.gmra.mrb[20].mxu1 %v1254_v47 }
  0x4b   :  { %614 = vmatprep.mubr.bf16.mxu0 %v1255_v48  ;;  %1157 = vmatprep.mubr.bf16.mxu1 %v1257_v49 }
  0x52   :  { %615 = vmatmul.mubr.bf16.gmra.mrb[24].mxu0 %v1258_v50  ;;  %1158 = vmatmul.mubr.bf16.gmra.mrb[24].mxu1 %v1259_v51 }
  0x53   :  { %622 = vmatprep.mubr.bf16.mxu0 %v1260_v52  ;;  %1161 = vmatprep.mubr.bf16.mxu1 %v1262_v53 }
  0x5a   :  { %623 = vmatmul.mubr.bf16.gmra.mrb[28].mxu0 %v1263_v54  ;;  %1162 = vmatmul.mubr.bf16.gmra.mrb[28].mxu1 %v1264_v55 }
  0x5b   :  { %630 = vmatprep.mubr.bf16.mxu0 %v1265_v56  ;;  %1165 = vmatprep.mubr.bf16.mxu1 %v1267_v57  ;;  %v1540_v56 = vld [vmem:[%s1686_s2] ss:$0 sm:$0xff] }
  0x62   :  { %631 = vmatmul.mubr.bf16.gmra.mrb[32].mxu0 %v1268_v58  ;;  %1166 = vmatmul.mubr.bf16.gmra.mrb[32].mxu1 %v1269_v59 }
  0x63   :  { %638 = vmatprep.mubr.bf16.mxu0 %v1270_v60  ;;  %1169 = vmatprep.mubr.bf16.mxu1 %v1272_v61 }
  0x6a   :  { %639 = vmatmul.mubr.bf16.gmra.mrb[36].mxu0 %v1273_v62  ;;  %1170 = vmatmul.mubr.bf16.gmra.mrb[36].mxu1 %v1274_v63 }
  0x6b   :  { %646 = vmatprep.mubr.bf16.mxu0 %v1275_v0  ;;  %1173 = vmatprep.mubr.bf16.mxu1 %v1277_v1 }
  0x72   :  { %647 = vmatmul.mubr.bf16.gmra.mrb[40].mxu0 %v1278_v2  ;;  %1174 = vmatmul.mubr.bf16.gmra.mrb[40].mxu1 %v1279_v3 }
  0x73   :  { %654 = vmatprep.mubr.bf16.mxu0 %v1280_v4  ;;  %1177 = vmatprep.mubr.bf16.mxu1 %v1282_v5 }
  0x7a   :  { %655 = vmatmul.mubr.bf16.gmra.mrb[44].mxu0 %v1283_v6  ;;  %1178 = vmatmul.mubr.bf16.gmra.mrb[44].mxu1 %v1284_v7 }
  0xf5   :  { %v1013_v8 = vpop.f32.mrb[0].mxu0  ;;  %v1085_v9 = vpop.f32.mrb[0].mxu1 }
  0xf6   :  { %v1014_v10 = vpop.f32.mrb[1].mxu0  ;;  %v1086_v11 = vpop.f32.mrb[1].mxu1 }
  0xf7   :  { %v1015_v12 = vadd.f32 %v1014_v10, %v1013_v8  ;;  %v1016_v13 = vpop.f32.mrb[2].mxu0  ;;  %v1521_v14 = vadd.f32 %v1086_v11, %v1085_v9  ;;  %v1088_v15 = vpop.f32.mrb[2].mxu1 }
  0xf8   :  { %v1017_v16 = vpop.f32.mrb[3].mxu0  ;;  %v1089_v17 = vpop.f32.mrb[3].mxu1 }
  0xf9   :  { %v1018_v18 = vadd.f32 %v1017_v16, %v1016_v13  ;;  %v1523_v19 = vadd.f32 %v1089_v17, %v1088_v15  ;;  %v569_v60 = vadd.f32 %v1015_v12, %v1540_v56 }
  0xfb   :  { %v572_v5 = vadd.f32 %v1018_v18, %v1540_v56 }
  0xfd   :  { %v1019_v20 = vpop.f32.mrb[4].mxu0  ;;  %v1091_v21 = vpop.f32.mrb[4].mxu1 }
  0xfe   :  { %v1020_v22 = vpop.f32.mrb[5].mxu0  ;;  %v1092_v23 = vpop.f32.mrb[5].mxu1 }
  0xff   :  { %v1021_v24 = vadd.f32 %v1020_v22, %v1019_v20  ;;  %v1022_v25 = vpop.f32.mrb[6].mxu0  ;;  %v1525_v26 = vadd.f32 %v1092_v23, %v1091_v21  ;;  %v1094_v27 = vpop.f32.mrb[6].mxu1 }
 0x100   :  { %v1023_v28 = vpop.f32.mrb[7].mxu0  ;;  %v1095_v29 = vpop.f32.mrb[7].mxu1 }
 0x101   :  { %v1024_v30 = vadd.f32 %v1023_v28, %v1022_v25  ;;  %v1527_v31 = vadd.f32 %v1095_v29, %v1094_v27  ;;  %v577_v57 = vadd.f32 %v1021_v24, %v1540_v56 }
 0x103   :  { %v580_v0 = vadd.f32 %v1024_v30, %v1540_v56 }
 0x105   :  { %v1025_v32 = vpop.f32.mrb[8].mxu0  ;;  %v1097_v33 = vpop.f32.mrb[8].mxu1 }
 0x106   :  { %v1026_v34 = vpop.f32.mrb[9].mxu0  ;;  %v1098_v35 = vpop.f32.mrb[9].mxu1 }
 0x107   :  { %v1027_v36 = vadd.f32 %v1026_v34, %v1025_v32  ;;  %v1028_v37 = vpop.f32.mrb[10].mxu0  ;;  %v1529_v38 = vadd.f32 %v1098_v35, %v1097_v33  ;;  %v1100_v39 = vpop.f32.mrb[10].mxu1 }
 0x108   :  { %v1029_v40 = vpop.f32.mrb[11].mxu0  ;;  %v1101_v41 = vpop.f32.mrb[11].mxu1 }
 0x109   :  { %v1030_v42 = vadd.f32 %v1029_v40, %v1028_v37  ;;  %v1531_v43 = vadd.f32 %v1101_v41, %v1100_v39  ;;  %v585_v20 = vadd.f32 %v1027_v36, %v1540_v56 }
 0x10b   :  { %v588_v30 = vadd.f32 %v1030_v42, %v1540_v56 }
 0x10d   :  { %v1031_v44 = vpop.f32.mrb[12].mxu0  ;;  %v1103_v45 = vpop.f32.mrb[12].mxu1 }
 0x10e   :  { %v1032_v46 = vpop.f32.mrb[13].mxu0  ;;  %v1104_v47 = vpop.f32.mrb[13].mxu1 }
 0x10f   :  { %v1033_v48 = vadd.f32 %v1032_v46, %v1031_v44  ;;  %v1034_v49 = vpop.f32.mrb[14].mxu0  ;;  %v1533_v50 = vadd.f32 %v1104_v47, %v1103_v45  ;;  %v1106_v51 = vpop.f32.mrb[14].mxu1 }
 0x110   :  { %v1035_v52 = vpop.f32.mrb[15].mxu0  ;;  %v1107_v53 = vpop.f32.mrb[15].mxu1 }
 0x111   :  { %v1036_v54 = vadd.f32 %v1035_v52, %v1034_v49  ;;  %v1535_v55 = vadd.f32 %v1107_v53, %v1106_v51  ;;  %v593_v16 = vadd.f32 %v1033_v48, %v1540_v56 }
 0x113   :  { %v596_v24 = vadd.f32 %v1036_v54, %v1540_v56 }
 0x115   :  { %v1037_v58 = vpop.f32.mrb[16].mxu0  ;;  %v1151_v59 = vpop.f32.mrb[16].mxu1 }
 0x116   :  { %v738_v61 = vadd.f32 %v1151_v59, %v577_v57  ;;  %v1038_v62 = vpop.f32.mrb[17].mxu0  ;;  %v729_v63 = vpop.f32.mrb[17].mxu1 }
 0x117   :  { %v1039_v1 = vadd.f32 %v1038_v62, %v1037_v58  ;;  %v730_v2 = vadd.f32 %v729_v63, %v569_v60  ;;  %v1040_v3 = vpop.f32.mrb[18].mxu0  ;;  %v1152_v4 = vpop.f32.mrb[18].mxu1 }
 0x118   :  { %v858_v6 = vmax.f32 %v738_v61, 0.0  ;;  %v741_v7 = vadd.f32 %v1152_v4, %v580_v0  ;;  %v1041_v8 = vpop.f32.mrb[19].mxu0  ;;  %v732_v9 = vpop.f32.mrb[19].mxu1 }
 0x119   :  { %v856_v10 = vmax.f32 %v730_v2, 0.0  ;;  %v1042_v11 = vadd.f32 %v1041_v8, %v1040_v3  ;;  %v733_v13 = vadd.f32 %v732_v9, %v572_v5  ;;  %v601_v46 = vadd.f32 %v1039_v1, %v1540_v56 }
 0x11a   :  { %890 = vst [vmem:[%s1687_s3 + $0x10] sm:$0xff] %v858_v6  ;;  %v859_v12 = vmax.f32 %v741_v7, 0.0 }
 0x11b   :  { %888 = vst [vmem:[%s1687_s3] sm:$0xff] %v856_v10  ;;  %v857_v15 = vmax.f32 %v733_v13, 0.0  ;;  %v604_v58 = vadd.f32 %v1042_v11, %v1540_v56 }
 0x11c   :  { %891 = vst [vmem:[%s1687_s3 + $0x18] sm:$0xff] %v859_v12 }
 0x11d   :  { %889 = vst [vmem:[%s1687_s3 + $0x8] sm:$0xff] %v857_v15  ;;  %v1043_v17 = vpop.f32.mrb[20].mxu0  ;;  %v1155_v18 = vpop.f32.mrb[20].mxu1 }
 0x11e   :  { %v754_v21 = vadd.f32 %v1155_v18, %v593_v16  ;;  %v1044_v22 = vpop.f32.mrb[21].mxu0  ;;  %v745_v23 = vpop.f32.mrb[21].mxu1 }
 0x11f   :  { %v1045_v25 = vadd.f32 %v1044_v22, %v1043_v17  ;;  %v746_v27 = vadd.f32 %v745_v23, %v585_v20  ;;  %v1046_v28 = vpop.f32.mrb[22].mxu0  ;;  %v1156_v29 = vpop.f32.mrb[22].mxu1 }
 0x120   :  { %v862_v32 = vmax.f32 %v754_v21, 0.0  ;;  %v757_v33 = vadd.f32 %v1156_v29, %v596_v24  ;;  %v1047_v34 = vpop.f32.mrb[23].mxu0  ;;  %v748_v35 = vpop.f32.mrb[23].mxu1 }
 0x121   :  { %v860_v37 = vmax.f32 %v746_v27, 0.0  ;;  %v1048_v39 = vadd.f32 %v1047_v34, %v1046_v28  ;;  %v749_v40 = vadd.f32 %v748_v35, %v588_v30  ;;  %v609_v42 = vadd.f32 %v1045_v25, %v1540_v56 }
 0x122   :  { %894 = vst [vmem:[%s1687_s3 + $0x30] sm:$0xff] %v862_v32  ;;  %v863_v36 = vmax.f32 %v757_v33, 0.0 }
 0x123   :  { %892 = vst [vmem:[%s1687_s3 + $0x20] sm:$0xff] %v860_v37  ;;  %v861_v41 = vmax.f32 %v749_v40, 0.0  ;;  %v612_v51 = vadd.f32 %v1048_v39, %v1540_v56 }
 0x124   :  { %895 = vst [vmem:[%s1687_s3 + $0x38] sm:$0xff] %v863_v36 }
 0x125   :  { %893 = vst [vmem:[%s1687_s3 + $0x28] sm:$0xff] %v861_v41  ;;  %v1049_v44 = vpop.f32.mrb[24].mxu0  ;;  %v1159_v45 = vpop.f32.mrb[24].mxu1 }
 0x126   :  { %v770_v47 = vadd.f32 %v1159_v45, %v609_v42  ;;  %v1050_v48 = vpop.f32.mrb[25].mxu0  ;;  %v761_v49 = vpop.f32.mrb[25].mxu1 }
 0x127   :  { %v1051_v52 = vadd.f32 %v1050_v48, %v1049_v44  ;;  %v762_v53 = vadd.f32 %v761_v49, %v601_v46  ;;  %v1052_v54 = vpop.f32.mrb[26].mxu0  ;;  %v1160_v57 = vpop.f32.mrb[26].mxu1 }
 0x128   :  { %v866_v59 = vmax.f32 %v770_v47, 0.0  ;;  %v773_v60 = vadd.f32 %v1160_v57, %v612_v51  ;;  %v1053_v61 = vpop.f32.mrb[27].mxu0  ;;  %v764_v62 = vpop.f32.mrb[27].mxu1 }
 0x129   :  { %v864_v63 = vmax.f32 %v762_v53, 0.0  ;;  %v1054_v0 = vadd.f32 %v1053_v61, %v1052_v54  ;;  %v765_v2 = vadd.f32 %v764_v62, %v604_v58  ;;  %v617_v6 = vadd.f32 %v1051_v52, %v1540_v56 }
 0x12a   :  { %898 = vst [vmem:[%s1687_s3 + $0x50] sm:$0xff] %v866_v59  ;;  %v867_v1 = vmax.f32 %v773_v60, 0.0 }
 0x12b   :  { %896 = vst [vmem:[%s1687_s3 + $0x40] sm:$0xff] %v864_v63  ;;  %v865_v3 = vmax.f32 %v765_v2, 0.0  ;;  %v620_v12 = vadd.f32 %v1054_v0, %v1540_v56  ;;  %v673_v0 = vadd.f32 %v1525_v26, %v1540_v56 }
 0x12c   :  { %899 = vst [vmem:[%s1687_s3 + $0x58] sm:$0xff] %v867_v1 }
 0x12d   :  { %897 = vst [vmem:[%s1687_s3 + $0x48] sm:$0xff] %v865_v3  ;;  %v1055_v4 = vpop.f32.mrb[28].mxu0  ;;  %v1163_v5 = vpop.f32.mrb[28].mxu1 }
 0x12e   :  { %v1056_v7 = vpop.f32.mrb[29].mxu0  ;;  %v777_v8 = vpop.f32.mrb[29].mxu1 }
 0x12f   :  { %v1057_v9 = vadd.f32 %v1056_v7, %v1055_v4  ;;  %v778_v10 = vadd.f32 %v777_v8, %v617_v6  ;;  %v1058_v11 = vpop.f32.mrb[30].mxu0  ;;  %v1164_v13 = vpop.f32.mrb[30].mxu1 }
 0x130   :  { %v1059_v15 = vpop.f32.mrb[31].mxu0  ;;  %v780_v16 = vpop.f32.mrb[31].mxu1 }
 0x131   :  { %v625_v17 = vadd.f32 %v1057_v9, %v1540_v56  ;;  %v868_v18 = vmax.f32 %v778_v10, 0.0  ;;  %v1060_v20 = vadd.f32 %v1059_v15, %v1058_v11  ;;  %v781_v21 = vadd.f32 %v780_v16, %v620_v12 }
 0x132   :  { %v676_v9 = vadd.f32 %v1527_v31, %v1540_v56  ;;  %v668_v15 = vadd.f32 %v1523_v19, %v1540_v56 }
 0x133   :  { %v786_v22 = vadd.f32 %v1163_v5, %v625_v17  ;;  %900 = vst [vmem:[%s1687_s3 + $0x60] sm:$0xff] %v868_v18  ;;  %v628_v23 = vadd.f32 %v1060_v20, %v1540_v56  ;;  %v869_v24 = vmax.f32 %v781_v21, 0.0  ;;  %v665_v5 = vadd.f32 %v1521_v14, %v1540_v56 }
 0x135   :  { %v870_v25 = vmax.f32 %v786_v22, 0.0  ;;  %v789_v27 = vadd.f32 %v1164_v13, %v628_v23  ;;  %901 = vst [vmem:[%s1687_s3 + $0x68] sm:$0xff] %v869_v24  ;;  %v1061_v28 = vpop.f32.mrb[32].mxu0  ;;  %v1167_v29 = vpop.f32.mrb[32].mxu1 }
 0x136   :  { %v1062_v30 = vpop.f32.mrb[33].mxu0  ;;  %v793_v32 = vpop.f32.mrb[33].mxu1 }
 0x137   :  { %902 = vst [vmem:[%s1687_s3 + $0x70] sm:$0xff] %v870_v25  ;;  %v871_v33 = vmax.f32 %v789_v27, 0.0  ;;  %v1063_v34 = vadd.f32 %v1062_v30, %v1061_v28  ;;  %v1064_v35 = vpop.f32.mrb[34].mxu0  ;;  %v1168_v37 = vpop.f32.mrb[34].mxu1  ;;  %v689_v27 = vadd.f32 %v1533_v50, %v1540_v56 }
 0x138   :  { %v1065_v39 = vpop.f32.mrb[35].mxu0  ;;  %v796_v40 = vpop.f32.mrb[35].mxu1 }
 0x139   :  { %903 = vst [vmem:[%s1687_s3 + $0x78] sm:$0xff] %v871_v33  ;;  %v633_v36 = vadd.f32 %v1063_v34, %v1540_v56  ;;  %v1066_v41 = vadd.f32 %v1065_v39, %v1064_v35  ;;  %v681_v33 = vadd.f32 %v1529_v38, %v1540_v56  ;;  %v692_v39 = vadd.f32 %v1535_v55, %v1540_v56 }
 0x13b   :  { %v794_v42 = vadd.f32 %v793_v32, %v633_v36  ;;  %v636_v44 = vadd.f32 %v1066_v41, %v1540_v56 }
 0x13d   :  { %v872_v45 = vmax.f32 %v794_v42, 0.0  ;;  %v797_v46 = vadd.f32 %v796_v40, %v636_v44  ;;  %v1067_v47 = vpop.f32.mrb[36].mxu0  ;;  %v1608_v48 = vpop.f32.mrb[36].mxu1  ;;  %v684_v44 = vadd.f32 %v1531_v43, %v1540_v56 }
 0x13e   :  { %v1068_v49 = vpop.f32.mrb[37].mxu0  ;;  %v809_v51 = vpop.f32.mrb[37].mxu1 }
 0x13f   :  { %904 = vst [vmem:[%s1687_s3 + $0x80] sm:$0xff] %v872_v45  ;;  %v873_v52 = vmax.f32 %v797_v46, 0.0  ;;  %v1069_v53 = vadd.f32 %v1068_v49, %v1067_v47  ;;  %v1070_v54 = vpop.f32.mrb[38].mxu0  ;;  %v1613_v57 = vpop.f32.mrb[38].mxu1 }
 0x140   :  { %v1071_v58 = vpop.f32.mrb[39].mxu0  ;;  %v812_v59 = vpop.f32.mrb[39].mxu1 }
 0x141   :  { %905 = vst [vmem:[%s1687_s3 + $0x88] sm:$0xff] %v873_v52  ;;  %v641_v60 = vadd.f32 %v1069_v53, %v1540_v56  ;;  %v1072_v61 = vadd.f32 %v1071_v58, %v1070_v54 }
 0x143   :  { %v802_v62 = vadd.f32 %v1167_v29, %v641_v60  ;;  %v644_v63 = vadd.f32 %v1072_v61, %v1540_v56 }
 0x145   :  { %v874_v2 = vmax.f32 %v802_v62, 0.0  ;;  %v805_v1 = vadd.f32 %v1168_v37, %v644_v63  ;;  %v1073_v3 = vpop.f32.mrb[40].mxu0  ;;  %v1175_v4 = vpop.f32.mrb[40].mxu1 }
 0x146   :  { %v834_v6 = vadd.f32 %v1175_v4, %v673_v0  ;;  %v1074_v7 = vpop.f32.mrb[41].mxu0  ;;  %v825_v8 = vpop.f32.mrb[41].mxu1 }
 0x147   :  { %906 = vst [vmem:[%s1687_s3 + $0x90] sm:$0xff] %v874_v2  ;;  %v875_v10 = vmax.f32 %v805_v1, 0.0  ;;  %v1075_v11 = vadd.f32 %v1074_v7, %v1073_v3  ;;  %v826_v26 = vadd.f32 %v825_v8, %v665_v5  ;;  %v1076_v13 = vpop.f32.mrb[42].mxu0  ;;  %v1176_v12 = vpop.f32.mrb[42].mxu1 }
 0x148   :  { %v882_v16 = vmax.f32 %v834_v6, 0.0  ;;  %v837_v14 = vadd.f32 %v1176_v12, %v676_v9  ;;  %v1077_v17 = vpop.f32.mrb[43].mxu0  ;;  %v828_v18 = vpop.f32.mrb[43].mxu1 }
 0x149   :  { %907 = vst [vmem:[%s1687_s3 + $0x98] sm:$0xff] %v875_v10  ;;  %v649_v31 = vadd.f32 %v1075_v11, %v1540_v56  ;;  %v880_v20 = vmax.f32 %v826_v26, 0.0  ;;  %v1078_v21 = vadd.f32 %v1077_v17, %v1076_v13  ;;  %v829_v22 = vadd.f32 %v828_v18, %v668_v15 }
 0x14a   :  { %914 = vst [vmem:[%s1687_s3 + $0xd0] sm:$0xff] %v882_v16  ;;  %v883_v23 = vmax.f32 %v837_v14, 0.0 }
 0x14b   :  { %v810_v24 = vadd.f32 %v809_v51, %v649_v31  ;;  %912 = vst [vmem:[%s1687_s3 + $0xc0] sm:$0xff] %v880_v20  ;;  %v652_v19 = vadd.f32 %v1078_v21, %v1540_v56  ;;  %v881_v25 = vmax.f32 %v829_v22, 0.0 }
 0x14c   :  { %915 = vst [vmem:[%s1687_s3 + $0xd8] sm:$0xff] %v883_v23 }
 0x14d   :  { %v876_v28 = vmax.f32 %v810_v24, 0.0  ;;  %v813_v29 = vadd.f32 %v812_v59, %v652_v19  ;;  %913 = vst [vmem:[%s1687_s3 + $0xc8] sm:$0xff] %v881_v25  ;;  %v1079_v30 = vpop.f32.mrb[44].mxu0  ;;  %v1179_v32 = vpop.f32.mrb[44].mxu1 }
 0x14e   :  { %v850_v34 = vadd.f32 %v1179_v32, %v689_v27  ;;  %v1080_v35 = vpop.f32.mrb[45].mxu0  ;;  %v841_v37 = vpop.f32.mrb[45].mxu1 }
 0x14f   :  { %908 = vst [vmem:[%s1687_s3 + $0xa0] sm:$0xff] %v876_v28  ;;  %v877_v50 = vmax.f32 %v813_v29, 0.0  ;;  %v1081_v40 = vadd.f32 %v1080_v35, %v1079_v30  ;;  %v842_v36 = vadd.f32 %v841_v37, %v681_v33  ;;  %v1082_v41 = vpop.f32.mrb[46].mxu0  ;;  %v1180_v42 = vpop.f32.mrb[46].mxu1 }
 0x150   :  { %v886_v45 = vmax.f32 %v850_v34, 0.0  ;;  %v853_v38 = vadd.f32 %v1180_v42, %v692_v39  ;;  %v1083_v46 = vpop.f32.mrb[47].mxu0  ;;  %v844_v47 = vpop.f32.mrb[47].mxu1 }
 0x151   :  { %909 = vst [vmem:[%s1687_s3 + $0xa8] sm:$0xff] %v877_v50  ;;  %v657_v55 = vadd.f32 %v1081_v40, %v1540_v56  ;;  %v884_v49 = vmax.f32 %v842_v36, 0.0  ;;  %v1084_v51 = vadd.f32 %v1083_v46, %v1082_v41  ;;  %v845_v52 = vadd.f32 %v844_v47, %v684_v44 }
 0x152   :  { %918 = vst [vmem:[%s1687_s3 + $0xf0] sm:$0xff] %v886_v45  ;;  %v887_v53 = vmax.f32 %v853_v38, 0.0 }
 0x153   :  { %v818_v43 = vadd.f32 %v1608_v48, %v657_v55  ;;  %916 = vst [vmem:[%s1687_s3 + $0xe0] sm:$0xff] %v884_v49  ;;  %v660_v54 = vadd.f32 %v1084_v51, %v1540_v56  ;;  %v885_v58 = vmax.f32 %v845_v52, 0.0 }
 0x154   :  { %919 = vst [vmem:[%s1687_s3 + $0xf8] sm:$0xff] %v887_v53 }
 0x155   :  { %v878_v59 = vmax.f32 %v818_v43, 0.0  ;;  %v821_v60 = vadd.f32 %v1613_v57, %v660_v54  ;;  %917 = vst [vmem:[%s1687_s3 + $0xe8] sm:$0xff] %v885_v58 }
 0x157   :  { %910 = vst [vmem:[%s1687_s3 + $0xb0] sm:$0xff] %v878_v59  ;;  %v879_v48 = vmax.f32 %v821_v60, 0.0 }
 0x159   :  { %911 = vst [vmem:[%s1687_s3 + $0xb8] sm:$0xff] %v879_v48 }

// kernel: autoencoder_forward.8
= control target key start
LH: loop header
LB: loop body
LE: loop exit
PB: predicated region body
PF: predicated region fallthrough
CT: control target
= control target key end

     0   :  { %s422_s0 = inlined_call_operand.vmem [shape: f32[9,56,128], index: 0, kind: input, shape index: {}]   ;;  %s423_s1 = inlined_call_operand.vmem [shape: f32[56,128], index: 1, kind: output, shape index: {}]  }
   0x1   :  { %v8_v0 = vld [vmem:[%s422_s0] sm:$0xff]  ;;  %v146_v1 = vld [vmem:[%s422_s0 + $0x38] sm:$0xff]  ;;  %v153_v2 = vld [vmem:[%s422_s0 + $0x70] sm:$0xff] }
   0x2   :  { %v23_v3 = vmax.f32 %v8_v0, %v146_v1  ;;  %v160_v4 = vld [vmem:[%s422_s0 + $0xa8] sm:$0xff]  ;;  %v147_v7 = vld [vmem:[%s422_s0 + $0x40] sm:$0xff]  ;;  %v154_v8 = vld [vmem:[%s422_s0 + $0x78] sm:$0xff] }
   0x3   :  { %v9_v6 = vld [vmem:[%s422_s0 + $0x8] sm:$0xff]  ;;  %v167_v9 = vld [vmem:[%s422_s0 + $0xe0] sm:$0xff]  ;;  %v174_v12 = vld [vmem:[%s422_s0 + $0x118] sm:$0xff] }
   0x4   :  { %v38_v5 = vmax.f32 %v23_v3, %v153_v2  ;;  %v24_v10 = vmax.f32 %v9_v6, %v147_v7  ;;  %v161_v13 = vld [vmem:[%s422_s0 + $0xb0] sm:$0xff]  ;;  %v148_v16 = vld [vmem:[%s422_s0 + $0x48] sm:$0xff]  ;;  %v155_v17 = vld [vmem:[%s422_s0 + $0x80] sm:$0xff] }
   0x5   :  { %v10_v15 = vld [vmem:[%s422_s0 + $0x10] sm:$0xff]  ;;  %v168_v19 = vld [vmem:[%s422_s0 + $0xe8] sm:$0xff]  ;;  %v175_v23 = vld [vmem:[%s422_s0 + $0x120] sm:$0xff] }
   0x6   :  { %v53_v11 = vmax.f32 %v38_v5, %v160_v4  ;;  %v39_v14 = vmax.f32 %v24_v10, %v154_v8  ;;  %v25_v20 = vmax.f32 %v10_v15, %v148_v16  ;;  %v181_v21 = vld [vmem:[%s422_s0 + $0x150] sm:$0xff]  ;;  %v162_v24 = vld [vmem:[%s422_s0 + $0xb8] sm:$0xff]  ;;  %v156_v29 = vld [vmem:[%s422_s0 + $0x88] sm:$0xff] }
   0x7   :  { %v11_v27 = vld [vmem:[%s422_s0 + $0x18] sm:$0xff]  ;;  %v149_v28 = vld [vmem:[%s422_s0 + $0x50] sm:$0xff]  ;;  %v188_v30 = vld [vmem:[%s422_s0 + $0x188] sm:$0xff] }
   0x8   :  { %v68_v18 = vmax.f32 %v53_v11, %v167_v9  ;;  %v54_v22 = vmax.f32 %v39_v14, %v161_v13  ;;  %v40_v26 = vmax.f32 %v25_v20, %v155_v17  ;;  %v195_v31 = vld [vmem:[%s422_s0 + $0x1c0] sm:$0xff]  ;;  %v169_v33 = vld [vmem:[%s422_s0 + $0xf0] sm:$0xff]  ;;  %v26_v34 = vmax.f32 %v11_v27, %v149_v28  ;;  %v182_v36 = vld [vmem:[%s422_s0 + $0x158] sm:$0xff] }
   0x9   :  { %v176_v38 = vld [vmem:[%s422_s0 + $0x128] sm:$0xff]  ;;  %v163_v39 = vld [vmem:[%s422_s0 + $0xc0] sm:$0xff]  ;;  %v150_v43 = vld [vmem:[%s422_s0 + $0x58] sm:$0xff] }
   0xa   :  { %v83_v25 = vmax.f32 %v68_v18, %v174_v12  ;;  %v69_v32 = vmax.f32 %v54_v22, %v168_v19  ;;  %v55_v37 = vmax.f32 %v40_v26, %v162_v24  ;;  %v41_v41 = vmax.f32 %v26_v34, %v156_v29  ;;  %v12_v42 = vld [vmem:[%s422_s0 + $0x20] sm:$0xff]  ;;  %v157_v44 = vld [vmem:[%s422_s0 + $0x90] sm:$0xff]  ;;  %v196_v47 = vld [vmem:[%s422_s0 + $0x1c8] sm:$0xff] }
   0xb   :  { %v189_v46 = vld [vmem:[%s422_s0 + $0x190] sm:$0xff]  ;;  %v170_v49 = vld [vmem:[%s422_s0 + $0xf8] sm:$0xff]  ;;  %v27_v50 = vmax.f32 %v12_v42, %v150_v43  ;;  %v183_v52 = vld [vmem:[%s422_s0 + $0x160] sm:$0xff] }
   0xc   :  { %v98_v35 = vmax.f32 %v83_v25, %v181_v21  ;;  %v84_v40 = vmax.f32 %v69_v32, %v175_v23  ;;  %v70_v48 = vmax.f32 %v55_v37, %v169_v33  ;;  %v56_v53 = vmax.f32 %v41_v41, %v163_v39  ;;  %v177_v54 = vld [vmem:[%s422_s0 + $0x130] sm:$0xff]  ;;  %v164_v55 = vld [vmem:[%s422_s0 + $0xc8] sm:$0xff]  ;;  %v151_v60 = vld [vmem:[%s422_s0 + $0x60] sm:$0xff] }
   0xd   :  { %v42_v58 = vmax.f32 %v27_v50, %v157_v44  ;;  %v13_v59 = vld [vmem:[%s422_s0 + $0x28] sm:$0xff]  ;;  %v158_v61 = vld [vmem:[%s422_s0 + $0x98] sm:$0xff]  ;;  %v197_v0 = vld [vmem:[%s422_s0 + $0x1d0] sm:$0xff] }
   0xe   :  { %v113_v45 = vmax.f32 %v98_v35, %v188_v30  ;;  %v99_v51 = vmax.f32 %v84_v40, %v182_v36  ;;  %v85_v57 = vmax.f32 %v70_v48, %v176_v38  ;;  %v190_v63 = vld [vmem:[%s422_s0 + $0x198] sm:$0xff]  ;;  %v71_v1 = vmax.f32 %v56_v53, %v170_v49  ;;  %v171_v2 = vld [vmem:[%s422_s0 + $0x100] sm:$0xff]  ;;  %v184_v5 = vld [vmem:[%s422_s0 + $0x168] sm:$0xff] }
   0xf   :  { %v28_v3 = vmax.f32 %v13_v59, %v151_v60  ;;  %v57_v6 = vmax.f32 %v42_v58, %v164_v55  ;;  %v178_v7 = vld [vmem:[%s422_s0 + $0x138] sm:$0xff]  ;;  %v165_v8 = vld [vmem:[%s422_s0 + $0xd0] sm:$0xff]  ;;  %v152_v13 = vld [vmem:[%s422_s0 + $0x68] sm:$0xff] }
  0x10   :  { %v128_v56 = vmax.f32 %v113_v45, %v195_v31  ;;  %v114_v62 = vmax.f32 %v99_v51, %v189_v46  ;;  %v100_v4 = vmax.f32 %v85_v57, %v183_v52  ;;  %v86_v10 = vmax.f32 %v71_v1, %v177_v54  ;;  %v14_v12 = vld [vmem:[%s422_s0 + $0x30] sm:$0xff]  ;;  %v159_v14 = vld [vmem:[%s422_s0 + $0xa0] sm:$0xff]  ;;  %v172_v18 = vld [vmem:[%s422_s0 + $0x108] sm:$0xff] }
  0x11   :  { %v43_v11 = vmax.f32 %v28_v3, %v158_v61  ;;  %v191_v16 = vld [vmem:[%s422_s0 + $0x1a0] sm:$0xff]  ;;  %v72_v17 = vmax.f32 %v57_v6, %v171_v2  ;;  %v29_v19 = vmax.f32 %v14_v12, %v152_v13  ;;  %v185_v21 = vld [vmem:[%s422_s0 + $0x170] sm:$0xff]  ;;  %v166_v23 = vld [vmem:[%s422_s0 + $0xd8] sm:$0xff] }
  0x12   :  { %135 = vst [vmem:[%s423_s1] sm:$0xff] %v128_v56  ;;  %v129_v9 = vmax.f32 %v114_v62, %v196_v47  ;;  %v115_v15 = vmax.f32 %v100_v4, %v190_v63  ;;  %v101_v20 = vmax.f32 %v86_v10, %v184_v5  ;;  %v198_v25 = vld [vmem:[%s422_s0 + $0x1d8] sm:$0xff]  ;;  %v179_v27 = vld [vmem:[%s422_s0 + $0x140] sm:$0xff]  ;;  %v192_v30 = vld [vmem:[%s422_s0 + $0x1a8] sm:$0xff] }
  0x13   :  { %v58_v22 = vmax.f32 %v43_v11, %v165_v8  ;;  %v87_v26 = vmax.f32 %v72_v17, %v178_v7  ;;  %v44_v28 = vmax.f32 %v29_v19, %v159_v14  ;;  %v173_v32 = vld [vmem:[%s422_s0 + $0x110] sm:$0xff]  ;;  %v186_v34 = vld [vmem:[%s422_s0 + $0x178] sm:$0xff]  ;;  %v199_v37 = vld [vmem:[%s422_s0 + $0x1e0] sm:$0xff] }
  0x14   :  { %136 = vst [vmem:[%s423_s1 + $0x8] sm:$0xff] %v129_v9  ;;  %v130_v24 = vmax.f32 %v115_v15, %v197_v0  ;;  %v116_v29 = vmax.f32 %v101_v20, %v191_v16  ;;  %v180_v39 = vld [vmem:[%s422_s0 + $0x148] sm:$0xff]  ;;  %v193_v41 = vld [vmem:[%s422_s0 + $0x1b0] sm:$0xff]  ;;  %v187_v44 = vld [vmem:[%s422_s0 + $0x180] sm:$0xff] }
  0x15   :  { %v73_v31 = vmax.f32 %v58_v22, %v172_v18  ;;  %v102_v33 = vmax.f32 %v87_v26, %v185_v21  ;;  %v59_v35 = vmax.f32 %v44_v28, %v166_v23  ;;  %v200_v46 = vld [vmem:[%s422_s0 + $0x1e8] sm:$0xff]  ;;  %v194_v49 = vld [vmem:[%s422_s0 + $0x1b8] sm:$0xff]  ;;  %v201_v52 = vld [vmem:[%s422_s0 + $0x1f0] sm:$0xff] }
  0x16   :  { %137 = vst [vmem:[%s423_s1 + $0x10] sm:$0xff] %v130_v24  ;;  %v131_v36 = vmax.f32 %v116_v29, %v198_v25 }
  0x17   :  { %v88_v38 = vmax.f32 %v73_v31, %v179_v27  ;;  %v117_v40 = vmax.f32 %v102_v33, %v192_v30  ;;  %v74_v42 = vmax.f32 %v59_v35, %v173_v32 }
  0x18   :  { %138 = vst [vmem:[%s423_s1 + $0x18] sm:$0xff] %v131_v36 }
  0x19   :  { %v103_v43 = vmax.f32 %v88_v38, %v186_v34  ;;  %v132_v45 = vmax.f32 %v117_v40, %v199_v37  ;;  %v89_v47 = vmax.f32 %v74_v42, %v180_v39 }
  0x1b   :  { %v118_v48 = vmax.f32 %v103_v43, %v193_v41  ;;  %139 = vst [vmem:[%s423_s1 + $0x20] sm:$0xff] %v132_v45  ;;  %v104_v50 = vmax.f32 %v89_v47, %v187_v44 }
  0x1d   :  { %v133_v51 = vmax.f32 %v118_v48, %v200_v46  ;;  %v119_v53 = vmax.f32 %v104_v50, %v194_v49 }
  0x1f   :  { %140 = vst [vmem:[%s423_s1 + $0x28] sm:$0xff] %v133_v51  ;;  %v134_v54 = vmax.f32 %v119_v53, %v201_v52 }
  0x21   :  { %141 = vst [vmem:[%s423_s1 + $0x30] sm:$0xff] %v134_v54 }

// kernel: autoencoder_forward.9
= control target key start
LH: loop header
LB: loop body
LE: loop exit
PB: predicated region body
PF: predicated region fallthrough
CT: control target
= control target key end

     0   :  { %s3803_s1 = inlined_call_operand.vmem [shape: bf16[1664,256], index: 1, kind: input, shape index: {}]   ;;  %s3804_s0 = inlined_call_operand.vmem [shape: bf16[64,1664], index: 0, kind: input, shape index: {}]   ;;  %s3805_s2 = inlined_call_operand.vmem [shape: f32[1,256], index: 2, kind: input, shape index: {}]   ;;  %s3806_s3 = inlined_call_operand.vmem [shape: f32[64,256], index: 3, kind: output, shape index: {}]  }
   0x1   :  { %v2531_v0 = vld [vmem:[%s3803_s1 + $0x4] ss:$8 sps:$4 sm:$0xff]   ;;  %v2535_v2 = vld [vmem:[%s3803_s1] ss:$8 sps:$4 sm:$0xff]   ;;  %v2537_v4 = vld [vmem:[%s3803_s1 + $0x14] ss:$8 sps:$4 sm:$0xff]  }
   0x2   :  { %v2533_v1 = vld [vmem:[%s3803_s1 + $0x304] ss:$8 sps:$4 sm:$0xff]   ;;  %1595 = vmatprep.subr.bf16.mxu1 %v2531_v0  ;;  %v2536_v3 = vld [vmem:[%s3803_s1 + $0x300] ss:$8 sps:$4 sm:$0xff]   ;;  %v2539_v5 = vld [vmem:[%s3803_s1 + $0x314] ss:$8 sps:$4 sm:$0xff]  }
   0x3   :  { %1814 = vmatprep.subr.bf16.mxu0 %v2533_v1  ;;  %1596 = vmatpush1.bf16.msra.mxu1 %v2535_v2  ;;  %v2541_v6 = vld [vmem:[%s3803_s1 + $0x10] ss:$8 sps:$4 sm:$0xff]   ;;  %v2543_v8 = vld [vmem:[%s3803_s1 + $0x24] ss:$8 sps:$4 sm:$0xff]   ;;  %v2547_v10 = vld [vmem:[%s3803_s1 + $0x20] ss:$8 sps:$4 sm:$0xff]  }
   0x4   :  { %1815 = vmatpush1.bf16.msra.mxu0 %v2536_v3  ;;  %1597 = vmatprep.subr.bf16.mxu1 %v2537_v4  ;;  %v2542_v7 = vld [vmem:[%s3803_s1 + $0x310] ss:$8 sps:$4 sm:$0xff]   ;;  %v2545_v9 = vld [vmem:[%s3803_s1 + $0x324] ss:$8 sps:$4 sm:$0xff]   ;;  %v2548_v11 = vld [vmem:[%s3803_s1 + $0x320] ss:$8 sps:$4 sm:$0xff]  }
   0x5   :  { %1816 = vmatprep.subr.bf16.mxu0 %v2539_v5  ;;  %v2549_v12 = vld [vmem:[%s3803_s1 + $0x34] ss:$8 sps:$4 sm:$0xff]   ;;  %v2553_v14 = vld [vmem:[%s3803_s1 + $0x30] ss:$8 sps:$4 sm:$0xff]   ;;  %v2555_v16 = vld [vmem:[%s3803_s1 + $0x44] ss:$8 sps:$4 sm:$0xff]  }
   0x6   :  { %v2551_v13 = vld [vmem:[%s3803_s1 + $0x334] ss:$8 sps:$4 sm:$0xff]   ;;  %v2554_v15 = vld [vmem:[%s3803_s1 + $0x330] ss:$8 sps:$4 sm:$0xff]   ;;  %v2557_v17 = vld [vmem:[%s3803_s1 + $0x344] ss:$8 sps:$4 sm:$0xff]  }
   0x7   :  { %1598 = vmatpush1.bf16.msra.mxu1 %v2541_v6  ;;  %v2559_v18 = vld [vmem:[%s3803_s1 + $0x40] ss:$8 sps:$4 sm:$0xff]   ;;  %v2561_v20 = vld [vmem:[%s3803_s1 + $0x54] ss:$8 sps:$4 sm:$0xff]   ;;  %v2565_v22 = vld [vmem:[%s3803_s1 + $0x50] ss:$8 sps:$4 sm:$0xff]  }
   0x8   :  { %1817 = vmatpush1.bf16.msra.mxu0 %v2542_v7  ;;  %1599 = vmatprep.subr.bf16.mxu1 %v2543_v8  ;;  %v2560_v19 = vld [vmem:[%s3803_s1 + $0x340] ss:$8 sps:$4 sm:$0xff]   ;;  %v2563_v21 = vld [vmem:[%s3803_s1 + $0x354] ss:$8 sps:$4 sm:$0xff]   ;;  %v2566_v23 = vld [vmem:[%s3803_s1 + $0x350] ss:$8 sps:$4 sm:$0xff]  }
   0x9   :  { %1818 = vmatprep.subr.bf16.mxu0 %v2545_v9  ;;  %v2567_v24 = vld [vmem:[%s3803_s1 + $0x64] ss:$8 sps:$4 sm:$0xff]   ;;  %v2571_v26 = vld [vmem:[%s3803_s1 + $0x60] ss:$8 sps:$4 sm:$0xff]   ;;  %v2573_v28 = vld [vmem:[%s3803_s1 + $0x74] ss:$8 sps:$4 sm:$0xff]  }
   0xa   :  { %v2569_v25 = vld [vmem:[%s3803_s1 + $0x364] ss:$8 sps:$4 sm:$0xff]   ;;  %v2572_v27 = vld [vmem:[%s3803_s1 + $0x360] ss:$8 sps:$4 sm:$0xff]   ;;  %v2575_v29 = vld [vmem:[%s3803_s1 + $0x374] ss:$8 sps:$4 sm:$0xff]  }
   0xb   :  { %1600 = vmatpush1.bf16.msra.mxu1 %v2547_v10  ;;  %v2577_v30 = vld [vmem:[%s3803_s1 + $0x70] ss:$8 sps:$4 sm:$0xff]   ;;  %v2579_v32 = vld [vmem:[%s3803_s1 + $0x84] ss:$8 sps:$4 sm:$0xff]   ;;  %v2583_v34 = vld [vmem:[%s3803_s1 + $0x80] ss:$8 sps:$4 sm:$0xff]  }
   0xc   :  { %1819 = vmatpush1.bf16.msra.mxu0 %v2548_v11  ;;  %1601 = vmatprep.subr.bf16.mxu1 %v2549_v12  ;;  %v2578_v31 = vld [vmem:[%s3803_s1 + $0x370] ss:$8 sps:$4 sm:$0xff]   ;;  %v2581_v33 = vld [vmem:[%s3803_s1 + $0x384] ss:$8 sps:$4 sm:$0xff]   ;;  %v2584_v35 = vld [vmem:[%s3803_s1 + $0x380] ss:$8 sps:$4 sm:$0xff]  }
   0xd   :  { %1820 = vmatprep.subr.bf16.mxu0 %v2551_v13  ;;  %v2585_v36 = vld [vmem:[%s3803_s1 + $0x94] ss:$8 sps:$4 sm:$0xff]   ;;  %v2589_v38 = vld [vmem:[%s3803_s1 + $0x90] ss:$8 sps:$4 sm:$0xff]   ;;  %v2591_v40 = vld [vmem:[%s3803_s1 + $0xa4] ss:$8 sps:$4 sm:$0xff]  }
   0xe   :  { %v2587_v37 = vld [vmem:[%s3803_s1 + $0x394] ss:$8 sps:$4 sm:$0xff]   ;;  %v2590_v39 = vld [vmem:[%s3803_s1 + $0x390] ss:$8 sps:$4 sm:$0xff]   ;;  %v2593_v41 = vld [vmem:[%s3803_s1 + $0x3a4] ss:$8 sps:$4 sm:$0xff]  }
   0xf   :  { %1602 = vmatpush1.bf16.msra.mxu1 %v2553_v14  ;;  %v2595_v42 = vld [vmem:[%s3803_s1 + $0xa0] ss:$8 sps:$4 sm:$0xff]   ;;  %v2597_v44 = vld [vmem:[%s3803_s1 + $0xb4] ss:$8 sps:$4 sm:$0xff]   ;;  %v2601_v46 = vld [vmem:[%s3803_s1 + $0xb0] ss:$8 sps:$4 sm:$0xff]  }
  0x10   :  { %1821 = vmatpush1.bf16.msra.mxu0 %v2554_v15  ;;  %1603 = vmatprep.subr.bf16.mxu1 %v2555_v16  ;;  %v2596_v43 = vld [vmem:[%s3803_s1 + $0x3a0] ss:$8 sps:$4 sm:$0xff]   ;;  %v2599_v45 = vld [vmem:[%s3803_s1 + $0x3b4] ss:$8 sps:$4 sm:$0xff]   ;;  %v2602_v47 = vld [vmem:[%s3803_s1 + $0x3b0] ss:$8 sps:$4 sm:$0xff]  }
  0x11   :  { %1822 = vmatprep.subr.bf16.mxu0 %v2557_v17  ;;  %v2629_v48 = vld [vmem:[%s3804_s0 + $0x4] ss:$52 sps:$4 sm:$0xff]   ;;  %v2635_v51 = vld [vmem:[%s3804_s0 + $0x1c] ss:$52 sps:$4 sm:$0xff]   ;;  %v2607_v52 = vld [vmem:[%s3803_s1 + $0xc0] ss:$8 sps:$4 sm:$0xff]  }
  0x12   :  { %v2603_v49 = vld [vmem:[%s3803_s1 + $0xc4] ss:$8 sps:$4 sm:$0xff]   ;;  %1627 = vmatprep.mubr.bf16.mxu1 %v2629_v48  ;;  %v2608_v53 = vld [vmem:[%s3803_s1 + $0x3c0] ss:$8 sps:$4 sm:$0xff]   ;;  %v2609_v54 = vld [vmem:[%s3803_s1 + $0xd4] ss:$8 sps:$4 sm:$0xff]   ;;  %1846 = vmatprep.mubr.bf16.mxu0 %v2635_v51 }
  0x13   :  { %1604 = vmatpush1.bf16.msra.mxu1 %v2559_v18  ;;  %v2605_v50 = vld [vmem:[%s3803_s1 + $0x3c4] ss:$8 sps:$4 sm:$0xff]   ;;  %v2611_v55 = vld [vmem:[%s3803_s1 + $0x3d4] ss:$8 sps:$4 sm:$0xff]   ;;  %v2613_v56 = vld [vmem:[%s3803_s1 + $0xd0] ss:$8 sps:$4 sm:$0xff]  }
  0x14   :  { %1823 = vmatpush1.bf16.msra.mxu0 %v2560_v19  ;;  %1605 = vmatprep.subr.bf16.mxu1 %v2561_v20  ;;  %v2614_v57 = vld [vmem:[%s3803_s1 + $0x3d0] ss:$8 sps:$4 sm:$0xff]   ;;  %v2615_v58 = vld [vmem:[%s3803_s1 + $0xe4] ss:$8 sps:$4 sm:$0xff]   ;;  %v2619_v60 = vld [vmem:[%s3803_s1 + $0xe0] ss:$8 sps:$4 sm:$0xff]  }
  0x15   :  { %1824 = vmatprep.subr.bf16.mxu0 %v2563_v21  ;;  %v2617_v59 = vld [vmem:[%s3803_s1 + $0x3e4] ss:$8 sps:$4 sm:$0xff]   ;;  %v2620_v61 = vld [vmem:[%s3803_s1 + $0x3e0] ss:$8 sps:$4 sm:$0xff]   ;;  %v2621_v62 = vld [vmem:[%s3803_s1 + $0xf4] ss:$8 sps:$4 sm:$0xff]  }
  0x16   :  { %v2623_v63 = vld [vmem:[%s3803_s1 + $0x3f4] ss:$8 sps:$4 sm:$0xff]   ;;  %v2625_v0 = vld [vmem:[%s3803_s1 + $0xf0] ss:$8 sps:$4 sm:$0xff]   ;;  %v2632_v2 = vld [vmem:[%s3803_s1 + $0x104] ss:$8 sps:$4 sm:$0xff]  }
  0x17   :  { %1606 = vmatpush1.bf16.msra.mxu1 %v2565_v22  ;;  %v2626_v1 = vld [vmem:[%s3803_s1 + $0x3f0] ss:$8 sps:$4 sm:$0xff]   ;;  %v2638_v3 = vld [vmem:[%s3803_s1 + $0x404] ss:$8 sps:$4 sm:$0xff]   ;;  %v2627_v4 = vld [vmem:[%s3804_s0] ss:$52 sps:$4 sm:$0xff]  }
  0x18   :  { %1825 = vmatpush1.bf16.msra.mxu0 %v2566_v23  ;;  %1607 = vmatprep.subr.bf16.mxu1 %v2567_v24  ;;  %v2630_v5 = vld [vmem:[%s3803_s1 + $0x100] ss:$8 sps:$4 sm:$0xff]   ;;  %v2633_v6 = vld [vmem:[%s3804_s0 + $0x18] ss:$52 sps:$4 sm:$0xff]   ;;  %v2641_v8 = vld [vmem:[%s3803_s1 + $0x114] ss:$8 sps:$4 sm:$0xff]  }
  0x19   :  { %1826 = vmatprep.subr.bf16.mxu0 %v2569_v25  ;;  %v2636_v7 = vld [vmem:[%s3803_s1 + $0x400] ss:$8 sps:$4 sm:$0xff]   ;;  %v2644_v9 = vld [vmem:[%s3803_s1 + $0x414] ss:$8 sps:$4 sm:$0xff]   ;;  %v2639_v10 = vld [vmem:[%s3803_s1 + $0x110] ss:$8 sps:$4 sm:$0xff]  }
  0x1a   :  { %v2642_v11 = vld [vmem:[%s3803_s1 + $0x410] ss:$8 sps:$4 sm:$0xff]   ;;  %v2647_v12 = vld [vmem:[%s3803_s1 + $0x124] ss:$8 sps:$4 sm:$0xff]   ;;  %v2645_v14 = vld [vmem:[%s3803_s1 + $0x120] ss:$8 sps:$4 sm:$0xff]  }
  0x1b   :  { %1608 = vmatpush1.bf16.msra.mxu1 %v2571_v26  ;;  %v2650_v13 = vld [vmem:[%s3803_s1 + $0x424] ss:$8 sps:$4 sm:$0xff]   ;;  %v2648_v15 = vld [vmem:[%s3803_s1 + $0x420] ss:$8 sps:$4 sm:$0xff]   ;;  %v2653_v16 = vld [vmem:[%s3803_s1 + $0x134] ss:$8 sps:$4 sm:$0xff]  }
  0x1c   :  { %1827 = vmatpush1.bf16.msra.mxu0 %v2572_v27  ;;  %1609 = vmatprep.subr.bf16.mxu1 %v2573_v28  ;;  %v2693_v17 = vld [vmem:[%s3804_s0 + $0x6c] ss:$52 sps:$4 sm:$0xff]   ;;  %v2656_v18 = vld [vmem:[%s3803_s1 + $0x434] ss:$8 sps:$4 sm:$0xff]   ;;  %v2651_v19 = vld [vmem:[%s3803_s1 + $0x130] ss:$8 sps:$4 sm:$0xff]  }
  0x1d   :  { %1828 = vmatprep.subr.bf16.mxu0 %v2575_v29  ;;  %v2654_v20 = vld [vmem:[%s3803_s1 + $0x430] ss:$8 sps:$4 sm:$0xff]   ;;  %v2659_v22 = vld [vmem:[%s3803_s1 + $0x144] ss:$8 sps:$4 sm:$0xff]   ;;  %v2703_v24 = vld [vmem:[%s3804_s0 + $0x68] ss:$52 sps:$4 sm:$0xff]  }
  0x1e   :  { %v2698_v21 = vld [vmem:[%s3804_s0 + $0x84] ss:$52 sps:$4 sm:$0xff]   ;;  %v2704_v25 = vld [vmem:[%s3804_s0 + $0x80] ss:$52 sps:$4 sm:$0xff]  }
  0x1f   :  { %1610 = vmatpush1.bf16.msra.mxu1 %v2577_v30  ;;  %v2662_v23 = vld [vmem:[%s3803_s1 + $0x444] ss:$8 sps:$4 sm:$0xff]   ;;  %v2657_v26 = vld [vmem:[%s3803_s1 + $0x140] ss:$8 sps:$4 sm:$0xff]   ;;  %v2665_v28 = vld [vmem:[%s3803_s1 + $0x154] ss:$8 sps:$4 sm:$0xff]  }
  0x20   :  { %1829 = vmatpush1.bf16.msra.mxu0 %v2578_v31  ;;  %1611 = vmatprep.subr.bf16.mxu1 %v2579_v32  ;;  %v2660_v27 = vld [vmem:[%s3803_s1 + $0x440] ss:$8 sps:$4 sm:$0xff]   ;;  %v2668_v30 = vld [vmem:[%s3803_s1 + $0x454] ss:$8 sps:$4 sm:$0xff]   ;;  %v2663_v31 = vld [vmem:[%s3803_s1 + $0x150] ss:$8 sps:$4 sm:$0xff]  }
  0x21   :  { %1830 = vmatprep.subr.bf16.mxu0 %v2581_v33  ;;  %v2711_v29 = vld [vmem:[%s3804_s0 + $0xd4] ss:$52 sps:$4 sm:$0xff]   ;;  %v2666_v32 = vld [vmem:[%s3803_s1 + $0x450] ss:$8 sps:$4 sm:$0xff]   ;;  %v2716_v33 = vld [vmem:[%s3804_s0 + $0xec] ss:$52 sps:$4 sm:$0xff]  }
  0x22   :  { %v2739_v48 = vld [vmem:[%s3804_s0 + $0x138] ss:$52 sps:$4 sm:$0xff]   ;;  %v2684_v51 = vld [vmem:[%s3803_s1 + $0x480] ss:$8 sps:$4 sm:$0xff]  }
  0x23   :  { %1612 = vmatpush1.bf16.msra.mxu1 %v2583_v34  ;;  %v2671_v34 = vld [vmem:[%s3803_s1 + $0x164] ss:$8 sps:$4 sm:$0xff]  }
  0x24   :  { %1831 = vmatpush1.bf16.msra.mxu0 %v2584_v35  ;;  %1613 = vmatprep.subr.bf16.mxu1 %v2585_v36  ;;  %v2674_v35 = vld [vmem:[%s3803_s1 + $0x464] ss:$8 sps:$4 sm:$0xff]  }
  0x25   :  { %1832 = vmatprep.subr.bf16.mxu0 %v2587_v37  ;;  %v2721_v36 = vld [vmem:[%s3804_s0 + $0xd0] ss:$52 sps:$4 sm:$0xff]   ;;  %v2722_v37 = vld [vmem:[%s3804_s0 + $0xe8] ss:$52 sps:$4 sm:$0xff]  }
  0x27   :  { %1614 = vmatpush1.bf16.msra.mxu1 %v2589_v38  ;;  %v2669_v38 = vld [vmem:[%s3803_s1 + $0x160] ss:$8 sps:$4 sm:$0xff]  }
  0x28   :  { %1833 = vmatpush1.bf16.msra.mxu0 %v2590_v39  ;;  %1615 = vmatprep.subr.bf16.mxu1 %v2591_v40  ;;  %v2672_v39 = vld [vmem:[%s3803_s1 + $0x460] ss:$8 sps:$4 sm:$0xff]   ;;  %v2677_v40 = vld [vmem:[%s3803_s1 + $0x174] ss:$8 sps:$4 sm:$0xff]  }
  0x29   :  { %1834 = vmatprep.subr.bf16.mxu0 %v2593_v41  ;;  %v2729_v41 = vld [vmem:[%s3804_s0 + $0x13c] ss:$52 sps:$4 sm:$0xff]  }
  0x2b   :  { %1616 = vmatpush1.bf16.msra.mxu1 %v2595_v42  ;;  %v2680_v42 = vld [vmem:[%s3803_s1 + $0x474] ss:$8 sps:$4 sm:$0xff]  }
  0x2c   :  { %1835 = vmatpush1.bf16.msra.mxu0 %v2596_v43  ;;  %1617 = vmatprep.subr.bf16.mxu1 %v2597_v44  ;;  %v2675_v43 = vld [vmem:[%s3803_s1 + $0x170] ss:$8 sps:$4 sm:$0xff]  }
  0x2d   :  { %1836 = vmatprep.subr.bf16.mxu0 %v2599_v45  ;;  %v2678_v44 = vld [vmem:[%s3803_s1 + $0x470] ss:$8 sps:$4 sm:$0xff]   ;;  %v2734_v45 = vld [vmem:[%s3804_s0 + $0x154] ss:$52 sps:$4 sm:$0xff]  }
  0x2f   :  { %1618 = vmatpush1.bf16.msra.mxu1 %v2601_v46  ;;  %v2683_v46 = vld [vmem:[%s3803_s1 + $0x184] ss:$8 sps:$4 sm:$0xff]  }
  0x30   :  { %1837 = vmatpush1.bf16.msra.mxu0 %v2602_v47  ;;  %1619 = vmatprep.subr.bf16.mxu1 %v2603_v49  ;;  %v2686_v47 = vld [vmem:[%s3803_s1 + $0x484] ss:$8 sps:$4 sm:$0xff]  }
  0x31   :  { %1838 = vmatprep.subr.bf16.mxu0 %v2605_v50  ;;  %v2740_v49 = vld [vmem:[%s3804_s0 + $0x150] ss:$52 sps:$4 sm:$0xff]   ;;  %v2681_v50 = vld [vmem:[%s3803_s1 + $0x180] ss:$8 sps:$4 sm:$0xff]  }
  0x33   :  { %1620 = vmatpush1.bf16.msra.mxu1 %v2607_v52  ;;  %v2689_v52 = vld [vmem:[%s3803_s1 + $0x194] ss:$8 sps:$4 sm:$0xff]  }
  0x34   :  { %1839 = vmatpush1.bf16.msra.mxu0 %v2608_v53  ;;  %1621 = vmatprep.subr.bf16.mxu1 %v2609_v54  ;;  %v2692_v53 = vld [vmem:[%s3803_s1 + $0x494] ss:$8 sps:$4 sm:$0xff]   ;;  %v2749_v54 = vld [vmem:[%s3804_s0 + $0xc] ss:$52 sps:$4 sm:$0xff]  }
  0x35   :  { %1840 = vmatprep.subr.bf16.mxu0 %v2611_v55  ;;  %v2687_v55 = vld [vmem:[%s3803_s1 + $0x190] ss:$8 sps:$4 sm:$0xff]  }
  0x37   :  { %1622 = vmatpush1.bf16.msra.mxu1 %v2613_v56  ;;  %v2690_v56 = vld [vmem:[%s3803_s1 + $0x490] ss:$8 sps:$4 sm:$0xff]  }
  0x38   :  { %1841 = vmatpush1.bf16.msra.mxu0 %v2614_v57  ;;  %1623 = vmatprep.subr.bf16.mxu1 %v2615_v58  ;;  %v2755_v57 = vld [vmem:[%s3804_s0 + $0x24] ss:$52 sps:$4 sm:$0xff]  }
  0x39   :  { %1842 = vmatprep.subr.bf16.mxu0 %v2617_v59  ;;  %v2697_v58 = vld [vmem:[%s3803_s1 + $0x1a4] ss:$8 sps:$4 sm:$0xff]  }
  0x3a   :  { %v2702_v59 = vld [vmem:[%s3803_s1 + $0x4a4] ss:$8 sps:$4 sm:$0xff]  }
  0x3b   :  { %1624 = vmatpush1.bf16.msra.mxu1 %v2619_v60  ;;  %v2695_v60 = vld [vmem:[%s3803_s1 + $0x1a0] ss:$8 sps:$4 sm:$0xff]  }
  0x3c   :  { %1843 = vmatpush1.bf16.msra.mxu0 %v2620_v61  ;;  %1625 = vmatprep.subr.bf16.mxu1 %v2621_v62  ;;  %v2700_v61 = vld [vmem:[%s3803_s1 + $0x4a0] ss:$8 sps:$4 sm:$0xff]   ;;  %v2707_v62 = vld [vmem:[%s3803_s1 + $0x1b4] ss:$8 sps:$4 sm:$0xff]  }
  0x3d   :  { %1844 = vmatprep.subr.bf16.mxu0 %v2623_v63  ;;  %v2710_v63 = vld [vmem:[%s3803_s1 + $0x4b4] ss:$8 sps:$4 sm:$0xff]  }
  0x3f   :  { %1626 = vmatpush1.bf16.msra.mxu1 %v2625_v0  ;;  %v2705_v0 = vld [vmem:[%s3803_s1 + $0x1b0] ss:$8 sps:$4 sm:$0xff]  }
  0x40   :  { %1845 = vmatpush1.bf16.msra.mxu0 %v2626_v1  ;;  %1668 = vmatprep.subr.bf16.mxu1 %v2632_v2  ;;  %v2708_v1 = vld [vmem:[%s3803_s1 + $0x4b0] ss:$8 sps:$4 sm:$0xff]   ;;  %v2715_v2 = vld [vmem:[%s3803_s1 + $0x1c4] ss:$8 sps:$4 sm:$0xff]  }
  0x41   :  { %1887 = vmatprep.subr.bf16.mxu0 %v2638_v3  ;;  %v2720_v3 = vld [vmem:[%s3803_s1 + $0x4c4] ss:$8 sps:$4 sm:$0xff]  }
  0x42   :  { %1628 = vmatmul.mubr.bf16.vlgmr.msra.gmra.mrb[0].mxu1 %v2627_v4  ;;  %v2713_v4 = vld [vmem:[%s3803_s1 + $0x1c0] ss:$8 sps:$4 sm:$0xff]  }
  0x43   :  { %1847 = vmatmul.mubr.bf16.vlgmr.msra.gmra.mrb[0].mxu0 %v2633_v6  ;;  %1669 = vmatpush1.bf16.msra.mxu1 %v2630_v5  ;;  %v2718_v5 = vld [vmem:[%s3803_s1 + $0x4c0] ss:$8 sps:$4 sm:$0xff]   ;;  %v2725_v6 = vld [vmem:[%s3803_s1 + $0x1d4] ss:$8 sps:$4 sm:$0xff]  }
  0x44   :  { %1888 = vmatpush1.bf16.msra.mxu0 %v2636_v7  ;;  %1670 = vmatprep.subr.bf16.mxu1 %v2641_v8  ;;  %v2728_v7 = vld [vmem:[%s3803_s1 + $0x4d4] ss:$8 sps:$4 sm:$0xff]   ;;  %v2723_v8 = vld [vmem:[%s3803_s1 + $0x1d0] ss:$8 sps:$4 sm:$0xff]  }
  0x45   :  { %1889 = vmatprep.subr.bf16.mxu0 %v2644_v9  ;;  %1637 = vmatprep.mubr.bf16.mxu1 %v2693_v17  ;;  %v2726_v9 = vld [vmem:[%s3803_s1 + $0x4d0] ss:$8 sps:$4 sm:$0xff]  }
  0x46   :  { %1856 = vmatprep.mubr.bf16.mxu0 %v2698_v21  ;;  %v2744_v17 = vld [vmem:[%s3803_s1 + $0x4f0] ss:$8 sps:$4 sm:$0xff]   ;;  %v2750_v21 = vld [vmem:[%s3803_s1 + $0x200] ss:$8 sps:$4 sm:$0xff]  }
  0x47   :  { %1671 = vmatpush1.bf16.msra.mxu1 %v2639_v10  ;;  %v2733_v10 = vld [vmem:[%s3803_s1 + $0x1e4] ss:$8 sps:$4 sm:$0xff]  }
  0x48   :  { %1890 = vmatpush1.bf16.msra.mxu0 %v2642_v11  ;;  %1672 = vmatprep.subr.bf16.mxu1 %v2647_v12  ;;  %v2738_v11 = vld [vmem:[%s3803_s1 + $0x4e4] ss:$8 sps:$4 sm:$0xff]   ;;  %v2731_v12 = vld [vmem:[%s3803_s1 + $0x1e0] ss:$8 sps:$4 sm:$0xff]  }
  0x49   :  { %1891 = vmatprep.subr.bf16.mxu0 %v2650_v13  ;;  %v2736_v13 = vld [vmem:[%s3803_s1 + $0x4e0] ss:$8 sps:$4 sm:$0xff]  }
  0x4a   :  { %1638 = vmatmul.mubr.bf16.gmra.mrb[4].mxu1 %v2703_v24  ;;  %v2761_v24 = vld [vmem:[%s3803_s1 + $0x214] ss:$8 sps:$4 sm:$0xff]  }
  0x4b   :  { %1673 = vmatpush1.bf16.msra.mxu1 %v2645_v14  ;;  %1857 = vmatmul.mubr.bf16.gmra.mrb[4].mxu0 %v2704_v25  ;;  %v2743_v14 = vld [vmem:[%s3803_s1 + $0x1f4] ss:$8 sps:$4 sm:$0xff]  }
  0x4c   :  { %1892 = vmatpush1.bf16.msra.mxu0 %v2648_v15  ;;  %1674 = vmatprep.subr.bf16.mxu1 %v2653_v16  ;;  %v2746_v15 = vld [vmem:[%s3803_s1 + $0x4f4] ss:$8 sps:$4 sm:$0xff]   ;;  %v2741_v16 = vld [vmem:[%s3803_s1 + $0x1f0] ss:$8 sps:$4 sm:$0xff]  }
  0x4d   :  { %1893 = vmatprep.subr.bf16.mxu0 %v2656_v18  ;;  %1647 = vmatprep.mubr.bf16.mxu1 %v2711_v29  ;;  %v2752_v18 = vld [vmem:[%s3803_s1 + $0x204] ss:$8 sps:$4 sm:$0xff]   ;;  %v2764_v25 = vld [vmem:[%s3803_s1 + $0x514] ss:$8 sps:$4 sm:$0xff]   ;;  %v2762_v29 = vld [vmem:[%s3803_s1 + $0x510] ss:$8 sps:$4 sm:$0xff]  }
  0x4e   :  { %1866 = vmatprep.mubr.bf16.mxu0 %v2716_v33  ;;  %v2817_v33 = vld [vmem:[%s3804_s0 + $0x70] ss:$52 sps:$4 sm:$0xff]  }
  0x4f   :  { %1675 = vmatpush1.bf16.msra.mxu1 %v2651_v19  ;;  %v2758_v19 = vld [vmem:[%s3803_s1 + $0x504] ss:$8 sps:$4 sm:$0xff]  }
  0x50   :  { %1894 = vmatpush1.bf16.msra.mxu0 %v2654_v20  ;;  %1676 = vmatprep.subr.bf16.mxu1 %v2659_v22  ;;  %v2747_v20 = vld [vmem:[%s3804_s0 + $0x8] ss:$52 sps:$4 sm:$0xff]   ;;  %v2753_v22 = vld [vmem:[%s3804_s0 + $0x20] ss:$52 sps:$4 sm:$0xff]  }
  0x51   :  { %1895 = vmatprep.subr.bf16.mxu0 %v2662_v23  ;;  %v2756_v23 = vld [vmem:[%s3803_s1 + $0x500] ss:$8 sps:$4 sm:$0xff]  }
  0x52   :  { %1648 = vmatmul.mubr.bf16.gmra.mrb[8].mxu1 %v2721_v36  ;;  %v2773_v36 = vld [vmem:[%s3803_s1 + $0x234] ss:$8 sps:$4 sm:$0xff]  }
  0x53   :  { %1677 = vmatpush1.bf16.msra.mxu1 %v2657_v26  ;;  %1867 = vmatmul.mubr.bf16.gmra.mrb[8].mxu0 %v2722_v37  ;;  %v2813_v26 = vld [vmem:[%s3804_s0 + $0x74] ss:$52 sps:$4 sm:$0xff]  }
  0x54   :  { %1896 = vmatpush1.bf16.msra.mxu0 %v2660_v27  ;;  %1678 = vmatprep.subr.bf16.mxu1 %v2665_v28  ;;  %v2815_v27 = vld [vmem:[%s3804_s0 + $0x8c] ss:$52 sps:$4 sm:$0xff]   ;;  %v2759_v28 = vld [vmem:[%s3803_s1 + $0x210] ss:$8 sps:$4 sm:$0xff]   ;;  %v2776_v37 = vld [vmem:[%s3803_s1 + $0x534] ss:$8 sps:$4 sm:$0xff]  }
  0x55   :  { %1897 = vmatprep.subr.bf16.mxu0 %v2668_v30  ;;  %1657 = vmatprep.mubr.bf16.mxu1 %v2729_v41  ;;  %v2767_v30 = vld [vmem:[%s3803_s1 + $0x224] ss:$8 sps:$4 sm:$0xff]   ;;  %v2774_v41 = vld [vmem:[%s3803_s1 + $0x530] ss:$8 sps:$4 sm:$0xff]  }
  0x56   :  { %1876 = vmatprep.mubr.bf16.mxu0 %v2734_v45  ;;  %v2835_v45 = vld [vmem:[%s3804_s0 + $0xd8] ss:$52 sps:$4 sm:$0xff]  }
  0x57   :  { %1679 = vmatpush1.bf16.msra.mxu1 %v2663_v31  ;;  %v2770_v31 = vld [vmem:[%s3803_s1 + $0x524] ss:$8 sps:$4 sm:$0xff]  }
  0x58   :  { %1898 = vmatpush1.bf16.msra.mxu0 %v2666_v32  ;;  %1680 = vmatprep.subr.bf16.mxu1 %v2671_v34  ;;  %v2765_v32 = vld [vmem:[%s3803_s1 + $0x220] ss:$8 sps:$4 sm:$0xff]  }
  0x59   :  { %1899 = vmatprep.subr.bf16.mxu0 %v2674_v35  ;;  %v2821_v34 = vld [vmem:[%s3804_s0 + $0x88] ss:$52 sps:$4 sm:$0xff]  }
  0x5a   :  { %1658 = vmatmul.mubr.bf16.gmra.mrb[12].mxu1 %v2739_v48  ;;  %v2768_v35 = vld [vmem:[%s3803_s1 + $0x520] ss:$8 sps:$4 sm:$0xff]   ;;  %v2785_v48 = vld [vmem:[%s3803_s1 + $0x254] ss:$8 sps:$4 sm:$0xff]  }
  0x5b   :  { %1681 = vmatpush1.bf16.msra.mxu1 %v2669_v38  ;;  %1877 = vmatmul.mubr.bf16.gmra.mrb[12].mxu0 %v2740_v49  ;;  %v2831_v38 = vld [vmem:[%s3804_s0 + $0xdc] ss:$52 sps:$4 sm:$0xff]  }
  0x5c   :  { %1900 = vmatpush1.bf16.msra.mxu0 %v2672_v39  ;;  %1682 = vmatprep.subr.bf16.mxu1 %v2677_v40  ;;  %v2833_v39 = vld [vmem:[%s3804_s0 + $0xf4] ss:$52 sps:$4 sm:$0xff]   ;;  %v2771_v40 = vld [vmem:[%s3803_s1 + $0x230] ss:$8 sps:$4 sm:$0xff]  }
  0x5d   :  { %1901 = vmatprep.subr.bf16.mxu0 %v2680_v42  ;;  %1700 = vmatprep.mubr.bf16.mxu1 %v2749_v54  ;;  %v2779_v42 = vld [vmem:[%s3803_s1 + $0x244] ss:$8 sps:$4 sm:$0xff]   ;;  %v2788_v49 = vld [vmem:[%s3803_s1 + $0x554] ss:$8 sps:$4 sm:$0xff]  }
  0x5e   :  { %1919 = vmatprep.mubr.bf16.mxu0 %v2755_v57  ;;  %v2791_v54 = vld [vmem:[%s3803_s1 + $0x264] ss:$8 sps:$4 sm:$0xff]   ;;  %v2792_v57 = vld [vmem:[%s3803_s1 + $0x560] ss:$8 sps:$4 sm:$0xff]  }
  0x5f   :  { %1683 = vmatpush1.bf16.msra.mxu1 %v2675_v43  ;;  %v2782_v43 = vld [vmem:[%s3803_s1 + $0x544] ss:$8 sps:$4 sm:$0xff]  }
  0x60   :  { %1902 = vmatpush1.bf16.msra.mxu0 %v2678_v44  ;;  %1684 = vmatprep.subr.bf16.mxu1 %v2683_v46  ;;  %v2777_v44 = vld [vmem:[%s3803_s1 + $0x240] ss:$8 sps:$4 sm:$0xff]   ;;  %v2839_v46 = vld [vmem:[%s3804_s0 + $0xf0] ss:$52 sps:$4 sm:$0xff]  }
  0x61   :  { %1903 = vmatprep.subr.bf16.mxu0 %v2686_v47  ;;  %v2780_v47 = vld [vmem:[%s3803_s1 + $0x540] ss:$8 sps:$4 sm:$0xff]  }
  0x63   :  { %1685 = vmatpush1.bf16.msra.mxu1 %v2681_v50  ;;  %v2849_v50 = vld [vmem:[%s3804_s0 + $0x144] ss:$52 sps:$4 sm:$0xff]  }
  0x64   :  { %1904 = vmatpush1.bf16.msra.mxu0 %v2684_v51  ;;  %1686 = vmatprep.subr.bf16.mxu1 %v2689_v52  ;;  %v2851_v51 = vld [vmem:[%s3804_s0 + $0x15c] ss:$52 sps:$4 sm:$0xff]  }
  0x65   :  { %1905 = vmatprep.subr.bf16.mxu0 %v2692_v53  ;;  %v2783_v52 = vld [vmem:[%s3803_s1 + $0x250] ss:$8 sps:$4 sm:$0xff]  }
  0x66   :  { %v2786_v53 = vld [vmem:[%s3803_s1 + $0x550] ss:$8 sps:$4 sm:$0xff]  }
  0x67   :  { %1687 = vmatpush1.bf16.msra.mxu1 %v2687_v55  ;;  %v2794_v55 = vld [vmem:[%s3803_s1 + $0x564] ss:$8 sps:$4 sm:$0xff]  }
  0x68   :  { %1906 = vmatpush1.bf16.msra.mxu0 %v2690_v56  ;;  %1688 = vmatprep.subr.bf16.mxu1 %v2697_v58  ;;  %v2789_v56 = vld [vmem:[%s3803_s1 + $0x260] ss:$8 sps:$4 sm:$0xff]  }
  0x69   :  { %1907 = vmatprep.subr.bf16.mxu0 %v2702_v59  ;;  %v2853_v58 = vld [vmem:[%s3804_s0 + $0x140] ss:$52 sps:$4 sm:$0xff]   ;;  %v2857_v59 = vld [vmem:[%s3804_s0 + $0x158] ss:$52 sps:$4 sm:$0xff]  }
  0x6b   :  { %1689 = vmatpush1.bf16.msra.mxu1 %v2695_v60  ;;  %v2797_v60 = vld [vmem:[%s3803_s1 + $0x274] ss:$8 sps:$4 sm:$0xff]  }
  0x6c   :  { %1908 = vmatpush1.bf16.msra.mxu0 %v2700_v61  ;;  %1690 = vmatprep.subr.bf16.mxu1 %v2707_v62  ;;  %v2800_v61 = vld [vmem:[%s3803_s1 + $0x574] ss:$8 sps:$4 sm:$0xff]  }
  0x6d   :  { %1909 = vmatprep.subr.bf16.mxu0 %v2710_v63  ;;  %v2869_v62 = vld [vmem:[%s3804_s0 + $0x14] ss:$52 sps:$4 sm:$0xff]   ;;  %v2872_v63 = vld [vmem:[%s3804_s0 + $0x2c] ss:$52 sps:$4 sm:$0xff]  }
  0x6f   :  { %1691 = vmatpush1.bf16.msra.mxu1 %v2705_v0  ;;  %v2795_v0 = vld [vmem:[%s3803_s1 + $0x270] ss:$8 sps:$4 sm:$0xff]  }
  0x70   :  { %1910 = vmatpush1.bf16.msra.mxu0 %v2708_v1  ;;  %1692 = vmatprep.subr.bf16.mxu1 %v2715_v2  ;;  %v2798_v1 = vld [vmem:[%s3803_s1 + $0x570] ss:$8 sps:$4 sm:$0xff]   ;;  %v2803_v2 = vld [vmem:[%s3803_s1 + $0x284] ss:$8 sps:$4 sm:$0xff]  }
  0x71   :  { %1911 = vmatprep.subr.bf16.mxu0 %v2720_v3  ;;  %v2806_v3 = vld [vmem:[%s3803_s1 + $0x584] ss:$8 sps:$4 sm:$0xff]  }
  0x73   :  { %1693 = vmatpush1.bf16.msra.mxu1 %v2713_v4  ;;  %v2801_v4 = vld [vmem:[%s3803_s1 + $0x280] ss:$8 sps:$4 sm:$0xff]  }
  0x74   :  { %1912 = vmatpush1.bf16.msra.mxu0 %v2718_v5  ;;  %1694 = vmatprep.subr.bf16.mxu1 %v2725_v6  ;;  %v2804_v5 = vld [vmem:[%s3803_s1 + $0x580] ss:$8 sps:$4 sm:$0xff]   ;;  %v2809_v6 = vld [vmem:[%s3803_s1 + $0x294] ss:$8 sps:$4 sm:$0xff]  }
  0x75   :  { %1913 = vmatprep.subr.bf16.mxu0 %v2728_v7  ;;  %v2812_v7 = vld [vmem:[%s3803_s1 + $0x594] ss:$8 sps:$4 sm:$0xff]  }
  0x77   :  { %1695 = vmatpush1.bf16.msra.mxu1 %v2723_v8  ;;  %v2807_v8 = vld [vmem:[%s3803_s1 + $0x290] ss:$8 sps:$4 sm:$0xff]  }
  0x78   :  { %1914 = vmatpush1.bf16.msra.mxu0 %v2726_v9  ;;  %1696 = vmatprep.subr.bf16.mxu1 %v2733_v10  ;;  %v2810_v9 = vld [vmem:[%s3803_s1 + $0x590] ss:$8 sps:$4 sm:$0xff]   ;;  %v2820_v10 = vld [vmem:[%s3803_s1 + $0x2a4] ss:$8 sps:$4 sm:$0xff]  }
  0x79   :  { %1915 = vmatprep.subr.bf16.mxu0 %v2738_v11  ;;  %v2824_v11 = vld [vmem:[%s3803_s1 + $0x5a4] ss:$8 sps:$4 sm:$0xff]  }
  0x7b   :  { %1697 = vmatpush1.bf16.msra.mxu1 %v2731_v12  ;;  %v2818_v12 = vld [vmem:[%s3803_s1 + $0x2a0] ss:$8 sps:$4 sm:$0xff]  }
  0x7c   :  { %1916 = vmatpush1.bf16.msra.mxu0 %v2736_v13  ;;  %1698 = vmatprep.subr.bf16.mxu1 %v2743_v14  ;;  %v2822_v13 = vld [vmem:[%s3803_s1 + $0x5a0] ss:$8 sps:$4 sm:$0xff]   ;;  %v2827_v14 = vld [vmem:[%s3803_s1 + $0x2b4] ss:$8 sps:$4 sm:$0xff]  }
  0x7d   :  { %1917 = vmatprep.subr.bf16.mxu0 %v2746_v15  ;;  %v2830_v15 = vld [vmem:[%s3803_s1 + $0x5b4] ss:$8 sps:$4 sm:$0xff]  }
  0x7f   :  { %1699 = vmatpush1.bf16.msra.mxu1 %v2741_v16  ;;  %v2825_v16 = vld [vmem:[%s3803_s1 + $0x2b0] ss:$8 sps:$4 sm:$0xff]  }
  0x80   :  { %1918 = vmatpush1.bf16.msra.mxu0 %v2744_v17  ;;  %1741 = vmatprep.subr.bf16.mxu1 %v2752_v18  ;;  %v2828_v17 = vld [vmem:[%s3803_s1 + $0x5b0] ss:$8 sps:$4 sm:$0xff]   ;;  %v2838_v18 = vld [vmem:[%s3803_s1 + $0x2c4] ss:$8 sps:$4 sm:$0xff]  }
  0x81   :  { %1960 = vmatprep.subr.bf16.mxu0 %v2758_v19  ;;  %v2842_v19 = vld [vmem:[%s3803_s1 + $0x5c4] ss:$8 sps:$4 sm:$0xff]  }
  0x82   :  { %1701 = vmatmul.mubr.bf16.vlgmr.msra.gmra.mrb[0].mxu1 %v2747_v20  ;;  %v2836_v20 = vld [vmem:[%s3803_s1 + $0x2c0] ss:$8 sps:$4 sm:$0xff]  }
  0x83   :  { %1920 = vmatmul.mubr.bf16.vlgmr.msra.gmra.mrb[0].mxu0 %v2753_v22  ;;  %1742 = vmatpush1.bf16.msra.mxu1 %v2750_v21  ;;  %v2840_v21 = vld [vmem:[%s3803_s1 + $0x5c0] ss:$8 sps:$4 sm:$0xff]   ;;  %v2845_v22 = vld [vmem:[%s3803_s1 + $0x2d4] ss:$8 sps:$4 sm:$0xff]  }
  0x84   :  { %1961 = vmatpush1.bf16.msra.mxu0 %v2756_v23  ;;  %1743 = vmatprep.subr.bf16.mxu1 %v2761_v24  ;;  %v2848_v23 = vld [vmem:[%s3803_s1 + $0x5d4] ss:$8 sps:$4 sm:$0xff]   ;;  %v2843_v24 = vld [vmem:[%s3803_s1 + $0x2d0] ss:$8 sps:$4 sm:$0xff]  }
  0x85   :  { %1962 = vmatprep.subr.bf16.mxu0 %v2764_v25  ;;  %1710 = vmatprep.mubr.bf16.mxu1 %v2813_v26  ;;  %v2846_v25 = vld [vmem:[%s3803_s1 + $0x5d0] ss:$8 sps:$4 sm:$0xff]   ;;  %v2856_v26 = vld [vmem:[%s3803_s1 + $0x2e4] ss:$8 sps:$4 sm:$0xff]  }
  0x86   :  { %1929 = vmatprep.mubr.bf16.mxu0 %v2815_v27  ;;  %v2860_v27 = vld [vmem:[%s3803_s1 + $0x5e4] ss:$8 sps:$4 sm:$0xff]  }
  0x87   :  { %1744 = vmatpush1.bf16.msra.mxu1 %v2759_v28  ;;  %v2854_v28 = vld [vmem:[%s3803_s1 + $0x2e0] ss:$8 sps:$4 sm:$0xff]  }
  0x88   :  { %1963 = vmatpush1.bf16.msra.mxu0 %v2762_v29  ;;  %1745 = vmatprep.subr.bf16.mxu1 %v2767_v30  ;;  %v2858_v29 = vld [vmem:[%s3803_s1 + $0x5e0] ss:$8 sps:$4 sm:$0xff]   ;;  %v2863_v30 = vld [vmem:[%s3803_s1 + $0x2f4] ss:$8 sps:$4 sm:$0xff]  }
  0x89   :  { %1964 = vmatprep.subr.bf16.mxu0 %v2770_v31  ;;  %v2866_v31 = vld [vmem:[%s3803_s1 + $0x5f4] ss:$8 sps:$4 sm:$0xff]  }
  0x8a   :  { %1711 = vmatmul.mubr.bf16.gmra.mrb[4].mxu1 %v2817_v33  ;;  %v2864_v33 = vld [vmem:[%s3803_s1 + $0x5f0] ss:$8 sps:$4 sm:$0xff]  }
  0x8b   :  { %1930 = vmatmul.mubr.bf16.gmra.mrb[4].mxu0 %v2821_v34  ;;  %1746 = vmatpush1.bf16.msra.mxu1 %v2765_v32  ;;  %v2861_v32 = vld [vmem:[%s3803_s1 + $0x2f0] ss:$8 sps:$4 sm:$0xff]   ;;  %v2875_v34 = vld [vmem:[%s3803_s1 + $0x604] ss:$8 sps:$4 sm:$0xff]  }
  0x8c   :  { %1965 = vmatpush1.bf16.msra.mxu0 %v2768_v35  ;;  %1747 = vmatprep.subr.bf16.mxu1 %v2773_v36  ;;  %v2867_v35 = vld [vmem:[%s3804_s0 + $0x10] ss:$52 sps:$4 sm:$0xff]   ;;  %v2870_v36 = vld [vmem:[%s3804_s0 + $0x28] ss:$52 sps:$4 sm:$0xff]  }
  0x8d   :  { %1966 = vmatprep.subr.bf16.mxu0 %v2776_v37  ;;  %1720 = vmatprep.mubr.bf16.mxu1 %v2831_v38  ;;  %v2873_v37 = vld [vmem:[%s3803_s1 + $0x600] ss:$8 sps:$4 sm:$0xff]   ;;  %v2878_v38 = vld [vmem:[%s3803_s1 + $0x614] ss:$8 sps:$4 sm:$0xff]  }
  0x8e   :  { %1939 = vmatprep.mubr.bf16.mxu0 %v2833_v39  ;;  %v2879_v39 = vld [vmem:[%s3804_s0 + $0x7c] ss:$52 sps:$4 sm:$0xff]  }
  0x8f   :  { %1748 = vmatpush1.bf16.msra.mxu1 %v2771_v40  ;;  %v2881_v40 = vld [vmem:[%s3804_s0 + $0x94] ss:$52 sps:$4 sm:$0xff]  }
  0x90   :  { %1967 = vmatpush1.bf16.msra.mxu0 %v2774_v41  ;;  %1749 = vmatprep.subr.bf16.mxu1 %v2779_v42  ;;  %v2876_v41 = vld [vmem:[%s3803_s1 + $0x610] ss:$8 sps:$4 sm:$0xff]   ;;  %v2887_v42 = vld [vmem:[%s3803_s1 + $0x624] ss:$8 sps:$4 sm:$0xff]  }
  0x91   :  { %1968 = vmatprep.subr.bf16.mxu0 %v2782_v43  ;;  %v2883_v43 = vld [vmem:[%s3804_s0 + $0x78] ss:$52 sps:$4 sm:$0xff]  }
  0x92   :  { %1721 = vmatmul.mubr.bf16.gmra.mrb[8].mxu1 %v2835_v45  ;;  %v2885_v45 = vld [vmem:[%s3803_s1 + $0x620] ss:$8 sps:$4 sm:$0xff]  }
  0x93   :  { %1940 = vmatmul.mubr.bf16.gmra.mrb[8].mxu0 %v2839_v46  ;;  %1750 = vmatpush1.bf16.msra.mxu1 %v2777_v44  ;;  %v2884_v44 = vld [vmem:[%s3804_s0 + $0x90] ss:$52 sps:$4 sm:$0xff]   ;;  %v2890_v46 = vld [vmem:[%s3803_s1 + $0x634] ss:$8 sps:$4 sm:$0xff]  }
  0x94   :  { %1969 = vmatpush1.bf16.msra.mxu0 %v2780_v47  ;;  %1751 = vmatprep.subr.bf16.mxu1 %v2785_v48  ;;  %v2891_v47 = vld [vmem:[%s3804_s0 + $0xe4] ss:$52 sps:$4 sm:$0xff]   ;;  %v2893_v48 = vld [vmem:[%s3804_s0 + $0xfc] ss:$52 sps:$4 sm:$0xff]  }
  0x95   :  { %1970 = vmatprep.subr.bf16.mxu0 %v2788_v49  ;;  %1730 = vmatprep.mubr.bf16.mxu1 %v2849_v50  ;;  %v2888_v49 = vld [vmem:[%s3803_s1 + $0x630] ss:$8 sps:$4 sm:$0xff]   ;;  %v2899_v50 = vld [vmem:[%s3803_s1 + $0x644] ss:$8 sps:$4 sm:$0xff]  }
  0x96   :  { %1949 = vmatprep.mubr.bf16.mxu0 %v2851_v51  ;;  %v2895_v51 = vld [vmem:[%s3804_s0 + $0xe0] ss:$52 sps:$4 sm:$0xff]  }
  0x97   :  { %1752 = vmatpush1.bf16.msra.mxu1 %v2783_v52  ;;  %v2896_v52 = vld [vmem:[%s3804_s0 + $0xf8] ss:$52 sps:$4 sm:$0xff]  }
  0x98   :  { %1971 = vmatpush1.bf16.msra.mxu0 %v2786_v53  ;;  %1753 = vmatprep.subr.bf16.mxu1 %v2791_v54  ;;  %v2897_v53 = vld [vmem:[%s3803_s1 + $0x640] ss:$8 sps:$4 sm:$0xff]   ;;  %v2902_v54 = vld [vmem:[%s3803_s1 + $0x654] ss:$8 sps:$4 sm:$0xff]  }
  0x99   :  { %1972 = vmatprep.subr.bf16.mxu0 %v2794_v55  ;;  %v2903_v55 = vld [vmem:[%s3804_s0 + $0x14c] ss:$52 sps:$4 sm:$0xff]  }
  0x9a   :  { %1731 = vmatmul.mubr.bf16.gmra.mrb[12].mxu1 %v2853_v58  ;;  %v2911_v58 = vld [vmem:[%s3803_s1 + $0x664] ss:$8 sps:$4 sm:$0xff]  }
  0x9b   :  { %1950 = vmatmul.mubr.bf16.gmra.mrb[12].mxu0 %v2857_v59  ;;  %1754 = vmatpush1.bf16.msra.mxu1 %v2789_v56  ;;  %v2905_v56 = vld [vmem:[%s3804_s0 + $0x164] ss:$52 sps:$4 sm:$0xff]   ;;  %v2907_v59 = vld [vmem:[%s3804_s0 + $0x148] ss:$52 sps:$4 sm:$0xff]  }
  0x9c   :  { %1973 = vmatpush1.bf16.msra.mxu0 %v2792_v57  ;;  %1755 = vmatprep.subr.bf16.mxu1 %v2797_v60  ;;  %v2900_v57 = vld [vmem:[%s3803_s1 + $0x650] ss:$8 sps:$4 sm:$0xff]   ;;  %v2908_v60 = vld [vmem:[%s3804_s0 + $0x160] ss:$52 sps:$4 sm:$0xff]  }
  0x9d   :  { %1974 = vmatprep.subr.bf16.mxu0 %v2800_v61  ;;  %1773 = vmatprep.mubr.bf16.mxu1 %v2869_v62  ;;  %v2909_v61 = vld [vmem:[%s3803_s1 + $0x660] ss:$8 sps:$4 sm:$0xff]   ;;  %v2914_v62 = vld [vmem:[%s3803_s1 + $0x674] ss:$8 sps:$4 sm:$0xff]  }
  0x9e   :  { %1992 = vmatprep.mubr.bf16.mxu0 %v2872_v63  ;;  %v2912_v63 = vld [vmem:[%s3803_s1 + $0x670] ss:$8 sps:$4 sm:$0xff]  }
  0x9f   :  { %1756 = vmatpush1.bf16.msra.mxu1 %v2795_v0  ;;  %v2919_v0 = vmov 0  }
  0xa0   :  { %1975 = vmatpush1.bf16.msra.mxu0 %v2798_v1  ;;  %1757 = vmatprep.subr.bf16.mxu1 %v2803_v2  ;;  %v2915_v1 = vld [vmem:[%s3804_s0 + $0x30] ss:$52 sps:$4 sm:$0xff]   ;;  %v2916_v2 = vld [vmem:[%s3804_s0 + $0x100] ss:$52 sps:$4 sm:$0xff]  }
  0xa1   :  { %1976 = vmatprep.subr.bf16.mxu0 %v2806_v3  ;;  %v2917_v3 = vld [vmem:[%s3804_s0 + $0x98] ss:$52 sps:$4 sm:$0xff]  }
  0xa3   :  { %1758 = vmatpush1.bf16.msra.mxu1 %v2801_v4  ;;  %v2918_v4 = vld [vmem:[%s3804_s0 + $0x168] ss:$52 sps:$4 sm:$0xff]  }
  0xa4   :  { %1977 = vmatpush1.bf16.msra.mxu0 %v2804_v5  ;;  %1759 = vmatprep.subr.bf16.mxu1 %v2809_v6 }
  0xa5   :  { %1978 = vmatprep.subr.bf16.mxu0 %v2812_v7 }
  0xa7   :  { %1760 = vmatpush1.bf16.msra.mxu1 %v2807_v8  ;;  %v281_v8 = vlaneseq }
  0xa8   :  { %1979 = vmatpush1.bf16.msra.mxu0 %v2810_v9  ;;  %1761 = vmatprep.subr.bf16.mxu1 %v2820_v10 }
  0xa9   :  { %1980 = vmatprep.subr.bf16.mxu0 %v2824_v11  ;;  %v282_v10 = vshrl.u32 %v281_v8, 7 }
  0xab   :  { %1762 = vmatpush1.bf16.msra.mxu1 %v2818_v12 }
  0xac   :  { %1981 = vmatpush1.bf16.msra.mxu0 %v2822_v13  ;;  %1763 = vmatprep.subr.bf16.mxu1 %v2827_v14  ;;  %v283_v14 = vsub.s32 0, %v282_v10 }
  0xad   :  { %1982 = vmatprep.subr.bf16.mxu0 %v2830_v15 }
  0xaf   :  { %1764 = vmatpush1.bf16.msra.mxu1 %v2825_v16  ;;  %v279_v16 = vld [vmem:[%s3805_s2] sm:$0x3] }
  0xb0   :  { %1983 = vmatpush1.bf16.msra.mxu0 %v2828_v17  ;;  %1765 = vmatprep.subr.bf16.mxu1 %v2838_v18  ;;  %v287_v17 = vsub.s32 1, %v282_v10  ;;  %v3731_v18 = vrot.slane %v279_v16, %v283_v14 }
  0xb1   :  { %1984 = vmatprep.subr.bf16.mxu0 %v2842_v19 }
  0xb2   :  { %v3733_v19 = vrot.slane %v279_v16, %v287_v17 }
  0xb3   :  { %1766 = vmatpush1.bf16.msra.mxu1 %v2836_v20 }
  0xb4   :  { %1985 = vmatpush1.bf16.msra.mxu0 %v2840_v21  ;;  %1767 = vmatprep.subr.bf16.mxu1 %v2845_v22 }
  0xb5   :  { %1986 = vmatprep.subr.bf16.mxu0 %v2848_v23 }
  0xb7   :  { %1768 = vmatpush1.bf16.msra.mxu1 %v2843_v24 }
  0xb8   :  { %1987 = vmatpush1.bf16.msra.mxu0 %v2846_v25  ;;  %1769 = vmatprep.subr.bf16.mxu1 %v2856_v26 }
  0xb9   :  { %1988 = vmatprep.subr.bf16.mxu0 %v2860_v27 }
  0xbb   :  { %1770 = vmatpush1.bf16.msra.mxu1 %v2854_v28 }
  0xbc   :  { %1989 = vmatpush1.bf16.msra.mxu0 %v2858_v29  ;;  %1771 = vmatprep.subr.bf16.mxu1 %v2863_v30 }
  0xbd   :  { %1990 = vmatprep.subr.bf16.mxu0 %v2866_v31 }
  0xbf   :  { %1772 = vmatpush1.bf16.msra.mxu1 %v2861_v32 }
  0xc0   :  { %1991 = vmatpush1.bf16.msra.mxu0 %v2864_v33  ;;  %2402 = vmatprep.subr.bf16.mxu1 %v2875_v34 }
  0xc1   :  { %2033 = vmatprep.subr.bf16.mxu0 %v2875_v34 }
  0xc2   :  { %1774 = vmatmul.mubr.bf16.vlgmr.msra.gmra.mrb[0].mxu1 %v2867_v35 }
  0xc3   :  { %1993 = vmatmul.mubr.bf16.vlgmr.msra.gmra.mrb[0].mxu0 %v2870_v36  ;;  %2410 = vmatpush1.bf16.msra.mxu1 %v2873_v37 }
  0xc4   :  { %2034 = vmatpush1.bf16.msra.mxu0 %v2873_v37  ;;  %2403 = vmatprep.subr.bf16.mxu1 %v2878_v38 }
  0xc5   :  { %2035 = vmatprep.subr.bf16.mxu0 %v2878_v38  ;;  %1783 = vmatprep.mubr.bf16.mxu1 %v2879_v39 }
  0xc6   :  { %2002 = vmatprep.mubr.bf16.mxu0 %v2881_v40 }
  0xc7   :  { %2411 = vmatpush1.bf16.msra.mxu1 %v2876_v41 }
  0xc8   :  { %2036 = vmatpush1.bf16.msra.mxu0 %v2876_v41  ;;  %2404 = vmatprep.subr.bf16.mxu1 %v2887_v42 }
  0xc9   :  { %2037 = vmatprep.subr.bf16.mxu0 %v2887_v42 }
  0xca   :  { %1784 = vmatmul.mubr.bf16.gmra.mrb[4].mxu1 %v2883_v43 }
  0xcb   :  { %2003 = vmatmul.mubr.bf16.gmra.mrb[4].mxu0 %v2884_v44  ;;  %2412 = vmatpush1.bf16.msra.mxu1 %v2885_v45 }
  0xcc   :  { %2038 = vmatpush1.bf16.msra.mxu0 %v2885_v45  ;;  %2405 = vmatprep.subr.bf16.mxu1 %v2890_v46 }
  0xcd   :  { %2039 = vmatprep.subr.bf16.mxu0 %v2890_v46  ;;  %1793 = vmatprep.mubr.bf16.mxu1 %v2891_v47 }
  0xce   :  { %2012 = vmatprep.mubr.bf16.mxu0 %v2893_v48 }
  0xcf   :  { %2413 = vmatpush1.bf16.msra.mxu1 %v2888_v49 }
  0xd0   :  { %2040 = vmatpush1.bf16.msra.mxu0 %v2888_v49  ;;  %2406 = vmatprep.subr.bf16.mxu1 %v2899_v50 }
  0xd1   :  { %2041 = vmatprep.subr.bf16.mxu0 %v2899_v50 }
  0xd2   :  { %1794 = vmatmul.mubr.bf16.gmra.mrb[8].mxu1 %v2895_v51 }
  0xd3   :  { %2013 = vmatmul.mubr.bf16.gmra.mrb[8].mxu0 %v2896_v52  ;;  %2414 = vmatpush1.bf16.msra.mxu1 %v2897_v53 }
  0xd4   :  { %2042 = vmatpush1.bf16.msra.mxu0 %v2897_v53  ;;  %2407 = vmatprep.subr.bf16.mxu1 %v2902_v54 }
  0xd5   :  { %2043 = vmatprep.subr.bf16.mxu0 %v2902_v54  ;;  %1803 = vmatprep.mubr.bf16.mxu1 %v2903_v55 }
  0xd6   :  { %2022 = vmatprep.mubr.bf16.mxu0 %v2905_v56 }
  0xd7   :  { %2415 = vmatpush1.bf16.msra.mxu1 %v2900_v57 }
  0xd8   :  { %2044 = vmatpush1.bf16.msra.mxu0 %v2900_v57  ;;  %2408 = vmatprep.subr.bf16.mxu1 %v2911_v58 }
  0xd9   :  { %2045 = vmatprep.subr.bf16.mxu0 %v2911_v58 }
  0xda   :  { %1804 = vmatmul.mubr.bf16.gmra.mrb[12].mxu1 %v2907_v59 }
  0xdb   :  { %2023 = vmatmul.mubr.bf16.gmra.mrb[12].mxu0 %v2908_v60  ;;  %2416 = vmatpush1.bf16.msra.mxu1 %v2909_v61 }
  0xdc   :  { %2046 = vmatpush1.bf16.msra.mxu0 %v2909_v61  ;;  %2409 = vmatprep.subr.bf16.mxu1 %v2914_v62 }
  0xdd   :  { %2047 = vmatprep.subr.bf16.mxu0 %v2914_v62  ;;  %2065 = vmatprep.mubr.bf16.mxu0 %v2919_v0 }
  0xde   :  { %2085 = vmatprep.mubr.bf16.mxu1 %v2919_v0 }
  0xdf   :  { %2417 = vmatpush1.bf16.msra.mxu1 %v2912_v63 }
  0xe0   :  { %2048 = vmatpush1.bf16.msra.mxu0 %v2912_v63 }
  0xe2   :  { %2086 = vmatmul.mubr.bf16.vlgmr.msra.gmra.mrb[16].mxu1 %v2916_v2 }
  0xe3   :  { %2066 = vmatmul.mubr.bf16.vlgmr.msra.gmra.mrb[0].mxu0 %v2915_v1  ;;  %2095 = vmatprep.mubr.bf16.mxu1 %v2919_v0 }
  0xe4   :  { %2075 = vmatprep.mubr.bf16.mxu0 %v2919_v0 }
  0xea   :  { %2096 = vmatmul.mubr.bf16.gmra.mrb[20].mxu1 %v2918_v4 }
  0xeb   :  { %2076 = vmatmul.mubr.bf16.gmra.mrb[4].mxu0 %v2917_v3 }
 0x195   :  { %v1775_v5 = vpop.f32.mrb[0].mxu1 }
 0x196   :  { %v1777_v6 = vpop.f32.mrb[1].mxu1  ;;  %v2418_v52 = vadd.f32 %v1775_v5, %v3731_v18 }
 0x197   :  { %v1779_v7 = vpop.f32.mrb[2].mxu1  ;;  %v2420_v53 = vadd.f32 %v1777_v6, %v3733_v19 }
 0x198   :  { %v1781_v9 = vpop.f32.mrb[3].mxu1  ;;  %v2422_v56 = vadd.f32 %v1779_v7, %v3731_v18 }
 0x199   :  { %v2424_v61 = vadd.f32 %v1781_v9, %v3733_v19 }
 0x19d   :  { %v3720_v11 = vpop.f32.mrb[4].mxu1 }
 0x19e   :  { %v3722_v12 = vpop.f32.mrb[5].mxu1 }
 0x19f   :  { %v3724_v13 = vpop.f32.mrb[6].mxu1 }
 0x1a0   :  { %v3726_v15 = vpop.f32.mrb[7].mxu1 }
 0x1a5   :  { %v1795_v20 = vpop.f32.mrb[8].mxu1 }
 0x1a6   :  { %v2014_v21 = vpop.f32.mrb[8].mxu0  ;;  %v2434_v22 = vadd.f32 %v1795_v20, %v3731_v18  ;;  %v1797_v23 = vpop.f32.mrb[9].mxu1 }
 0x1a7   :  { %v2016_v24 = vpop.f32.mrb[9].mxu0  ;;  %v2437_v25 = vadd.f32 %v1797_v23, %v3733_v19  ;;  %v1799_v26 = vpop.f32.mrb[10].mxu1  ;;  %v2428_v23 = vadd.f32 %v3722_v12, %v3733_v19  ;;  %v2432_v12 = vadd.f32 %v3726_v15, %v3733_v19 }
 0x1a8   :  { %v2018_v27 = vpop.f32.mrb[10].mxu0  ;;  %v2435_v28 = vadd.f32 %v2434_v22, %v2014_v21  ;;  %v2440_v29 = vadd.f32 %v1799_v26, %v3731_v18  ;;  %v1801_v30 = vpop.f32.mrb[11].mxu1  ;;  %v2426_v22 = vadd.f32 %v3720_v11, %v3731_v18 }
 0x1a9   :  { %v2020_v31 = vpop.f32.mrb[11].mxu0  ;;  %v2438_v32 = vadd.f32 %v2437_v25, %v2016_v24  ;;  %v2443_v33 = vadd.f32 %v1801_v30, %v3733_v19  ;;  %v2430_v25 = vadd.f32 %v3724_v13, %v3731_v18 }
 0x1aa   :  { %v2441_v34 = vadd.f32 %v2440_v29, %v2018_v27 }
 0x1ab   :  { %v2444_v35 = vadd.f32 %v2443_v33, %v2020_v31 }
 0x1ad   :  { %v1805_v36 = vpop.f32.mrb[12].mxu1 }
 0x1ae   :  { %v2024_v37 = vpop.f32.mrb[12].mxu0  ;;  %v2446_v38 = vadd.f32 %v1805_v36, %v3731_v18  ;;  %v1807_v39 = vpop.f32.mrb[13].mxu1 }
 0x1af   :  { %v2026_v40 = vpop.f32.mrb[13].mxu0  ;;  %v2449_v41 = vadd.f32 %v1807_v39, %v3733_v19  ;;  %v1809_v42 = vpop.f32.mrb[14].mxu1 }
 0x1b0   :  { %v2028_v43 = vpop.f32.mrb[14].mxu0  ;;  %v2447_v44 = vadd.f32 %v2446_v38, %v2024_v37  ;;  %v2452_v45 = vadd.f32 %v1809_v42, %v3731_v18  ;;  %v1811_v46 = vpop.f32.mrb[15].mxu1 }
 0x1b1   :  { %v2030_v47 = vpop.f32.mrb[15].mxu0  ;;  %v2450_v48 = vadd.f32 %v2449_v41, %v2026_v40  ;;  %v2455_v49 = vadd.f32 %v1811_v46, %v3733_v19 }
 0x1b2   :  { %v2453_v50 = vadd.f32 %v2452_v45, %v2028_v43 }
 0x1b3   :  { %v2456_v51 = vadd.f32 %v2455_v49, %v2030_v47 }
 0x1b5   :  { %v2087_v55 = vpop.f32.mrb[16].mxu1 }
 0x1b6   :  { %v2067_v54 = vpop.f32.mrb[0].mxu0  ;;  %v2436_v58 = vadd.f32 %v2435_v28, %v2087_v55  ;;  %v2089_v60 = vpop.f32.mrb[17].mxu1 }
 0x1b7   :  { %v2419_v57 = vadd.f32 %v2418_v52, %v2067_v54  ;;  %v2069_v59 = vpop.f32.mrb[1].mxu0  ;;  %v2439_v63 = vadd.f32 %v2438_v32, %v2089_v60  ;;  %v2091_v1 = vpop.f32.mrb[18].mxu1 }
 0x1b8   :  { %v2421_v62 = vadd.f32 %v2420_v53, %v2069_v59  ;;  %v2071_v0 = vpop.f32.mrb[2].mxu0  ;;  %v2114_v3 = vmax.f32 %v2436_v58, 0.0  ;;  %v2442_v5 = vadd.f32 %v2441_v34, %v2091_v1  ;;  %v2093_v6 = vpop.f32.mrb[19].mxu1 }
 0x1b9   :  { %v2106_v2 = vmax.f32 %v2419_v57, 0.0  ;;  %v2423_v4 = vadd.f32 %v2422_v56, %v2071_v0  ;;  %v2073_v8 = vpop.f32.mrb[3].mxu0  ;;  %v2115_v14 = vmax.f32 %v2439_v63, 0.0  ;;  %v2445_v7 = vadd.f32 %v2444_v35, %v2093_v6 }
 0x1ba   :  { %v2107_v10 = vmax.f32 %v2421_v62, 0.0  ;;  %v2425_v16 = vadd.f32 %v2424_v61, %v2073_v8  ;;  %2130 = vst [vmem:[%s3806_s3 + $0x40] sm:$0xff] %v2114_v3  ;;  %v2116_v17 = vmax.f32 %v2442_v5, 0.0 }
 0x1bb   :  { %2122 = vst [vmem:[%s3806_s3] sm:$0xff] %v2106_v2  ;;  %v2108_v9 = vmax.f32 %v2423_v4, 0.0  ;;  %2131 = vst [vmem:[%s3806_s3 + $0x48] sm:$0xff] %v2115_v14  ;;  %v2117_v21 = vmax.f32 %v2445_v7, 0.0 }
 0x1bc   :  { %2123 = vst [vmem:[%s3806_s3 + $0x8] sm:$0xff] %v2107_v10  ;;  %v2109_v20 = vmax.f32 %v2425_v16, 0.0  ;;  %2132 = vst [vmem:[%s3806_s3 + $0x50] sm:$0xff] %v2116_v17 }
 0x1bd   :  { %2124 = vst [vmem:[%s3806_s3 + $0x10] sm:$0xff] %v2108_v9  ;;  %2133 = vst [vmem:[%s3806_s3 + $0x58] sm:$0xff] %v2117_v21  ;;  %v2097_v24 = vpop.f32.mrb[20].mxu1 }
 0x1be   :  { %2125 = vst [vmem:[%s3806_s3 + $0x18] sm:$0xff] %v2109_v20  ;;  %v2077_v11 = vpop.f32.mrb[4].mxu0  ;;  %v2448_v27 = vadd.f32 %v2447_v44, %v2097_v24  ;;  %v2099_v29 = vpop.f32.mrb[21].mxu1 }
 0x1bf   :  { %v2427_v26 = vadd.f32 %v2426_v22, %v2077_v11  ;;  %v2079_v28 = vpop.f32.mrb[5].mxu0  ;;  %v2451_v31 = vadd.f32 %v2450_v48, %v2099_v29  ;;  %v2101_v33 = vpop.f32.mrb[22].mxu1 }
 0x1c0   :  { %v2429_v30 = vadd.f32 %v2428_v23, %v2079_v28  ;;  %v2081_v32 = vpop.f32.mrb[6].mxu0  ;;  %v2118_v35 = vmax.f32 %v2448_v27, 0.0  ;;  %v2454_v37 = vadd.f32 %v2453_v50, %v2101_v33  ;;  %v2103_v39 = vpop.f32.mrb[23].mxu1 }
 0x1c1   :  { %v2110_v34 = vmax.f32 %v2427_v26, 0.0  ;;  %v2431_v36 = vadd.f32 %v2430_v25, %v2081_v32  ;;  %v2083_v38 = vpop.f32.mrb[7].mxu0  ;;  %v2119_v41 = vmax.f32 %v2451_v31, 0.0  ;;  %v2457_v18 = vadd.f32 %v2456_v51, %v2103_v39 }
 0x1c2   :  { %v2111_v40 = vmax.f32 %v2429_v30, 0.0  ;;  %v2433_v13 = vadd.f32 %v2432_v12, %v2083_v38  ;;  %2134 = vst [vmem:[%s3806_s3 + $0x60] sm:$0xff] %v2118_v35  ;;  %v2120_v19 = vmax.f32 %v2454_v37, 0.0 }
 0x1c3   :  { %2126 = vst [vmem:[%s3806_s3 + $0x20] sm:$0xff] %v2110_v34  ;;  %v2112_v15 = vmax.f32 %v2431_v36, 0.0  ;;  %2135 = vst [vmem:[%s3806_s3 + $0x68] sm:$0xff] %v2119_v41  ;;  %v2121_v43 = vmax.f32 %v2457_v18, 0.0 }
 0x1c4   :  { %2127 = vst [vmem:[%s3806_s3 + $0x28] sm:$0xff] %v2111_v40  ;;  %v2113_v42 = vmax.f32 %v2433_v13, 0.0  ;;  %2136 = vst [vmem:[%s3806_s3 + $0x70] sm:$0xff] %v2120_v19 }
 0x1c5   :  { %2128 = vst [vmem:[%s3806_s3 + $0x30] sm:$0xff] %v2112_v15  ;;  %2137 = vst [vmem:[%s3806_s3 + $0x78] sm:$0xff] %v2121_v43 }
 0x1c6   :  { %2129 = vst [vmem:[%s3806_s3 + $0x38] sm:$0xff] %v2113_v42 }

// kernel: autoencoder_forward.10
= control target key start
LH: loop header
LB: loop body
LE: loop exit
PB: predicated region body
PF: predicated region fallthrough
CT: control target
= control target key end

     0   :  { %s142_s0 = inlined_call_operand.vmem [shape: f32[9,8,256], index: 0, kind: input, shape index: {}]   ;;  %s143_s1 = inlined_call_operand.vmem [shape: f32[8,256], index: 1, kind: output, shape index: {}]  }
   0x1   :  { %v8_v0 = vld [vmem:[%s142_s0] sm:$0xff]  ;;  %v56_v1 = vld [vmem:[%s142_s0 + $0x10] sm:$0xff]  ;;  %v9_v6 = vld [vmem:[%s142_s0 + $0x8] sm:$0xff] }
   0x2   :  { %v58_v2 = vld [vmem:[%s142_s0 + $0x20] sm:$0xff]  ;;  %v13_v3 = vmax.f32 %v8_v0, %v56_v1  ;;  %v60_v4 = vld [vmem:[%s142_s0 + $0x30] sm:$0xff]  ;;  %v57_v7 = vld [vmem:[%s142_s0 + $0x18] sm:$0xff] }
   0x3   :  { %v59_v8 = vld [vmem:[%s142_s0 + $0x28] sm:$0xff]  ;;  %v62_v9 = vld [vmem:[%s142_s0 + $0x40] sm:$0xff]  ;;  %v14_v10 = vmax.f32 %v9_v6, %v57_v7  ;;  %v61_v12 = vld [vmem:[%s142_s0 + $0x38] sm:$0xff] }
   0x4   :  { %v18_v5 = vmax.f32 %v13_v3, %v58_v2  ;;  %v64_v13 = vld [vmem:[%s142_s0 + $0x50] sm:$0xff]  ;;  %v63_v16 = vld [vmem:[%s142_s0 + $0x48] sm:$0xff]  ;;  %v66_v17 = vld [vmem:[%s142_s0 + $0x60] sm:$0xff] }
   0x5   :  { %v19_v14 = vmax.f32 %v14_v10, %v59_v8  ;;  %v65_v20 = vld [vmem:[%s142_s0 + $0x58] sm:$0xff]  ;;  %v68_v21 = vld [vmem:[%s142_s0 + $0x70] sm:$0xff]  ;;  %v67_v24 = vld [vmem:[%s142_s0 + $0x68] sm:$0xff] }
   0x6   :  { %v23_v11 = vmax.f32 %v18_v5, %v60_v4  ;;  %v70_v25 = vld [vmem:[%s142_s0 + $0x80] sm:$0xff]  ;;  %v69_v28 = vld [vmem:[%s142_s0 + $0x78] sm:$0xff]  ;;  %v71_v31 = vld [vmem:[%s142_s0 + $0x88] sm:$0xff] }
   0x7   :  { %v24_v18 = vmax.f32 %v19_v14, %v61_v12 }
   0x8   :  { %v28_v15 = vmax.f32 %v23_v11, %v62_v9 }
   0x9   :  { %v29_v22 = vmax.f32 %v24_v18, %v63_v16 }
   0xa   :  { %v33_v19 = vmax.f32 %v28_v15, %v64_v13 }
   0xb   :  { %v34_v26 = vmax.f32 %v29_v22, %v65_v20 }
   0xc   :  { %v38_v23 = vmax.f32 %v33_v19, %v66_v17 }
   0xd   :  { %v39_v29 = vmax.f32 %v34_v26, %v67_v24 }
   0xe   :  { %v43_v27 = vmax.f32 %v38_v23, %v68_v21 }
   0xf   :  { %v44_v32 = vmax.f32 %v39_v29, %v69_v28 }
  0x10   :  { %v48_v30 = vmax.f32 %v43_v27, %v70_v25 }
  0x11   :  { %v49_v33 = vmax.f32 %v44_v32, %v71_v31 }
  0x12   :  { %50 = vst [vmem:[%s143_s1] sm:$0xff] %v48_v30 }
  0x13   :  { %51 = vst [vmem:[%s143_s1 + $0x8] sm:$0xff] %v49_v33 }

// kernel: autoencoder_forward.11
= control target key start
LH: loop header
LB: loop body
LE: loop exit
PB: predicated region body
PF: predicated region fallthrough
CT: control target
= control target key end

     0   :  { %s5165_s1 = inlined_call_operand.vmem [shape: bf16[512,1024], index: 1, kind: input, shape index: {}]   ;;  %s5166_s0 = inlined_call_operand.vmem [shape: bf16[128,512], index: 0, kind: input, shape index: {}]   ;;  %s5167_s2 = inlined_call_operand.vmem [shape: f32[1,1024], index: 2, kind: input, shape index: {}]   ;;  %s5168_s3 = inlined_call_operand.vmem [shape: f32[128,1024], index: 3, kind: output, shape index: {}]  }
   0x1   :  { %v46_v0 = vld [vmem:[%s5165_s1] sm:$0xff]  ;;  %v47_v2 = vld [vmem:[%s5165_s1 + $0x8] sm:$0xff] }
   0x2   :  { %v50_v1 = vld [vmem:[%s5165_s1 + $0x20] sm:$0xff]  ;;  %v51_v4 = vld [vmem:[%s5165_s1 + $0x28] sm:$0xff] }
   0x3   :  { %v2981_v3 = vcombine.high %v46_v0, %v50_v1  ;;  %v2980_v5 = vcombine.low %v46_v0, %v50_v1  ;;  %v54_v6 = vld [vmem:[%s5165_s1 + $0x40] sm:$0xff]  ;;  %v2983_v8 = vcombine.high %v47_v2, %v51_v4  ;;  %v2982_v9 = vcombine.low %v47_v2, %v51_v4  ;;  %v55_v11 = vld [vmem:[%s5165_s1 + $0x48] sm:$0xff] }
   0x4   :  { %v58_v7 = vld [vmem:[%s5165_s1 + $0x60] sm:$0xff]  ;;  %v59_v12 = vld [vmem:[%s5165_s1 + $0x68] sm:$0xff] }
   0x5   :  { %v2989_v10 = vcombine.high %v54_v6, %v58_v7  ;;  %v62_v13 = vld [vmem:[%s5165_s1 + $0x80] sm:$0xff]  ;;  %1784 = vmatprep.subr.bf16.mxu0 %v2981_v3  ;;  %v2991_v14 = vcombine.high %v55_v11, %v59_v12  ;;  %v63_v16 = vld [vmem:[%s5165_s1 + $0x88] sm:$0xff]  ;;  %2010 = vmatprep.subr.bf16.mxu1 %v2983_v8  ;;  %v2988_v18 = vcombine.low %v54_v6, %v58_v7 }
   0x6   :  { %v66_v15 = vld [vmem:[%s5165_s1 + $0xa0] sm:$0xff]  ;;  %v67_v17 = vld [vmem:[%s5165_s1 + $0xa8] sm:$0xff]  ;;  %1785 = vmatpush1.bf16.msra.mxu0 %v2980_v5  ;;  %2011 = vmatpush1.bf16.msra.mxu1 %v2982_v9  ;;  %v2990_v19 = vcombine.low %v55_v11, %v59_v12 }
   0x7   :  { %1786 = vmatprep.subr.bf16.mxu0 %v2989_v10  ;;  %v2997_v20 = vcombine.high %v62_v13, %v66_v15  ;;  %2012 = vmatprep.subr.bf16.mxu1 %v2991_v14  ;;  %v2999_v21 = vcombine.high %v63_v16, %v67_v17  ;;  %v70_v22 = vld [vmem:[%s5165_s1 + $0xc0] sm:$0xff]  ;;  %v71_v24 = vld [vmem:[%s5165_s1 + $0xc8] sm:$0xff]  ;;  %v2996_v26 = vcombine.low %v62_v13, %v66_v15 }
   0x8   :  { %v74_v23 = vld [vmem:[%s5165_s1 + $0xe0] sm:$0xff]  ;;  %v75_v25 = vld [vmem:[%s5165_s1 + $0xe8] sm:$0xff]  ;;  %v2998_v27 = vcombine.low %v63_v16, %v67_v17 }
   0x9   :  { %v3005_v28 = vcombine.high %v70_v22, %v74_v23  ;;  %v3007_v29 = vcombine.high %v71_v24, %v75_v25  ;;  %v78_v30 = vld [vmem:[%s5165_s1 + $0x100] sm:$0xff]  ;;  %v79_v32 = vld [vmem:[%s5165_s1 + $0x108] sm:$0xff]  ;;  %v3004_v34 = vcombine.low %v70_v22, %v74_v23  ;;  %v3006_v35 = vcombine.low %v71_v24, %v75_v25 }
   0xa   :  { %1787 = vmatpush1.bf16.msra.mxu0 %v2988_v18  ;;  %2013 = vmatpush1.bf16.msra.mxu1 %v2990_v19  ;;  %v82_v31 = vld [vmem:[%s5165_s1 + $0x120] sm:$0xff]  ;;  %v83_v33 = vld [vmem:[%s5165_s1 + $0x128] sm:$0xff] }
   0xb   :  { %1788 = vmatprep.subr.bf16.mxu0 %v2997_v20  ;;  %2014 = vmatprep.subr.bf16.mxu1 %v2999_v21  ;;  %v3013_v36 = vcombine.high %v78_v30, %v82_v31  ;;  %v3015_v37 = vcombine.high %v79_v32, %v83_v33  ;;  %v86_v38 = vld [vmem:[%s5165_s1 + $0x140] sm:$0xff]  ;;  %v87_v40 = vld [vmem:[%s5165_s1 + $0x148] sm:$0xff]  ;;  %v3012_v42 = vcombine.low %v78_v30, %v82_v31 }
   0xc   :  { %v90_v39 = vld [vmem:[%s5165_s1 + $0x160] sm:$0xff]  ;;  %v91_v41 = vld [vmem:[%s5165_s1 + $0x168] sm:$0xff]  ;;  %v3014_v43 = vcombine.low %v79_v32, %v83_v33 }
   0xd   :  { %v3021_v44 = vcombine.high %v86_v38, %v90_v39  ;;  %v3023_v45 = vcombine.high %v87_v40, %v91_v41  ;;  %v94_v46 = vld [vmem:[%s5165_s1 + $0x180] sm:$0xff]  ;;  %v95_v48 = vld [vmem:[%s5165_s1 + $0x188] sm:$0xff]  ;;  %v3020_v50 = vcombine.low %v86_v38, %v90_v39  ;;  %v3022_v51 = vcombine.low %v87_v40, %v91_v41 }
   0xe   :  { %1789 = vmatpush1.bf16.msra.mxu0 %v2996_v26  ;;  %2015 = vmatpush1.bf16.msra.mxu1 %v2998_v27  ;;  %v98_v47 = vld [vmem:[%s5165_s1 + $0x1a0] sm:$0xff]  ;;  %v99_v49 = vld [vmem:[%s5165_s1 + $0x1a8] sm:$0xff] }
   0xf   :  { %1790 = vmatprep.subr.bf16.mxu0 %v3005_v28  ;;  %2016 = vmatprep.subr.bf16.mxu1 %v3007_v29  ;;  %v3029_v52 = vcombine.high %v94_v46, %v98_v47  ;;  %v3031_v53 = vcombine.high %v95_v48, %v99_v49  ;;  %v102_v54 = vld [vmem:[%s5165_s1 + $0x1c0] sm:$0xff]  ;;  %v103_v57 = vld [vmem:[%s5165_s1 + $0x1c8] sm:$0xff]  ;;  %v3028_v59 = vcombine.low %v94_v46, %v98_v47 }
  0x10   :  { %v106_v55 = vld [vmem:[%s5165_s1 + $0x1e0] sm:$0xff]  ;;  %v107_v58 = vld [vmem:[%s5165_s1 + $0x1e8] sm:$0xff]  ;;  %v3030_v60 = vcombine.low %v95_v48, %v99_v49 }
  0x11   :  { %v3492_v56 = vld [vmem:[%s5166_s0 + $0x4] ss:$16 sps:$4 sm:$0xff]   ;;  %v3037_v61 = vcombine.high %v102_v54, %v106_v55  ;;  %v3039_v62 = vcombine.high %v103_v57, %v107_v58  ;;  %v111_v1 = vld [vmem:[%s5165_s1 + $0x208] sm:$0xff]  ;;  %v3036_v3 = vcombine.low %v102_v54, %v106_v55  ;;  %v3038_v4 = vcombine.low %v103_v57, %v107_v58 }
  0x12   :  { %1791 = vmatpush1.bf16.msra.mxu0 %v3004_v34  ;;  %2017 = vmatpush1.bf16.msra.mxu1 %v3006_v35  ;;  %v110_v63 = vld [vmem:[%s5165_s1 + $0x200] sm:$0xff]  ;;  %v115_v2 = vld [vmem:[%s5165_s1 + $0x228] sm:$0xff] }
  0x13   :  { %1792 = vmatprep.subr.bf16.mxu0 %v3013_v36  ;;  %2018 = vmatprep.subr.bf16.mxu1 %v3015_v37  ;;  %v114_v0 = vld [vmem:[%s5165_s1 + $0x220] sm:$0xff]  ;;  %v3047_v6 = vcombine.high %v111_v1, %v115_v2  ;;  %v119_v9 = vld [vmem:[%s5165_s1 + $0x248] sm:$0xff]  ;;  %v3046_v12 = vcombine.low %v111_v1, %v115_v2 }
  0x14   :  { %1816 = vmatprep.mubr.bf16.mxu0 %v3492_v56  ;;  %2042 = vmatprep.mubr.bf16.mxu1 %v3492_v56  ;;  %v3045_v5 = vcombine.high %v110_v63, %v114_v0  ;;  %v118_v7 = vld [vmem:[%s5165_s1 + $0x240] sm:$0xff]  ;;  %v123_v10 = vld [vmem:[%s5165_s1 + $0x268] sm:$0xff]  ;;  %v3044_v11 = vcombine.low %v110_v63, %v114_v0 }
  0x15   :  { %v122_v8 = vld [vmem:[%s5165_s1 + $0x260] sm:$0xff]  ;;  %v3055_v14 = vcombine.high %v119_v9, %v123_v10  ;;  %v127_v17 = vld [vmem:[%s5165_s1 + $0x288] sm:$0xff]  ;;  %v3054_v20 = vcombine.low %v119_v9, %v123_v10 }
  0x16   :  { %1793 = vmatpush1.bf16.msra.mxu0 %v3012_v42  ;;  %2019 = vmatpush1.bf16.msra.mxu1 %v3014_v43  ;;  %v3053_v13 = vcombine.high %v118_v7, %v122_v8  ;;  %v126_v15 = vld [vmem:[%s5165_s1 + $0x280] sm:$0xff]  ;;  %v131_v18 = vld [vmem:[%s5165_s1 + $0x2a8] sm:$0xff]  ;;  %v3052_v19 = vcombine.low %v118_v7, %v122_v8 }
  0x17   :  { %1794 = vmatprep.subr.bf16.mxu0 %v3021_v44  ;;  %2020 = vmatprep.subr.bf16.mxu1 %v3023_v45  ;;  %v130_v16 = vld [vmem:[%s5165_s1 + $0x2a0] sm:$0xff]  ;;  %v3063_v22 = vcombine.high %v127_v17, %v131_v18  ;;  %v135_v25 = vld [vmem:[%s5165_s1 + $0x2c8] sm:$0xff]  ;;  %v3062_v28 = vcombine.low %v127_v17, %v131_v18 }
  0x18   :  { %v3061_v21 = vcombine.high %v126_v15, %v130_v16  ;;  %v134_v23 = vld [vmem:[%s5165_s1 + $0x2c0] sm:$0xff]  ;;  %v139_v26 = vld [vmem:[%s5165_s1 + $0x2e8] sm:$0xff]  ;;  %v3060_v27 = vcombine.low %v126_v15, %v130_v16 }
  0x19   :  { %v138_v24 = vld [vmem:[%s5165_s1 + $0x2e0] sm:$0xff]  ;;  %v3071_v30 = vcombine.high %v135_v25, %v139_v26  ;;  %v143_v33 = vld [vmem:[%s5165_s1 + $0x308] sm:$0xff]  ;;  %v3070_v36 = vcombine.low %v135_v25, %v139_v26 }
  0x1a   :  { %1795 = vmatpush1.bf16.msra.mxu0 %v3020_v50  ;;  %2021 = vmatpush1.bf16.msra.mxu1 %v3022_v51  ;;  %v3069_v29 = vcombine.high %v134_v23, %v138_v24  ;;  %v142_v31 = vld [vmem:[%s5165_s1 + $0x300] sm:$0xff]  ;;  %v147_v34 = vld [vmem:[%s5165_s1 + $0x328] sm:$0xff]  ;;  %v3068_v35 = vcombine.low %v134_v23, %v138_v24 }
  0x1b   :  { %1796 = vmatprep.subr.bf16.mxu0 %v3029_v52  ;;  %2022 = vmatprep.subr.bf16.mxu1 %v3031_v53  ;;  %v146_v32 = vld [vmem:[%s5165_s1 + $0x320] sm:$0xff]  ;;  %v3079_v38 = vcombine.high %v143_v33, %v147_v34  ;;  %v151_v41 = vld [vmem:[%s5165_s1 + $0x348] sm:$0xff]  ;;  %v3078_v44 = vcombine.low %v143_v33, %v147_v34 }
  0x1c   :  { %v3077_v37 = vcombine.high %v142_v31, %v146_v32  ;;  %v150_v39 = vld [vmem:[%s5165_s1 + $0x340] sm:$0xff]  ;;  %v155_v42 = vld [vmem:[%s5165_s1 + $0x368] sm:$0xff]  ;;  %v3076_v43 = vcombine.low %v142_v31, %v146_v32 }
  0x1d   :  { %v154_v40 = vld [vmem:[%s5165_s1 + $0x360] sm:$0xff]  ;;  %v3087_v46 = vcombine.high %v151_v41, %v155_v42  ;;  %v159_v49 = vld [vmem:[%s5165_s1 + $0x388] sm:$0xff]  ;;  %v3086_v52 = vcombine.low %v151_v41, %v155_v42 }
  0x1e   :  { %1797 = vmatpush1.bf16.msra.mxu0 %v3028_v59  ;;  %2023 = vmatpush1.bf16.msra.mxu1 %v3030_v60  ;;  %v3085_v45 = vcombine.high %v150_v39, %v154_v40  ;;  %v158_v47 = vld [vmem:[%s5165_s1 + $0x380] sm:$0xff]  ;;  %v163_v50 = vld [vmem:[%s5165_s1 + $0x3a8] sm:$0xff]  ;;  %v3084_v51 = vcombine.low %v150_v39, %v154_v40 }
  0x1f   :  { %1798 = vmatprep.subr.bf16.mxu0 %v3037_v61  ;;  %2024 = vmatprep.subr.bf16.mxu1 %v3039_v62  ;;  %v162_v48 = vld [vmem:[%s5165_s1 + $0x3a0] sm:$0xff]  ;;  %v3095_v54 = vcombine.high %v159_v49, %v163_v50  ;;  %v167_v57 = vld [vmem:[%s5165_s1 + $0x3c8] sm:$0xff]  ;;  %v3094_v60 = vcombine.low %v159_v49, %v163_v50 }
  0x20   :  { %v3093_v53 = vcombine.high %v158_v47, %v162_v48  ;;  %v166_v55 = vld [vmem:[%s5165_s1 + $0x3c0] sm:$0xff]  ;;  %v171_v58 = vld [vmem:[%s5165_s1 + $0x3e8] sm:$0xff]  ;;  %v3092_v59 = vcombine.low %v158_v47, %v162_v48 }
  0x21   :  { %v170_v56 = vld [vmem:[%s5165_s1 + $0x3e0] sm:$0xff]  ;;  %v3103_v62 = vcombine.high %v167_v57, %v171_v58  ;;  %v175_v1 = vld [vmem:[%s5165_s1 + $0x408] sm:$0xff] }
  0x22   :  { %1799 = vmatpush1.bf16.msra.mxu0 %v3036_v3  ;;  %2025 = vmatpush1.bf16.msra.mxu1 %v3038_v4  ;;  %v3101_v61 = vcombine.high %v166_v55, %v170_v56  ;;  %v174_v63 = vld [vmem:[%s5165_s1 + $0x400] sm:$0xff]  ;;  %v179_v2 = vld [vmem:[%s5165_s1 + $0x428] sm:$0xff]  ;;  %v3100_v3 = vcombine.low %v166_v55, %v170_v56  ;;  %v3102_v4 = vcombine.low %v167_v57, %v171_v58 }
  0x23   :  { %1800 = vmatprep.subr.bf16.mxu0 %v3045_v5  ;;  %2026 = vmatprep.subr.bf16.mxu1 %v3047_v6  ;;  %v178_v0 = vld [vmem:[%s5165_s1 + $0x420] sm:$0xff]  ;;  %v3111_v6 = vcombine.high %v175_v1, %v179_v2  ;;  %v183_v10 = vld [vmem:[%s5165_s1 + $0x448] sm:$0xff] }
  0x24   :  { %v3109_v5 = vcombine.high %v174_v63, %v178_v0  ;;  %v182_v7 = vld [vmem:[%s5165_s1 + $0x440] sm:$0xff]  ;;  %v219_v47 = vld [vmem:[%s5165_s1 + $0x568] sm:$0xff] }
  0x25   :  { %v186_v8 = vld [vmem:[%s5165_s1 + $0x460] sm:$0xff]  ;;  %v223_v55 = vld [vmem:[%s5165_s1 + $0x588] sm:$0xff] }
  0x26   :  { %1801 = vmatpush1.bf16.msra.mxu0 %v3044_v11  ;;  %2027 = vmatpush1.bf16.msra.mxu1 %v3046_v12  ;;  %v3777_v9 = vld [vmem:[%s5166_s0] ss:$16 sps:$4 sm:$0xff]   ;;  %v187_v11 = vld [vmem:[%s5165_s1 + $0x468] sm:$0xff]  ;;  %v3108_v12 = vcombine.low %v174_v63, %v178_v0  ;;  %v3788_v16 = vld [vmem:[%s5166_s0 + $0x24] ss:$16 sps:$4 sm:$0xff]  }
  0x27   :  { %1802 = vmatprep.subr.bf16.mxu0 %v3053_v13  ;;  %2028 = vmatprep.subr.bf16.mxu1 %v3055_v14  ;;  %v3110_v13 = vcombine.low %v175_v1, %v179_v2  ;;  %v3117_v14 = vcombine.high %v182_v7, %v186_v8  ;;  %v3119_v15 = vcombine.high %v183_v10, %v187_v11  ;;  %v190_v17 = vld [vmem:[%s5165_s1 + $0x480] sm:$0xff]  ;;  %v227_v56 = vld [vmem:[%s5165_s1 + $0x5a8] sm:$0xff] }
  0x28   :  { %v194_v18 = vld [vmem:[%s5165_s1 + $0x4a0] sm:$0xff]  ;;  %v231_v0 = vld [vmem:[%s5165_s1 + $0x5c8] sm:$0xff] }
  0x29   :  { %v3125_v23 = vcombine.high %v190_v17, %v194_v18  ;;  %v198_v25 = vld [vmem:[%s5165_s1 + $0x4c0] sm:$0xff]  ;;  %v235_v1 = vld [vmem:[%s5165_s1 + $0x5e8] sm:$0xff] }
  0x2a   :  { %1803 = vmatpush1.bf16.msra.mxu0 %v3052_v19  ;;  %2029 = vmatpush1.bf16.msra.mxu1 %v3054_v20  ;;  %v191_v19 = vld [vmem:[%s5165_s1 + $0x488] sm:$0xff]  ;;  %v202_v26 = vld [vmem:[%s5165_s1 + $0x4e0] sm:$0xff] }
  0x2b   :  { %1804 = vmatprep.subr.bf16.mxu0 %v3061_v21  ;;  %2030 = vmatprep.subr.bf16.mxu1 %v3063_v22  ;;  %v195_v20 = vld [vmem:[%s5165_s1 + $0x4a8] sm:$0xff]  ;;  %v3116_v21 = vcombine.low %v182_v7, %v186_v8  ;;  %v3118_v22 = vcombine.low %v183_v10, %v187_v11  ;;  %v3133_v32 = vcombine.high %v198_v25, %v202_v26  ;;  %v3826_v34 = vld [vmem:[%s5166_s0 + $0x44] ss:$16 sps:$4 sm:$0xff]   ;;  %v3891_v63 = vld [vmem:[%s5166_s0 + $0x60] ss:$16 sps:$4 sm:$0xff]  }
  0x2c   :  { %v3127_v24 = vcombine.high %v191_v19, %v195_v20  ;;  %v3126_v31 = vcombine.low %v191_v19, %v195_v20  ;;  %v3132_v39 = vcombine.low %v198_v25, %v202_v26  ;;  %v238_v7 = vld [vmem:[%s5165_s1 + $0x600] sm:$0xff]  ;;  %v239_v10 = vld [vmem:[%s5165_s1 + $0x608] sm:$0xff] }
  0x2d   :  { %v242_v8 = vld [vmem:[%s5165_s1 + $0x620] sm:$0xff]  ;;  %v243_v11 = vld [vmem:[%s5165_s1 + $0x628] sm:$0xff] }
  0x2e   :  { %1805 = vmatpush1.bf16.msra.mxu0 %v3060_v27  ;;  %2031 = vmatpush1.bf16.msra.mxu1 %v3062_v28  ;;  %v3815_v27 = vld [vmem:[%s5166_s0 + $0x20] ss:$16 sps:$4 sm:$0xff]   ;;  %v199_v28 = vld [vmem:[%s5165_s1 + $0x4c8] sm:$0xff]  ;;  %v3940_v26 = vld [vmem:[%s5166_s0 + $0xa4] ss:$16 sps:$4 sm:$0xff]  }
  0x2f   :  { %1806 = vmatprep.subr.bf16.mxu0 %v3069_v29  ;;  %2032 = vmatprep.subr.bf16.mxu1 %v3071_v30  ;;  %v203_v29 = vld [vmem:[%s5165_s1 + $0x4e8] sm:$0xff]  ;;  %v3124_v30 = vcombine.low %v190_v17, %v194_v18  ;;  %v246_v17 = vld [vmem:[%s5165_s1 + $0x640] sm:$0xff] }
  0x30   :  { %v3135_v33 = vcombine.high %v199_v28, %v203_v29  ;;  %v3134_v40 = vcombine.low %v199_v28, %v203_v29  ;;  %v250_v18 = vld [vmem:[%s5165_s1 + $0x660] sm:$0xff]  ;;  %v247_v20 = vld [vmem:[%s5165_s1 + $0x648] sm:$0xff] }
  0x31   :  { %v3929_v19 = vld [vmem:[%s5166_s0 + $0x80] ss:$16 sps:$4 sm:$0xff]  }
  0x32   :  { %1807 = vmatpush1.bf16.msra.mxu0 %v3068_v35  ;;  %2033 = vmatpush1.bf16.msra.mxu1 %v3070_v36  ;;  %v206_v35 = vld [vmem:[%s5165_s1 + $0x500] sm:$0xff] }
  0x33   :  { %1808 = vmatprep.subr.bf16.mxu0 %v3077_v37  ;;  %2034 = vmatprep.subr.bf16.mxu1 %v3079_v38  ;;  %v210_v36 = vld [vmem:[%s5165_s1 + $0x520] sm:$0xff]  ;;  %v207_v37 = vld [vmem:[%s5165_s1 + $0x508] sm:$0xff] }
  0x34   :  { %v211_v38 = vld [vmem:[%s5165_s1 + $0x528] sm:$0xff]  ;;  %v3141_v41 = vcombine.high %v206_v35, %v210_v36  ;;  %v3140_v48 = vcombine.low %v206_v35, %v210_v36  ;;  %v254_v28 = vld [vmem:[%s5165_s1 + $0x680] sm:$0xff] }
  0x35   :  { %v3143_v42 = vcombine.high %v207_v37, %v211_v38  ;;  %v3142_v49 = vcombine.low %v207_v37, %v211_v38  ;;  %v258_v29 = vld [vmem:[%s5165_s1 + $0x6a0] sm:$0xff] }
  0x36   :  { %1809 = vmatpush1.bf16.msra.mxu0 %v3076_v43  ;;  %2035 = vmatpush1.bf16.msra.mxu1 %v3078_v44  ;;  %v214_v43 = vld [vmem:[%s5165_s1 + $0x540] sm:$0xff]  ;;  %v3189_v35 = vcombine.high %v254_v28, %v258_v29 }
  0x37   :  { %1810 = vmatprep.subr.bf16.mxu0 %v3085_v45  ;;  %2036 = vmatprep.subr.bf16.mxu1 %v3087_v46  ;;  %v218_v44 = vld [vmem:[%s5165_s1 + $0x560] sm:$0xff]  ;;  %v215_v46 = vld [vmem:[%s5165_s1 + $0x548] sm:$0xff] }
  0x38   :  { %v3853_v45 = vld [vmem:[%s5166_s0 + $0x40] ss:$16 sps:$4 sm:$0xff]   ;;  %v3149_v50 = vcombine.high %v214_v43, %v218_v44  ;;  %v3148_v57 = vcombine.low %v214_v43, %v218_v44  ;;  %v3150_v58 = vcombine.low %v215_v46, %v219_v47 }
  0x39   :  { %v262_v37 = vld [vmem:[%s5165_s1 + $0x6c0] sm:$0xff] }
  0x3a   :  { %1811 = vmatpush1.bf16.msra.mxu0 %v3084_v51  ;;  %2037 = vmatpush1.bf16.msra.mxu1 %v3086_v52  ;;  %v3151_v51 = vcombine.high %v215_v46, %v219_v47  ;;  %v3864_v52 = vld [vmem:[%s5166_s0 + $0x64] ss:$16 sps:$4 sm:$0xff]  }
  0x3b   :  { %1812 = vmatprep.subr.bf16.mxu0 %v3093_v53  ;;  %2038 = vmatprep.subr.bf16.mxu1 %v3095_v54  ;;  %v222_v53 = vld [vmem:[%s5165_s1 + $0x580] sm:$0xff] }
  0x3c   :  { %v226_v54 = vld [vmem:[%s5165_s1 + $0x5a0] sm:$0xff] }
  0x3d   :  { %v3156_v2 = vcombine.low %v222_v53, %v226_v54  ;;  %v266_v38 = vld [vmem:[%s5165_s1 + $0x6e0] sm:$0xff] }
  0x3e   :  { %1813 = vmatpush1.bf16.msra.mxu0 %v3092_v59  ;;  %2039 = vmatpush1.bf16.msra.mxu1 %v3094_v60  ;;  %v3157_v59 = vcombine.high %v222_v53, %v226_v54  ;;  %v3159_v60 = vcombine.high %v223_v55, %v227_v56  ;;  %v3197_v44 = vcombine.high %v262_v37, %v266_v38  ;;  %v3978_v47 = vld [vmem:[%s5166_s0 + $0xc4] ss:$16 sps:$4 sm:$0xff]  }
  0x3f   :  { %1814 = vmatprep.subr.bf16.mxu0 %v3101_v61  ;;  %2040 = vmatprep.subr.bf16.mxu1 %v3103_v62  ;;  %v230_v61 = vld [vmem:[%s5165_s1 + $0x5c0] sm:$0xff]  ;;  %v3196_v53 = vcombine.low %v262_v37, %v266_v38  ;;  %v56_v37 = vld [vmem:[%s5165_s1 + $0x50] sm:$0xff] }
  0x40   :  { %v234_v62 = vld [vmem:[%s5165_s1 + $0x5e0] sm:$0xff]  ;;  %v60_v38 = vld [vmem:[%s5165_s1 + $0x70] sm:$0xff] }
  0x42   :  { %1815 = vmatpush1.bf16.msra.mxu0 %v3100_v3  ;;  %2041 = vmatpush1.bf16.msra.mxu1 %v3102_v4  ;;  %v3158_v3 = vcombine.low %v223_v55, %v227_v56  ;;  %v3165_v4 = vcombine.high %v230_v61, %v234_v62 }
  0x43   :  { %1897 = vmatprep.subr.bf16.mxu0 %v3109_v5  ;;  %2123 = vmatprep.subr.bf16.mxu1 %v3111_v6  ;;  %v3167_v5 = vcombine.high %v231_v0, %v235_v1  ;;  %v3902_v6 = vld [vmem:[%s5166_s0 + $0x84] ss:$16 sps:$4 sm:$0xff]  }
  0x45   :  { %1817 = vmatmul.mubr.bf16.vlgmr.msra.gmra.mrb[0].mxu0 %v3777_v9  ;;  %2043 = vmatmul.mubr.bf16.vlgmr.msra.gmra.mrb[0].mxu1 %v3777_v9 }
  0x46   :  { %1898 = vmatpush1.bf16.msra.mxu0 %v3108_v12  ;;  %2124 = vmatpush1.bf16.msra.mxu1 %v3110_v13  ;;  %v3164_v12 = vcombine.low %v230_v61, %v234_v62  ;;  %v3166_v13 = vcombine.low %v231_v0, %v235_v1  ;;  %v283_v61 = vld [vmem:[%s5165_s1 + $0x768] sm:$0xff] }
  0x47   :  { %1899 = vmatprep.subr.bf16.mxu0 %v3117_v14  ;;  %2125 = vmatprep.subr.bf16.mxu1 %v3119_v15  ;;  %v3173_v14 = vcombine.high %v238_v7, %v242_v8  ;;  %v3175_v15 = vcombine.high %v239_v10, %v243_v11 }
  0x48   :  { %1826 = vmatprep.mubr.bf16.mxu0 %v3788_v16  ;;  %2052 = vmatprep.mubr.bf16.mxu1 %v3788_v16 }
  0x4a   :  { %1900 = vmatpush1.bf16.msra.mxu0 %v3116_v21  ;;  %2126 = vmatpush1.bf16.msra.mxu1 %v3118_v22  ;;  %v251_v21 = vld [vmem:[%s5165_s1 + $0x668] sm:$0xff]  ;;  %v3172_v22 = vcombine.low %v238_v7, %v242_v8 }
  0x4b   :  { %1901 = vmatprep.subr.bf16.mxu0 %v3125_v23  ;;  %2127 = vmatprep.subr.bf16.mxu1 %v3127_v24  ;;  %v3174_v23 = vcombine.low %v239_v10, %v243_v11  ;;  %v3181_v24 = vcombine.high %v246_v17, %v250_v18  ;;  %v3183_v25 = vcombine.high %v247_v20, %v251_v21  ;;  %v287_v7 = vld [vmem:[%s5165_s1 + $0x788] sm:$0xff] }
  0x4c   :  { %v291_v8 = vld [vmem:[%s5165_s1 + $0x7a8] sm:$0xff] }
  0x4d   :  { %1827 = vmatmul.mubr.bf16.gmra.mrb[4].mxu0 %v3815_v27  ;;  %2053 = vmatmul.mubr.bf16.gmra.mrb[4].mxu1 %v3815_v27 }
  0x4e   :  { %1902 = vmatpush1.bf16.msra.mxu0 %v3124_v30  ;;  %2128 = vmatpush1.bf16.msra.mxu1 %v3126_v31  ;;  %v255_v30 = vld [vmem:[%s5165_s1 + $0x688] sm:$0xff] }
  0x4f   :  { %1903 = vmatprep.subr.bf16.mxu0 %v3133_v32  ;;  %2129 = vmatprep.subr.bf16.mxu1 %v3135_v33  ;;  %v259_v31 = vld [vmem:[%s5165_s1 + $0x6a8] sm:$0xff]  ;;  %v3180_v32 = vcombine.low %v246_v17, %v250_v18  ;;  %v3182_v33 = vcombine.low %v247_v20, %v251_v21  ;;  %v4043_v17 = vld [vmem:[%s5166_s0 + $0xe0] ss:$16 sps:$4 sm:$0xff]  }
  0x50   :  { %1836 = vmatprep.mubr.bf16.mxu0 %v3826_v34  ;;  %2062 = vmatprep.mubr.bf16.mxu1 %v3826_v34  ;;  %v3191_v36 = vcombine.high %v255_v30, %v259_v31  ;;  %v3190_v43 = vcombine.low %v255_v30, %v259_v31  ;;  %v295_v18 = vld [vmem:[%s5165_s1 + $0x7c8] sm:$0xff]  ;;  %v49_v30 = vld [vmem:[%s5165_s1 + $0x18] sm:$0xff] }
  0x51   :  { %v299_v20 = vld [vmem:[%s5165_s1 + $0x7e8] sm:$0xff]  ;;  %v53_v31 = vld [vmem:[%s5165_s1 + $0x38] sm:$0xff] }
  0x52   :  { %1904 = vmatpush1.bf16.msra.mxu0 %v3132_v39  ;;  %2130 = vmatpush1.bf16.msra.mxu1 %v3134_v40  ;;  %v3967_v39 = vld [vmem:[%s5166_s0 + $0xa0] ss:$16 sps:$4 sm:$0xff]   ;;  %v263_v40 = vld [vmem:[%s5165_s1 + $0x6c8] sm:$0xff] }
  0x53   :  { %1905 = vmatprep.subr.bf16.mxu0 %v3141_v41  ;;  %2131 = vmatprep.subr.bf16.mxu1 %v3143_v42  ;;  %v267_v41 = vld [vmem:[%s5165_s1 + $0x6e8] sm:$0xff]  ;;  %v3188_v42 = vcombine.low %v254_v28, %v258_v29  ;;  %v48_v28 = vld [vmem:[%s5165_s1 + $0x10] sm:$0xff] }
  0x54   :  { %v3199_v46 = vcombine.high %v263_v40, %v267_v41  ;;  %v3198_v54 = vcombine.low %v263_v40, %v267_v41  ;;  %v52_v29 = vld [vmem:[%s5165_s1 + $0x30] sm:$0xff]  ;;  %v4080_v40 = vld [vmem:[%s5166_s0 + $0x8] ss:$16 sps:$4 sm:$0xff]  }
  0x55   :  { %1837 = vmatmul.mubr.bf16.gmra.mrb[8].mxu0 %v3853_v45  ;;  %2063 = vmatmul.mubr.bf16.gmra.mrb[8].mxu1 %v3853_v45  ;;  %v57_v41 = vld [vmem:[%s5165_s1 + $0x58] sm:$0xff] }
  0x56   :  { %1906 = vmatpush1.bf16.msra.mxu0 %v3140_v48  ;;  %2132 = vmatpush1.bf16.msra.mxu1 %v3142_v49  ;;  %v270_v48 = vld [vmem:[%s5165_s1 + $0x700] sm:$0xff] }
  0x57   :  { %1907 = vmatprep.subr.bf16.mxu0 %v3149_v50  ;;  %2133 = vmatprep.subr.bf16.mxu1 %v3151_v51  ;;  %v274_v49 = vld [vmem:[%s5165_s1 + $0x720] sm:$0xff]  ;;  %v271_v50 = vld [vmem:[%s5165_s1 + $0x708] sm:$0xff] }
  0x58   :  { %1846 = vmatprep.mubr.bf16.mxu0 %v3864_v52  ;;  %2072 = vmatprep.mubr.bf16.mxu1 %v3864_v52  ;;  %v275_v51 = vld [vmem:[%s5165_s1 + $0x728] sm:$0xff]  ;;  %v3205_v55 = vcombine.high %v270_v48, %v274_v49  ;;  %v3204_v62 = vcombine.low %v270_v48, %v274_v49 }
  0x59   :  { %v3207_v56 = vcombine.high %v271_v50, %v275_v51  ;;  %v3206_v0 = vcombine.low %v271_v50, %v275_v51  ;;  %v4092_v49 = vld [vmem:[%s5166_s0 + $0x2c] ss:$16 sps:$4 sm:$0xff]   ;;  %v64_v50 = vld [vmem:[%s5165_s1 + $0x90] sm:$0xff] }
  0x5a   :  { %1908 = vmatpush1.bf16.msra.mxu0 %v3148_v57  ;;  %2134 = vmatpush1.bf16.msra.mxu1 %v3150_v58  ;;  %v278_v57 = vld [vmem:[%s5165_s1 + $0x740] sm:$0xff]  ;;  %v68_v51 = vld [vmem:[%s5165_s1 + $0xb0] sm:$0xff] }
  0x5b   :  { %1909 = vmatprep.subr.bf16.mxu0 %v3157_v59  ;;  %2135 = vmatprep.subr.bf16.mxu1 %v3159_v60  ;;  %v282_v58 = vld [vmem:[%s5165_s1 + $0x760] sm:$0xff]  ;;  %v279_v60 = vld [vmem:[%s5165_s1 + $0x748] sm:$0xff] }
  0x5c   :  { %v4005_v59 = vld [vmem:[%s5166_s0 + $0xc0] ss:$16 sps:$4 sm:$0xff]   ;;  %v3213_v1 = vcombine.high %v278_v57, %v282_v58  ;;  %v3212_v10 = vcombine.low %v278_v57, %v282_v58  ;;  %v3214_v11 = vcombine.low %v279_v60, %v283_v61  ;;  %v3001_v57 = vcombine.high %v64_v50, %v68_v51 }
  0x5d   :  { %1847 = vmatmul.mubr.bf16.gmra.mrb[12].mxu0 %v3891_v63  ;;  %2073 = vmatmul.mubr.bf16.gmra.mrb[12].mxu1 %v3891_v63 }
  0x5e   :  { %1910 = vmatpush1.bf16.msra.mxu0 %v3156_v2  ;;  %2136 = vmatpush1.bf16.msra.mxu1 %v3158_v3  ;;  %v3215_v2 = vcombine.high %v279_v60, %v283_v61  ;;  %v4016_v3 = vld [vmem:[%s5166_s0 + $0xe4] ss:$16 sps:$4 sm:$0xff]  }
  0x5f   :  { %1911 = vmatprep.subr.bf16.mxu0 %v3165_v4  ;;  %2137 = vmatprep.subr.bf16.mxu1 %v3167_v5  ;;  %v286_v4 = vld [vmem:[%s5165_s1 + $0x780] sm:$0xff]  ;;  %v72_v60 = vld [vmem:[%s5165_s1 + $0xd0] sm:$0xff] }
  0x60   :  { %1856 = vmatprep.mubr.bf16.mxu0 %v3902_v6  ;;  %2082 = vmatprep.mubr.bf16.mxu1 %v3902_v6  ;;  %v290_v5 = vld [vmem:[%s5165_s1 + $0x7a0] sm:$0xff]  ;;  %v76_v61 = vld [vmem:[%s5165_s1 + $0xf0] sm:$0xff] }
  0x61   :  { %v3220_v21 = vcombine.low %v286_v4, %v290_v5 }
  0x62   :  { %1912 = vmatpush1.bf16.msra.mxu0 %v3164_v12  ;;  %2138 = vmatpush1.bf16.msra.mxu1 %v3166_v13  ;;  %v3221_v12 = vcombine.high %v286_v4, %v290_v5  ;;  %v3223_v13 = vcombine.high %v287_v7, %v291_v8  ;;  %v3009_v5 = vcombine.high %v72_v60, %v76_v61 }
  0x63   :  { %1913 = vmatprep.subr.bf16.mxu0 %v3173_v14  ;;  %2139 = vmatprep.subr.bf16.mxu1 %v3175_v15  ;;  %v294_v14 = vld [vmem:[%s5165_s1 + $0x7c0] sm:$0xff] }
  0x64   :  { %v298_v15 = vld [vmem:[%s5165_s1 + $0x7e0] sm:$0xff] }
  0x65   :  { %1857 = vmatmul.mubr.bf16.gmra.mrb[16].mxu0 %v3929_v19  ;;  %2083 = vmatmul.mubr.bf16.gmra.mrb[16].mxu1 %v3929_v19 }
  0x66   :  { %1914 = vmatpush1.bf16.msra.mxu0 %v3172_v22  ;;  %2140 = vmatpush1.bf16.msra.mxu1 %v3174_v23  ;;  %v3222_v22 = vcombine.low %v287_v7, %v291_v8  ;;  %v3229_v23 = vcombine.high %v294_v14, %v298_v15  ;;  %v4130_v8 = vld [vmem:[%s5166_s0 + $0x4c] ss:$16 sps:$4 sm:$0xff]  }
  0x67   :  { %1915 = vmatprep.subr.bf16.mxu0 %v3181_v24  ;;  %2141 = vmatprep.subr.bf16.mxu1 %v3183_v25  ;;  %v3231_v24 = vcombine.high %v295_v18, %v299_v20  ;;  %v4054_v25 = vld [vmem:[%s5166_s0 + $0xc] ss:$16 sps:$4 sm:$0xff]  }
  0x68   :  { %1866 = vmatprep.mubr.bf16.mxu0 %v3940_v26  ;;  %2092 = vmatprep.mubr.bf16.mxu1 %v3940_v26 }
  0x6a   :  { %1916 = vmatpush1.bf16.msra.mxu0 %v3180_v32  ;;  %2142 = vmatpush1.bf16.msra.mxu1 %v3182_v33  ;;  %v3228_v32 = vcombine.low %v294_v14, %v298_v15  ;;  %v3230_v33 = vcombine.low %v295_v18, %v299_v20  ;;  %v3008_v14 = vcombine.low %v72_v60, %v76_v61  ;;  %v112_v60 = vld [vmem:[%s5165_s1 + $0x210] sm:$0xff] }
  0x6b   :  { %1917 = vmatprep.subr.bf16.mxu0 %v3189_v35  ;;  %2143 = vmatprep.subr.bf16.mxu1 %v3191_v36  ;;  %v2985_v35 = vcombine.high %v48_v28, %v52_v29  ;;  %v2987_v36 = vcombine.high %v49_v30, %v53_v31  ;;  %v116_v61 = vld [vmem:[%s5165_s1 + $0x230] sm:$0xff] }
  0x6d   :  { %1867 = vmatmul.mubr.bf16.gmra.mrb[20].mxu0 %v3967_v39  ;;  %2093 = vmatmul.mubr.bf16.gmra.mrb[20].mxu1 %v3967_v39 }
  0x6e   :  { %1918 = vmatpush1.bf16.msra.mxu0 %v3188_v42  ;;  %2144 = vmatpush1.bf16.msra.mxu1 %v3190_v43  ;;  %v61_v42 = vld [vmem:[%s5165_s1 + $0x78] sm:$0xff]  ;;  %v2984_v43 = vcombine.low %v48_v28, %v52_v29 }
  0x6f   :  { %1919 = vmatprep.subr.bf16.mxu0 %v3197_v44  ;;  %2145 = vmatprep.subr.bf16.mxu1 %v3199_v46  ;;  %v2986_v44 = vcombine.low %v49_v30, %v53_v31  ;;  %v2993_v46 = vcombine.high %v56_v37, %v60_v38  ;;  %v2995_v48 = vcombine.high %v57_v41, %v61_v42  ;;  %v93_v28 = vld [vmem:[%s5165_s1 + $0x178] sm:$0xff] }
  0x70   :  { %1876 = vmatprep.mubr.bf16.mxu0 %v3978_v47  ;;  %2102 = vmatprep.mubr.bf16.mxu1 %v3978_v47 }
  0x72   :  { %1920 = vmatpush1.bf16.msra.mxu0 %v3196_v53  ;;  %2146 = vmatpush1.bf16.msra.mxu1 %v3198_v54  ;;  %v65_v53 = vld [vmem:[%s5165_s1 + $0x98] sm:$0xff] }
  0x73   :  { %1921 = vmatprep.subr.bf16.mxu0 %v3205_v55  ;;  %2147 = vmatprep.subr.bf16.mxu1 %v3207_v56  ;;  %v69_v54 = vld [vmem:[%s5165_s1 + $0xb8] sm:$0xff]  ;;  %v2992_v55 = vcombine.low %v56_v37, %v60_v38  ;;  %v2994_v56 = vcombine.low %v57_v41, %v61_v42 }
  0x74   :  { %v3003_v58 = vcombine.high %v65_v53, %v69_v54  ;;  %v3002_v4 = vcombine.low %v65_v53, %v69_v54  ;;  %v97_v37 = vld [vmem:[%s5165_s1 + $0x198] sm:$0xff] }
  0x75   :  { %1877 = vmatmul.mubr.bf16.gmra.mrb[24].mxu0 %v4005_v59  ;;  %2103 = vmatmul.mubr.bf16.gmra.mrb[24].mxu1 %v4005_v59  ;;  %v101_v38 = vld [vmem:[%s5165_s1 + $0x1b8] sm:$0xff] }
  0x76   :  { %1922 = vmatpush1.bf16.msra.mxu0 %v3204_v62  ;;  %2148 = vmatpush1.bf16.msra.mxu1 %v3206_v0  ;;  %v4119_v62 = vld [vmem:[%s5166_s0 + $0x28] ss:$16 sps:$4 sm:$0xff]  }
  0x77   :  { %1923 = vmatprep.subr.bf16.mxu0 %v3213_v1  ;;  %2149 = vmatprep.subr.bf16.mxu1 %v3215_v2  ;;  %v73_v0 = vld [vmem:[%s5165_s1 + $0xd8] sm:$0xff]  ;;  %v3000_v2 = vcombine.low %v64_v50, %v68_v51 }
  0x78   :  { %1886 = vmatprep.mubr.bf16.mxu0 %v4016_v3  ;;  %2112 = vmatprep.mubr.bf16.mxu1 %v4016_v3  ;;  %v77_v1 = vld [vmem:[%s5165_s1 + $0xf8] sm:$0xff] }
  0x79   :  { %v3011_v7 = vcombine.high %v73_v0, %v77_v1  ;;  %v3010_v15 = vcombine.low %v73_v0, %v77_v1  ;;  %v4195_v50 = vld [vmem:[%s5166_s0 + $0x68] ss:$16 sps:$4 sm:$0xff]  }
  0x7a   :  { %1924 = vmatpush1.bf16.msra.mxu0 %v3212_v10  ;;  %2150 = vmatpush1.bf16.msra.mxu1 %v3214_v11  ;;  %v80_v10 = vld [vmem:[%s5165_s1 + $0x110] sm:$0xff]  ;;  %v105_v51 = vld [vmem:[%s5165_s1 + $0x1d8] sm:$0xff] }
  0x7b   :  { %1925 = vmatprep.subr.bf16.mxu0 %v3221_v12  ;;  %2151 = vmatprep.subr.bf16.mxu1 %v3223_v13  ;;  %v84_v11 = vld [vmem:[%s5165_s1 + $0x130] sm:$0xff]  ;;  %v81_v12 = vld [vmem:[%s5165_s1 + $0x118] sm:$0xff] }
  0x7c   :  { %v85_v13 = vld [vmem:[%s5165_s1 + $0x138] sm:$0xff]  ;;  %v3017_v18 = vcombine.high %v80_v10, %v84_v11  ;;  %v3016_v29 = vcombine.low %v80_v10, %v84_v11  ;;  %v120_v10 = vld [vmem:[%s5165_s1 + $0x250] sm:$0xff] }
  0x7d   :  { %1887 = vmatmul.mubr.bf16.gmra.mrb[28].mxu0 %v4043_v17  ;;  %2113 = vmatmul.mubr.bf16.gmra.mrb[28].mxu1 %v4043_v17  ;;  %v3019_v20 = vcombine.high %v81_v12, %v85_v13  ;;  %v3018_v30 = vcombine.low %v81_v12, %v85_v13  ;;  %v109_v53 = vld [vmem:[%s5165_s1 + $0x1f8] sm:$0xff]  ;;  %v124_v11 = vld [vmem:[%s5165_s1 + $0x270] sm:$0xff] }
  0x7e   :  { %1926 = vmatpush1.bf16.msra.mxu0 %v3220_v21  ;;  %2152 = vmatpush1.bf16.msra.mxu1 %v3222_v22  ;;  %v88_v21 = vld [vmem:[%s5165_s1 + $0x150] sm:$0xff]  ;;  %v113_v0 = vld [vmem:[%s5165_s1 + $0x218] sm:$0xff] }
  0x7f   :  { %1927 = vmatprep.subr.bf16.mxu0 %v3229_v23  ;;  %2153 = vmatprep.subr.bf16.mxu1 %v3231_v24  ;;  %v92_v22 = vld [vmem:[%s5165_s1 + $0x170] sm:$0xff]  ;;  %v4157_v23 = vld [vmem:[%s5166_s0 + $0x48] ss:$16 sps:$4 sm:$0xff]  }
  0x80   :  { %1929 = vmatprep.mubr.bf16.mxu0 %v4054_v25  ;;  %2155 = vmatprep.mubr.bf16.mxu1 %v4054_v25  ;;  %v89_v24 = vld [vmem:[%s5165_s1 + $0x158] sm:$0xff]  ;;  %v3025_v31 = vcombine.high %v88_v21, %v92_v22  ;;  %v3024_v41 = vcombine.low %v88_v21, %v92_v22 }
  0x81   :  { %v3026_v42 = vcombine.low %v89_v24, %v93_v28  ;;  %v117_v1 = vld [vmem:[%s5165_s1 + $0x238] sm:$0xff] }
  0x82   :  { %1928 = vmatpush1.bf16.msra.mxu0 %v3228_v32  ;;  %2154 = vmatpush1.bf16.msra.mxu1 %v3230_v33  ;;  %v3027_v32 = vcombine.high %v89_v24, %v93_v28  ;;  %v4168_v33 = vld [vmem:[%s5166_s0 + $0x6c] ss:$16 sps:$4 sm:$0xff]   ;;  %v4233_v12 = vld [vmem:[%s5166_s0 + $0x88] ss:$16 sps:$4 sm:$0xff]   ;;  %v128_v24 = vld [vmem:[%s5165_s1 + $0x290] sm:$0xff] }
  0x83   :  { %2236 = vmatprep.subr.bf16.mxu0 %v2985_v35  ;;  %2462 = vmatprep.subr.bf16.mxu1 %v2987_v36  ;;  %v96_v35 = vld [vmem:[%s5165_s1 + $0x190] sm:$0xff]  ;;  %v121_v13 = vld [vmem:[%s5165_s1 + $0x258] sm:$0xff] }
  0x84   :  { %v100_v36 = vld [vmem:[%s5165_s1 + $0x1b0] sm:$0xff]  ;;  %v4244_v22 = vld [vmem:[%s5166_s0 + $0xac] ss:$16 sps:$4 sm:$0xff]  }
  0x85   :  { %1930 = vmatmul.mubr.bf16.vlgmr.msra.gmra.mrb[0].mxu0 %v4080_v40  ;;  %2156 = vmatmul.mubr.bf16.vlgmr.msra.gmra.mrb[0].mxu1 %v4080_v40  ;;  %v3032_v54 = vcombine.low %v96_v35, %v100_v36  ;;  %v132_v28 = vld [vmem:[%s5165_s1 + $0x2b0] sm:$0xff] }
  0x86   :  { %2237 = vmatpush1.bf16.msra.mxu0 %v2984_v43  ;;  %2463 = vmatpush1.bf16.msra.mxu1 %v2986_v44  ;;  %v3033_v43 = vcombine.high %v96_v35, %v100_v36  ;;  %v3035_v44 = vcombine.high %v97_v37, %v101_v38  ;;  %v3065_v35 = vcombine.high %v128_v24, %v132_v28 }
  0x87   :  { %2238 = vmatprep.subr.bf16.mxu0 %v2993_v46  ;;  %2464 = vmatprep.subr.bf16.mxu1 %v2995_v48  ;;  %v104_v46 = vld [vmem:[%s5165_s1 + $0x1d0] sm:$0xff] }
  0x88   :  { %1939 = vmatprep.mubr.bf16.mxu0 %v4092_v49  ;;  %2165 = vmatprep.mubr.bf16.mxu1 %v4092_v49  ;;  %v108_v48 = vld [vmem:[%s5165_s1 + $0x1f0] sm:$0xff] }
  0x8a   :  { %2239 = vmatpush1.bf16.msra.mxu0 %v2992_v55  ;;  %2465 = vmatpush1.bf16.msra.mxu1 %v2994_v56  ;;  %v3034_v55 = vcombine.low %v97_v37, %v101_v38  ;;  %v3041_v56 = vcombine.high %v104_v46, %v108_v48  ;;  %v136_v37 = vld [vmem:[%s5165_s1 + $0x2d0] sm:$0xff] }
  0x8b   :  { %2240 = vmatprep.subr.bf16.mxu0 %v3001_v57  ;;  %2466 = vmatprep.subr.bf16.mxu1 %v3003_v58  ;;  %v3043_v57 = vcombine.high %v105_v51, %v109_v53  ;;  %v4206_v58 = vld [vmem:[%s5166_s0 + $0x8c] ss:$16 sps:$4 sm:$0xff]   ;;  %v140_v38 = vld [vmem:[%s5165_s1 + $0x2f0] sm:$0xff] }
  0x8d   :  { %1940 = vmatmul.mubr.bf16.gmra.mrb[4].mxu0 %v4119_v62  ;;  %2166 = vmatmul.mubr.bf16.gmra.mrb[4].mxu1 %v4119_v62 }
  0x8e   :  { %2241 = vmatpush1.bf16.msra.mxu0 %v3000_v2  ;;  %2467 = vmatpush1.bf16.msra.mxu1 %v3002_v4  ;;  %v3040_v2 = vcombine.low %v104_v46, %v108_v48  ;;  %v3042_v4 = vcombine.low %v105_v51, %v109_v53  ;;  %v3073_v48 = vcombine.high %v136_v37, %v140_v38  ;;  %v4282_v53 = vld [vmem:[%s5166_s0 + $0xcc] ss:$16 sps:$4 sm:$0xff]  }
  0x8f   :  { %2242 = vmatprep.subr.bf16.mxu0 %v3009_v5  ;;  %2468 = vmatprep.subr.bf16.mxu1 %v3011_v7  ;;  %v3049_v5 = vcombine.high %v112_v60, %v116_v61  ;;  %v3051_v7 = vcombine.high %v113_v0, %v117_v1 }
  0x90   :  { %1949 = vmatprep.mubr.bf16.mxu0 %v4130_v8  ;;  %2175 = vmatprep.mubr.bf16.mxu1 %v4130_v8 }
  0x92   :  { %2243 = vmatpush1.bf16.msra.mxu0 %v3008_v14  ;;  %2469 = vmatpush1.bf16.msra.mxu1 %v3010_v15  ;;  %v125_v14 = vld [vmem:[%s5165_s1 + $0x278] sm:$0xff]  ;;  %v3048_v15 = vcombine.low %v112_v60, %v116_v61  ;;  %v3072_v60 = vcombine.low %v136_v37, %v140_v38 }
  0x93   :  { %2244 = vmatprep.subr.bf16.mxu0 %v3017_v18  ;;  %2470 = vmatprep.subr.bf16.mxu1 %v3019_v20  ;;  %v3050_v18 = vcombine.low %v113_v0, %v117_v1  ;;  %v3057_v20 = vcombine.high %v120_v10, %v124_v11  ;;  %v3059_v21 = vcombine.high %v121_v13, %v125_v14  ;;  %v4347_v37 = vld [vmem:[%s5166_s0 + $0xe8] ss:$16 sps:$4 sm:$0xff]  }
  0x94   :  { %v169_v38 = vld [vmem:[%s5165_s1 + $0x3d8] sm:$0xff] }
  0x95   :  { %1950 = vmatmul.mubr.bf16.gmra.mrb[8].mxu0 %v4157_v23  ;;  %2176 = vmatmul.mubr.bf16.gmra.mrb[8].mxu1 %v4157_v23 }
  0x96   :  { %2245 = vmatpush1.bf16.msra.mxu0 %v3016_v29  ;;  %2471 = vmatpush1.bf16.msra.mxu1 %v3018_v30  ;;  %v129_v29 = vld [vmem:[%s5165_s1 + $0x298] sm:$0xff] }
  0x97   :  { %2246 = vmatprep.subr.bf16.mxu0 %v3025_v31  ;;  %2472 = vmatprep.subr.bf16.mxu1 %v3027_v32  ;;  %v133_v30 = vld [vmem:[%s5165_s1 + $0x2b8] sm:$0xff]  ;;  %v3056_v31 = vcombine.low %v120_v10, %v124_v11  ;;  %v3058_v32 = vcombine.low %v121_v13, %v125_v14 }
  0x98   :  { %1959 = vmatprep.mubr.bf16.mxu0 %v4168_v33  ;;  %2185 = vmatprep.mubr.bf16.mxu1 %v4168_v33  ;;  %v3067_v36 = vcombine.high %v129_v29, %v133_v30  ;;  %v3066_v46 = vcombine.low %v129_v29, %v133_v30  ;;  %v157_v10 = vld [vmem:[%s5165_s1 + $0x378] sm:$0xff] }
  0x9a   :  { %2247 = vmatpush1.bf16.msra.mxu0 %v3024_v41  ;;  %2473 = vmatpush1.bf16.msra.mxu1 %v3026_v42  ;;  %v4271_v41 = vld [vmem:[%s5166_s0 + $0xa8] ss:$16 sps:$4 sm:$0xff]  }
  0x9b   :  { %2248 = vmatprep.subr.bf16.mxu0 %v3033_v43  ;;  %2474 = vmatprep.subr.bf16.mxu1 %v3035_v44  ;;  %v137_v42 = vld [vmem:[%s5165_s1 + $0x2d8] sm:$0xff]  ;;  %v3064_v44 = vcombine.low %v128_v24, %v132_v28 }
  0x9c   :  { %v141_v43 = vld [vmem:[%s5165_s1 + $0x2f8] sm:$0xff] }
  0x9d   :  { %1960 = vmatmul.mubr.bf16.gmra.mrb[12].mxu0 %v4195_v50  ;;  %2186 = vmatmul.mubr.bf16.gmra.mrb[12].mxu1 %v4195_v50  ;;  %v3075_v51 = vcombine.high %v137_v42, %v141_v43  ;;  %v3074_v61 = vcombine.low %v137_v42, %v141_v43  ;;  %v161_v24 = vld [vmem:[%s5165_s1 + $0x398] sm:$0xff] }
  0x9e   :  { %2249 = vmatpush1.bf16.msra.mxu0 %v3032_v54  ;;  %2475 = vmatpush1.bf16.msra.mxu1 %v3034_v55  ;;  %v144_v54 = vld [vmem:[%s5165_s1 + $0x310] sm:$0xff]  ;;  %v165_v28 = vld [vmem:[%s5165_s1 + $0x3b8] sm:$0xff] }
  0x9f   :  { %2250 = vmatprep.subr.bf16.mxu0 %v3041_v56  ;;  %2476 = vmatprep.subr.bf16.mxu1 %v3043_v57  ;;  %v148_v55 = vld [vmem:[%s5165_s1 + $0x330] sm:$0xff]  ;;  %v145_v56 = vld [vmem:[%s5165_s1 + $0x318] sm:$0xff] }
  0xa0   :  { %1969 = vmatprep.mubr.bf16.mxu0 %v4206_v58  ;;  %2195 = vmatprep.mubr.bf16.mxu1 %v4206_v58  ;;  %v149_v57 = vld [vmem:[%s5165_s1 + $0x338] sm:$0xff]  ;;  %v3081_v0 = vcombine.high %v144_v54, %v148_v55  ;;  %v3080_v11 = vcombine.low %v144_v54, %v148_v55  ;;  %v180_v54 = vld [vmem:[%s5165_s1 + $0x430] sm:$0xff] }
  0xa1   :  { %v3083_v1 = vcombine.high %v145_v56, %v149_v57  ;;  %v3082_v13 = vcombine.low %v145_v56, %v149_v57  ;;  %v173_v42 = vld [vmem:[%s5165_s1 + $0x3f8] sm:$0xff] }
  0xa2   :  { %2251 = vmatpush1.bf16.msra.mxu0 %v3040_v2  ;;  %2477 = vmatpush1.bf16.msra.mxu1 %v3042_v4  ;;  %v152_v2 = vld [vmem:[%s5165_s1 + $0x350] sm:$0xff]  ;;  %v177_v55 = vld [vmem:[%s5165_s1 + $0x418] sm:$0xff] }
  0xa3   :  { %2252 = vmatprep.subr.bf16.mxu0 %v3049_v5  ;;  %2478 = vmatprep.subr.bf16.mxu1 %v3051_v7  ;;  %v156_v4 = vld [vmem:[%s5165_s1 + $0x370] sm:$0xff]  ;;  %v4309_v5 = vld [vmem:[%s5166_s0 + $0xc8] ss:$16 sps:$4 sm:$0xff]  }
  0xa4   :  { %v153_v7 = vld [vmem:[%s5165_s1 + $0x358] sm:$0xff]  ;;  %v3089_v14 = vcombine.high %v152_v2, %v156_v4  ;;  %v3088_v29 = vcombine.low %v152_v2, %v156_v4  ;;  %v184_v2 = vld [vmem:[%s5165_s1 + $0x450] sm:$0xff] }
  0xa5   :  { %1970 = vmatmul.mubr.bf16.gmra.mrb[16].mxu0 %v4233_v12  ;;  %2196 = vmatmul.mubr.bf16.gmra.mrb[16].mxu1 %v4233_v12  ;;  %v3090_v30 = vcombine.low %v153_v7, %v157_v10  ;;  %v181_v56 = vld [vmem:[%s5165_s1 + $0x438] sm:$0xff]  ;;  %v188_v4 = vld [vmem:[%s5165_s1 + $0x470] sm:$0xff] }
  0xa6   :  { %2253 = vmatpush1.bf16.msra.mxu0 %v3048_v15  ;;  %2479 = vmatpush1.bf16.msra.mxu1 %v3050_v18  ;;  %v3091_v15 = vcombine.high %v153_v7, %v157_v10  ;;  %v4320_v18 = vld [vmem:[%s5166_s0 + $0xec] ss:$16 sps:$4 sm:$0xff]  }
  0xa7   :  { %2254 = vmatprep.subr.bf16.mxu0 %v3057_v20  ;;  %2480 = vmatprep.subr.bf16.mxu1 %v3059_v21  ;;  %v160_v20 = vld [vmem:[%s5165_s1 + $0x390] sm:$0xff]  ;;  %v185_v7 = vld [vmem:[%s5165_s1 + $0x458] sm:$0xff] }
  0xa8   :  { %1979 = vmatprep.mubr.bf16.mxu0 %v4244_v22  ;;  %2205 = vmatprep.mubr.bf16.mxu1 %v4244_v22  ;;  %v164_v21 = vld [vmem:[%s5165_s1 + $0x3b0] sm:$0xff]  ;;  %v189_v10 = vld [vmem:[%s5165_s1 + $0x478] sm:$0xff] }
  0xa9   :  { %v3096_v43 = vcombine.low %v160_v20, %v164_v21 }
  0xaa   :  { %2255 = vmatpush1.bf16.msra.mxu0 %v3056_v31  ;;  %2481 = vmatpush1.bf16.msra.mxu1 %v3058_v32  ;;  %v3097_v31 = vcombine.high %v160_v20, %v164_v21  ;;  %v3099_v32 = vcombine.high %v161_v24, %v165_v28  ;;  %v192_v20 = vld [vmem:[%s5165_s1 + $0x490] sm:$0xff] }
  0xab   :  { %2256 = vmatprep.subr.bf16.mxu0 %v3065_v35  ;;  %2482 = vmatprep.subr.bf16.mxu1 %v3067_v36  ;;  %v168_v35 = vld [vmem:[%s5165_s1 + $0x3d0] sm:$0xff] }
  0xac   :  { %v172_v36 = vld [vmem:[%s5165_s1 + $0x3f0] sm:$0xff] }
  0xad   :  { %1980 = vmatmul.mubr.bf16.gmra.mrb[20].mxu0 %v4271_v41  ;;  %2206 = vmatmul.mubr.bf16.gmra.mrb[20].mxu1 %v4271_v41  ;;  %v3104_v57 = vcombine.low %v168_v35, %v172_v36  ;;  %v196_v21 = vld [vmem:[%s5165_s1 + $0x4b0] sm:$0xff] }
  0xae   :  { %2257 = vmatpush1.bf16.msra.mxu0 %v3064_v44  ;;  %2483 = vmatpush1.bf16.msra.mxu1 %v3066_v46  ;;  %v3098_v44 = vcombine.low %v161_v24, %v165_v28  ;;  %v3105_v46 = vcombine.high %v168_v35, %v172_v36  ;;  %v193_v24 = vld [vmem:[%s5165_s1 + $0x498] sm:$0xff]  ;;  %v200_v35 = vld [vmem:[%s5165_s1 + $0x4d0] sm:$0xff] }
  0xaf   :  { %2258 = vmatprep.subr.bf16.mxu0 %v3073_v48  ;;  %2484 = vmatprep.subr.bf16.mxu1 %v3075_v51  ;;  %v3107_v48 = vcombine.high %v169_v38, %v173_v42  ;;  %v176_v51 = vld [vmem:[%s5165_s1 + $0x410] sm:$0xff]  ;;  %v197_v28 = vld [vmem:[%s5165_s1 + $0x4b8] sm:$0xff] }
  0xb0   :  { %1989 = vmatprep.mubr.bf16.mxu0 %v4282_v53  ;;  %2215 = vmatprep.mubr.bf16.mxu1 %v4282_v53  ;;  %v204_v36 = vld [vmem:[%s5165_s1 + $0x4f0] sm:$0xff] }
  0xb2   :  { %2259 = vmatpush1.bf16.msra.mxu0 %v3072_v60  ;;  %2485 = vmatpush1.bf16.msra.mxu1 %v3074_v61  ;;  %v3106_v60 = vcombine.low %v169_v38, %v173_v42  ;;  %v3113_v61 = vcombine.high %v176_v51, %v180_v54  ;;  %v205_v38 = vld [vmem:[%s5165_s1 + $0x4f8] sm:$0xff]  ;;  %v3128_v42 = vcombine.low %v192_v20, %v196_v21 }
  0xb3   :  { %2260 = vmatprep.subr.bf16.mxu0 %v3081_v0  ;;  %2486 = vmatprep.subr.bf16.mxu1 %v3083_v1  ;;  %v3540_v0 = vld [vmem:[%s5166_s0 + $0x4] ss:$16 sps:$4 sm:$0xff]   ;;  %v3115_v1 = vcombine.high %v177_v55, %v181_v56 }
  0xb5   :  { %1990 = vmatmul.mubr.bf16.gmra.mrb[24].mxu0 %v4309_v5  ;;  %2216 = vmatmul.mubr.bf16.gmra.mrb[24].mxu1 %v4309_v5 }
  0xb6   :  { %2261 = vmatpush1.bf16.msra.mxu0 %v3080_v11  ;;  %2487 = vmatpush1.bf16.msra.mxu1 %v3082_v13  ;;  %v3112_v11 = vcombine.low %v176_v51, %v180_v54  ;;  %v3114_v13 = vcombine.low %v177_v55, %v181_v56  ;;  %v209_v51 = vld [vmem:[%s5165_s1 + $0x518] sm:$0xff]  ;;  %v3136_v55 = vcombine.low %v200_v35, %v204_v36 }
  0xb7   :  { %2262 = vmatprep.subr.bf16.mxu0 %v3089_v14  ;;  %2488 = vmatprep.subr.bf16.mxu1 %v3091_v15  ;;  %v3121_v14 = vcombine.high %v184_v2, %v188_v4  ;;  %v3123_v15 = vcombine.high %v185_v7, %v189_v10  ;;  %v213_v54 = vld [vmem:[%s5165_s1 + $0x538] sm:$0xff] }
  0xb8   :  { %1999 = vmatprep.mubr.bf16.mxu0 %v4320_v18  ;;  %2225 = vmatprep.mubr.bf16.mxu1 %v4320_v18 }
  0xba   :  { %2263 = vmatpush1.bf16.msra.mxu0 %v3088_v29  ;;  %2489 = vmatpush1.bf16.msra.mxu1 %v3090_v30  ;;  %v3120_v29 = vcombine.low %v184_v2, %v188_v4  ;;  %v3122_v30 = vcombine.low %v185_v7, %v189_v10  ;;  %v3146_v4 = vcombine.low %v209_v51, %v213_v54 }
  0xbb   :  { %2264 = vmatprep.subr.bf16.mxu0 %v3097_v31  ;;  %2490 = vmatprep.subr.bf16.mxu1 %v3099_v32  ;;  %v3129_v31 = vcombine.high %v192_v20, %v196_v21  ;;  %v3131_v32 = vcombine.high %v193_v24, %v197_v28 }
  0xbd   :  { %2000 = vmatmul.mubr.bf16.gmra.mrb[28].mxu0 %v4347_v37  ;;  %2226 = vmatmul.mubr.bf16.gmra.mrb[28].mxu1 %v4347_v37 }
  0xbe   :  { %2265 = vmatpush1.bf16.msra.mxu0 %v3096_v43  ;;  %2491 = vmatpush1.bf16.msra.mxu1 %v3098_v44  ;;  %v3130_v43 = vcombine.low %v193_v24, %v197_v28  ;;  %v3137_v44 = vcombine.high %v200_v35, %v204_v36  ;;  %v232_v28 = vld [vmem:[%s5165_s1 + $0x5d0] sm:$0xff] }
  0xbf   :  { %2266 = vmatprep.subr.bf16.mxu0 %v3105_v46  ;;  %2492 = vmatprep.subr.bf16.mxu1 %v3107_v48  ;;  %v212_v48 = vld [vmem:[%s5165_s1 + $0x530] sm:$0xff] }
  0xc0   :  { %2268 = vmatprep.mubr.bf16.mxu0 %v3540_v0  ;;  %2494 = vmatprep.mubr.bf16.mxu1 %v3540_v0  ;;  %v220_v0 = vld [vmem:[%s5165_s1 + $0x570] sm:$0xff] }
  0xc2   :  { %2267 = vmatpush1.bf16.msra.mxu0 %v3104_v57  ;;  %2493 = vmatpush1.bf16.msra.mxu1 %v3106_v60  ;;  %v3147_v60 = vcombine.high %v209_v51, %v213_v54  ;;  %v252_v51 = vld [vmem:[%s5165_s1 + $0x670] sm:$0xff]  ;;  %v253_v54 = vld [vmem:[%s5165_s1 + $0x678] sm:$0xff] }
  0xc3   :  { %2349 = vmatprep.subr.bf16.mxu0 %v3113_v61  ;;  %2575 = vmatprep.subr.bf16.mxu1 %v3115_v1  ;;  %v216_v61 = vld [vmem:[%s5165_s1 + $0x550] sm:$0xff]  ;;  %v221_v1 = vld [vmem:[%s5165_s1 + $0x578] sm:$0xff] }
  0xc4   :  { %v3153_v7 = vcombine.high %v216_v61, %v220_v0 }
  0xc5   :  { %2269 = vmatmul.mubr.bf16.vlgmr.msra.gmra.mrb[32].mxu0 %v3777_v9  ;;  %2495 = vmatmul.mubr.bf16.vlgmr.msra.gmra.mrb[32].mxu1 %v3777_v9  ;;  %v201_v9 = vld [vmem:[%s5165_s1 + $0x4d8] sm:$0xff] }
  0xc6   :  { %2350 = vmatpush1.bf16.msra.mxu0 %v3112_v11  ;;  %2576 = vmatpush1.bf16.msra.mxu1 %v3114_v13  ;;  %v3139_v46 = vcombine.high %v201_v9, %v205_v38  ;;  %v3138_v56 = vcombine.low %v201_v9, %v205_v38  ;;  %v228_v11 = vld [vmem:[%s5165_s1 + $0x5b0] sm:$0xff]  ;;  %v225_v13 = vld [vmem:[%s5165_s1 + $0x598] sm:$0xff] }
  0xc7   :  { %2351 = vmatprep.subr.bf16.mxu0 %v3121_v14  ;;  %2577 = vmatprep.subr.bf16.mxu1 %v3123_v15  ;;  %v229_v14 = vld [vmem:[%s5165_s1 + $0x5b8] sm:$0xff]  ;;  %v3152_v15 = vcombine.low %v216_v61, %v220_v0  ;;  %v244_v9 = vld [vmem:[%s5165_s1 + $0x630] sm:$0xff] }
  0xc8   :  { %2278 = vmatprep.mubr.bf16.mxu0 %v3788_v16  ;;  %2504 = vmatprep.mubr.bf16.mxu1 %v3788_v16  ;;  %v208_v16 = vld [vmem:[%s5165_s1 + $0x510] sm:$0xff]  ;;  %v3163_v24 = vcombine.high %v225_v13, %v229_v14  ;;  %v241_v38 = vld [vmem:[%s5165_s1 + $0x618] sm:$0xff] }
  0xc9   :  { %v3145_v57 = vcombine.high %v208_v16, %v212_v48  ;;  %v3144_v2 = vcombine.low %v208_v16, %v212_v48  ;;  %v248_v48 = vld [vmem:[%s5165_s1 + $0x650] sm:$0xff]  ;;  %v257_v0 = vld [vmem:[%s5165_s1 + $0x698] sm:$0xff] }
  0xca   :  { %2352 = vmatpush1.bf16.msra.mxu0 %v3120_v29  ;;  %2578 = vmatpush1.bf16.msra.mxu1 %v3122_v30  ;;  %v236_v29 = vld [vmem:[%s5165_s1 + $0x5f0] sm:$0xff]  ;;  %v237_v30 = vld [vmem:[%s5165_s1 + $0x5f8] sm:$0xff] }
  0xcb   :  { %2353 = vmatprep.subr.bf16.mxu0 %v3129_v31  ;;  %2579 = vmatprep.subr.bf16.mxu1 %v3131_v32  ;;  %v3162_v32 = vcombine.low %v225_v13, %v229_v14  ;;  %v3169_v35 = vcombine.high %v232_v28, %v236_v29  ;;  %v260_v61 = vld [vmem:[%s5165_s1 + $0x6b0] sm:$0xff] }
  0xcd   :  { %2279 = vmatmul.mubr.bf16.gmra.mrb[36].mxu0 %v3815_v27  ;;  %2505 = vmatmul.mubr.bf16.gmra.mrb[36].mxu1 %v3815_v27  ;;  %v217_v27 = vld [vmem:[%s5165_s1 + $0x558] sm:$0xff] }
  0xce   :  { %2354 = vmatpush1.bf16.msra.mxu0 %v3128_v42  ;;  %2580 = vmatpush1.bf16.msra.mxu1 %v3130_v43  ;;  %v3155_v10 = vcombine.high %v217_v27, %v221_v1  ;;  %v3154_v20 = vcombine.low %v217_v27, %v221_v1  ;;  %v245_v42 = vld [vmem:[%s5165_s1 + $0x638] sm:$0xff]  ;;  %v3168_v43 = vcombine.low %v232_v28, %v236_v29 }
  0xcf   :  { %2355 = vmatprep.subr.bf16.mxu0 %v3137_v44  ;;  %2581 = vmatprep.subr.bf16.mxu1 %v3139_v46  ;;  %v3179_v16 = vcombine.high %v241_v38, %v245_v42  ;;  %v261_v27 = vld [vmem:[%s5165_s1 + $0x6b8] sm:$0xff]  ;;  %v3184_v1 = vcombine.low %v248_v48, %v252_v51 }
  0xd0   :  { %2288 = vmatprep.mubr.bf16.mxu0 %v3826_v34  ;;  %2514 = vmatprep.mubr.bf16.mxu1 %v3826_v34  ;;  %v224_v34 = vld [vmem:[%s5165_s1 + $0x590] sm:$0xff]  ;;  %v3194_v14 = vcombine.low %v257_v0, %v261_v27  ;;  %v277_v28 = vld [vmem:[%s5165_s1 + $0x738] sm:$0xff] }
  0xd1   :  { %v3161_v21 = vcombine.high %v224_v34, %v228_v11  ;;  %v3160_v31 = vcombine.low %v224_v34, %v228_v11  ;;  %v268_v34 = vld [vmem:[%s5165_s1 + $0x6f0] sm:$0xff]  ;;  %v269_v11 = vld [vmem:[%s5165_s1 + $0x6f8] sm:$0xff] }
  0xd2   :  { %2356 = vmatpush1.bf16.msra.mxu0 %v3136_v55  ;;  %2582 = vmatpush1.bf16.msra.mxu1 %v3138_v56  ;;  %v3178_v56 = vcombine.low %v241_v38, %v245_v42 }
  0xd3   :  { %2357 = vmatprep.subr.bf16.mxu0 %v3145_v57  ;;  %2583 = vmatprep.subr.bf16.mxu1 %v3147_v60  ;;  %v3185_v57 = vcombine.high %v248_v48, %v252_v51 }
  0xd5   :  { %2289 = vmatmul.mubr.bf16.gmra.mrb[40].mxu0 %v3853_v45  ;;  %2515 = vmatmul.mubr.bf16.gmra.mrb[40].mxu1 %v3853_v45  ;;  %v233_v45 = vld [vmem:[%s5165_s1 + $0x5d8] sm:$0xff] }
  0xd6   :  { %2358 = vmatpush1.bf16.msra.mxu0 %v3144_v2  ;;  %2584 = vmatpush1.bf16.msra.mxu1 %v3146_v4  ;;  %v3171_v36 = vcombine.high %v233_v45, %v237_v30  ;;  %v3170_v44 = vcombine.low %v233_v45, %v237_v30 }
  0xd7   :  { %2359 = vmatprep.subr.bf16.mxu0 %v3153_v7  ;;  %2585 = vmatprep.subr.bf16.mxu1 %v3155_v10  ;;  %v3195_v7 = vcombine.high %v257_v0, %v261_v27  ;;  %v264_v10 = vld [vmem:[%s5165_s1 + $0x6d0] sm:$0xff] }
  0xd8   :  { %2298 = vmatprep.mubr.bf16.mxu0 %v3864_v52  ;;  %2524 = vmatprep.mubr.bf16.mxu1 %v3864_v52  ;;  %v240_v52 = vld [vmem:[%s5165_s1 + $0x610] sm:$0xff]  ;;  %v3200_v29 = vcombine.low %v264_v10, %v268_v34 }
  0xd9   :  { %v3177_v46 = vcombine.high %v240_v52, %v244_v9  ;;  %v3176_v55 = vcombine.low %v240_v52, %v244_v9 }
  0xda   :  { %2360 = vmatpush1.bf16.msra.mxu0 %v3152_v15  ;;  %2586 = vmatpush1.bf16.msra.mxu1 %v3154_v20  ;;  %v3201_v15 = vcombine.high %v264_v10, %v268_v34 }
  0xdb   :  { %2361 = vmatprep.subr.bf16.mxu0 %v3161_v21  ;;  %2587 = vmatprep.subr.bf16.mxu1 %v3163_v24  ;;  %v276_v21 = vld [vmem:[%s5165_s1 + $0x730] sm:$0xff]  ;;  %v273_v24 = vld [vmem:[%s5165_s1 + $0x718] sm:$0xff] }
  0xdc   :  { %v3210_v9 = vcombine.low %v273_v24, %v277_v28 }
  0xdd   :  { %2299 = vmatmul.mubr.bf16.gmra.mrb[44].mxu0 %v3891_v63  ;;  %2525 = vmatmul.mubr.bf16.gmra.mrb[44].mxu1 %v3891_v63  ;;  %v249_v63 = vld [vmem:[%s5165_s1 + $0x658] sm:$0xff] }
  0xde   :  { %2362 = vmatpush1.bf16.msra.mxu0 %v3160_v31  ;;  %2588 = vmatpush1.bf16.msra.mxu1 %v3162_v32  ;;  %v3187_v60 = vcombine.high %v249_v63, %v253_v54  ;;  %v3186_v2 = vcombine.low %v249_v63, %v253_v54  ;;  %v3211_v31 = vcombine.high %v273_v24, %v277_v28  ;;  %v280_v32 = vld [vmem:[%s5165_s1 + $0x750] sm:$0xff] }
  0xdf   :  { %2363 = vmatprep.subr.bf16.mxu0 %v3169_v35  ;;  %2589 = vmatprep.subr.bf16.mxu1 %v3171_v36  ;;  %v284_v35 = vld [vmem:[%s5165_s1 + $0x770] sm:$0xff]  ;;  %v285_v36 = vld [vmem:[%s5165_s1 + $0x778] sm:$0xff] }
  0xe0   :  { %2308 = vmatprep.mubr.bf16.mxu0 %v3902_v6  ;;  %2534 = vmatprep.mubr.bf16.mxu1 %v3902_v6  ;;  %v256_v6 = vld [vmem:[%s5165_s1 + $0x690] sm:$0xff]  ;;  %v3217_v38 = vcombine.high %v280_v32, %v284_v35 }
  0xe1   :  { %v3193_v4 = vcombine.high %v256_v6, %v260_v61  ;;  %v3192_v13 = vcombine.low %v256_v6, %v260_v61  ;;  %v296_v54 = vld [vmem:[%s5165_s1 + $0x7d0] sm:$0xff] }
  0xe2   :  { %2364 = vmatpush1.bf16.msra.mxu0 %v3168_v43  ;;  %2590 = vmatpush1.bf16.msra.mxu1 %v3170_v44  ;;  %v292_v43 = vld [vmem:[%s5165_s1 + $0x7b0] sm:$0xff]  ;;  %v289_v44 = vld [vmem:[%s5165_s1 + $0x798] sm:$0xff] }
  0xe3   :  { %2365 = vmatprep.subr.bf16.mxu0 %v3177_v46  ;;  %2591 = vmatprep.subr.bf16.mxu1 %v3179_v16  ;;  %v293_v46 = vld [vmem:[%s5165_s1 + $0x7b8] sm:$0xff]  ;;  %v3216_v16 = vcombine.low %v280_v32, %v284_v35 }
  0xe4   :  { %v3227_v63 = vcombine.high %v289_v44, %v293_v46 }
  0xe5   :  { %2309 = vmatmul.mubr.bf16.gmra.mrb[48].mxu0 %v3929_v19  ;;  %2535 = vmatmul.mubr.bf16.gmra.mrb[48].mxu1 %v3929_v19  ;;  %v265_v19 = vld [vmem:[%s5165_s1 + $0x6d8] sm:$0xff] }
  0xe6   :  { %2366 = vmatpush1.bf16.msra.mxu0 %v3176_v55  ;;  %2592 = vmatpush1.bf16.msra.mxu1 %v3178_v56  ;;  %v3203_v20 = vcombine.high %v265_v19, %v269_v11  ;;  %v3202_v45 = vcombine.low %v265_v19, %v269_v11  ;;  %v300_v55 = vld [vmem:[%s5165_s1 + $0x7f0] sm:$0xff]  ;;  %v301_v56 = vld [vmem:[%s5165_s1 + $0x7f8] sm:$0xff] }
  0xe7   :  { %2367 = vmatprep.subr.bf16.mxu0 %v3185_v57  ;;  %2593 = vmatprep.subr.bf16.mxu1 %v3187_v60  ;;  %v3226_v60 = vcombine.low %v289_v44, %v293_v46  ;;  %v3233_v6 = vcombine.high %v296_v54, %v300_v55 }
  0xe8   :  { %2318 = vmatprep.mubr.bf16.mxu0 %v3940_v26  ;;  %2544 = vmatprep.mubr.bf16.mxu1 %v3940_v26  ;;  %v272_v26 = vld [vmem:[%s5165_s1 + $0x710] sm:$0xff] }
  0xe9   :  { %v3209_v30 = vcombine.high %v272_v26, %v276_v21  ;;  %v3208_v52 = vcombine.low %v272_v26, %v276_v21 }
  0xea   :  { %2368 = vmatpush1.bf16.msra.mxu0 %v3184_v1  ;;  %2594 = vmatpush1.bf16.msra.mxu1 %v3186_v2 }
  0xeb   :  { %2369 = vmatprep.subr.bf16.mxu0 %v3193_v4  ;;  %2595 = vmatprep.subr.bf16.mxu1 %v3195_v7 }
  0xed   :  { %2319 = vmatmul.mubr.bf16.gmra.mrb[52].mxu0 %v3967_v39  ;;  %2545 = vmatmul.mubr.bf16.gmra.mrb[52].mxu1 %v3967_v39  ;;  %v281_v39 = vld [vmem:[%s5165_s1 + $0x758] sm:$0xff] }
  0xee   :  { %2370 = vmatpush1.bf16.msra.mxu0 %v3192_v13  ;;  %2596 = vmatpush1.bf16.msra.mxu1 %v3194_v14  ;;  %v3219_v42 = vcombine.high %v281_v39, %v285_v36  ;;  %v3218_v48 = vcombine.low %v281_v39, %v285_v36 }
  0xef   :  { %2371 = vmatprep.subr.bf16.mxu0 %v3201_v15  ;;  %2597 = vmatprep.subr.bf16.mxu1 %v3203_v20 }
  0xf0   :  { %2328 = vmatprep.mubr.bf16.mxu0 %v3978_v47  ;;  %2554 = vmatprep.mubr.bf16.mxu1 %v3978_v47  ;;  %v288_v47 = vld [vmem:[%s5165_s1 + $0x790] sm:$0xff] }
  0xf1   :  { %v3225_v51 = vcombine.high %v288_v47, %v292_v43  ;;  %v3224_v57 = vcombine.low %v288_v47, %v292_v43 }
  0xf2   :  { %2372 = vmatpush1.bf16.msra.mxu0 %v3200_v29  ;;  %2598 = vmatpush1.bf16.msra.mxu1 %v3202_v45 }
  0xf3   :  { %2373 = vmatprep.subr.bf16.mxu0 %v3209_v30  ;;  %2599 = vmatprep.subr.bf16.mxu1 %v3211_v31 }
  0xf5   :  { %2329 = vmatmul.mubr.bf16.gmra.mrb[56].mxu0 %v4005_v59  ;;  %2555 = vmatmul.mubr.bf16.gmra.mrb[56].mxu1 %v4005_v59  ;;  %v297_v59 = vld [vmem:[%s5165_s1 + $0x7d8] sm:$0xff] }
  0xf6   :  { %2374 = vmatpush1.bf16.msra.mxu0 %v3208_v52  ;;  %2600 = vmatpush1.bf16.msra.mxu1 %v3210_v9  ;;  %v3235_v61 = vcombine.high %v297_v59, %v301_v56  ;;  %v3234_v0 = vcombine.low %v297_v59, %v301_v56 }
  0xf7   :  { %2375 = vmatprep.subr.bf16.mxu0 %v3217_v38  ;;  %2601 = vmatprep.subr.bf16.mxu1 %v3219_v42 }
  0xf8   :  { %2338 = vmatprep.mubr.bf16.mxu0 %v4016_v3  ;;  %2564 = vmatprep.mubr.bf16.mxu1 %v4016_v3  ;;  %v3232_v3 = vcombine.low %v296_v54, %v300_v55 }
  0xfa   :  { %2376 = vmatpush1.bf16.msra.mxu0 %v3216_v16  ;;  %2602 = vmatpush1.bf16.msra.mxu1 %v3218_v48 }
  0xfb   :  { %2377 = vmatprep.subr.bf16.mxu0 %v3225_v51  ;;  %2603 = vmatprep.subr.bf16.mxu1 %v3227_v63 }
  0xfd   :  { %2339 = vmatmul.mubr.bf16.gmra.mrb[60].mxu0 %v4043_v17  ;;  %2565 = vmatmul.mubr.bf16.gmra.mrb[60].mxu1 %v4043_v17  ;;  %v304_v17 = vlaneseq }
  0xfe   :  { %2378 = vmatpush1.bf16.msra.mxu0 %v3224_v57  ;;  %2604 = vmatpush1.bf16.msra.mxu1 %v3226_v60 }
  0xff   :  { %2379 = vmatprep.subr.bf16.mxu0 %v3233_v6  ;;  %2605 = vmatprep.subr.bf16.mxu1 %v3235_v61 }
 0x100   :  { %2381 = vmatprep.mubr.bf16.mxu0 %v4054_v25  ;;  %2607 = vmatprep.mubr.bf16.mxu1 %v4054_v25  ;;  %v4614_v25 = vshrl.u32 %v304_v17, 7 }
 0x102   :  { %2380 = vmatpush1.bf16.msra.mxu0 %v3232_v3  ;;  %2606 = vmatpush1.bf16.msra.mxu1 %v3234_v0 }
 0x105   :  { %2382 = vmatmul.mubr.bf16.vlgmr.msra.gmra.mrb[32].mxu0 %v4080_v40  ;;  %2608 = vmatmul.mubr.bf16.vlgmr.msra.gmra.mrb[32].mxu1 %v4080_v40  ;;  %v306_v40 = vsub.s32 0, %v4614_v25 }
 0x106   :  { %2391 = vmatprep.mubr.bf16.mxu0 %v4092_v49  ;;  %2617 = vmatprep.mubr.bf16.mxu1 %v4092_v49  ;;  %v4620_v49 = vld [vmem:[%s5167_s2] sm:$0xff] }
 0x10d   :  { %2392 = vmatmul.mubr.bf16.gmra.mrb[36].mxu0 %v4119_v62  ;;  %2618 = vmatmul.mubr.bf16.gmra.mrb[36].mxu1 %v4119_v62  ;;  %v314_v62 = vsub.s32 2, %v4614_v25 }
 0x10e   :  { %2401 = vmatprep.mubr.bf16.mxu0 %v4130_v8  ;;  %2627 = vmatprep.mubr.bf16.mxu1 %v4130_v8  ;;  %v310_v8 = vsub.s32 1, %v4614_v25 }
 0x115   :  { %2402 = vmatmul.mubr.bf16.gmra.mrb[40].mxu0 %v4157_v23  ;;  %2628 = vmatmul.mubr.bf16.gmra.mrb[40].mxu1 %v4157_v23  ;;  %v318_v23 = vsub.s32 3, %v4614_v25 }
 0x116   :  { %2411 = vmatprep.mubr.bf16.mxu0 %v4168_v33  ;;  %2637 = vmatprep.mubr.bf16.mxu1 %v4168_v33  ;;  %v4626_v33 = vrot.slane %v4620_v49, %v306_v40 }
 0x11d   :  { %2412 = vmatmul.mubr.bf16.gmra.mrb[44].mxu0 %v4195_v50  ;;  %2638 = vmatmul.mubr.bf16.gmra.mrb[44].mxu1 %v4195_v50  ;;  %v4629_v50 = vrot.slane %v4620_v49, %v314_v62 }
 0x11e   :  { %2421 = vmatprep.mubr.bf16.mxu0 %v4206_v58  ;;  %2647 = vmatprep.mubr.bf16.mxu1 %v4206_v58  ;;  %v4632_v58 = vrot.slane %v4620_v49, %v310_v8 }
 0x125   :  { %2422 = vmatmul.mubr.bf16.gmra.mrb[48].mxu0 %v4233_v12  ;;  %2648 = vmatmul.mubr.bf16.gmra.mrb[48].mxu1 %v4233_v12  ;;  %v4635_v12 = vrot.slane %v4620_v49, %v318_v23 }
 0x126   :  { %2431 = vmatprep.mubr.bf16.mxu0 %v4244_v22  ;;  %2657 = vmatprep.mubr.bf16.mxu1 %v4244_v22 }
 0x12d   :  { %2432 = vmatmul.mubr.bf16.gmra.mrb[52].mxu0 %v4271_v41  ;;  %2658 = vmatmul.mubr.bf16.gmra.mrb[52].mxu1 %v4271_v41 }
 0x12e   :  { %2441 = vmatprep.mubr.bf16.mxu0 %v4282_v53  ;;  %2667 = vmatprep.mubr.bf16.mxu1 %v4282_v53 }
 0x135   :  { %2442 = vmatmul.mubr.bf16.gmra.mrb[56].mxu0 %v4309_v5  ;;  %2668 = vmatmul.mubr.bf16.gmra.mrb[56].mxu1 %v4309_v5 }
 0x136   :  { %2451 = vmatprep.mubr.bf16.mxu0 %v4320_v18  ;;  %2677 = vmatprep.mubr.bf16.mxu1 %v4320_v18 }
 0x13d   :  { %2452 = vmatmul.mubr.bf16.gmra.mrb[60].mxu0 %v4347_v37  ;;  %2678 = vmatmul.mubr.bf16.gmra.mrb[60].mxu1 %v4347_v37 }
 0x158   :  { %v1931_v22 = vpop.f32.mrb[0].mxu0  ;;  %v2157_v53 = vpop.f32.mrb[0].mxu1 }
 0x159   :  { %v3236_v41 = vadd.f32 %v1931_v22, %v4626_v33  ;;  %v1933_v5 = vpop.f32.mrb[1].mxu0  ;;  %v3268_v18 = vadd.f32 %v2157_v53, %v4629_v50  ;;  %v2159_v27 = vpop.f32.mrb[1].mxu1 }
 0x15a   :  { %v3237_v37 = vadd.f32 %v1933_v5, %v4632_v58  ;;  %v1935_v1 = vpop.f32.mrb[2].mxu0  ;;  %v3269_v4 = vadd.f32 %v2159_v27, %v4635_v12  ;;  %v2161_v10 = vpop.f32.mrb[2].mxu1 }
 0x15b   :  { %v2688_v2 = vmax.f32 %v3236_v41, 0.0  ;;  %v3238_v7 = vadd.f32 %v1935_v1, %v4626_v33  ;;  %v1937_v34 = vpop.f32.mrb[3].mxu0  ;;  %v2690_v19 = vmax.f32 %v3268_v18, 0.0  ;;  %v3270_v13 = vadd.f32 %v2161_v10, %v4629_v50  ;;  %v2163_v15 = vpop.f32.mrb[3].mxu1 }
 0x15c   :  { %v2689_v11 = vmax.f32 %v3237_v37, 0.0  ;;  %v3239_v14 = vadd.f32 %v1937_v34, %v4632_v58  ;;  %v2691_v20 = vmax.f32 %v3269_v4, 0.0  ;;  %v3271_v21 = vadd.f32 %v2163_v15, %v4635_v12 }
 0x15d   :  { %2816 = vst [vmem:[%s5168_s3] sm:$0xff] %v2688_v2  ;;  %v2696_v26 = vmax.f32 %v3238_v7, 0.0  ;;  %2818 = vst [vmem:[%s5168_s3 + $0x10] sm:$0xff] %v2690_v19  ;;  %v2698_v24 = vmax.f32 %v3270_v13, 0.0 }
 0x15e   :  { %2817 = vst [vmem:[%s5168_s3 + $0x8] sm:$0xff] %v2689_v11  ;;  %v2697_v28 = vmax.f32 %v3239_v14, 0.0  ;;  %2819 = vst [vmem:[%s5168_s3 + $0x18] sm:$0xff] %v2691_v20  ;;  %v2699_v29 = vmax.f32 %v3271_v21, 0.0 }
 0x15f   :  { %2824 = vst [vmem:[%s5168_s3 + $0x40] sm:$0xff] %v2696_v26  ;;  %2826 = vst [vmem:[%s5168_s3 + $0x50] sm:$0xff] %v2698_v24 }
 0x160   :  { %2825 = vst [vmem:[%s5168_s3 + $0x48] sm:$0xff] %v2697_v28  ;;  %v1941_v45 = vpop.f32.mrb[4].mxu0  ;;  %2827 = vst [vmem:[%s5168_s3 + $0x58] sm:$0xff] %v2699_v29  ;;  %v2167_v31 = vpop.f32.mrb[4].mxu1 }
 0x161   :  { %v3240_v30 = vadd.f32 %v1941_v45, %v4626_v33  ;;  %v1943_v32 = vpop.f32.mrb[5].mxu0  ;;  %v3272_v35 = vadd.f32 %v2167_v31, %v4629_v50  ;;  %v2169_v36 = vpop.f32.mrb[5].mxu1 }
 0x162   :  { %v3241_v39 = vadd.f32 %v1943_v32, %v4632_v58  ;;  %v1945_v52 = vpop.f32.mrb[6].mxu0  ;;  %v3273_v38 = vadd.f32 %v2169_v36, %v4635_v12  ;;  %v2171_v47 = vpop.f32.mrb[6].mxu1 }
 0x163   :  { %v2704_v9 = vmax.f32 %v3240_v30, 0.0  ;;  %v3242_v42 = vadd.f32 %v1945_v52, %v4626_v33  ;;  %v1947_v43 = vpop.f32.mrb[7].mxu0  ;;  %v2706_v44 = vmax.f32 %v3272_v35, 0.0  ;;  %v3274_v16 = vadd.f32 %v2171_v47, %v4629_v50  ;;  %v2173_v51 = vpop.f32.mrb[7].mxu1 }
 0x164   :  { %v2705_v46 = vmax.f32 %v3241_v39, 0.0  ;;  %v3243_v48 = vadd.f32 %v1947_v43, %v4632_v58  ;;  %v2707_v63 = vmax.f32 %v3273_v38, 0.0  ;;  %v3275_v55 = vadd.f32 %v2173_v51, %v4635_v12 }
 0x165   :  { %2832 = vst [vmem:[%s5168_s3 + $0x80] sm:$0xff] %v2704_v9  ;;  %v2712_v54 = vmax.f32 %v3242_v42, 0.0  ;;  %2834 = vst [vmem:[%s5168_s3 + $0x90] sm:$0xff] %v2706_v44  ;;  %v2714_v59 = vmax.f32 %v3274_v16, 0.0 }
 0x166   :  { %2833 = vst [vmem:[%s5168_s3 + $0x88] sm:$0xff] %v2705_v46  ;;  %v2713_v56 = vmax.f32 %v3243_v48, 0.0  ;;  %2835 = vst [vmem:[%s5168_s3 + $0x98] sm:$0xff] %v2707_v63  ;;  %v2715_v57 = vmax.f32 %v3275_v55, 0.0 }
 0x167   :  { %2840 = vst [vmem:[%s5168_s3 + $0xc0] sm:$0xff] %v2712_v54  ;;  %2842 = vst [vmem:[%s5168_s3 + $0xd0] sm:$0xff] %v2714_v59 }
 0x168   :  { %2841 = vst [vmem:[%s5168_s3 + $0xc8] sm:$0xff] %v2713_v56  ;;  %v1951_v60 = vpop.f32.mrb[8].mxu0  ;;  %2843 = vst [vmem:[%s5168_s3 + $0xd8] sm:$0xff] %v2715_v57  ;;  %v2177_v61 = vpop.f32.mrb[8].mxu1 }
 0x169   :  { %v3244_v6 = vadd.f32 %v1951_v60, %v4626_v33  ;;  %v1953_v3 = vpop.f32.mrb[9].mxu0  ;;  %v3276_v0 = vadd.f32 %v2177_v61, %v4629_v50  ;;  %v2179_v40 = vpop.f32.mrb[9].mxu1 }
 0x16a   :  { %v3245_v17 = vadd.f32 %v1953_v3, %v4632_v58  ;;  %v1955_v62 = vpop.f32.mrb[10].mxu0  ;;  %v3277_v23 = vadd.f32 %v2179_v40, %v4635_v12  ;;  %v2181_v41 = vpop.f32.mrb[10].mxu1 }
 0x16b   :  { %v2720_v8 = vmax.f32 %v3244_v6, 0.0  ;;  %v3246_v22 = vadd.f32 %v1955_v62, %v4626_v33  ;;  %v1957_v53 = vpop.f32.mrb[11].mxu0  ;;  %v2722_v5 = vmax.f32 %v3276_v0, 0.0  ;;  %v3278_v37 = vadd.f32 %v2181_v41, %v4629_v50  ;;  %v2183_v1 = vpop.f32.mrb[11].mxu1 }
 0x16c   :  { %v2721_v18 = vmax.f32 %v3245_v17, 0.0  ;;  %v3247_v27 = vadd.f32 %v1957_v53, %v4632_v58  ;;  %v2723_v2 = vmax.f32 %v3277_v23, 0.0  ;;  %v3279_v7 = vadd.f32 %v2183_v1, %v4635_v12 }
 0x16d   :  { %2848 = vst [vmem:[%s5168_s3 + $0x100] sm:$0xff] %v2720_v8  ;;  %v2728_v4 = vmax.f32 %v3246_v22, 0.0  ;;  %2850 = vst [vmem:[%s5168_s3 + $0x110] sm:$0xff] %v2722_v5  ;;  %v2730_v10 = vmax.f32 %v3278_v37, 0.0 }
 0x16e   :  { %2849 = vst [vmem:[%s5168_s3 + $0x108] sm:$0xff] %v2721_v18  ;;  %v2729_v34 = vmax.f32 %v3247_v27, 0.0  ;;  %2851 = vst [vmem:[%s5168_s3 + $0x118] sm:$0xff] %v2723_v2  ;;  %v2731_v19 = vmax.f32 %v3279_v7, 0.0 }
 0x16f   :  { %2856 = vst [vmem:[%s5168_s3 + $0x140] sm:$0xff] %v2728_v4  ;;  %2858 = vst [vmem:[%s5168_s3 + $0x150] sm:$0xff] %v2730_v10 }
 0x170   :  { %2857 = vst [vmem:[%s5168_s3 + $0x148] sm:$0xff] %v2729_v34  ;;  %v1961_v11 = vpop.f32.mrb[12].mxu0  ;;  %2859 = vst [vmem:[%s5168_s3 + $0x158] sm:$0xff] %v2731_v19  ;;  %v2187_v14 = vpop.f32.mrb[12].mxu1 }
 0x171   :  { %v3248_v13 = vadd.f32 %v1961_v11, %v4626_v33  ;;  %v1963_v15 = vpop.f32.mrb[13].mxu0  ;;  %v3280_v20 = vadd.f32 %v2187_v14, %v4629_v50  ;;  %v2189_v21 = vpop.f32.mrb[13].mxu1 }
 0x172   :  { %v3249_v26 = vadd.f32 %v1963_v15, %v4632_v58  ;;  %v1965_v24 = vpop.f32.mrb[14].mxu0  ;;  %v3281_v29 = vadd.f32 %v2189_v21, %v4635_v12  ;;  %v2191_v30 = vpop.f32.mrb[14].mxu1 }
 0x173   :  { %v2736_v28 = vmax.f32 %v3248_v13, 0.0  ;;  %v3250_v45 = vadd.f32 %v1965_v24, %v4626_v33  ;;  %v1967_v31 = vpop.f32.mrb[15].mxu0  ;;  %v2738_v32 = vmax.f32 %v3280_v20, 0.0  ;;  %v3282_v39 = vadd.f32 %v2191_v30, %v4629_v50  ;;  %v2193_v52 = vpop.f32.mrb[15].mxu1 }
 0x174   :  { %v2737_v35 = vmax.f32 %v3249_v26, 0.0  ;;  %v3251_v36 = vadd.f32 %v1967_v31, %v4632_v58  ;;  %v2739_v9 = vmax.f32 %v3281_v29, 0.0  ;;  %v3283_v42 = vadd.f32 %v2193_v52, %v4635_v12 }
 0x175   :  { %2864 = vst [vmem:[%s5168_s3 + $0x180] sm:$0xff] %v2736_v28  ;;  %v2744_v38 = vmax.f32 %v3250_v45, 0.0  ;;  %2866 = vst [vmem:[%s5168_s3 + $0x190] sm:$0xff] %v2738_v32  ;;  %v2746_v47 = vmax.f32 %v3282_v39, 0.0 }
 0x176   :  { %2865 = vst [vmem:[%s5168_s3 + $0x188] sm:$0xff] %v2737_v35  ;;  %v2745_v43 = vmax.f32 %v3251_v36, 0.0  ;;  %2867 = vst [vmem:[%s5168_s3 + $0x198] sm:$0xff] %v2739_v9  ;;  %v2747_v44 = vmax.f32 %v3283_v42, 0.0 }
 0x177   :  { %2872 = vst [vmem:[%s5168_s3 + $0x1c0] sm:$0xff] %v2744_v38  ;;  %2874 = vst [vmem:[%s5168_s3 + $0x1d0] sm:$0xff] %v2746_v47 }
 0x178   :  { %2873 = vst [vmem:[%s5168_s3 + $0x1c8] sm:$0xff] %v2745_v43  ;;  %v1971_v46 = vpop.f32.mrb[16].mxu0  ;;  %2875 = vst [vmem:[%s5168_s3 + $0x1d8] sm:$0xff] %v2747_v44  ;;  %v2197_v48 = vpop.f32.mrb[16].mxu1 }
 0x179   :  { %v3252_v16 = vadd.f32 %v1971_v46, %v4626_v33  ;;  %v1973_v51 = vpop.f32.mrb[17].mxu0  ;;  %v3284_v63 = vadd.f32 %v2197_v48, %v4629_v50  ;;  %v2199_v55 = vpop.f32.mrb[17].mxu1 }
 0x17a   :  { %v3253_v54 = vadd.f32 %v1973_v51, %v4632_v58  ;;  %v1975_v59 = vpop.f32.mrb[18].mxu0  ;;  %v3285_v57 = vadd.f32 %v2199_v55, %v4635_v12  ;;  %v2201_v6 = vpop.f32.mrb[18].mxu1 }
 0x17b   :  { %v2752_v56 = vmax.f32 %v3252_v16, 0.0  ;;  %v3254_v60 = vadd.f32 %v1975_v59, %v4626_v33  ;;  %v1977_v61 = vpop.f32.mrb[19].mxu0  ;;  %v2754_v3 = vmax.f32 %v3284_v63, 0.0  ;;  %v3286_v17 = vadd.f32 %v2201_v6, %v4629_v50  ;;  %v2203_v62 = vpop.f32.mrb[19].mxu1 }
 0x17c   :  { %v2753_v0 = vmax.f32 %v3253_v54, 0.0  ;;  %v3255_v40 = vadd.f32 %v1977_v61, %v4632_v58  ;;  %v2755_v8 = vmax.f32 %v3285_v57, 0.0  ;;  %v3287_v22 = vadd.f32 %v2203_v62, %v4635_v12 }
 0x17d   :  { %2880 = vst [vmem:[%s5168_s3 + $0x200] sm:$0xff] %v2752_v56  ;;  %v2760_v23 = vmax.f32 %v3254_v60, 0.0  ;;  %2882 = vst [vmem:[%s5168_s3 + $0x210] sm:$0xff] %v2754_v3  ;;  %v2762_v41 = vmax.f32 %v3286_v17, 0.0 }
 0x17e   :  { %2881 = vst [vmem:[%s5168_s3 + $0x208] sm:$0xff] %v2753_v0  ;;  %v2761_v53 = vmax.f32 %v3255_v40, 0.0  ;;  %2883 = vst [vmem:[%s5168_s3 + $0x218] sm:$0xff] %v2755_v8  ;;  %v2763_v5 = vmax.f32 %v3287_v22, 0.0 }
 0x17f   :  { %2888 = vst [vmem:[%s5168_s3 + $0x240] sm:$0xff] %v2760_v23  ;;  %2890 = vst [vmem:[%s5168_s3 + $0x250] sm:$0xff] %v2762_v41 }
 0x180   :  { %2889 = vst [vmem:[%s5168_s3 + $0x248] sm:$0xff] %v2761_v53  ;;  %v1981_v18 = vpop.f32.mrb[20].mxu0  ;;  %2891 = vst [vmem:[%s5168_s3 + $0x258] sm:$0xff] %v2763_v5  ;;  %v2207_v27 = vpop.f32.mrb[20].mxu1 }
 0x181   :  { %v3256_v37 = vadd.f32 %v1981_v18, %v4626_v33  ;;  %v1983_v1 = vpop.f32.mrb[21].mxu0  ;;  %v3288_v2 = vadd.f32 %v2207_v27, %v4629_v50  ;;  %v2209_v7 = vpop.f32.mrb[21].mxu1 }
 0x182   :  { %v3257_v4 = vadd.f32 %v1983_v1, %v4632_v58  ;;  %v1985_v10 = vpop.f32.mrb[22].mxu0  ;;  %v3289_v19 = vadd.f32 %v2209_v7, %v4635_v12  ;;  %v2211_v13 = vpop.f32.mrb[22].mxu1 }
 0x183   :  { %v2768_v34 = vmax.f32 %v3256_v37, 0.0  ;;  %v3258_v11 = vadd.f32 %v1985_v10, %v4626_v33  ;;  %v1987_v14 = vpop.f32.mrb[23].mxu0  ;;  %v2770_v15 = vmax.f32 %v3288_v2, 0.0  ;;  %v3290_v26 = vadd.f32 %v2211_v13, %v4629_v50  ;;  %v2213_v24 = vpop.f32.mrb[23].mxu1 }
 0x184   :  { %v2769_v20 = vmax.f32 %v3257_v4, 0.0  ;;  %v3259_v21 = vadd.f32 %v1987_v14, %v4632_v58  ;;  %v2771_v28 = vmax.f32 %v3289_v19, 0.0  ;;  %v3291_v45 = vadd.f32 %v2213_v24, %v4635_v12 }
 0x185   :  { %2896 = vst [vmem:[%s5168_s3 + $0x280] sm:$0xff] %v2768_v34  ;;  %v2776_v29 = vmax.f32 %v3258_v11, 0.0  ;;  %2898 = vst [vmem:[%s5168_s3 + $0x290] sm:$0xff] %v2770_v15  ;;  %v2778_v30 = vmax.f32 %v3290_v26, 0.0  ;;  %v330_v13 = vsub.s32 6, %v4614_v25  ;;  %v326_v14 = vsub.s32 5, %v4614_v25 }
 0x186   :  { %2897 = vst [vmem:[%s5168_s3 + $0x288] sm:$0xff] %v2769_v20  ;;  %v2777_v31 = vmax.f32 %v3259_v21, 0.0  ;;  %2899 = vst [vmem:[%s5168_s3 + $0x298] sm:$0xff] %v2771_v28  ;;  %v2779_v32 = vmax.f32 %v3291_v45, 0.0  ;;  %v334_v15 = vsub.s32 7, %v4614_v25 }
 0x187   :  { %2904 = vst [vmem:[%s5168_s3 + $0x2c0] sm:$0xff] %v2776_v29  ;;  %2906 = vst [vmem:[%s5168_s3 + $0x2d0] sm:$0xff] %v2778_v30  ;;  %v4901_v26 = vrot.slane %v4620_v49, %v330_v13  ;;  %v4904_v21 = vrot.slane %v4620_v49, %v326_v14 }
 0x188   :  { %2905 = vst [vmem:[%s5168_s3 + $0x2c8] sm:$0xff] %v2777_v31  ;;  %v1991_v35 = vpop.f32.mrb[24].mxu0  ;;  %2907 = vst [vmem:[%s5168_s3 + $0x2d8] sm:$0xff] %v2779_v32  ;;  %v2217_v36 = vpop.f32.mrb[24].mxu1  ;;  %v4907_v24 = vrot.slane %v4620_v49, %v334_v15 }
 0x189   :  { %v3260_v39 = vadd.f32 %v1991_v35, %v4626_v33  ;;  %v1993_v52 = vpop.f32.mrb[25].mxu0  ;;  %v3292_v9 = vadd.f32 %v2217_v36, %v4629_v50  ;;  %v2219_v42 = vpop.f32.mrb[25].mxu1 }
 0x18a   :  { %v3261_v38 = vadd.f32 %v1993_v52, %v4632_v58  ;;  %v1995_v47 = vpop.f32.mrb[26].mxu0  ;;  %v3293_v44 = vadd.f32 %v2219_v42, %v4635_v12  ;;  %v2221_v16 = vpop.f32.mrb[26].mxu1 }
 0x18b   :  { %v2784_v43 = vmax.f32 %v3260_v39, 0.0  ;;  %v3262_v46 = vadd.f32 %v1995_v47, %v4626_v33  ;;  %v1997_v48 = vpop.f32.mrb[27].mxu0  ;;  %v2786_v51 = vmax.f32 %v3292_v9, 0.0  ;;  %v3294_v54 = vadd.f32 %v2221_v16, %v4629_v50  ;;  %v2223_v59 = vpop.f32.mrb[27].mxu1 }
 0x18c   :  { %v2785_v63 = vmax.f32 %v3261_v38, 0.0  ;;  %v3263_v55 = vadd.f32 %v1997_v48, %v4632_v58  ;;  %v2787_v56 = vmax.f32 %v3293_v44, 0.0  ;;  %v3295_v60 = vadd.f32 %v2223_v59, %v4635_v12 }
 0x18d   :  { %2912 = vst [vmem:[%s5168_s3 + $0x300] sm:$0xff] %v2784_v43  ;;  %v2792_v57 = vmax.f32 %v3262_v46, 0.0  ;;  %2914 = vst [vmem:[%s5168_s3 + $0x310] sm:$0xff] %v2786_v51  ;;  %v2794_v6 = vmax.f32 %v3294_v54, 0.0 }
 0x18e   :  { %2913 = vst [vmem:[%s5168_s3 + $0x308] sm:$0xff] %v2785_v63  ;;  %v2793_v61 = vmax.f32 %v3263_v55, 0.0  ;;  %2915 = vst [vmem:[%s5168_s3 + $0x318] sm:$0xff] %v2787_v56  ;;  %v2795_v3 = vmax.f32 %v3295_v60, 0.0 }
 0x18f   :  { %2920 = vst [vmem:[%s5168_s3 + $0x340] sm:$0xff] %v2792_v57  ;;  %2922 = vst [vmem:[%s5168_s3 + $0x350] sm:$0xff] %v2794_v6 }
 0x190   :  { %2921 = vst [vmem:[%s5168_s3 + $0x348] sm:$0xff] %v2793_v61  ;;  %v2001_v0 = vpop.f32.mrb[28].mxu0  ;;  %2923 = vst [vmem:[%s5168_s3 + $0x358] sm:$0xff] %v2795_v3  ;;  %v2227_v40 = vpop.f32.mrb[28].mxu1 }
 0x191   :  { %v3264_v17 = vadd.f32 %v2001_v0, %v4626_v33  ;;  %v2003_v62 = vpop.f32.mrb[29].mxu0  ;;  %v3296_v8 = vadd.f32 %v2227_v40, %v4629_v50  ;;  %v2229_v22 = vpop.f32.mrb[29].mxu1 }
 0x192   :  { %v3265_v23 = vadd.f32 %v2003_v62, %v4632_v58  ;;  %v2005_v41 = vpop.f32.mrb[30].mxu0  ;;  %v3297_v5 = vadd.f32 %v2229_v22, %v4635_v12  ;;  %v2231_v37 = vpop.f32.mrb[30].mxu1 }
 0x193   :  { %v2800_v53 = vmax.f32 %v3264_v17, 0.0  ;;  %v3266_v18 = vadd.f32 %v2005_v41, %v4626_v33  ;;  %v2007_v27 = vpop.f32.mrb[31].mxu0  ;;  %v2802_v1 = vmax.f32 %v3296_v8, 0.0  ;;  %v3298_v4 = vadd.f32 %v2231_v37, %v4629_v50  ;;  %v2233_v10 = vpop.f32.mrb[31].mxu1 }
 0x194   :  { %v2801_v2 = vmax.f32 %v3265_v23, 0.0  ;;  %v3267_v7 = vadd.f32 %v2007_v27, %v4632_v58  ;;  %v2803_v34 = vmax.f32 %v3297_v5, 0.0  ;;  %v3299_v11 = vadd.f32 %v2233_v10, %v4635_v12 }
 0x195   :  { %2928 = vst [vmem:[%s5168_s3 + $0x380] sm:$0xff] %v2800_v53  ;;  %v2808_v19 = vmax.f32 %v3266_v18, 0.0  ;;  %2930 = vst [vmem:[%s5168_s3 + $0x390] sm:$0xff] %v2802_v1  ;;  %v2810_v33 = vmax.f32 %v3298_v4, 0.0  ;;  %v322_v12 = vsub.s32 4, %v4614_v25 }
 0x196   :  { %2929 = vst [vmem:[%s5168_s3 + $0x388] sm:$0xff] %v2801_v2  ;;  %v2809_v50 = vmax.f32 %v3267_v7, 0.0  ;;  %2931 = vst [vmem:[%s5168_s3 + $0x398] sm:$0xff] %v2803_v34  ;;  %v2811_v58 = vmax.f32 %v3299_v11, 0.0 }
 0x197   :  { %2936 = vst [vmem:[%s5168_s3 + $0x3c0] sm:$0xff] %v2808_v19  ;;  %2938 = vst [vmem:[%s5168_s3 + $0x3d0] sm:$0xff] %v2810_v33  ;;  %v4898_v20 = vrot.slane %v4620_v49, %v322_v12 }
 0x198   :  { %2937 = vst [vmem:[%s5168_s3 + $0x3c8] sm:$0xff] %v2809_v50  ;;  %2939 = vst [vmem:[%s5168_s3 + $0x3d8] sm:$0xff] %v2811_v58 }
 0x1d8   :  { %v2383_v28 = vpop.f32.mrb[32].mxu0  ;;  %v2609_v45 = vpop.f32.mrb[32].mxu1 }
 0x1d9   :  { %v3300_v29 = vadd.f32 %v2383_v28, %v4898_v20  ;;  %v2385_v30 = vpop.f32.mrb[33].mxu0  ;;  %v3332_v31 = vadd.f32 %v2609_v45, %v4901_v26  ;;  %v2611_v32 = vpop.f32.mrb[33].mxu1 }
 0x1da   :  { %v3301_v25 = vadd.f32 %v2385_v30, %v4904_v21  ;;  %v2387_v35 = vpop.f32.mrb[34].mxu0  ;;  %v3333_v36 = vadd.f32 %v2611_v32, %v4907_v24  ;;  %v2613_v9 = vpop.f32.mrb[34].mxu1 }
 0x1db   :  { %v2692_v39 = vmax.f32 %v3300_v29, 0.0  ;;  %v3302_v52 = vadd.f32 %v2387_v35, %v4898_v20  ;;  %v2389_v38 = vpop.f32.mrb[35].mxu0  ;;  %v2694_v49 = vmax.f32 %v3332_v31, 0.0  ;;  %v3334_v47 = vadd.f32 %v2613_v9, %v4901_v26  ;;  %v2615_v44 = vpop.f32.mrb[35].mxu1 }
 0x1dc   :  { %v2693_v42 = vmax.f32 %v3301_v25, 0.0  ;;  %v3303_v43 = vadd.f32 %v2389_v38, %v4904_v21  ;;  %v2695_v46 = vmax.f32 %v3333_v36, 0.0  ;;  %v3335_v48 = vadd.f32 %v2615_v44, %v4907_v24 }
 0x1dd   :  { %2820 = vst [vmem:[%s5168_s3 + $0x20] sm:$0xff] %v2692_v39  ;;  %v2700_v16 = vmax.f32 %v3302_v52, 0.0  ;;  %2822 = vst [vmem:[%s5168_s3 + $0x30] sm:$0xff] %v2694_v49  ;;  %v2702_v51 = vmax.f32 %v3334_v47, 0.0 }
 0x1de   :  { %2821 = vst [vmem:[%s5168_s3 + $0x28] sm:$0xff] %v2693_v42  ;;  %v2701_v63 = vmax.f32 %v3303_v43, 0.0  ;;  %2823 = vst [vmem:[%s5168_s3 + $0x38] sm:$0xff] %v2695_v46  ;;  %v2703_v54 = vmax.f32 %v3335_v48, 0.0 }
 0x1df   :  { %2828 = vst [vmem:[%s5168_s3 + $0x60] sm:$0xff] %v2700_v16  ;;  %2830 = vst [vmem:[%s5168_s3 + $0x70] sm:$0xff] %v2702_v51 }
 0x1e0   :  { %2829 = vst [vmem:[%s5168_s3 + $0x68] sm:$0xff] %v2701_v63  ;;  %v2393_v55 = vpop.f32.mrb[36].mxu0  ;;  %2831 = vst [vmem:[%s5168_s3 + $0x78] sm:$0xff] %v2703_v54  ;;  %v2619_v56 = vpop.f32.mrb[36].mxu1 }
 0x1e1   :  { %v3304_v59 = vadd.f32 %v2393_v55, %v4898_v20  ;;  %v2395_v57 = vpop.f32.mrb[37].mxu0  ;;  %v3336_v60 = vadd.f32 %v2619_v56, %v4901_v26  ;;  %v2621_v61 = vpop.f32.mrb[37].mxu1 }
 0x1e2   :  { %v3305_v6 = vadd.f32 %v2395_v57, %v4904_v21  ;;  %v2397_v3 = vpop.f32.mrb[38].mxu0  ;;  %v3337_v17 = vadd.f32 %v2621_v61, %v4907_v24  ;;  %v2623_v62 = vpop.f32.mrb[38].mxu1 }
 0x1e3   :  { %v2708_v0 = vmax.f32 %v3304_v59, 0.0  ;;  %v3306_v40 = vadd.f32 %v2397_v3, %v4898_v20  ;;  %v2399_v8 = vpop.f32.mrb[39].mxu0  ;;  %v2710_v23 = vmax.f32 %v3336_v60, 0.0  ;;  %v3338_v41 = vadd.f32 %v2623_v62, %v4901_v26  ;;  %v2625_v5 = vpop.f32.mrb[39].mxu1 }
 0x1e4   :  { %v2709_v22 = vmax.f32 %v3305_v6, 0.0  ;;  %v3307_v53 = vadd.f32 %v2399_v8, %v4904_v21  ;;  %v2711_v18 = vmax.f32 %v3337_v17, 0.0  ;;  %v3339_v27 = vadd.f32 %v2625_v5, %v4907_v24 }
 0x1e5   :  { %2836 = vst [vmem:[%s5168_s3 + $0xa0] sm:$0xff] %v2708_v0  ;;  %v2716_v37 = vmax.f32 %v3306_v40, 0.0  ;;  %2838 = vst [vmem:[%s5168_s3 + $0xb0] sm:$0xff] %v2710_v23  ;;  %v2718_v1 = vmax.f32 %v3338_v41, 0.0 }
 0x1e6   :  { %2837 = vst [vmem:[%s5168_s3 + $0xa8] sm:$0xff] %v2709_v22  ;;  %v2717_v2 = vmax.f32 %v3307_v53, 0.0  ;;  %2839 = vst [vmem:[%s5168_s3 + $0xb8] sm:$0xff] %v2711_v18  ;;  %v2719_v4 = vmax.f32 %v3339_v27, 0.0 }
 0x1e7   :  { %2844 = vst [vmem:[%s5168_s3 + $0xe0] sm:$0xff] %v2716_v37  ;;  %2846 = vst [vmem:[%s5168_s3 + $0xf0] sm:$0xff] %v2718_v1 }
 0x1e8   :  { %2845 = vst [vmem:[%s5168_s3 + $0xe8] sm:$0xff] %v2717_v2  ;;  %v2403_v7 = vpop.f32.mrb[40].mxu0  ;;  %2847 = vst [vmem:[%s5168_s3 + $0xf8] sm:$0xff] %v2719_v4  ;;  %v2629_v34 = vpop.f32.mrb[40].mxu1 }
 0x1e9   :  { %v3308_v10 = vadd.f32 %v2403_v7, %v4898_v20  ;;  %v2405_v19 = vpop.f32.mrb[41].mxu0  ;;  %v3340_v11 = vadd.f32 %v2629_v34, %v4901_v26  ;;  %v2631_v50 = vpop.f32.mrb[41].mxu1 }
 0x1ea   :  { %v3309_v33 = vadd.f32 %v2405_v19, %v4904_v21  ;;  %v2407_v58 = vpop.f32.mrb[42].mxu0  ;;  %v3341_v13 = vadd.f32 %v2631_v50, %v4907_v24  ;;  %v2633_v15 = vpop.f32.mrb[42].mxu1 }
 0x1eb   :  { %v2724_v12 = vmax.f32 %v3308_v10, 0.0  ;;  %v3310_v14 = vadd.f32 %v2407_v58, %v4898_v20  ;;  %v2409_v28 = vpop.f32.mrb[43].mxu0  ;;  %v2726_v29 = vmax.f32 %v3340_v11, 0.0  ;;  %v3342_v30 = vadd.f32 %v2633_v15, %v4901_v26  ;;  %v2635_v25 = vpop.f32.mrb[43].mxu1 }
 0x1ec   :  { %v2725_v45 = vmax.f32 %v3309_v33, 0.0  ;;  %v3311_v31 = vadd.f32 %v2409_v28, %v4904_v21  ;;  %v2727_v32 = vmax.f32 %v3341_v13, 0.0  ;;  %v3343_v39 = vadd.f32 %v2635_v25, %v4907_v24 }
 0x1ed   :  { %2852 = vst [vmem:[%s5168_s3 + $0x120] sm:$0xff] %v2724_v12  ;;  %v2732_v35 = vmax.f32 %v3310_v14, 0.0  ;;  %2854 = vst [vmem:[%s5168_s3 + $0x130] sm:$0xff] %v2726_v29  ;;  %v2734_v36 = vmax.f32 %v3342_v30, 0.0 }
 0x1ee   :  { %2853 = vst [vmem:[%s5168_s3 + $0x128] sm:$0xff] %v2725_v45  ;;  %v2733_v52 = vmax.f32 %v3311_v31, 0.0  ;;  %2855 = vst [vmem:[%s5168_s3 + $0x138] sm:$0xff] %v2727_v32  ;;  %v2735_v9 = vmax.f32 %v3343_v39, 0.0 }
 0x1ef   :  { %2860 = vst [vmem:[%s5168_s3 + $0x160] sm:$0xff] %v2732_v35  ;;  %2862 = vst [vmem:[%s5168_s3 + $0x170] sm:$0xff] %v2734_v36 }
 0x1f0   :  { %2861 = vst [vmem:[%s5168_s3 + $0x168] sm:$0xff] %v2733_v52  ;;  %v2413_v38 = vpop.f32.mrb[44].mxu0  ;;  %2863 = vst [vmem:[%s5168_s3 + $0x178] sm:$0xff] %v2735_v9  ;;  %v2639_v42 = vpop.f32.mrb[44].mxu1 }
 0x1f1   :  { %v3312_v49 = vadd.f32 %v2413_v38, %v4898_v20  ;;  %v2415_v47 = vpop.f32.mrb[45].mxu0  ;;  %v3344_v43 = vadd.f32 %v2639_v42, %v4901_v26  ;;  %v2641_v46 = vpop.f32.mrb[45].mxu1 }
 0x1f2   :  { %v3313_v44 = vadd.f32 %v2415_v47, %v4904_v21  ;;  %v2417_v16 = vpop.f32.mrb[46].mxu0  ;;  %v3345_v51 = vadd.f32 %v2641_v46, %v4907_v24  ;;  %v2643_v54 = vpop.f32.mrb[46].mxu1 }
 0x1f3   :  { %v2740_v48 = vmax.f32 %v3312_v49, 0.0  ;;  %v3314_v63 = vadd.f32 %v2417_v16, %v4898_v20  ;;  %v2419_v55 = vpop.f32.mrb[47].mxu0  ;;  %v2742_v59 = vmax.f32 %v3344_v43, 0.0  ;;  %v3346_v57 = vadd.f32 %v2643_v54, %v4901_v26  ;;  %v2645_v6 = vpop.f32.mrb[47].mxu1 }
 0x1f4   :  { %v2741_v56 = vmax.f32 %v3313_v44, 0.0  ;;  %v3315_v60 = vadd.f32 %v2419_v55, %v4904_v21  ;;  %v2743_v61 = vmax.f32 %v3345_v51, 0.0  ;;  %v3347_v0 = vadd.f32 %v2645_v6, %v4907_v24 }
 0x1f5   :  { %2868 = vst [vmem:[%s5168_s3 + $0x1a0] sm:$0xff] %v2740_v48  ;;  %v2748_v3 = vmax.f32 %v3314_v63, 0.0  ;;  %2870 = vst [vmem:[%s5168_s3 + $0x1b0] sm:$0xff] %v2742_v59  ;;  %v2750_v17 = vmax.f32 %v3346_v57, 0.0 }
 0x1f6   :  { %2869 = vst [vmem:[%s5168_s3 + $0x1a8] sm:$0xff] %v2741_v56  ;;  %v2749_v40 = vmax.f32 %v3315_v60, 0.0  ;;  %2871 = vst [vmem:[%s5168_s3 + $0x1b8] sm:$0xff] %v2743_v61  ;;  %v2751_v62 = vmax.f32 %v3347_v0, 0.0 }
 0x1f7   :  { %2876 = vst [vmem:[%s5168_s3 + $0x1e0] sm:$0xff] %v2748_v3  ;;  %2878 = vst [vmem:[%s5168_s3 + $0x1f0] sm:$0xff] %v2750_v17 }
 0x1f8   :  { %2877 = vst [vmem:[%s5168_s3 + $0x1e8] sm:$0xff] %v2749_v40  ;;  %v2423_v8 = vpop.f32.mrb[48].mxu0  ;;  %2879 = vst [vmem:[%s5168_s3 + $0x1f8] sm:$0xff] %v2751_v62  ;;  %v2649_v22 = vpop.f32.mrb[48].mxu1 }
 0x1f9   :  { %v3316_v23 = vadd.f32 %v2423_v8, %v4898_v20  ;;  %v2425_v41 = vpop.f32.mrb[49].mxu0  ;;  %v3348_v53 = vadd.f32 %v2649_v22, %v4901_v26  ;;  %v2651_v18 = vpop.f32.mrb[49].mxu1 }
 0x1fa   :  { %v3317_v5 = vadd.f32 %v2425_v41, %v4904_v21  ;;  %v2427_v37 = vpop.f32.mrb[50].mxu0  ;;  %v3349_v1 = vadd.f32 %v2651_v18, %v4907_v24  ;;  %v2653_v4 = vpop.f32.mrb[50].mxu1 }
 0x1fb   :  { %v2756_v27 = vmax.f32 %v3316_v23, 0.0  ;;  %v3318_v2 = vadd.f32 %v2427_v37, %v4898_v20  ;;  %v2429_v7 = vpop.f32.mrb[51].mxu0  ;;  %v2758_v10 = vmax.f32 %v3348_v53, 0.0  ;;  %v3350_v19 = vadd.f32 %v2653_v4, %v4901_v26  ;;  %v2655_v33 = vpop.f32.mrb[51].mxu1 }
 0x1fc   :  { %v2757_v34 = vmax.f32 %v3317_v5, 0.0  ;;  %v3319_v11 = vadd.f32 %v2429_v7, %v4904_v21  ;;  %v2759_v50 = vmax.f32 %v3349_v1, 0.0  ;;  %v3351_v12 = vadd.f32 %v2655_v33, %v4907_v24 }
 0x1fd   :  { %2884 = vst [vmem:[%s5168_s3 + $0x220] sm:$0xff] %v2756_v27  ;;  %v2764_v58 = vmax.f32 %v3318_v2, 0.0  ;;  %2886 = vst [vmem:[%s5168_s3 + $0x230] sm:$0xff] %v2758_v10  ;;  %v2766_v13 = vmax.f32 %v3350_v19, 0.0 }
 0x1fe   :  { %2885 = vst [vmem:[%s5168_s3 + $0x228] sm:$0xff] %v2757_v34  ;;  %v2765_v14 = vmax.f32 %v3319_v11, 0.0  ;;  %2887 = vst [vmem:[%s5168_s3 + $0x238] sm:$0xff] %v2759_v50  ;;  %v2767_v15 = vmax.f32 %v3351_v12, 0.0 }
 0x1ff   :  { %2892 = vst [vmem:[%s5168_s3 + $0x260] sm:$0xff] %v2764_v58  ;;  %2894 = vst [vmem:[%s5168_s3 + $0x270] sm:$0xff] %v2766_v13 }
 0x200   :  { %2893 = vst [vmem:[%s5168_s3 + $0x268] sm:$0xff] %v2765_v14  ;;  %v2433_v28 = vpop.f32.mrb[52].mxu0  ;;  %2895 = vst [vmem:[%s5168_s3 + $0x278] sm:$0xff] %v2767_v15  ;;  %v2659_v45 = vpop.f32.mrb[52].mxu1 }
 0x201   :  { %v3320_v29 = vadd.f32 %v2433_v28, %v4898_v20  ;;  %v2435_v30 = vpop.f32.mrb[53].mxu0  ;;  %v3352_v31 = vadd.f32 %v2659_v45, %v4901_v26  ;;  %v2661_v32 = vpop.f32.mrb[53].mxu1 }
 0x202   :  { %v3321_v25 = vadd.f32 %v2435_v30, %v4904_v21  ;;  %v2437_v35 = vpop.f32.mrb[54].mxu0  ;;  %v3353_v36 = vadd.f32 %v2661_v32, %v4907_v24  ;;  %v2663_v9 = vpop.f32.mrb[54].mxu1 }
 0x203   :  { %v2772_v39 = vmax.f32 %v3320_v29, 0.0  ;;  %v3322_v52 = vadd.f32 %v2437_v35, %v4898_v20  ;;  %v2439_v38 = vpop.f32.mrb[55].mxu0  ;;  %v2774_v49 = vmax.f32 %v3352_v31, 0.0  ;;  %v3354_v47 = vadd.f32 %v2663_v9, %v4901_v26  ;;  %v2665_v44 = vpop.f32.mrb[55].mxu1 }
 0x204   :  { %v2773_v42 = vmax.f32 %v3321_v25, 0.0  ;;  %v3323_v43 = vadd.f32 %v2439_v38, %v4904_v21  ;;  %v2775_v46 = vmax.f32 %v3353_v36, 0.0  ;;  %v3355_v48 = vadd.f32 %v2665_v44, %v4907_v24 }
 0x205   :  { %2900 = vst [vmem:[%s5168_s3 + $0x2a0] sm:$0xff] %v2772_v39  ;;  %v2780_v16 = vmax.f32 %v3322_v52, 0.0  ;;  %2902 = vst [vmem:[%s5168_s3 + $0x2b0] sm:$0xff] %v2774_v49  ;;  %v2782_v51 = vmax.f32 %v3354_v47, 0.0 }
 0x206   :  { %2901 = vst [vmem:[%s5168_s3 + $0x2a8] sm:$0xff] %v2773_v42  ;;  %v2781_v63 = vmax.f32 %v3323_v43, 0.0  ;;  %2903 = vst [vmem:[%s5168_s3 + $0x2b8] sm:$0xff] %v2775_v46  ;;  %v2783_v54 = vmax.f32 %v3355_v48, 0.0 }
 0x207   :  { %2908 = vst [vmem:[%s5168_s3 + $0x2e0] sm:$0xff] %v2780_v16  ;;  %2910 = vst [vmem:[%s5168_s3 + $0x2f0] sm:$0xff] %v2782_v51 }
 0x208   :  { %2909 = vst [vmem:[%s5168_s3 + $0x2e8] sm:$0xff] %v2781_v63  ;;  %v2443_v55 = vpop.f32.mrb[56].mxu0  ;;  %2911 = vst [vmem:[%s5168_s3 + $0x2f8] sm:$0xff] %v2783_v54  ;;  %v2669_v56 = vpop.f32.mrb[56].mxu1 }
 0x209   :  { %v3324_v59 = vadd.f32 %v2443_v55, %v4898_v20  ;;  %v2445_v57 = vpop.f32.mrb[57].mxu0  ;;  %v3356_v60 = vadd.f32 %v2669_v56, %v4901_v26  ;;  %v2671_v61 = vpop.f32.mrb[57].mxu1 }
 0x20a   :  { %v3325_v6 = vadd.f32 %v2445_v57, %v4904_v21  ;;  %v2447_v3 = vpop.f32.mrb[58].mxu0  ;;  %v3357_v17 = vadd.f32 %v2671_v61, %v4907_v24  ;;  %v2673_v62 = vpop.f32.mrb[58].mxu1 }
 0x20b   :  { %v2788_v0 = vmax.f32 %v3324_v59, 0.0  ;;  %v3326_v40 = vadd.f32 %v2447_v3, %v4898_v20  ;;  %v2449_v8 = vpop.f32.mrb[59].mxu0  ;;  %v2790_v23 = vmax.f32 %v3356_v60, 0.0  ;;  %v3358_v41 = vadd.f32 %v2673_v62, %v4901_v26  ;;  %v2675_v5 = vpop.f32.mrb[59].mxu1 }
 0x20c   :  { %v2789_v22 = vmax.f32 %v3325_v6, 0.0  ;;  %v3327_v53 = vadd.f32 %v2449_v8, %v4904_v21  ;;  %v2791_v18 = vmax.f32 %v3357_v17, 0.0  ;;  %v3359_v27 = vadd.f32 %v2675_v5, %v4907_v24 }
 0x20d   :  { %2916 = vst [vmem:[%s5168_s3 + $0x320] sm:$0xff] %v2788_v0  ;;  %v2796_v37 = vmax.f32 %v3326_v40, 0.0  ;;  %2918 = vst [vmem:[%s5168_s3 + $0x330] sm:$0xff] %v2790_v23  ;;  %v2798_v1 = vmax.f32 %v3358_v41, 0.0 }
 0x20e   :  { %2917 = vst [vmem:[%s5168_s3 + $0x328] sm:$0xff] %v2789_v22  ;;  %v2797_v2 = vmax.f32 %v3327_v53, 0.0  ;;  %2919 = vst [vmem:[%s5168_s3 + $0x338] sm:$0xff] %v2791_v18  ;;  %v2799_v4 = vmax.f32 %v3359_v27, 0.0 }
 0x20f   :  { %2924 = vst [vmem:[%s5168_s3 + $0x360] sm:$0xff] %v2796_v37  ;;  %2926 = vst [vmem:[%s5168_s3 + $0x370] sm:$0xff] %v2798_v1 }
 0x210   :  { %2925 = vst [vmem:[%s5168_s3 + $0x368] sm:$0xff] %v2797_v2  ;;  %v2453_v7 = vpop.f32.mrb[60].mxu0  ;;  %2927 = vst [vmem:[%s5168_s3 + $0x378] sm:$0xff] %v2799_v4  ;;  %v2679_v34 = vpop.f32.mrb[60].mxu1 }
 0x211   :  { %v3328_v10 = vadd.f32 %v2453_v7, %v4898_v20  ;;  %v2455_v19 = vpop.f32.mrb[61].mxu0  ;;  %v3360_v11 = vadd.f32 %v2679_v34, %v4901_v26  ;;  %v2681_v50 = vpop.f32.mrb[61].mxu1 }
 0x212   :  { %v3329_v33 = vadd.f32 %v2455_v19, %v4904_v21  ;;  %v2457_v58 = vpop.f32.mrb[62].mxu0  ;;  %v3361_v13 = vadd.f32 %v2681_v50, %v4907_v24  ;;  %v2683_v15 = vpop.f32.mrb[62].mxu1 }
 0x213   :  { %v2804_v12 = vmax.f32 %v3328_v10, 0.0  ;;  %v3330_v14 = vadd.f32 %v2457_v58, %v4898_v20  ;;  %v2459_v28 = vpop.f32.mrb[63].mxu0  ;;  %v2806_v29 = vmax.f32 %v3360_v11, 0.0  ;;  %v3362_v30 = vadd.f32 %v2683_v15, %v4901_v26  ;;  %v2685_v25 = vpop.f32.mrb[63].mxu1 }
 0x214   :  { %v2805_v45 = vmax.f32 %v3329_v33, 0.0  ;;  %v3331_v31 = vadd.f32 %v2459_v28, %v4904_v21  ;;  %v2807_v32 = vmax.f32 %v3361_v13, 0.0  ;;  %v3363_v39 = vadd.f32 %v2685_v25, %v4907_v24 }
 0x215   :  { %2932 = vst [vmem:[%s5168_s3 + $0x3a0] sm:$0xff] %v2804_v12  ;;  %v2812_v35 = vmax.f32 %v3330_v14, 0.0  ;;  %2934 = vst [vmem:[%s5168_s3 + $0x3b0] sm:$0xff] %v2806_v29  ;;  %v2814_v20 = vmax.f32 %v3362_v30, 0.0 }
 0x216   :  { %2933 = vst [vmem:[%s5168_s3 + $0x3a8] sm:$0xff] %v2805_v45  ;;  %v2813_v26 = vmax.f32 %v3331_v31, 0.0  ;;  %2935 = vst [vmem:[%s5168_s3 + $0x3b8] sm:$0xff] %v2807_v32  ;;  %v2815_v21 = vmax.f32 %v3363_v39, 0.0 }
 0x217   :  { %2940 = vst [vmem:[%s5168_s3 + $0x3e0] sm:$0xff] %v2812_v35  ;;  %2942 = vst [vmem:[%s5168_s3 + $0x3f0] sm:$0xff] %v2814_v20 }
 0x218   :  { %2941 = vst [vmem:[%s5168_s3 + $0x3e8] sm:$0xff] %v2813_v26  ;;  %2943 = vst [vmem:[%s5168_s3 + $0x3f8] sm:$0xff] %v2815_v21 }

// kernel: autoencoder_forward.12
= control target key start
LH: loop header
LB: loop body
LE: loop exit
PB: predicated region body
PF: predicated region fallthrough
CT: control target
= control target key end

     0   :  { %s8909_s1 = inlined_call_operand.vmem [shape: bf16[768,512], index: 1, kind: input, shape index: {}]   ;;  %s8910_s0 = inlined_call_operand.vmem [shape: bf16[512,768], index: 0, kind: input, shape index: {}]   ;;  %s8911_s2 = inlined_call_operand.vmem [shape: f32[1,512], index: 2, kind: input, shape index: {}]   ;;  %s8912_s3 = inlined_call_operand.vmem [shape: f32[512,512], index: 3, kind: output, shape index: {}]  }
   0x1   :  { %v6126_v0 = vld [vmem:[%s8909_s1 + $0x4] ss:$16 sps:$4 sm:$0xff]   ;;  %v6128_v1 = vld [vmem:[%s8909_s1 + $0xc] ss:$16 sps:$4 sm:$0xff]   ;;  %v6130_v2 = vld [vmem:[%s8909_s1] ss:$16 sps:$4 sm:$0xff]  }
   0x2   :  { %2340 = vmatprep.subr.bf16.mxu0 %v6126_v0  ;;  %v6131_v3 = vld [vmem:[%s8909_s1 + $0x8] ss:$16 sps:$4 sm:$0xff]   ;;  %3399 = vmatprep.subr.bf16.mxu1 %v6128_v1  ;;  %v6132_v4 = vld [vmem:[%s8909_s1 + $0x24] ss:$16 sps:$4 sm:$0xff]   ;;  %v6134_v5 = vld [vmem:[%s8909_s1 + $0x2c] ss:$16 sps:$4 sm:$0xff]  }
   0x3   :  { %2341 = vmatpush1.bf16.msra.mxu0 %v6130_v2  ;;  %3400 = vmatpush1.bf16.msra.mxu1 %v6131_v3  ;;  %v6136_v6 = vld [vmem:[%s8909_s1 + $0x20] ss:$16 sps:$4 sm:$0xff]   ;;  %v6137_v7 = vld [vmem:[%s8909_s1 + $0x28] ss:$16 sps:$4 sm:$0xff]   ;;  %v6138_v8 = vld [vmem:[%s8909_s1 + $0x44] ss:$16 sps:$4 sm:$0xff]  }
   0x4   :  { %2342 = vmatprep.subr.bf16.mxu0 %v6132_v4  ;;  %3401 = vmatprep.subr.bf16.mxu1 %v6134_v5  ;;  %v6140_v9 = vld [vmem:[%s8909_s1 + $0x4c] ss:$16 sps:$4 sm:$0xff]   ;;  %v6142_v10 = vld [vmem:[%s8909_s1 + $0x40] ss:$16 sps:$4 sm:$0xff]   ;;  %v6143_v11 = vld [vmem:[%s8909_s1 + $0x48] ss:$16 sps:$4 sm:$0xff]  }
   0x5   :  { %v6144_v12 = vld [vmem:[%s8909_s1 + $0x64] ss:$16 sps:$4 sm:$0xff]   ;;  %v6146_v13 = vld [vmem:[%s8909_s1 + $0x6c] ss:$16 sps:$4 sm:$0xff]   ;;  %v6148_v14 = vld [vmem:[%s8909_s1 + $0x60] ss:$16 sps:$4 sm:$0xff]  }
   0x6   :  { %v6149_v15 = vld [vmem:[%s8909_s1 + $0x68] ss:$16 sps:$4 sm:$0xff]   ;;  %v6150_v16 = vld [vmem:[%s8909_s1 + $0x84] ss:$16 sps:$4 sm:$0xff]   ;;  %v6152_v17 = vld [vmem:[%s8909_s1 + $0x8c] ss:$16 sps:$4 sm:$0xff]  }
   0x7   :  { %2343 = vmatpush1.bf16.msra.mxu0 %v6136_v6  ;;  %3402 = vmatpush1.bf16.msra.mxu1 %v6137_v7  ;;  %v6154_v18 = vld [vmem:[%s8909_s1 + $0x80] ss:$16 sps:$4 sm:$0xff]   ;;  %v6155_v19 = vld [vmem:[%s8909_s1 + $0x88] ss:$16 sps:$4 sm:$0xff]   ;;  %v6156_v20 = vld [vmem:[%s8909_s1 + $0xa4] ss:$16 sps:$4 sm:$0xff]  }
   0x8   :  { %2344 = vmatprep.subr.bf16.mxu0 %v6138_v8  ;;  %3403 = vmatprep.subr.bf16.mxu1 %v6140_v9  ;;  %v6158_v21 = vld [vmem:[%s8909_s1 + $0xac] ss:$16 sps:$4 sm:$0xff]   ;;  %v6160_v22 = vld [vmem:[%s8909_s1 + $0xa0] ss:$16 sps:$4 sm:$0xff]   ;;  %v6161_v23 = vld [vmem:[%s8909_s1 + $0xa8] ss:$16 sps:$4 sm:$0xff]  }
   0x9   :  { %v6162_v24 = vld [vmem:[%s8909_s1 + $0xc4] ss:$16 sps:$4 sm:$0xff]   ;;  %v6164_v25 = vld [vmem:[%s8909_s1 + $0xcc] ss:$16 sps:$4 sm:$0xff]   ;;  %v6166_v26 = vld [vmem:[%s8909_s1 + $0xc0] ss:$16 sps:$4 sm:$0xff]  }
   0xa   :  { %v6167_v27 = vld [vmem:[%s8909_s1 + $0xc8] ss:$16 sps:$4 sm:$0xff]   ;;  %v6168_v28 = vld [vmem:[%s8909_s1 + $0xe4] ss:$16 sps:$4 sm:$0xff]   ;;  %v6170_v29 = vld [vmem:[%s8909_s1 + $0xec] ss:$16 sps:$4 sm:$0xff]  }
   0xb   :  { %2345 = vmatpush1.bf16.msra.mxu0 %v6142_v10  ;;  %3404 = vmatpush1.bf16.msra.mxu1 %v6143_v11  ;;  %v6172_v30 = vld [vmem:[%s8909_s1 + $0xe0] ss:$16 sps:$4 sm:$0xff]   ;;  %v6173_v31 = vld [vmem:[%s8909_s1 + $0xe8] ss:$16 sps:$4 sm:$0xff]   ;;  %v6174_v32 = vld [vmem:[%s8909_s1 + $0x104] ss:$16 sps:$4 sm:$0xff]  }
   0xc   :  { %2346 = vmatprep.subr.bf16.mxu0 %v6144_v12  ;;  %3405 = vmatprep.subr.bf16.mxu1 %v6146_v13  ;;  %v6176_v33 = vld [vmem:[%s8909_s1 + $0x10c] ss:$16 sps:$4 sm:$0xff]   ;;  %v6178_v34 = vld [vmem:[%s8909_s1 + $0x100] ss:$16 sps:$4 sm:$0xff]   ;;  %v6179_v35 = vld [vmem:[%s8909_s1 + $0x108] ss:$16 sps:$4 sm:$0xff]  }
   0xd   :  { %v6180_v36 = vld [vmem:[%s8909_s1 + $0x124] ss:$16 sps:$4 sm:$0xff]   ;;  %v6182_v37 = vld [vmem:[%s8909_s1 + $0x12c] ss:$16 sps:$4 sm:$0xff]   ;;  %v6184_v38 = vld [vmem:[%s8909_s1 + $0x120] ss:$16 sps:$4 sm:$0xff]  }
   0xe   :  { %v6185_v39 = vld [vmem:[%s8909_s1 + $0x128] ss:$16 sps:$4 sm:$0xff]   ;;  %v6186_v40 = vld [vmem:[%s8909_s1 + $0x144] ss:$16 sps:$4 sm:$0xff]   ;;  %v6188_v41 = vld [vmem:[%s8909_s1 + $0x14c] ss:$16 sps:$4 sm:$0xff]  }
   0xf   :  { %2347 = vmatpush1.bf16.msra.mxu0 %v6148_v14  ;;  %3406 = vmatpush1.bf16.msra.mxu1 %v6149_v15  ;;  %v6190_v42 = vld [vmem:[%s8909_s1 + $0x140] ss:$16 sps:$4 sm:$0xff]   ;;  %v6191_v43 = vld [vmem:[%s8909_s1 + $0x148] ss:$16 sps:$4 sm:$0xff]   ;;  %v6192_v44 = vld [vmem:[%s8909_s1 + $0x164] ss:$16 sps:$4 sm:$0xff]  }
  0x10   :  { %2348 = vmatprep.subr.bf16.mxu0 %v6150_v16  ;;  %3407 = vmatprep.subr.bf16.mxu1 %v6152_v17  ;;  %v6194_v45 = vld [vmem:[%s8909_s1 + $0x16c] ss:$16 sps:$4 sm:$0xff]   ;;  %v6196_v46 = vld [vmem:[%s8909_s1 + $0x160] ss:$16 sps:$4 sm:$0xff]   ;;  %v6197_v47 = vld [vmem:[%s8909_s1 + $0x168] ss:$16 sps:$4 sm:$0xff]  }
  0x11   :  { %v6224_v48 = vld [vmem:[%s8910_s0 + $0x4] ss:$24 sps:$4 sm:$0xff]   ;;  %v6202_v51 = vld [vmem:[%s8909_s1 + $0x180] ss:$16 sps:$4 sm:$0xff]   ;;  %v6203_v52 = vld [vmem:[%s8909_s1 + $0x188] ss:$16 sps:$4 sm:$0xff]  }
  0x12   :  { %v6198_v49 = vld [vmem:[%s8909_s1 + $0x184] ss:$16 sps:$4 sm:$0xff]   ;;  %v6200_v50 = vld [vmem:[%s8909_s1 + $0x18c] ss:$16 sps:$4 sm:$0xff]   ;;  %2372 = vmatprep.mubr.bf16.mxu0 %v6224_v48  ;;  %3431 = vmatprep.mubr.bf16.mxu1 %v6224_v48  ;;  %v6208_v55 = vld [vmem:[%s8909_s1 + $0x1a0] ss:$16 sps:$4 sm:$0xff]  }
  0x13   :  { %2349 = vmatpush1.bf16.msra.mxu0 %v6154_v18  ;;  %3408 = vmatpush1.bf16.msra.mxu1 %v6155_v19  ;;  %v6204_v53 = vld [vmem:[%s8909_s1 + $0x1a4] ss:$16 sps:$4 sm:$0xff]   ;;  %v6206_v54 = vld [vmem:[%s8909_s1 + $0x1ac] ss:$16 sps:$4 sm:$0xff]   ;;  %v6209_v56 = vld [vmem:[%s8909_s1 + $0x1a8] ss:$16 sps:$4 sm:$0xff]  }
  0x14   :  { %2350 = vmatprep.subr.bf16.mxu0 %v6156_v20  ;;  %3409 = vmatprep.subr.bf16.mxu1 %v6158_v21  ;;  %v6210_v57 = vld [vmem:[%s8909_s1 + $0x1c4] ss:$16 sps:$4 sm:$0xff]   ;;  %v6212_v58 = vld [vmem:[%s8909_s1 + $0x1cc] ss:$16 sps:$4 sm:$0xff]   ;;  %v6214_v59 = vld [vmem:[%s8909_s1 + $0x1c0] ss:$16 sps:$4 sm:$0xff]  }
  0x15   :  { %v6215_v60 = vld [vmem:[%s8909_s1 + $0x1c8] ss:$16 sps:$4 sm:$0xff]   ;;  %v6216_v61 = vld [vmem:[%s8909_s1 + $0x1e4] ss:$16 sps:$4 sm:$0xff]   ;;  %v6218_v62 = vld [vmem:[%s8909_s1 + $0x1ec] ss:$16 sps:$4 sm:$0xff]  }
  0x16   :  { %v6220_v63 = vld [vmem:[%s8909_s1 + $0x1e0] ss:$16 sps:$4 sm:$0xff]   ;;  %v6221_v0 = vld [vmem:[%s8909_s1 + $0x1e8] ss:$16 sps:$4 sm:$0xff]   ;;  %v6227_v1 = vld [vmem:[%s8909_s1 + $0x204] ss:$16 sps:$4 sm:$0xff]  }
  0x17   :  { %2351 = vmatpush1.bf16.msra.mxu0 %v6160_v22  ;;  %3410 = vmatpush1.bf16.msra.mxu1 %v6161_v23  ;;  %v6230_v2 = vld [vmem:[%s8909_s1 + $0x20c] ss:$16 sps:$4 sm:$0xff]   ;;  %v6222_v3 = vld [vmem:[%s8910_s0] ss:$24 sps:$4 sm:$0xff]   ;;  %v6239_v7 = vld [vmem:[%s8909_s1 + $0x224] ss:$16 sps:$4 sm:$0xff]  }
  0x18   :  { %2352 = vmatprep.subr.bf16.mxu0 %v6162_v24  ;;  %3411 = vmatprep.subr.bf16.mxu1 %v6164_v25  ;;  %v6225_v4 = vld [vmem:[%s8909_s1 + $0x200] ss:$16 sps:$4 sm:$0xff]   ;;  %v6228_v5 = vld [vmem:[%s8909_s1 + $0x208] ss:$16 sps:$4 sm:$0xff]   ;;  %v6231_v6 = vld [vmem:[%s8910_s0 + $0x34] ss:$24 sps:$4 sm:$0xff]  }
  0x19   :  { %v6242_v8 = vld [vmem:[%s8909_s1 + $0x22c] ss:$16 sps:$4 sm:$0xff]   ;;  %v6237_v9 = vld [vmem:[%s8909_s1 + $0x220] ss:$16 sps:$4 sm:$0xff]   ;;  %v6240_v10 = vld [vmem:[%s8909_s1 + $0x228] ss:$16 sps:$4 sm:$0xff]  }
  0x1a   :  { %v6251_v11 = vld [vmem:[%s8909_s1 + $0x244] ss:$16 sps:$4 sm:$0xff]   ;;  %v6254_v12 = vld [vmem:[%s8909_s1 + $0x24c] ss:$16 sps:$4 sm:$0xff]   ;;  %v6233_v13 = vld [vmem:[%s8910_s0 + $0x30] ss:$24 sps:$4 sm:$0xff]  }
  0x1b   :  { %2353 = vmatpush1.bf16.msra.mxu0 %v6166_v26  ;;  %3412 = vmatpush1.bf16.msra.mxu1 %v6167_v27  ;;  %v6234_v14 = vld [vmem:[%s8910_s0 + $0x64] ss:$24 sps:$4 sm:$0xff]   ;;  %v6249_v15 = vld [vmem:[%s8909_s1 + $0x240] ss:$16 sps:$4 sm:$0xff]   ;;  %v6252_v16 = vld [vmem:[%s8909_s1 + $0x248] ss:$16 sps:$4 sm:$0xff]  }
  0x1c   :  { %2354 = vmatprep.subr.bf16.mxu0 %v6168_v28  ;;  %3413 = vmatprep.subr.bf16.mxu1 %v6170_v29  ;;  %v6263_v17 = vld [vmem:[%s8909_s1 + $0x264] ss:$16 sps:$4 sm:$0xff]   ;;  %v6266_v18 = vld [vmem:[%s8909_s1 + $0x26c] ss:$16 sps:$4 sm:$0xff]   ;;  %v6261_v19 = vld [vmem:[%s8909_s1 + $0x260] ss:$16 sps:$4 sm:$0xff]  }
  0x1d   :  { %v6264_v20 = vld [vmem:[%s8909_s1 + $0x268] ss:$16 sps:$4 sm:$0xff]   ;;  %v6275_v21 = vld [vmem:[%s8909_s1 + $0x284] ss:$16 sps:$4 sm:$0xff]   ;;  %v6278_v22 = vld [vmem:[%s8909_s1 + $0x28c] ss:$16 sps:$4 sm:$0xff]  }
  0x1e   :  { %v6236_v23 = vld [vmem:[%s8910_s0 + $0x60] ss:$24 sps:$4 sm:$0xff]   ;;  %v6243_v24 = vld [vmem:[%s8910_s0 + $0x94] ss:$24 sps:$4 sm:$0xff]  }
  0x1f   :  { %2355 = vmatpush1.bf16.msra.mxu0 %v6172_v30  ;;  %3414 = vmatpush1.bf16.msra.mxu1 %v6173_v31  ;;  %v6273_v25 = vld [vmem:[%s8909_s1 + $0x280] ss:$16 sps:$4 sm:$0xff]   ;;  %v6276_v26 = vld [vmem:[%s8909_s1 + $0x288] ss:$16 sps:$4 sm:$0xff]   ;;  %v6287_v27 = vld [vmem:[%s8909_s1 + $0x2a4] ss:$16 sps:$4 sm:$0xff]  }
  0x20   :  { %2356 = vmatprep.subr.bf16.mxu0 %v6174_v32  ;;  %3415 = vmatprep.subr.bf16.mxu1 %v6176_v33  ;;  %v6290_v28 = vld [vmem:[%s8909_s1 + $0x2ac] ss:$16 sps:$4 sm:$0xff]   ;;  %v6285_v29 = vld [vmem:[%s8909_s1 + $0x2a0] ss:$16 sps:$4 sm:$0xff]   ;;  %v6288_v30 = vld [vmem:[%s8909_s1 + $0x2a8] ss:$16 sps:$4 sm:$0xff]  }
  0x21   :  { %v6299_v31 = vld [vmem:[%s8909_s1 + $0x2c4] ss:$16 sps:$4 sm:$0xff]   ;;  %v6302_v32 = vld [vmem:[%s8909_s1 + $0x2cc] ss:$16 sps:$4 sm:$0xff]   ;;  %v6245_v33 = vld [vmem:[%s8910_s0 + $0x90] ss:$24 sps:$4 sm:$0xff]  }
  0x22   :  { %v6338_v48 = vld [vmem:[%s8909_s1 + $0x32c] ss:$16 sps:$4 sm:$0xff]  }
  0x23   :  { %2357 = vmatpush1.bf16.msra.mxu0 %v6178_v34  ;;  %3416 = vmatpush1.bf16.msra.mxu1 %v6179_v35  ;;  %v6246_v34 = vld [vmem:[%s8910_s0 + $0xc4] ss:$24 sps:$4 sm:$0xff]   ;;  %v6297_v35 = vld [vmem:[%s8909_s1 + $0x2c0] ss:$16 sps:$4 sm:$0xff]  }
  0x24   :  { %2358 = vmatprep.subr.bf16.mxu0 %v6180_v36  ;;  %3417 = vmatprep.subr.bf16.mxu1 %v6182_v37  ;;  %v6300_v36 = vld [vmem:[%s8909_s1 + $0x2c8] ss:$16 sps:$4 sm:$0xff]   ;;  %v6311_v37 = vld [vmem:[%s8909_s1 + $0x2e4] ss:$16 sps:$4 sm:$0xff]  }
  0x27   :  { %2359 = vmatpush1.bf16.msra.mxu0 %v6184_v38  ;;  %3418 = vmatpush1.bf16.msra.mxu1 %v6185_v39  ;;  %v6314_v38 = vld [vmem:[%s8909_s1 + $0x2ec] ss:$16 sps:$4 sm:$0xff]   ;;  %v6309_v39 = vld [vmem:[%s8909_s1 + $0x2e0] ss:$16 sps:$4 sm:$0xff]  }
  0x28   :  { %2360 = vmatprep.subr.bf16.mxu0 %v6186_v40  ;;  %3419 = vmatprep.subr.bf16.mxu1 %v6188_v41  ;;  %v6248_v40 = vld [vmem:[%s8910_s0 + $0xc0] ss:$24 sps:$4 sm:$0xff]  }
  0x29   :  { %v6312_v41 = vld [vmem:[%s8909_s1 + $0x2e8] ss:$16 sps:$4 sm:$0xff]  }
  0x2b   :  { %2361 = vmatpush1.bf16.msra.mxu0 %v6190_v42  ;;  %3420 = vmatpush1.bf16.msra.mxu1 %v6191_v43  ;;  %v6255_v42 = vld [vmem:[%s8910_s0 + $0xf4] ss:$24 sps:$4 sm:$0xff]  }
  0x2c   :  { %2362 = vmatprep.subr.bf16.mxu0 %v6192_v44  ;;  %3421 = vmatprep.subr.bf16.mxu1 %v6194_v45  ;;  %v6323_v43 = vld [vmem:[%s8909_s1 + $0x304] ss:$16 sps:$4 sm:$0xff]   ;;  %v6326_v44 = vld [vmem:[%s8909_s1 + $0x30c] ss:$16 sps:$4 sm:$0xff]   ;;  %v6321_v45 = vld [vmem:[%s8909_s1 + $0x300] ss:$16 sps:$4 sm:$0xff]  }
  0x2f   :  { %2363 = vmatpush1.bf16.msra.mxu0 %v6196_v46  ;;  %3422 = vmatpush1.bf16.msra.mxu1 %v6197_v47  ;;  %v6324_v46 = vld [vmem:[%s8909_s1 + $0x308] ss:$16 sps:$4 sm:$0xff]   ;;  %v6335_v47 = vld [vmem:[%s8909_s1 + $0x324] ss:$16 sps:$4 sm:$0xff]  }
  0x30   :  { %2364 = vmatprep.subr.bf16.mxu0 %v6198_v49  ;;  %3423 = vmatprep.subr.bf16.mxu1 %v6200_v50  ;;  %v6333_v49 = vld [vmem:[%s8909_s1 + $0x320] ss:$16 sps:$4 sm:$0xff]   ;;  %v6336_v50 = vld [vmem:[%s8909_s1 + $0x328] ss:$16 sps:$4 sm:$0xff]  }
  0x33   :  { %2365 = vmatpush1.bf16.msra.mxu0 %v6202_v51  ;;  %3424 = vmatpush1.bf16.msra.mxu1 %v6203_v52  ;;  %v6347_v51 = vld [vmem:[%s8909_s1 + $0x344] ss:$16 sps:$4 sm:$0xff]   ;;  %v6257_v52 = vld [vmem:[%s8910_s0 + $0xf0] ss:$24 sps:$4 sm:$0xff]  }
  0x34   :  { %2366 = vmatprep.subr.bf16.mxu0 %v6204_v53  ;;  %3425 = vmatprep.subr.bf16.mxu1 %v6206_v54  ;;  %v6350_v53 = vld [vmem:[%s8909_s1 + $0x34c] ss:$16 sps:$4 sm:$0xff]  }
  0x35   :  { %v6258_v54 = vld [vmem:[%s8910_s0 + $0x124] ss:$24 sps:$4 sm:$0xff]  }
  0x37   :  { %2367 = vmatpush1.bf16.msra.mxu0 %v6208_v55  ;;  %3426 = vmatpush1.bf16.msra.mxu1 %v6209_v56  ;;  %v6345_v55 = vld [vmem:[%s8909_s1 + $0x340] ss:$16 sps:$4 sm:$0xff]   ;;  %v6348_v56 = vld [vmem:[%s8909_s1 + $0x348] ss:$16 sps:$4 sm:$0xff]  }
  0x38   :  { %2368 = vmatprep.subr.bf16.mxu0 %v6210_v57  ;;  %3427 = vmatprep.subr.bf16.mxu1 %v6212_v58  ;;  %v6260_v57 = vld [vmem:[%s8910_s0 + $0x120] ss:$24 sps:$4 sm:$0xff]   ;;  %v6267_v58 = vld [vmem:[%s8910_s0 + $0x154] ss:$24 sps:$4 sm:$0xff]  }
  0x3b   :  { %2369 = vmatpush1.bf16.msra.mxu0 %v6214_v59  ;;  %3428 = vmatpush1.bf16.msra.mxu1 %v6215_v60  ;;  %v6357_v59 = vld [vmem:[%s8909_s1 + $0x360] ss:$16 sps:$4 sm:$0xff]   ;;  %v6359_v60 = vld [vmem:[%s8909_s1 + $0x364] ss:$16 sps:$4 sm:$0xff]  }
  0x3c   :  { %2370 = vmatprep.subr.bf16.mxu0 %v6216_v61  ;;  %3429 = vmatprep.subr.bf16.mxu1 %v6218_v62  ;;  %v6360_v61 = vld [vmem:[%s8909_s1 + $0x368] ss:$16 sps:$4 sm:$0xff]   ;;  %v6362_v62 = vld [vmem:[%s8909_s1 + $0x36c] ss:$16 sps:$4 sm:$0xff]  }
  0x3f   :  { %2371 = vmatpush1.bf16.msra.mxu0 %v6220_v63  ;;  %3430 = vmatpush1.bf16.msra.mxu1 %v6221_v0  ;;  %v6269_v63 = vld [vmem:[%s8910_s0 + $0x150] ss:$24 sps:$4 sm:$0xff]   ;;  %v6270_v0 = vld [vmem:[%s8910_s0 + $0x184] ss:$24 sps:$4 sm:$0xff]  }
  0x40   :  { %2693 = vmatprep.subr.bf16.mxu0 %v6227_v1  ;;  %3752 = vmatprep.subr.bf16.mxu1 %v6230_v2  ;;  %v6272_v1 = vld [vmem:[%s8910_s0 + $0x180] ss:$24 sps:$4 sm:$0xff]   ;;  %v6279_v2 = vld [vmem:[%s8910_s0 + $0x1b4] ss:$24 sps:$4 sm:$0xff]  }
  0x42   :  { %2373 = vmatmul.mubr.bf16.vlgmr.msra.gmra.mrb[0].mxu0 %v6222_v3  ;;  %3432 = vmatmul.mubr.bf16.vlgmr.msra.gmra.mrb[0].mxu1 %v6222_v3  ;;  %v6369_v3 = vld [vmem:[%s8909_s1 + $0x380] ss:$16 sps:$4 sm:$0xff]  }
  0x43   :  { %2694 = vmatpush1.bf16.msra.mxu0 %v6225_v4  ;;  %3753 = vmatpush1.bf16.msra.mxu1 %v6228_v5  ;;  %v6371_v4 = vld [vmem:[%s8909_s1 + $0x384] ss:$16 sps:$4 sm:$0xff]   ;;  %v6372_v5 = vld [vmem:[%s8909_s1 + $0x388] ss:$16 sps:$4 sm:$0xff]  }
  0x44   :  { %2382 = vmatprep.mubr.bf16.mxu0 %v6231_v6  ;;  %3441 = vmatprep.mubr.bf16.mxu1 %v6231_v6  ;;  %v6374_v6 = vld [vmem:[%s8909_s1 + $0x38c] ss:$16 sps:$4 sm:$0xff]  }
  0x45   :  { %2695 = vmatprep.subr.bf16.mxu0 %v6239_v7  ;;  %3754 = vmatprep.subr.bf16.mxu1 %v6242_v8  ;;  %v6281_v7 = vld [vmem:[%s8910_s0 + $0x1b0] ss:$24 sps:$4 sm:$0xff]   ;;  %v6282_v8 = vld [vmem:[%s8910_s0 + $0x1e4] ss:$24 sps:$4 sm:$0xff]  }
  0x47   :  { %2696 = vmatpush1.bf16.msra.mxu0 %v6237_v9  ;;  %3755 = vmatpush1.bf16.msra.mxu1 %v6240_v10  ;;  %v6284_v9 = vld [vmem:[%s8910_s0 + $0x1e0] ss:$24 sps:$4 sm:$0xff]   ;;  %v6291_v10 = vld [vmem:[%s8910_s0 + $0x214] ss:$24 sps:$4 sm:$0xff]  }
  0x48   :  { %2697 = vmatprep.subr.bf16.mxu0 %v6251_v11  ;;  %3756 = vmatprep.subr.bf16.mxu1 %v6254_v12  ;;  %v6381_v11 = vld [vmem:[%s8909_s1 + $0x3a0] ss:$16 sps:$4 sm:$0xff]   ;;  %v6383_v12 = vld [vmem:[%s8909_s1 + $0x3a4] ss:$16 sps:$4 sm:$0xff]  }
  0x4a   :  { %2383 = vmatmul.mubr.bf16.gmra.mrb[4].mxu0 %v6233_v13  ;;  %3442 = vmatmul.mubr.bf16.gmra.mrb[4].mxu1 %v6233_v13  ;;  %v6384_v13 = vld [vmem:[%s8909_s1 + $0x3a8] ss:$16 sps:$4 sm:$0xff]  }
  0x4b   :  { %2392 = vmatprep.mubr.bf16.mxu0 %v6234_v14  ;;  %3451 = vmatprep.mubr.bf16.mxu1 %v6234_v14  ;;  %v6386_v14 = vld [vmem:[%s8909_s1 + $0x3ac] ss:$16 sps:$4 sm:$0xff]  }
  0x4c   :  { %2698 = vmatpush1.bf16.msra.mxu0 %v6249_v15  ;;  %3757 = vmatpush1.bf16.msra.mxu1 %v6252_v16  ;;  %v6293_v15 = vld [vmem:[%s8910_s0 + $0x210] ss:$24 sps:$4 sm:$0xff]   ;;  %v6294_v16 = vld [vmem:[%s8910_s0 + $0x244] ss:$24 sps:$4 sm:$0xff]  }
  0x4d   :  { %2699 = vmatprep.subr.bf16.mxu0 %v6263_v17  ;;  %3758 = vmatprep.subr.bf16.mxu1 %v6266_v18  ;;  %v6296_v17 = vld [vmem:[%s8910_s0 + $0x240] ss:$24 sps:$4 sm:$0xff]   ;;  %v6303_v18 = vld [vmem:[%s8910_s0 + $0x274] ss:$24 sps:$4 sm:$0xff]  }
  0x50   :  { %2700 = vmatpush1.bf16.msra.mxu0 %v6261_v19  ;;  %3759 = vmatpush1.bf16.msra.mxu1 %v6264_v20  ;;  %v6393_v19 = vld [vmem:[%s8909_s1 + $0x3c0] ss:$16 sps:$4 sm:$0xff]   ;;  %v6395_v20 = vld [vmem:[%s8909_s1 + $0x3c4] ss:$16 sps:$4 sm:$0xff]  }
  0x51   :  { %2701 = vmatprep.subr.bf16.mxu0 %v6275_v21  ;;  %3760 = vmatprep.subr.bf16.mxu1 %v6278_v22  ;;  %v6396_v21 = vld [vmem:[%s8909_s1 + $0x3c8] ss:$16 sps:$4 sm:$0xff]   ;;  %v6398_v22 = vld [vmem:[%s8909_s1 + $0x3cc] ss:$16 sps:$4 sm:$0xff]  }
  0x52   :  { %2393 = vmatmul.mubr.bf16.gmra.mrb[8].mxu0 %v6236_v23  ;;  %3452 = vmatmul.mubr.bf16.gmra.mrb[8].mxu1 %v6236_v23  ;;  %v6305_v23 = vld [vmem:[%s8910_s0 + $0x270] ss:$24 sps:$4 sm:$0xff]  }
  0x53   :  { %2402 = vmatprep.mubr.bf16.mxu0 %v6243_v24  ;;  %3461 = vmatprep.mubr.bf16.mxu1 %v6243_v24  ;;  %v6306_v24 = vld [vmem:[%s8910_s0 + $0x2a4] ss:$24 sps:$4 sm:$0xff]  }
  0x54   :  { %2702 = vmatpush1.bf16.msra.mxu0 %v6273_v25  ;;  %3761 = vmatpush1.bf16.msra.mxu1 %v6276_v26  ;;  %v6308_v25 = vld [vmem:[%s8910_s0 + $0x2a0] ss:$24 sps:$4 sm:$0xff]   ;;  %v6315_v26 = vld [vmem:[%s8910_s0 + $0x2d4] ss:$24 sps:$4 sm:$0xff]  }
  0x55   :  { %2703 = vmatprep.subr.bf16.mxu0 %v6287_v27  ;;  %3762 = vmatprep.subr.bf16.mxu1 %v6290_v28  ;;  %v6405_v27 = vld [vmem:[%s8909_s1 + $0x3e0] ss:$16 sps:$4 sm:$0xff]   ;;  %v6407_v28 = vld [vmem:[%s8909_s1 + $0x3e4] ss:$16 sps:$4 sm:$0xff]  }
  0x58   :  { %2704 = vmatpush1.bf16.msra.mxu0 %v6285_v29  ;;  %3763 = vmatpush1.bf16.msra.mxu1 %v6288_v30  ;;  %v6408_v29 = vld [vmem:[%s8909_s1 + $0x3e8] ss:$16 sps:$4 sm:$0xff]   ;;  %v6410_v30 = vld [vmem:[%s8909_s1 + $0x3ec] ss:$16 sps:$4 sm:$0xff]  }
  0x59   :  { %2705 = vmatprep.subr.bf16.mxu0 %v6299_v31  ;;  %3764 = vmatprep.subr.bf16.mxu1 %v6302_v32  ;;  %v6317_v31 = vld [vmem:[%s8910_s0 + $0x2d0] ss:$24 sps:$4 sm:$0xff]   ;;  %v6318_v32 = vld [vmem:[%s8910_s0 + $0x304] ss:$24 sps:$4 sm:$0xff]  }
  0x5a   :  { %2403 = vmatmul.mubr.bf16.gmra.mrb[12].mxu0 %v6245_v33  ;;  %3462 = vmatmul.mubr.bf16.gmra.mrb[12].mxu1 %v6245_v33  ;;  %v6320_v33 = vld [vmem:[%s8910_s0 + $0x300] ss:$24 sps:$4 sm:$0xff]  }
  0x5b   :  { %2412 = vmatprep.mubr.bf16.mxu0 %v6246_v34  ;;  %3471 = vmatprep.mubr.bf16.mxu1 %v6246_v34  ;;  %v6327_v34 = vld [vmem:[%s8910_s0 + $0x334] ss:$24 sps:$4 sm:$0xff]  }
  0x5c   :  { %2706 = vmatpush1.bf16.msra.mxu0 %v6297_v35  ;;  %3765 = vmatpush1.bf16.msra.mxu1 %v6300_v36  ;;  %v6419_v35 = vld [vmem:[%s8909_s1 + $0x404] ss:$16 sps:$4 sm:$0xff]   ;;  %v6422_v36 = vld [vmem:[%s8909_s1 + $0x40c] ss:$16 sps:$4 sm:$0xff]  }
  0x5d   :  { %2707 = vmatprep.subr.bf16.mxu0 %v6311_v37  ;;  %3766 = vmatprep.subr.bf16.mxu1 %v6314_v38  ;;  %v6329_v37 = vld [vmem:[%s8910_s0 + $0x330] ss:$24 sps:$4 sm:$0xff]   ;;  %v6330_v38 = vld [vmem:[%s8910_s0 + $0x364] ss:$24 sps:$4 sm:$0xff]  }
  0x60   :  { %2708 = vmatpush1.bf16.msra.mxu0 %v6309_v39  ;;  %3767 = vmatpush1.bf16.msra.mxu1 %v6312_v41  ;;  %v6332_v39 = vld [vmem:[%s8910_s0 + $0x360] ss:$24 sps:$4 sm:$0xff]   ;;  %v6341_v41 = vld [vmem:[%s8910_s0 + $0x390] ss:$24 sps:$4 sm:$0xff]  }
  0x61   :  { %2709 = vmatprep.subr.bf16.mxu0 %v6323_v43  ;;  %3768 = vmatprep.subr.bf16.mxu1 %v6326_v44  ;;  %v6344_v43 = vld [vmem:[%s8910_s0 + $0x3c0] ss:$24 sps:$4 sm:$0xff]   ;;  %v6351_v44 = vld [vmem:[%s8910_s0 + $0x3f4] ss:$24 sps:$4 sm:$0xff]  }
  0x62   :  { %2413 = vmatmul.mubr.bf16.gmra.mrb[16].mxu0 %v6248_v40  ;;  %3472 = vmatmul.mubr.bf16.gmra.mrb[16].mxu1 %v6248_v40  ;;  %v6339_v40 = vld [vmem:[%s8910_s0 + $0x394] ss:$24 sps:$4 sm:$0xff]  }
  0x63   :  { %2422 = vmatprep.mubr.bf16.mxu0 %v6255_v42  ;;  %3481 = vmatprep.mubr.bf16.mxu1 %v6255_v42  ;;  %v6342_v42 = vld [vmem:[%s8910_s0 + $0x3c4] ss:$24 sps:$4 sm:$0xff]  }
  0x64   :  { %2710 = vmatpush1.bf16.msra.mxu0 %v6321_v45  ;;  %3769 = vmatpush1.bf16.msra.mxu1 %v6324_v46  ;;  %v6353_v45 = vld [vmem:[%s8910_s0 + $0x3f0] ss:$24 sps:$4 sm:$0xff]   ;;  %v6354_v46 = vld [vmem:[%s8910_s0 + $0x424] ss:$24 sps:$4 sm:$0xff]  }
  0x65   :  { %2711 = vmatprep.subr.bf16.mxu0 %v6335_v47  ;;  %3770 = vmatprep.subr.bf16.mxu1 %v6338_v48  ;;  %v6356_v47 = vld [vmem:[%s8910_s0 + $0x420] ss:$24 sps:$4 sm:$0xff]   ;;  %v6363_v48 = vld [vmem:[%s8910_s0 + $0x454] ss:$24 sps:$4 sm:$0xff]  }
  0x68   :  { %2712 = vmatpush1.bf16.msra.mxu0 %v6333_v49  ;;  %3771 = vmatpush1.bf16.msra.mxu1 %v6336_v50  ;;  %v6365_v49 = vld [vmem:[%s8910_s0 + $0x450] ss:$24 sps:$4 sm:$0xff]   ;;  %v6366_v50 = vld [vmem:[%s8910_s0 + $0x484] ss:$24 sps:$4 sm:$0xff]  }
  0x69   :  { %2713 = vmatprep.subr.bf16.mxu0 %v6347_v51  ;;  %3772 = vmatprep.subr.bf16.mxu1 %v6350_v53  ;;  %v6368_v51 = vld [vmem:[%s8910_s0 + $0x480] ss:$24 sps:$4 sm:$0xff]   ;;  %v6377_v53 = vld [vmem:[%s8910_s0 + $0x4b0] ss:$24 sps:$4 sm:$0xff]  }
  0x6a   :  { %2423 = vmatmul.mubr.bf16.gmra.mrb[20].mxu0 %v6257_v52  ;;  %3482 = vmatmul.mubr.bf16.gmra.mrb[20].mxu1 %v6257_v52  ;;  %v6375_v52 = vld [vmem:[%s8910_s0 + $0x4b4] ss:$24 sps:$4 sm:$0xff]  }
  0x6b   :  { %2432 = vmatprep.mubr.bf16.mxu0 %v6258_v54  ;;  %3491 = vmatprep.mubr.bf16.mxu1 %v6258_v54  ;;  %v6378_v54 = vld [vmem:[%s8910_s0 + $0x4e4] ss:$24 sps:$4 sm:$0xff]  }
  0x6c   :  { %2714 = vmatpush1.bf16.msra.mxu0 %v6345_v55  ;;  %3773 = vmatpush1.bf16.msra.mxu1 %v6348_v56  ;;  %v6380_v55 = vld [vmem:[%s8910_s0 + $0x4e0] ss:$24 sps:$4 sm:$0xff]   ;;  %v6387_v56 = vld [vmem:[%s8910_s0 + $0x514] ss:$24 sps:$4 sm:$0xff]  }
  0x6d   :  { %2715 = vmatprep.subr.bf16.mxu0 %v6359_v60  ;;  %3774 = vmatprep.subr.bf16.mxu1 %v6362_v62  ;;  %v6399_v60 = vld [vmem:[%s8910_s0 + $0x574] ss:$24 sps:$4 sm:$0xff]   ;;  %v6402_v62 = vld [vmem:[%s8910_s0 + $0x5a4] ss:$24 sps:$4 sm:$0xff]  }
  0x70   :  { %2716 = vmatpush1.bf16.msra.mxu0 %v6357_v59  ;;  %3775 = vmatpush1.bf16.msra.mxu1 %v6360_v61  ;;  %v6392_v59 = vld [vmem:[%s8910_s0 + $0x540] ss:$24 sps:$4 sm:$0xff]   ;;  %v6401_v61 = vld [vmem:[%s8910_s0 + $0x570] ss:$24 sps:$4 sm:$0xff]  }
  0x71   :  { %2717 = vmatprep.subr.bf16.mxu0 %v6371_v4  ;;  %3776 = vmatprep.subr.bf16.mxu1 %v6374_v6  ;;  %v6417_v4 = vld [vmem:[%s8909_s1 + $0x400] ss:$16 sps:$4 sm:$0xff]   ;;  %v6423_v6 = vld [vmem:[%s8910_s0 + $0x3c] ss:$24 sps:$4 sm:$0xff]  }
  0x72   :  { %2433 = vmatmul.mubr.bf16.gmra.mrb[24].mxu0 %v6260_v57  ;;  %3492 = vmatmul.mubr.bf16.gmra.mrb[24].mxu1 %v6260_v57  ;;  %v6389_v57 = vld [vmem:[%s8910_s0 + $0x510] ss:$24 sps:$4 sm:$0xff]  }
  0x73   :  { %2442 = vmatprep.mubr.bf16.mxu0 %v6267_v58  ;;  %3501 = vmatprep.mubr.bf16.mxu1 %v6267_v58  ;;  %v6390_v58 = vld [vmem:[%s8910_s0 + $0x544] ss:$24 sps:$4 sm:$0xff]  }
  0x74   :  { %2718 = vmatpush1.bf16.msra.mxu0 %v6369_v3  ;;  %3777 = vmatpush1.bf16.msra.mxu1 %v6372_v5  ;;  %v6414_v3 = vld [vmem:[%s8910_s0 + $0x8] ss:$24 sps:$4 sm:$0xff]  }
  0x75   :  { %2719 = vmatprep.subr.bf16.mxu0 %v6383_v12  ;;  %3778 = vmatprep.subr.bf16.mxu1 %v6386_v14  ;;  %v6420_v5 = vld [vmem:[%s8909_s1 + $0x408] ss:$16 sps:$4 sm:$0xff]   ;;  %v6446_v12 = vld [vmem:[%s8909_s1 + $0x44c] ss:$16 sps:$4 sm:$0xff]  }
  0x76   :  { %v6426_v14 = vld [vmem:[%s8910_s0 + $0x6c] ss:$24 sps:$4 sm:$0xff]  }
  0x78   :  { %2720 = vmatpush1.bf16.msra.mxu0 %v6381_v11  ;;  %3779 = vmatpush1.bf16.msra.mxu1 %v6384_v13  ;;  %v6443_v11 = vld [vmem:[%s8909_s1 + $0x444] ss:$16 sps:$4 sm:$0xff]   ;;  %v6425_v13 = vld [vmem:[%s8910_s0 + $0x38] ss:$24 sps:$4 sm:$0xff]  }
  0x79   :  { %2721 = vmatprep.subr.bf16.mxu0 %v6395_v20  ;;  %3780 = vmatprep.subr.bf16.mxu1 %v6398_v22  ;;  %v6456_v20 = vld [vmem:[%s8909_s1 + $0x468] ss:$16 sps:$4 sm:$0xff]   ;;  %v6470_v22 = vld [vmem:[%s8909_s1 + $0x48c] ss:$16 sps:$4 sm:$0xff]  }
  0x7a   :  { %2443 = vmatmul.mubr.bf16.gmra.mrb[28].mxu0 %v6269_v63  ;;  %3502 = vmatmul.mubr.bf16.gmra.mrb[28].mxu1 %v6269_v63  ;;  %v6404_v63 = vld [vmem:[%s8910_s0 + $0x5a0] ss:$24 sps:$4 sm:$0xff]  }
  0x7b   :  { %2452 = vmatprep.mubr.bf16.mxu0 %v6270_v0  ;;  %3511 = vmatprep.mubr.bf16.mxu1 %v6270_v0  ;;  %v6411_v0 = vld [vmem:[%s8910_s0 + $0x5d4] ss:$24 sps:$4 sm:$0xff]  }
  0x7c   :  { %2722 = vmatpush1.bf16.msra.mxu0 %v6393_v19  ;;  %3781 = vmatpush1.bf16.msra.mxu1 %v6396_v21  ;;  %v6453_v19 = vld [vmem:[%s8909_s1 + $0x460] ss:$16 sps:$4 sm:$0xff]   ;;  %v6467_v21 = vld [vmem:[%s8909_s1 + $0x484] ss:$16 sps:$4 sm:$0xff]  }
  0x7d   :  { %2723 = vmatprep.subr.bf16.mxu0 %v6407_v28  ;;  %3782 = vmatprep.subr.bf16.mxu1 %v6410_v30  ;;  %v6482_v28 = vld [vmem:[%s8909_s1 + $0x4ac] ss:$16 sps:$4 sm:$0xff]   ;;  %v6480_v30 = vld [vmem:[%s8909_s1 + $0x4a8] ss:$16 sps:$4 sm:$0xff]  }
  0x80   :  { %2724 = vmatpush1.bf16.msra.mxu0 %v6405_v27  ;;  %3783 = vmatpush1.bf16.msra.mxu1 %v6408_v29  ;;  %v6479_v27 = vld [vmem:[%s8909_s1 + $0x4a4] ss:$16 sps:$4 sm:$0xff]   ;;  %v6477_v29 = vld [vmem:[%s8909_s1 + $0x4a0] ss:$16 sps:$4 sm:$0xff]  }
  0x81   :  { %3046 = vmatprep.subr.bf16.mxu0 %v6419_v35  ;;  %4105 = vmatprep.subr.bf16.mxu1 %v6422_v36  ;;  %v6489_v35 = vld [vmem:[%s8909_s1 + $0x4c0] ss:$16 sps:$4 sm:$0xff]   ;;  %v6492_v36 = vld [vmem:[%s8909_s1 + $0x4c8] ss:$16 sps:$4 sm:$0xff]  }
  0x82   :  { %2453 = vmatmul.mubr.bf16.gmra.mrb[32].mxu0 %v6272_v1  ;;  %3512 = vmatmul.mubr.bf16.gmra.mrb[32].mxu1 %v6272_v1  ;;  %v6413_v1 = vld [vmem:[%s8910_s0 + $0x5d0] ss:$24 sps:$4 sm:$0xff]  }
  0x83   :  { %2462 = vmatprep.mubr.bf16.mxu0 %v6279_v2  ;;  %3521 = vmatprep.mubr.bf16.mxu1 %v6279_v2  ;;  %v6416_v2 = vld [vmem:[%s8910_s0 + $0xc] ss:$24 sps:$4 sm:$0xff]  }
  0x8a   :  { %2463 = vmatmul.mubr.bf16.gmra.mrb[36].mxu0 %v6281_v7  ;;  %3522 = vmatmul.mubr.bf16.gmra.mrb[36].mxu1 %v6281_v7  ;;  %v6431_v7 = vld [vmem:[%s8909_s1 + $0x424] ss:$16 sps:$4 sm:$0xff]  }
  0x8b   :  { %2472 = vmatprep.mubr.bf16.mxu0 %v6282_v8  ;;  %3531 = vmatprep.mubr.bf16.mxu1 %v6282_v8  ;;  %v6434_v8 = vld [vmem:[%s8909_s1 + $0x42c] ss:$16 sps:$4 sm:$0xff]  }
  0x92   :  { %2473 = vmatmul.mubr.bf16.gmra.mrb[40].mxu0 %v6284_v9  ;;  %3532 = vmatmul.mubr.bf16.gmra.mrb[40].mxu1 %v6284_v9  ;;  %v6429_v9 = vld [vmem:[%s8909_s1 + $0x420] ss:$16 sps:$4 sm:$0xff]  }
  0x93   :  { %2482 = vmatprep.mubr.bf16.mxu0 %v6291_v10  ;;  %3541 = vmatprep.mubr.bf16.mxu1 %v6291_v10  ;;  %v6432_v10 = vld [vmem:[%s8909_s1 + $0x428] ss:$16 sps:$4 sm:$0xff]  }
  0x9a   :  { %2483 = vmatmul.mubr.bf16.gmra.mrb[44].mxu0 %v6293_v15  ;;  %3542 = vmatmul.mubr.bf16.gmra.mrb[44].mxu1 %v6293_v15  ;;  %v6441_v15 = vld [vmem:[%s8909_s1 + $0x440] ss:$16 sps:$4 sm:$0xff]  }
  0x9b   :  { %2492 = vmatprep.mubr.bf16.mxu0 %v6294_v16  ;;  %3551 = vmatprep.mubr.bf16.mxu1 %v6294_v16  ;;  %v6444_v16 = vld [vmem:[%s8909_s1 + $0x448] ss:$16 sps:$4 sm:$0xff]  }
  0xa2   :  { %2493 = vmatmul.mubr.bf16.gmra.mrb[48].mxu0 %v6296_v17  ;;  %3552 = vmatmul.mubr.bf16.gmra.mrb[48].mxu1 %v6296_v17  ;;  %v6455_v17 = vld [vmem:[%s8909_s1 + $0x464] ss:$16 sps:$4 sm:$0xff]  }
  0xa3   :  { %2502 = vmatprep.mubr.bf16.mxu0 %v6303_v18  ;;  %3561 = vmatprep.mubr.bf16.mxu1 %v6303_v18  ;;  %v6458_v18 = vld [vmem:[%s8909_s1 + $0x46c] ss:$16 sps:$4 sm:$0xff]  }
  0xaa   :  { %2503 = vmatmul.mubr.bf16.gmra.mrb[52].mxu0 %v6305_v23  ;;  %3562 = vmatmul.mubr.bf16.gmra.mrb[52].mxu1 %v6305_v23  ;;  %v6428_v23 = vld [vmem:[%s8910_s0 + $0x68] ss:$24 sps:$4 sm:$0xff]  }
  0xab   :  { %2512 = vmatprep.mubr.bf16.mxu0 %v6306_v24  ;;  %3571 = vmatprep.mubr.bf16.mxu1 %v6306_v24  ;;  %v6435_v24 = vld [vmem:[%s8910_s0 + $0x9c] ss:$24 sps:$4 sm:$0xff]  }
  0xb2   :  { %2513 = vmatmul.mubr.bf16.gmra.mrb[56].mxu0 %v6308_v25  ;;  %3572 = vmatmul.mubr.bf16.gmra.mrb[56].mxu1 %v6308_v25  ;;  %v6465_v25 = vld [vmem:[%s8909_s1 + $0x480] ss:$16 sps:$4 sm:$0xff]  }
  0xb3   :  { %2522 = vmatprep.mubr.bf16.mxu0 %v6315_v26  ;;  %3581 = vmatprep.mubr.bf16.mxu1 %v6315_v26  ;;  %v6468_v26 = vld [vmem:[%s8909_s1 + $0x488] ss:$16 sps:$4 sm:$0xff]  }
  0xba   :  { %2523 = vmatmul.mubr.bf16.gmra.mrb[60].mxu0 %v6317_v31  ;;  %3582 = vmatmul.mubr.bf16.gmra.mrb[60].mxu1 %v6317_v31  ;;  %v6491_v31 = vld [vmem:[%s8909_s1 + $0x4c4] ss:$16 sps:$4 sm:$0xff]  }
  0xbb   :  { %2532 = vmatprep.mubr.bf16.mxu0 %v6318_v32  ;;  %3591 = vmatprep.mubr.bf16.mxu1 %v6318_v32  ;;  %v6494_v32 = vld [vmem:[%s8909_s1 + $0x4cc] ss:$16 sps:$4 sm:$0xff]  }
  0xc2   :  { %2533 = vmatmul.mubr.bf16.gmra.mrb[64].mxu0 %v6320_v33  ;;  %3592 = vmatmul.mubr.bf16.gmra.mrb[64].mxu1 %v6320_v33  ;;  %v6437_v33 = vld [vmem:[%s8910_s0 + $0x98] ss:$24 sps:$4 sm:$0xff]  }
  0xc3   :  { %2542 = vmatprep.mubr.bf16.mxu0 %v6327_v34  ;;  %3601 = vmatprep.mubr.bf16.mxu1 %v6327_v34  ;;  %v6438_v34 = vld [vmem:[%s8910_s0 + $0xcc] ss:$24 sps:$4 sm:$0xff]  }
  0xca   :  { %2543 = vmatmul.mubr.bf16.gmra.mrb[68].mxu0 %v6329_v37  ;;  %3602 = vmatmul.mubr.bf16.gmra.mrb[68].mxu1 %v6329_v37  ;;  %v6503_v37 = vld [vmem:[%s8909_s1 + $0x4e4] ss:$16 sps:$4 sm:$0xff]  }
  0xcb   :  { %2552 = vmatprep.mubr.bf16.mxu0 %v6330_v38  ;;  %3611 = vmatprep.mubr.bf16.mxu1 %v6330_v38  ;;  %v6506_v38 = vld [vmem:[%s8909_s1 + $0x4ec] ss:$16 sps:$4 sm:$0xff]  }
  0xd2   :  { %2553 = vmatmul.mubr.bf16.gmra.mrb[72].mxu0 %v6332_v39  ;;  %3612 = vmatmul.mubr.bf16.gmra.mrb[72].mxu1 %v6332_v39  ;;  %v6501_v39 = vld [vmem:[%s8909_s1 + $0x4e0] ss:$16 sps:$4 sm:$0xff]  }
  0xd3   :  { %2562 = vmatprep.mubr.bf16.mxu0 %v6339_v40  ;;  %3621 = vmatprep.mubr.bf16.mxu1 %v6339_v40  ;;  %v6504_v40 = vld [vmem:[%s8909_s1 + $0x4e8] ss:$16 sps:$4 sm:$0xff]  }
  0xda   :  { %2563 = vmatmul.mubr.bf16.gmra.mrb[76].mxu0 %v6341_v41  ;;  %3622 = vmatmul.mubr.bf16.gmra.mrb[76].mxu1 %v6341_v41  ;;  %v6515_v41 = vld [vmem:[%s8909_s1 + $0x504] ss:$16 sps:$4 sm:$0xff]  }
  0xdb   :  { %2572 = vmatprep.mubr.bf16.mxu0 %v6342_v42  ;;  %3631 = vmatprep.mubr.bf16.mxu1 %v6342_v42  ;;  %v6518_v42 = vld [vmem:[%s8909_s1 + $0x50c] ss:$16 sps:$4 sm:$0xff]  }
  0xe2   :  { %2573 = vmatmul.mubr.bf16.gmra.mrb[80].mxu0 %v6344_v43  ;;  %3632 = vmatmul.mubr.bf16.gmra.mrb[80].mxu1 %v6344_v43  ;;  %v6440_v43 = vld [vmem:[%s8910_s0 + $0xc8] ss:$24 sps:$4 sm:$0xff]  }
  0xe3   :  { %2582 = vmatprep.mubr.bf16.mxu0 %v6351_v44  ;;  %3641 = vmatprep.mubr.bf16.mxu1 %v6351_v44  ;;  %v6447_v44 = vld [vmem:[%s8910_s0 + $0xfc] ss:$24 sps:$4 sm:$0xff]  }
  0xea   :  { %2583 = vmatmul.mubr.bf16.gmra.mrb[84].mxu0 %v6353_v45  ;;  %3642 = vmatmul.mubr.bf16.gmra.mrb[84].mxu1 %v6353_v45  ;;  %v6513_v45 = vld [vmem:[%s8909_s1 + $0x500] ss:$16 sps:$4 sm:$0xff]  }
  0xeb   :  { %2592 = vmatprep.mubr.bf16.mxu0 %v6354_v46  ;;  %3651 = vmatprep.mubr.bf16.mxu1 %v6354_v46  ;;  %v6516_v46 = vld [vmem:[%s8909_s1 + $0x508] ss:$16 sps:$4 sm:$0xff]  }
  0xf2   :  { %2593 = vmatmul.mubr.bf16.gmra.mrb[88].mxu0 %v6356_v47  ;;  %3652 = vmatmul.mubr.bf16.gmra.mrb[88].mxu1 %v6356_v47  ;;  %v6527_v47 = vld [vmem:[%s8909_s1 + $0x524] ss:$16 sps:$4 sm:$0xff]  }
  0xf3   :  { %2602 = vmatprep.mubr.bf16.mxu0 %v6363_v48  ;;  %3661 = vmatprep.mubr.bf16.mxu1 %v6363_v48  ;;  %v6530_v48 = vld [vmem:[%s8909_s1 + $0x52c] ss:$16 sps:$4 sm:$0xff]  }
  0xfa   :  { %2603 = vmatmul.mubr.bf16.gmra.mrb[92].mxu0 %v6365_v49  ;;  %3662 = vmatmul.mubr.bf16.gmra.mrb[92].mxu1 %v6365_v49  ;;  %v6525_v49 = vld [vmem:[%s8909_s1 + $0x520] ss:$16 sps:$4 sm:$0xff]  }
  0xfb   :  { %2612 = vmatprep.mubr.bf16.mxu0 %v6366_v50  ;;  %3671 = vmatprep.mubr.bf16.mxu1 %v6366_v50  ;;  %v6528_v50 = vld [vmem:[%s8909_s1 + $0x528] ss:$16 sps:$4 sm:$0xff]  }
 0x102   :  { %2613 = vmatmul.mubr.bf16.gmra.mrb[96].mxu0 %v6368_v51  ;;  %3672 = vmatmul.mubr.bf16.gmra.mrb[96].mxu1 %v6368_v51  ;;  %v6539_v51 = vld [vmem:[%s8909_s1 + $0x544] ss:$16 sps:$4 sm:$0xff]  }
 0x103   :  { %2622 = vmatprep.mubr.bf16.mxu0 %v6375_v52  ;;  %3681 = vmatprep.mubr.bf16.mxu1 %v6375_v52  ;;  %v6542_v52 = vld [vmem:[%s8909_s1 + $0x54c] ss:$16 sps:$4 sm:$0xff]  }
 0x10a   :  { %2623 = vmatmul.mubr.bf16.gmra.mrb[100].mxu0 %v6377_v53  ;;  %3682 = vmatmul.mubr.bf16.gmra.mrb[100].mxu1 %v6377_v53  ;;  %v6449_v53 = vld [vmem:[%s8910_s0 + $0xf8] ss:$24 sps:$4 sm:$0xff]  }
 0x10b   :  { %2632 = vmatprep.mubr.bf16.mxu0 %v6378_v54  ;;  %3691 = vmatprep.mubr.bf16.mxu1 %v6378_v54  ;;  %v6450_v54 = vld [vmem:[%s8910_s0 + $0x12c] ss:$24 sps:$4 sm:$0xff]  }
 0x112   :  { %2633 = vmatmul.mubr.bf16.gmra.mrb[104].mxu0 %v6380_v55  ;;  %3692 = vmatmul.mubr.bf16.gmra.mrb[104].mxu1 %v6380_v55  ;;  %v6537_v55 = vld [vmem:[%s8909_s1 + $0x540] ss:$16 sps:$4 sm:$0xff]  }
 0x113   :  { %2642 = vmatprep.mubr.bf16.mxu0 %v6387_v56  ;;  %3701 = vmatprep.mubr.bf16.mxu1 %v6387_v56  ;;  %v6540_v56 = vld [vmem:[%s8909_s1 + $0x548] ss:$16 sps:$4 sm:$0xff]  }
 0x11a   :  { %2643 = vmatmul.mubr.bf16.gmra.mrb[108].mxu0 %v6389_v57  ;;  %3702 = vmatmul.mubr.bf16.gmra.mrb[108].mxu1 %v6389_v57  ;;  %v6452_v57 = vld [vmem:[%s8910_s0 + $0x128] ss:$24 sps:$4 sm:$0xff]  }
 0x11b   :  { %2652 = vmatprep.mubr.bf16.mxu0 %v6390_v58  ;;  %3711 = vmatprep.mubr.bf16.mxu1 %v6390_v58  ;;  %v6459_v58 = vld [vmem:[%s8910_s0 + $0x15c] ss:$24 sps:$4 sm:$0xff]  }
 0x122   :  { %2653 = vmatmul.mubr.bf16.gmra.mrb[112].mxu0 %v6392_v59  ;;  %3712 = vmatmul.mubr.bf16.gmra.mrb[112].mxu1 %v6392_v59  ;;  %v6549_v59 = vld [vmem:[%s8909_s1 + $0x560] ss:$16 sps:$4 sm:$0xff]  }
 0x123   :  { %2662 = vmatprep.mubr.bf16.mxu0 %v6399_v60  ;;  %3721 = vmatprep.mubr.bf16.mxu1 %v6399_v60  ;;  %v6551_v60 = vld [vmem:[%s8909_s1 + $0x564] ss:$16 sps:$4 sm:$0xff]  }
 0x12a   :  { %2663 = vmatmul.mubr.bf16.gmra.mrb[116].mxu0 %v6401_v61  ;;  %3722 = vmatmul.mubr.bf16.gmra.mrb[116].mxu1 %v6401_v61  ;;  %v6552_v61 = vld [vmem:[%s8909_s1 + $0x568] ss:$16 sps:$4 sm:$0xff]  }
 0x12b   :  { %2672 = vmatprep.mubr.bf16.mxu0 %v6402_v62  ;;  %3731 = vmatprep.mubr.bf16.mxu1 %v6402_v62  ;;  %v6554_v62 = vld [vmem:[%s8909_s1 + $0x56c] ss:$16 sps:$4 sm:$0xff]  }
 0x132   :  { %2673 = vmatmul.mubr.bf16.gmra.mrb[120].mxu0 %v6404_v63  ;;  %3732 = vmatmul.mubr.bf16.gmra.mrb[120].mxu1 %v6404_v63  ;;  %v6461_v63 = vld [vmem:[%s8910_s0 + $0x158] ss:$24 sps:$4 sm:$0xff]  }
 0x133   :  { %2682 = vmatprep.mubr.bf16.mxu0 %v6411_v0  ;;  %3741 = vmatprep.mubr.bf16.mxu1 %v6411_v0  ;;  %v6462_v0 = vld [vmem:[%s8910_s0 + $0x18c] ss:$24 sps:$4 sm:$0xff]  }
 0x13a   :  { %2683 = vmatmul.mubr.bf16.gmra.mrb[124].mxu0 %v6413_v1  ;;  %3742 = vmatmul.mubr.bf16.gmra.mrb[124].mxu1 %v6413_v1  ;;  %v6464_v1 = vld [vmem:[%s8910_s0 + $0x188] ss:$24 sps:$4 sm:$0xff]  }
 0x13b   :  { %2725 = vmatprep.mubr.bf16.mxu0 %v6416_v2  ;;  %3784 = vmatprep.mubr.bf16.mxu1 %v6416_v2  ;;  %v6471_v2 = vld [vmem:[%s8910_s0 + $0x1bc] ss:$24 sps:$4 sm:$0xff]  }
 0x142   :  { %2726 = vmatmul.mubr.bf16.vlgmr.msra.gmra.mrb[0].mxu0 %v6414_v3  ;;  %3785 = vmatmul.mubr.bf16.vlgmr.msra.gmra.mrb[0].mxu1 %v6414_v3  ;;  %v6561_v3 = vld [vmem:[%s8909_s1 + $0x580] ss:$16 sps:$4 sm:$0xff]  }
 0x143   :  { %3047 = vmatpush1.bf16.msra.mxu0 %v6417_v4  ;;  %4106 = vmatpush1.bf16.msra.mxu1 %v6420_v5  ;;  %v6563_v4 = vld [vmem:[%s8909_s1 + $0x584] ss:$16 sps:$4 sm:$0xff]   ;;  %v6564_v5 = vld [vmem:[%s8909_s1 + $0x588] ss:$16 sps:$4 sm:$0xff]  }
 0x144   :  { %2735 = vmatprep.mubr.bf16.mxu0 %v6423_v6  ;;  %3794 = vmatprep.mubr.bf16.mxu1 %v6423_v6  ;;  %v6566_v6 = vld [vmem:[%s8909_s1 + $0x58c] ss:$16 sps:$4 sm:$0xff]  }
 0x145   :  { %3048 = vmatprep.subr.bf16.mxu0 %v6431_v7  ;;  %4107 = vmatprep.subr.bf16.mxu1 %v6434_v8  ;;  %v6473_v7 = vld [vmem:[%s8910_s0 + $0x1b8] ss:$24 sps:$4 sm:$0xff]   ;;  %v6474_v8 = vld [vmem:[%s8910_s0 + $0x1ec] ss:$24 sps:$4 sm:$0xff]  }
 0x147   :  { %3049 = vmatpush1.bf16.msra.mxu0 %v6429_v9  ;;  %4108 = vmatpush1.bf16.msra.mxu1 %v6432_v10  ;;  %v6476_v9 = vld [vmem:[%s8910_s0 + $0x1e8] ss:$24 sps:$4 sm:$0xff]   ;;  %v6483_v10 = vld [vmem:[%s8910_s0 + $0x21c] ss:$24 sps:$4 sm:$0xff]  }
 0x148   :  { %3050 = vmatprep.subr.bf16.mxu0 %v6443_v11  ;;  %4109 = vmatprep.subr.bf16.mxu1 %v6446_v12  ;;  %v6573_v11 = vld [vmem:[%s8909_s1 + $0x5a0] ss:$16 sps:$4 sm:$0xff]   ;;  %v6575_v12 = vld [vmem:[%s8909_s1 + $0x5a4] ss:$16 sps:$4 sm:$0xff]  }
 0x14a   :  { %2736 = vmatmul.mubr.bf16.gmra.mrb[4].mxu0 %v6425_v13  ;;  %3795 = vmatmul.mubr.bf16.gmra.mrb[4].mxu1 %v6425_v13  ;;  %v6576_v13 = vld [vmem:[%s8909_s1 + $0x5a8] ss:$16 sps:$4 sm:$0xff]  }
 0x14b   :  { %2745 = vmatprep.mubr.bf16.mxu0 %v6426_v14  ;;  %3804 = vmatprep.mubr.bf16.mxu1 %v6426_v14  ;;  %v6578_v14 = vld [vmem:[%s8909_s1 + $0x5ac] ss:$16 sps:$4 sm:$0xff]  }
 0x14c   :  { %3051 = vmatpush1.bf16.msra.mxu0 %v6441_v15  ;;  %4110 = vmatpush1.bf16.msra.mxu1 %v6444_v16  ;;  %v6485_v15 = vld [vmem:[%s8910_s0 + $0x218] ss:$24 sps:$4 sm:$0xff]   ;;  %v6486_v16 = vld [vmem:[%s8910_s0 + $0x24c] ss:$24 sps:$4 sm:$0xff]  }
 0x14d   :  { %3052 = vmatprep.subr.bf16.mxu0 %v6455_v17  ;;  %4111 = vmatprep.subr.bf16.mxu1 %v6458_v18  ;;  %v6488_v17 = vld [vmem:[%s8910_s0 + $0x248] ss:$24 sps:$4 sm:$0xff]   ;;  %v6495_v18 = vld [vmem:[%s8910_s0 + $0x27c] ss:$24 sps:$4 sm:$0xff]  }
 0x150   :  { %3053 = vmatpush1.bf16.msra.mxu0 %v6453_v19  ;;  %4112 = vmatpush1.bf16.msra.mxu1 %v6456_v20  ;;  %v6585_v19 = vld [vmem:[%s8909_s1 + $0x5c0] ss:$16 sps:$4 sm:$0xff]   ;;  %v6587_v20 = vld [vmem:[%s8909_s1 + $0x5c4] ss:$16 sps:$4 sm:$0xff]  }
 0x151   :  { %3054 = vmatprep.subr.bf16.mxu0 %v6467_v21  ;;  %4113 = vmatprep.subr.bf16.mxu1 %v6470_v22  ;;  %v6588_v21 = vld [vmem:[%s8909_s1 + $0x5c8] ss:$16 sps:$4 sm:$0xff]   ;;  %v6590_v22 = vld [vmem:[%s8909_s1 + $0x5cc] ss:$16 sps:$4 sm:$0xff]  }
 0x152   :  { %2746 = vmatmul.mubr.bf16.gmra.mrb[8].mxu0 %v6428_v23  ;;  %3805 = vmatmul.mubr.bf16.gmra.mrb[8].mxu1 %v6428_v23  ;;  %v6497_v23 = vld [vmem:[%s8910_s0 + $0x278] ss:$24 sps:$4 sm:$0xff]  }
 0x153   :  { %2755 = vmatprep.mubr.bf16.mxu0 %v6435_v24  ;;  %3814 = vmatprep.mubr.bf16.mxu1 %v6435_v24  ;;  %v6498_v24 = vld [vmem:[%s8910_s0 + $0x2ac] ss:$24 sps:$4 sm:$0xff]  }
 0x154   :  { %3055 = vmatpush1.bf16.msra.mxu0 %v6465_v25  ;;  %4114 = vmatpush1.bf16.msra.mxu1 %v6468_v26  ;;  %v6500_v25 = vld [vmem:[%s8910_s0 + $0x2a8] ss:$24 sps:$4 sm:$0xff]   ;;  %v6507_v26 = vld [vmem:[%s8910_s0 + $0x2dc] ss:$24 sps:$4 sm:$0xff]  }
 0x155   :  { %3056 = vmatprep.subr.bf16.mxu0 %v6479_v27  ;;  %4115 = vmatprep.subr.bf16.mxu1 %v6482_v28  ;;  %v6597_v27 = vld [vmem:[%s8909_s1 + $0x5e0] ss:$16 sps:$4 sm:$0xff]   ;;  %v6599_v28 = vld [vmem:[%s8909_s1 + $0x5e4] ss:$16 sps:$4 sm:$0xff]  }
 0x158   :  { %3057 = vmatpush1.bf16.msra.mxu0 %v6477_v29  ;;  %4116 = vmatpush1.bf16.msra.mxu1 %v6480_v30  ;;  %v6600_v29 = vld [vmem:[%s8909_s1 + $0x5e8] ss:$16 sps:$4 sm:$0xff]   ;;  %v6602_v30 = vld [vmem:[%s8909_s1 + $0x5ec] ss:$16 sps:$4 sm:$0xff]  }
 0x159   :  { %3058 = vmatprep.subr.bf16.mxu0 %v6491_v31  ;;  %4117 = vmatprep.subr.bf16.mxu1 %v6494_v32  ;;  %v6509_v31 = vld [vmem:[%s8910_s0 + $0x2d8] ss:$24 sps:$4 sm:$0xff]   ;;  %v6510_v32 = vld [vmem:[%s8910_s0 + $0x30c] ss:$24 sps:$4 sm:$0xff]  }
 0x15a   :  { %2756 = vmatmul.mubr.bf16.gmra.mrb[12].mxu0 %v6437_v33  ;;  %3815 = vmatmul.mubr.bf16.gmra.mrb[12].mxu1 %v6437_v33  ;;  %v6512_v33 = vld [vmem:[%s8910_s0 + $0x308] ss:$24 sps:$4 sm:$0xff]  }
 0x15b   :  { %2765 = vmatprep.mubr.bf16.mxu0 %v6438_v34  ;;  %3824 = vmatprep.mubr.bf16.mxu1 %v6438_v34  ;;  %v6519_v34 = vld [vmem:[%s8910_s0 + $0x33c] ss:$24 sps:$4 sm:$0xff]  }
 0x15c   :  { %3059 = vmatpush1.bf16.msra.mxu0 %v6489_v35  ;;  %4118 = vmatpush1.bf16.msra.mxu1 %v6492_v36  ;;  %v6521_v35 = vld [vmem:[%s8910_s0 + $0x338] ss:$24 sps:$4 sm:$0xff]   ;;  %v6522_v36 = vld [vmem:[%s8910_s0 + $0x36c] ss:$24 sps:$4 sm:$0xff]  }
 0x15d   :  { %3060 = vmatprep.subr.bf16.mxu0 %v6503_v37  ;;  %4119 = vmatprep.subr.bf16.mxu1 %v6506_v38  ;;  %v6524_v37 = vld [vmem:[%s8910_s0 + $0x368] ss:$24 sps:$4 sm:$0xff]   ;;  %v6531_v38 = vld [vmem:[%s8910_s0 + $0x39c] ss:$24 sps:$4 sm:$0xff]  }
 0x160   :  { %3061 = vmatpush1.bf16.msra.mxu0 %v6501_v39  ;;  %4120 = vmatpush1.bf16.msra.mxu1 %v6504_v40  ;;  %v6533_v39 = vld [vmem:[%s8910_s0 + $0x398] ss:$24 sps:$4 sm:$0xff]   ;;  %v6534_v40 = vld [vmem:[%s8910_s0 + $0x3cc] ss:$24 sps:$4 sm:$0xff]  }
 0x161   :  { %3062 = vmatprep.subr.bf16.mxu0 %v6515_v41  ;;  %4121 = vmatprep.subr.bf16.mxu1 %v6518_v42  ;;  %v6536_v41 = vld [vmem:[%s8910_s0 + $0x3c8] ss:$24 sps:$4 sm:$0xff]   ;;  %v6543_v42 = vld [vmem:[%s8910_s0 + $0x3fc] ss:$24 sps:$4 sm:$0xff]  }
 0x162   :  { %2766 = vmatmul.mubr.bf16.gmra.mrb[16].mxu0 %v6440_v43  ;;  %3825 = vmatmul.mubr.bf16.gmra.mrb[16].mxu1 %v6440_v43  ;;  %v6545_v43 = vld [vmem:[%s8910_s0 + $0x3f8] ss:$24 sps:$4 sm:$0xff]  }
 0x163   :  { %2775 = vmatprep.mubr.bf16.mxu0 %v6447_v44  ;;  %3834 = vmatprep.mubr.bf16.mxu1 %v6447_v44  ;;  %v6546_v44 = vld [vmem:[%s8910_s0 + $0x42c] ss:$24 sps:$4 sm:$0xff]  }
 0x164   :  { %3063 = vmatpush1.bf16.msra.mxu0 %v6513_v45  ;;  %4122 = vmatpush1.bf16.msra.mxu1 %v6516_v46  ;;  %v6548_v45 = vld [vmem:[%s8910_s0 + $0x428] ss:$24 sps:$4 sm:$0xff]   ;;  %v6555_v46 = vld [vmem:[%s8910_s0 + $0x45c] ss:$24 sps:$4 sm:$0xff]  }
 0x165   :  { %3064 = vmatprep.subr.bf16.mxu0 %v6527_v47  ;;  %4123 = vmatprep.subr.bf16.mxu1 %v6530_v48  ;;  %v6557_v47 = vld [vmem:[%s8910_s0 + $0x458] ss:$24 sps:$4 sm:$0xff]   ;;  %v6558_v48 = vld [vmem:[%s8910_s0 + $0x48c] ss:$24 sps:$4 sm:$0xff]  }
 0x168   :  { %3065 = vmatpush1.bf16.msra.mxu0 %v6525_v49  ;;  %4124 = vmatpush1.bf16.msra.mxu1 %v6528_v50  ;;  %v6560_v49 = vld [vmem:[%s8910_s0 + $0x488] ss:$24 sps:$4 sm:$0xff]   ;;  %v6567_v50 = vld [vmem:[%s8910_s0 + $0x4bc] ss:$24 sps:$4 sm:$0xff]  }
 0x169   :  { %3066 = vmatprep.subr.bf16.mxu0 %v6539_v51  ;;  %4125 = vmatprep.subr.bf16.mxu1 %v6542_v52  ;;  %v6569_v51 = vld [vmem:[%s8910_s0 + $0x4b8] ss:$24 sps:$4 sm:$0xff]   ;;  %v6570_v52 = vld [vmem:[%s8910_s0 + $0x4ec] ss:$24 sps:$4 sm:$0xff]  }
 0x16a   :  { %2776 = vmatmul.mubr.bf16.gmra.mrb[20].mxu0 %v6449_v53  ;;  %3835 = vmatmul.mubr.bf16.gmra.mrb[20].mxu1 %v6449_v53  ;;  %v6572_v53 = vld [vmem:[%s8910_s0 + $0x4e8] ss:$24 sps:$4 sm:$0xff]  }
 0x16b   :  { %2785 = vmatprep.mubr.bf16.mxu0 %v6450_v54  ;;  %3844 = vmatprep.mubr.bf16.mxu1 %v6450_v54  ;;  %v6579_v54 = vld [vmem:[%s8910_s0 + $0x51c] ss:$24 sps:$4 sm:$0xff]  }
 0x16c   :  { %3067 = vmatpush1.bf16.msra.mxu0 %v6537_v55  ;;  %4126 = vmatpush1.bf16.msra.mxu1 %v6540_v56  ;;  %v6581_v55 = vld [vmem:[%s8910_s0 + $0x518] ss:$24 sps:$4 sm:$0xff]   ;;  %v6582_v56 = vld [vmem:[%s8910_s0 + $0x54c] ss:$24 sps:$4 sm:$0xff]  }
 0x16d   :  { %3068 = vmatprep.subr.bf16.mxu0 %v6551_v60  ;;  %4127 = vmatprep.subr.bf16.mxu1 %v6554_v62  ;;  %v6594_v60 = vld [vmem:[%s8910_s0 + $0x5ac] ss:$24 sps:$4 sm:$0xff]   ;;  %v6603_v62 = vld [vmem:[%s8910_s0 + $0x5dc] ss:$24 sps:$4 sm:$0xff]  }
 0x170   :  { %3069 = vmatpush1.bf16.msra.mxu0 %v6549_v59  ;;  %4128 = vmatpush1.bf16.msra.mxu1 %v6552_v61  ;;  %v6593_v59 = vld [vmem:[%s8910_s0 + $0x578] ss:$24 sps:$4 sm:$0xff]   ;;  %v6596_v61 = vld [vmem:[%s8910_s0 + $0x5a8] ss:$24 sps:$4 sm:$0xff]  }
 0x171   :  { %3070 = vmatprep.subr.bf16.mxu0 %v6563_v4  ;;  %4129 = vmatprep.subr.bf16.mxu1 %v6566_v6  ;;  %v6612_v4 = vld [vmem:[%s8910_s0 + $0x74] ss:$24 sps:$4 sm:$0xff]   ;;  %v6615_v6 = vld [vmem:[%s8910_s0 + $0xa4] ss:$24 sps:$4 sm:$0xff]  }
 0x172   :  { %2786 = vmatmul.mubr.bf16.gmra.mrb[24].mxu0 %v6452_v57  ;;  %3845 = vmatmul.mubr.bf16.gmra.mrb[24].mxu1 %v6452_v57  ;;  %v6584_v57 = vld [vmem:[%s8910_s0 + $0x548] ss:$24 sps:$4 sm:$0xff]  }
 0x173   :  { %2795 = vmatprep.mubr.bf16.mxu0 %v6459_v58  ;;  %3854 = vmatprep.mubr.bf16.mxu1 %v6459_v58  ;;  %v6591_v58 = vld [vmem:[%s8910_s0 + $0x57c] ss:$24 sps:$4 sm:$0xff]  }
 0x174   :  { %3071 = vmatpush1.bf16.msra.mxu0 %v6561_v3  ;;  %4130 = vmatpush1.bf16.msra.mxu1 %v6564_v5  ;;  %v6611_v3 = vld [vmem:[%s8910_s0 + $0x40] ss:$24 sps:$4 sm:$0xff]   ;;  %v6614_v5 = vld [vmem:[%s8910_s0 + $0x70] ss:$24 sps:$4 sm:$0xff]  }
 0x175   :  { %3072 = vmatprep.subr.bf16.mxu0 %v6575_v12  ;;  %4131 = vmatprep.subr.bf16.mxu1 %v6578_v14  ;;  %v6624_v12 = vld [vmem:[%s8910_s0 + $0x134] ss:$24 sps:$4 sm:$0xff]   ;;  %v6627_v14 = vld [vmem:[%s8910_s0 + $0x164] ss:$24 sps:$4 sm:$0xff]  }
 0x178   :  { %3073 = vmatpush1.bf16.msra.mxu0 %v6573_v11  ;;  %4132 = vmatpush1.bf16.msra.mxu1 %v6576_v13  ;;  %v6623_v11 = vld [vmem:[%s8910_s0 + $0x100] ss:$24 sps:$4 sm:$0xff]   ;;  %v6626_v13 = vld [vmem:[%s8910_s0 + $0x130] ss:$24 sps:$4 sm:$0xff]  }
 0x179   :  { %3074 = vmatprep.subr.bf16.mxu0 %v6587_v20  ;;  %4133 = vmatprep.subr.bf16.mxu1 %v6590_v22  ;;  %v6636_v20 = vld [vmem:[%s8910_s0 + $0x1f4] ss:$24 sps:$4 sm:$0xff]   ;;  %v6639_v22 = vld [vmem:[%s8910_s0 + $0x224] ss:$24 sps:$4 sm:$0xff]  }
 0x17a   :  { %2796 = vmatmul.mubr.bf16.gmra.mrb[28].mxu0 %v6461_v63  ;;  %3855 = vmatmul.mubr.bf16.gmra.mrb[28].mxu1 %v6461_v63  ;;  %v6605_v63 = vld [vmem:[%s8910_s0 + $0x5d8] ss:$24 sps:$4 sm:$0xff]  }
 0x17b   :  { %2805 = vmatprep.mubr.bf16.mxu0 %v6462_v0  ;;  %3864 = vmatprep.mubr.bf16.mxu1 %v6462_v0  ;;  %v6608_v0 = vld [vmem:[%s8910_s0 + $0x14] ss:$24 sps:$4 sm:$0xff]  }
 0x17c   :  { %3075 = vmatpush1.bf16.msra.mxu0 %v6585_v19  ;;  %4134 = vmatpush1.bf16.msra.mxu1 %v6588_v21  ;;  %v6635_v19 = vld [vmem:[%s8910_s0 + $0x1c0] ss:$24 sps:$4 sm:$0xff]   ;;  %v6638_v21 = vld [vmem:[%s8910_s0 + $0x1f0] ss:$24 sps:$4 sm:$0xff]  }
 0x17d   :  { %3076 = vmatprep.subr.bf16.mxu0 %v6599_v28  ;;  %4135 = vmatprep.subr.bf16.mxu1 %v6602_v30  ;;  %v6648_v28 = vld [vmem:[%s8910_s0 + $0x2b4] ss:$24 sps:$4 sm:$0xff]   ;;  %v6651_v30 = vld [vmem:[%s8910_s0 + $0x2e4] ss:$24 sps:$4 sm:$0xff]  }
 0x180   :  { %3077 = vmatpush1.bf16.msra.mxu0 %v6597_v27  ;;  %4136 = vmatpush1.bf16.msra.mxu1 %v6600_v29  ;;  %v6647_v27 = vld [vmem:[%s8910_s0 + $0x280] ss:$24 sps:$4 sm:$0xff]   ;;  %v6650_v29 = vld [vmem:[%s8910_s0 + $0x2b0] ss:$24 sps:$4 sm:$0xff]  }
 0x182   :  { %2806 = vmatmul.mubr.bf16.gmra.mrb[32].mxu0 %v6464_v1  ;;  %3865 = vmatmul.mubr.bf16.gmra.mrb[32].mxu1 %v6464_v1  ;;  %v6606_v1 = vld [vmem:[%s8910_s0 + $0x10] ss:$24 sps:$4 sm:$0xff]  }
 0x183   :  { %2815 = vmatprep.mubr.bf16.mxu0 %v6471_v2  ;;  %3874 = vmatprep.mubr.bf16.mxu1 %v6471_v2  ;;  %v6609_v2 = vld [vmem:[%s8910_s0 + $0x44] ss:$24 sps:$4 sm:$0xff]  }
 0x18a   :  { %2816 = vmatmul.mubr.bf16.gmra.mrb[36].mxu0 %v6473_v7  ;;  %3875 = vmatmul.mubr.bf16.gmra.mrb[36].mxu1 %v6473_v7  ;;  %v6617_v7 = vld [vmem:[%s8910_s0 + $0xa0] ss:$24 sps:$4 sm:$0xff]  }
 0x18b   :  { %2825 = vmatprep.mubr.bf16.mxu0 %v6474_v8  ;;  %3884 = vmatprep.mubr.bf16.mxu1 %v6474_v8  ;;  %v6618_v8 = vld [vmem:[%s8910_s0 + $0xd4] ss:$24 sps:$4 sm:$0xff]  }
 0x192   :  { %2826 = vmatmul.mubr.bf16.gmra.mrb[40].mxu0 %v6476_v9  ;;  %3885 = vmatmul.mubr.bf16.gmra.mrb[40].mxu1 %v6476_v9  ;;  %v6620_v9 = vld [vmem:[%s8910_s0 + $0xd0] ss:$24 sps:$4 sm:$0xff]  }
 0x193   :  { %2835 = vmatprep.mubr.bf16.mxu0 %v6483_v10  ;;  %3894 = vmatprep.mubr.bf16.mxu1 %v6483_v10  ;;  %v6621_v10 = vld [vmem:[%s8910_s0 + $0x104] ss:$24 sps:$4 sm:$0xff]  }
 0x19a   :  { %2836 = vmatmul.mubr.bf16.gmra.mrb[44].mxu0 %v6485_v15  ;;  %3895 = vmatmul.mubr.bf16.gmra.mrb[44].mxu1 %v6485_v15  ;;  %v6629_v15 = vld [vmem:[%s8910_s0 + $0x160] ss:$24 sps:$4 sm:$0xff]  }
 0x19b   :  { %2845 = vmatprep.mubr.bf16.mxu0 %v6486_v16  ;;  %3904 = vmatprep.mubr.bf16.mxu1 %v6486_v16  ;;  %v6630_v16 = vld [vmem:[%s8910_s0 + $0x194] ss:$24 sps:$4 sm:$0xff]  }
 0x1a2   :  { %2846 = vmatmul.mubr.bf16.gmra.mrb[48].mxu0 %v6488_v17  ;;  %3905 = vmatmul.mubr.bf16.gmra.mrb[48].mxu1 %v6488_v17  ;;  %v6632_v17 = vld [vmem:[%s8910_s0 + $0x190] ss:$24 sps:$4 sm:$0xff]  }
 0x1a3   :  { %2855 = vmatprep.mubr.bf16.mxu0 %v6495_v18  ;;  %3914 = vmatprep.mubr.bf16.mxu1 %v6495_v18  ;;  %v6633_v18 = vld [vmem:[%s8910_s0 + $0x1c4] ss:$24 sps:$4 sm:$0xff]  }
 0x1aa   :  { %2856 = vmatmul.mubr.bf16.gmra.mrb[52].mxu0 %v6497_v23  ;;  %3915 = vmatmul.mubr.bf16.gmra.mrb[52].mxu1 %v6497_v23  ;;  %v6641_v23 = vld [vmem:[%s8910_s0 + $0x220] ss:$24 sps:$4 sm:$0xff]  }
 0x1ab   :  { %2865 = vmatprep.mubr.bf16.mxu0 %v6498_v24  ;;  %3924 = vmatprep.mubr.bf16.mxu1 %v6498_v24  ;;  %v6642_v24 = vld [vmem:[%s8910_s0 + $0x254] ss:$24 sps:$4 sm:$0xff]  }
 0x1b2   :  { %2866 = vmatmul.mubr.bf16.gmra.mrb[56].mxu0 %v6500_v25  ;;  %3925 = vmatmul.mubr.bf16.gmra.mrb[56].mxu1 %v6500_v25  ;;  %v6644_v25 = vld [vmem:[%s8910_s0 + $0x250] ss:$24 sps:$4 sm:$0xff]  }
 0x1b3   :  { %2875 = vmatprep.mubr.bf16.mxu0 %v6507_v26  ;;  %3934 = vmatprep.mubr.bf16.mxu1 %v6507_v26  ;;  %v6645_v26 = vld [vmem:[%s8910_s0 + $0x284] ss:$24 sps:$4 sm:$0xff]  }
 0x1ba   :  { %2876 = vmatmul.mubr.bf16.gmra.mrb[60].mxu0 %v6509_v31  ;;  %3935 = vmatmul.mubr.bf16.gmra.mrb[60].mxu1 %v6509_v31  ;;  %v6653_v31 = vld [vmem:[%s8910_s0 + $0x2e0] ss:$24 sps:$4 sm:$0xff]  }
 0x1bb   :  { %2885 = vmatprep.mubr.bf16.mxu0 %v6510_v32  ;;  %3944 = vmatprep.mubr.bf16.mxu1 %v6510_v32  ;;  %v6654_v32 = vld [vmem:[%s8910_s0 + $0x314] ss:$24 sps:$4 sm:$0xff]  }
 0x1c2   :  { %2886 = vmatmul.mubr.bf16.gmra.mrb[64].mxu0 %v6512_v33  ;;  %3945 = vmatmul.mubr.bf16.gmra.mrb[64].mxu1 %v6512_v33  ;;  %v6656_v33 = vld [vmem:[%s8910_s0 + $0x310] ss:$24 sps:$4 sm:$0xff]  }
 0x1c3   :  { %2895 = vmatprep.mubr.bf16.mxu0 %v6519_v34  ;;  %3954 = vmatprep.mubr.bf16.mxu1 %v6519_v34  ;;  %v6657_v34 = vld [vmem:[%s8910_s0 + $0x344] ss:$24 sps:$4 sm:$0xff]  }
 0x1ca   :  { %2896 = vmatmul.mubr.bf16.gmra.mrb[68].mxu0 %v6521_v35  ;;  %3955 = vmatmul.mubr.bf16.gmra.mrb[68].mxu1 %v6521_v35  ;;  %v6659_v35 = vld [vmem:[%s8910_s0 + $0x340] ss:$24 sps:$4 sm:$0xff]  }
 0x1cb   :  { %2905 = vmatprep.mubr.bf16.mxu0 %v6522_v36  ;;  %3964 = vmatprep.mubr.bf16.mxu1 %v6522_v36  ;;  %v6660_v36 = vld [vmem:[%s8910_s0 + $0x374] ss:$24 sps:$4 sm:$0xff]  }
 0x1d2   :  { %2906 = vmatmul.mubr.bf16.gmra.mrb[72].mxu0 %v6524_v37  ;;  %3965 = vmatmul.mubr.bf16.gmra.mrb[72].mxu1 %v6524_v37  ;;  %v6662_v37 = vld [vmem:[%s8910_s0 + $0x370] ss:$24 sps:$4 sm:$0xff]  }
 0x1d3   :  { %2915 = vmatprep.mubr.bf16.mxu0 %v6531_v38  ;;  %3974 = vmatprep.mubr.bf16.mxu1 %v6531_v38  ;;  %v6663_v38 = vld [vmem:[%s8910_s0 + $0x3a4] ss:$24 sps:$4 sm:$0xff]  }
 0x1da   :  { %2916 = vmatmul.mubr.bf16.gmra.mrb[76].mxu0 %v6533_v39  ;;  %3975 = vmatmul.mubr.bf16.gmra.mrb[76].mxu1 %v6533_v39  ;;  %v6665_v39 = vld [vmem:[%s8910_s0 + $0x3a0] ss:$24 sps:$4 sm:$0xff]  }
 0x1db   :  { %2925 = vmatprep.mubr.bf16.mxu0 %v6534_v40  ;;  %3984 = vmatprep.mubr.bf16.mxu1 %v6534_v40  ;;  %v6666_v40 = vld [vmem:[%s8910_s0 + $0x3d4] ss:$24 sps:$4 sm:$0xff]  }
 0x1e2   :  { %2926 = vmatmul.mubr.bf16.gmra.mrb[80].mxu0 %v6536_v41  ;;  %3985 = vmatmul.mubr.bf16.gmra.mrb[80].mxu1 %v6536_v41  ;;  %v6668_v41 = vld [vmem:[%s8910_s0 + $0x3d0] ss:$24 sps:$4 sm:$0xff]  }
 0x1e3   :  { %2935 = vmatprep.mubr.bf16.mxu0 %v6543_v42  ;;  %3994 = vmatprep.mubr.bf16.mxu1 %v6543_v42  ;;  %v6669_v42 = vld [vmem:[%s8910_s0 + $0x404] ss:$24 sps:$4 sm:$0xff]  }
 0x1ea   :  { %2936 = vmatmul.mubr.bf16.gmra.mrb[84].mxu0 %v6545_v43  ;;  %3995 = vmatmul.mubr.bf16.gmra.mrb[84].mxu1 %v6545_v43  ;;  %v6671_v43 = vld [vmem:[%s8910_s0 + $0x400] ss:$24 sps:$4 sm:$0xff]  }
 0x1eb   :  { %2945 = vmatprep.mubr.bf16.mxu0 %v6546_v44  ;;  %4004 = vmatprep.mubr.bf16.mxu1 %v6546_v44  ;;  %v6672_v44 = vld [vmem:[%s8910_s0 + $0x434] ss:$24 sps:$4 sm:$0xff]  }
 0x1f2   :  { %2946 = vmatmul.mubr.bf16.gmra.mrb[88].mxu0 %v6548_v45  ;;  %4005 = vmatmul.mubr.bf16.gmra.mrb[88].mxu1 %v6548_v45  ;;  %v6674_v45 = vld [vmem:[%s8910_s0 + $0x430] ss:$24 sps:$4 sm:$0xff]  }
 0x1f3   :  { %2955 = vmatprep.mubr.bf16.mxu0 %v6555_v46  ;;  %4014 = vmatprep.mubr.bf16.mxu1 %v6555_v46  ;;  %v6675_v46 = vld [vmem:[%s8910_s0 + $0x464] ss:$24 sps:$4 sm:$0xff]  }
 0x1fa   :  { %2956 = vmatmul.mubr.bf16.gmra.mrb[92].mxu0 %v6557_v47  ;;  %4015 = vmatmul.mubr.bf16.gmra.mrb[92].mxu1 %v6557_v47  ;;  %v6677_v47 = vld [vmem:[%s8910_s0 + $0x460] ss:$24 sps:$4 sm:$0xff]  }
 0x1fb   :  { %2965 = vmatprep.mubr.bf16.mxu0 %v6558_v48  ;;  %4024 = vmatprep.mubr.bf16.mxu1 %v6558_v48  ;;  %v6678_v48 = vld [vmem:[%s8910_s0 + $0x494] ss:$24 sps:$4 sm:$0xff]  }
 0x202   :  { %2966 = vmatmul.mubr.bf16.gmra.mrb[96].mxu0 %v6560_v49  ;;  %4025 = vmatmul.mubr.bf16.gmra.mrb[96].mxu1 %v6560_v49  ;;  %v6680_v49 = vld [vmem:[%s8910_s0 + $0x490] ss:$24 sps:$4 sm:$0xff]  }
 0x203   :  { %2975 = vmatprep.mubr.bf16.mxu0 %v6567_v50  ;;  %4034 = vmatprep.mubr.bf16.mxu1 %v6567_v50  ;;  %v6681_v50 = vld [vmem:[%s8910_s0 + $0x4c4] ss:$24 sps:$4 sm:$0xff]  }
 0x20a   :  { %2976 = vmatmul.mubr.bf16.gmra.mrb[100].mxu0 %v6569_v51  ;;  %4035 = vmatmul.mubr.bf16.gmra.mrb[100].mxu1 %v6569_v51  ;;  %v6683_v51 = vld [vmem:[%s8910_s0 + $0x4c0] ss:$24 sps:$4 sm:$0xff]  }
 0x20b   :  { %2985 = vmatprep.mubr.bf16.mxu0 %v6570_v52  ;;  %4044 = vmatprep.mubr.bf16.mxu1 %v6570_v52  ;;  %v400_v52 = vlaneseq }
 0x212   :  { %2986 = vmatmul.mubr.bf16.gmra.mrb[104].mxu0 %v6572_v53  ;;  %4045 = vmatmul.mubr.bf16.gmra.mrb[104].mxu1 %v6572_v53  ;;  %v6684_v53 = vld [vmem:[%s8910_s0 + $0x4f4] ss:$24 sps:$4 sm:$0xff]  }
 0x213   :  { %2995 = vmatprep.mubr.bf16.mxu0 %v6579_v54  ;;  %4054 = vmatprep.mubr.bf16.mxu1 %v6579_v54  ;;  %v401_v54 = vshrl.u32 %v400_v52, 7 }
 0x21a   :  { %2996 = vmatmul.mubr.bf16.gmra.mrb[108].mxu0 %v6581_v55  ;;  %4055 = vmatmul.mubr.bf16.gmra.mrb[108].mxu1 %v6581_v55  ;;  %v6686_v55 = vld [vmem:[%s8910_s0 + $0x4f0] ss:$24 sps:$4 sm:$0xff]  }
 0x21b   :  { %3005 = vmatprep.mubr.bf16.mxu0 %v6582_v56  ;;  %4064 = vmatprep.mubr.bf16.mxu1 %v6582_v56  ;;  %v402_v56 = vsub.s32 0, %v401_v54 }
 0x222   :  { %3006 = vmatmul.mubr.bf16.gmra.mrb[112].mxu0 %v6584_v57  ;;  %4065 = vmatmul.mubr.bf16.gmra.mrb[112].mxu1 %v6584_v57  ;;  %v410_v57 = vsub.s32 2, %v401_v54 }
 0x223   :  { %3015 = vmatprep.mubr.bf16.mxu0 %v6591_v58  ;;  %4074 = vmatprep.mubr.bf16.mxu1 %v6591_v58  ;;  %v398_v58 = vld [vmem:[%s8911_s2] sm:$0xf] }
 0x22a   :  { %3016 = vmatmul.mubr.bf16.gmra.mrb[116].mxu0 %v6593_v59  ;;  %4075 = vmatmul.mubr.bf16.gmra.mrb[116].mxu1 %v6593_v59  ;;  %v406_v59 = vsub.s32 1, %v401_v54 }
 0x22b   :  { %3025 = vmatprep.mubr.bf16.mxu0 %v6594_v60  ;;  %4084 = vmatprep.mubr.bf16.mxu1 %v6594_v60  ;;  %v414_v60 = vsub.s32 3, %v401_v54 }
 0x232   :  { %3026 = vmatmul.mubr.bf16.gmra.mrb[120].mxu0 %v6596_v61  ;;  %4085 = vmatmul.mubr.bf16.gmra.mrb[120].mxu1 %v6596_v61  ;;  %v6687_v61 = vld [vmem:[%s8910_s0 + $0x524] ss:$24 sps:$4 sm:$0xff]  }
 0x233   :  { %3035 = vmatprep.mubr.bf16.mxu0 %v6603_v62  ;;  %4094 = vmatprep.mubr.bf16.mxu1 %v6603_v62  ;;  %v7850_v62 = vrot.slane %v398_v58, %v402_v56 }
 0x23a   :  { %3036 = vmatmul.mubr.bf16.gmra.mrb[124].mxu0 %v6605_v63  ;;  %4095 = vmatmul.mubr.bf16.gmra.mrb[124].mxu1 %v6605_v63  ;;  %v7852_v63 = vrot.slane %v398_v58, %v410_v57 }
 0x23b   :  { %3078 = vmatprep.mubr.bf16.mxu0 %v6608_v0  ;;  %4137 = vmatprep.mubr.bf16.mxu1 %v6608_v0  ;;  %v7854_v0 = vrot.slane %v398_v58, %v406_v59 }
 0x242   :  { %3079 = vmatmul.mubr.bf16.vlgmr.msra.gmra.mrb[0].mxu0 %v6606_v1  ;;  %4138 = vmatmul.mubr.bf16.vlgmr.msra.gmra.mrb[0].mxu1 %v6606_v1  ;;  %v7856_v1 = vrot.slane %v398_v58, %v414_v60  ;;  %v6695_v60 = vld [vmem:[%s8910_s0 + $0x580] ss:$24 sps:$4 sm:$0xff]  }
 0x243   :  { %3088 = vmatprep.mubr.bf16.mxu0 %v6609_v2  ;;  %4147 = vmatprep.mubr.bf16.mxu1 %v6609_v2 }
 0x24a   :  { %3089 = vmatmul.mubr.bf16.gmra.mrb[4].mxu0 %v6611_v3  ;;  %4148 = vmatmul.mubr.bf16.gmra.mrb[4].mxu1 %v6611_v3 }
 0x24b   :  { %3098 = vmatprep.mubr.bf16.mxu0 %v6612_v4  ;;  %4157 = vmatprep.mubr.bf16.mxu1 %v6612_v4 }
 0x252   :  { %3099 = vmatmul.mubr.bf16.gmra.mrb[8].mxu0 %v6614_v5  ;;  %4158 = vmatmul.mubr.bf16.gmra.mrb[8].mxu1 %v6614_v5 }
 0x253   :  { %3108 = vmatprep.mubr.bf16.mxu0 %v6615_v6  ;;  %4167 = vmatprep.mubr.bf16.mxu1 %v6615_v6 }
 0x25a   :  { %3109 = vmatmul.mubr.bf16.gmra.mrb[12].mxu0 %v6617_v7  ;;  %4168 = vmatmul.mubr.bf16.gmra.mrb[12].mxu1 %v6617_v7 }
 0x25b   :  { %3118 = vmatprep.mubr.bf16.mxu0 %v6618_v8  ;;  %4177 = vmatprep.mubr.bf16.mxu1 %v6618_v8  ;;  %v6689_v8 = vld [vmem:[%s8910_s0 + $0x520] ss:$24 sps:$4 sm:$0xff]  }
 0x262   :  { %3119 = vmatmul.mubr.bf16.gmra.mrb[16].mxu0 %v6620_v9  ;;  %4178 = vmatmul.mubr.bf16.gmra.mrb[16].mxu1 %v6620_v9 }
 0x263   :  { %3128 = vmatprep.mubr.bf16.mxu0 %v6621_v10  ;;  %4187 = vmatprep.mubr.bf16.mxu1 %v6621_v10 }
 0x26a   :  { %3129 = vmatmul.mubr.bf16.gmra.mrb[20].mxu0 %v6623_v11  ;;  %4188 = vmatmul.mubr.bf16.gmra.mrb[20].mxu1 %v6623_v11 }
 0x26b   :  { %3138 = vmatprep.mubr.bf16.mxu0 %v6624_v12  ;;  %4197 = vmatprep.mubr.bf16.mxu1 %v6624_v12 }
 0x272   :  { %3139 = vmatmul.mubr.bf16.gmra.mrb[24].mxu0 %v6626_v13  ;;  %4198 = vmatmul.mubr.bf16.gmra.mrb[24].mxu1 %v6626_v13  ;;  %v6690_v13 = vld [vmem:[%s8910_s0 + $0x554] ss:$24 sps:$4 sm:$0xff]  }
 0x273   :  { %3148 = vmatprep.mubr.bf16.mxu0 %v6627_v14  ;;  %4207 = vmatprep.mubr.bf16.mxu1 %v6627_v14 }
 0x27a   :  { %3149 = vmatmul.mubr.bf16.gmra.mrb[28].mxu0 %v6629_v15  ;;  %4208 = vmatmul.mubr.bf16.gmra.mrb[28].mxu1 %v6629_v15 }
 0x27b   :  { %3158 = vmatprep.mubr.bf16.mxu0 %v6630_v16  ;;  %4217 = vmatprep.mubr.bf16.mxu1 %v6630_v16 }
 0x282   :  { %3159 = vmatmul.mubr.bf16.gmra.mrb[32].mxu0 %v6632_v17  ;;  %4218 = vmatmul.mubr.bf16.gmra.mrb[32].mxu1 %v6632_v17 }
 0x283   :  { %3168 = vmatprep.mubr.bf16.mxu0 %v6633_v18  ;;  %4227 = vmatprep.mubr.bf16.mxu1 %v6633_v18 }
 0x28a   :  { %3169 = vmatmul.mubr.bf16.gmra.mrb[36].mxu0 %v6635_v19  ;;  %4228 = vmatmul.mubr.bf16.gmra.mrb[36].mxu1 %v6635_v19 }
 0x28b   :  { %3178 = vmatprep.mubr.bf16.mxu0 %v6636_v20  ;;  %4237 = vmatprep.mubr.bf16.mxu1 %v6636_v20 }
 0x292   :  { %3179 = vmatmul.mubr.bf16.gmra.mrb[40].mxu0 %v6638_v21  ;;  %4238 = vmatmul.mubr.bf16.gmra.mrb[40].mxu1 %v6638_v21 }
 0x293   :  { %3188 = vmatprep.mubr.bf16.mxu0 %v6639_v22  ;;  %4247 = vmatprep.mubr.bf16.mxu1 %v6639_v22 }
 0x29a   :  { %3189 = vmatmul.mubr.bf16.gmra.mrb[44].mxu0 %v6641_v23  ;;  %4248 = vmatmul.mubr.bf16.gmra.mrb[44].mxu1 %v6641_v23 }
 0x29b   :  { %3198 = vmatprep.mubr.bf16.mxu0 %v6642_v24  ;;  %4257 = vmatprep.mubr.bf16.mxu1 %v6642_v24 }
 0x2a2   :  { %3199 = vmatmul.mubr.bf16.gmra.mrb[48].mxu0 %v6644_v25  ;;  %4258 = vmatmul.mubr.bf16.gmra.mrb[48].mxu1 %v6644_v25 }
 0x2a3   :  { %3208 = vmatprep.mubr.bf16.mxu0 %v6645_v26  ;;  %4267 = vmatprep.mubr.bf16.mxu1 %v6645_v26 }
 0x2aa   :  { %3209 = vmatmul.mubr.bf16.gmra.mrb[52].mxu0 %v6647_v27  ;;  %4268 = vmatmul.mubr.bf16.gmra.mrb[52].mxu1 %v6647_v27 }
 0x2ab   :  { %3218 = vmatprep.mubr.bf16.mxu0 %v6648_v28  ;;  %4277 = vmatprep.mubr.bf16.mxu1 %v6648_v28 }
 0x2b2   :  { %3219 = vmatmul.mubr.bf16.gmra.mrb[56].mxu0 %v6650_v29  ;;  %4278 = vmatmul.mubr.bf16.gmra.mrb[56].mxu1 %v6650_v29 }
 0x2b3   :  { %3228 = vmatprep.mubr.bf16.mxu0 %v6651_v30  ;;  %4287 = vmatprep.mubr.bf16.mxu1 %v6651_v30 }
 0x2ba   :  { %3229 = vmatmul.mubr.bf16.gmra.mrb[60].mxu0 %v6653_v31  ;;  %4288 = vmatmul.mubr.bf16.gmra.mrb[60].mxu1 %v6653_v31 }
 0x2bb   :  { %3238 = vmatprep.mubr.bf16.mxu0 %v6654_v32  ;;  %4297 = vmatprep.mubr.bf16.mxu1 %v6654_v32 }
 0x2c2   :  { %3239 = vmatmul.mubr.bf16.gmra.mrb[64].mxu0 %v6656_v33  ;;  %4298 = vmatmul.mubr.bf16.gmra.mrb[64].mxu1 %v6656_v33 }
 0x2c3   :  { %3248 = vmatprep.mubr.bf16.mxu0 %v6657_v34  ;;  %4307 = vmatprep.mubr.bf16.mxu1 %v6657_v34  ;;  %v6692_v34 = vld [vmem:[%s8910_s0 + $0x550] ss:$24 sps:$4 sm:$0xff]  }
 0x2ca   :  { %3249 = vmatmul.mubr.bf16.gmra.mrb[68].mxu0 %v6659_v35  ;;  %4308 = vmatmul.mubr.bf16.gmra.mrb[68].mxu1 %v6659_v35 }
 0x2cb   :  { %3258 = vmatprep.mubr.bf16.mxu0 %v6660_v36  ;;  %4317 = vmatprep.mubr.bf16.mxu1 %v6660_v36 }
 0x2d2   :  { %3259 = vmatmul.mubr.bf16.gmra.mrb[72].mxu0 %v6662_v37  ;;  %4318 = vmatmul.mubr.bf16.gmra.mrb[72].mxu1 %v6662_v37 }
 0x2d3   :  { %3268 = vmatprep.mubr.bf16.mxu0 %v6663_v38  ;;  %4327 = vmatprep.mubr.bf16.mxu1 %v6663_v38 }
 0x2da   :  { %3269 = vmatmul.mubr.bf16.gmra.mrb[76].mxu0 %v6665_v39  ;;  %4328 = vmatmul.mubr.bf16.gmra.mrb[76].mxu1 %v6665_v39  ;;  %v6693_v39 = vld [vmem:[%s8910_s0 + $0x584] ss:$24 sps:$4 sm:$0xff]  }
 0x2db   :  { %3278 = vmatprep.mubr.bf16.mxu0 %v6666_v40  ;;  %4337 = vmatprep.mubr.bf16.mxu1 %v6666_v40 }
 0x2e2   :  { %3279 = vmatmul.mubr.bf16.gmra.mrb[80].mxu0 %v6668_v41  ;;  %4338 = vmatmul.mubr.bf16.gmra.mrb[80].mxu1 %v6668_v41 }
 0x2e3   :  { %3288 = vmatprep.mubr.bf16.mxu0 %v6669_v42  ;;  %4347 = vmatprep.mubr.bf16.mxu1 %v6669_v42 }
 0x2ea   :  { %3289 = vmatmul.mubr.bf16.gmra.mrb[84].mxu0 %v6671_v43  ;;  %4348 = vmatmul.mubr.bf16.gmra.mrb[84].mxu1 %v6671_v43 }
 0x2eb   :  { %3298 = vmatprep.mubr.bf16.mxu0 %v6672_v44  ;;  %4357 = vmatprep.mubr.bf16.mxu1 %v6672_v44 }
 0x2f2   :  { %3299 = vmatmul.mubr.bf16.gmra.mrb[88].mxu0 %v6674_v45  ;;  %4358 = vmatmul.mubr.bf16.gmra.mrb[88].mxu1 %v6674_v45 }
 0x2f3   :  { %3308 = vmatprep.mubr.bf16.mxu0 %v6675_v46  ;;  %4367 = vmatprep.mubr.bf16.mxu1 %v6675_v46 }
 0x2fa   :  { %3309 = vmatmul.mubr.bf16.gmra.mrb[92].mxu0 %v6677_v47  ;;  %4368 = vmatmul.mubr.bf16.gmra.mrb[92].mxu1 %v6677_v47 }
 0x2fb   :  { %3318 = vmatprep.mubr.bf16.mxu0 %v6678_v48  ;;  %4377 = vmatprep.mubr.bf16.mxu1 %v6678_v48 }
 0x302   :  { %3319 = vmatmul.mubr.bf16.gmra.mrb[96].mxu0 %v6680_v49  ;;  %4378 = vmatmul.mubr.bf16.gmra.mrb[96].mxu1 %v6680_v49 }
 0x303   :  { %3328 = vmatprep.mubr.bf16.mxu0 %v6681_v50  ;;  %4387 = vmatprep.mubr.bf16.mxu1 %v6681_v50 }
 0x30a   :  { %3329 = vmatmul.mubr.bf16.gmra.mrb[100].mxu0 %v6683_v51  ;;  %4388 = vmatmul.mubr.bf16.gmra.mrb[100].mxu1 %v6683_v51 }
 0x30b   :  { %3338 = vmatprep.mubr.bf16.mxu0 %v6684_v53  ;;  %4397 = vmatprep.mubr.bf16.mxu1 %v6684_v53 }
 0x312   :  { %3339 = vmatmul.mubr.bf16.gmra.mrb[104].mxu0 %v6686_v55  ;;  %4398 = vmatmul.mubr.bf16.gmra.mrb[104].mxu1 %v6686_v55 }
 0x313   :  { %3348 = vmatprep.mubr.bf16.mxu0 %v6687_v61  ;;  %4407 = vmatprep.mubr.bf16.mxu1 %v6687_v61 }
 0x315   :  { %v3080_v2 = vpop.f32.mrb[0].mxu0  ;;  %v4139_v3 = vpop.f32.mrb[0].mxu1 }
 0x316   :  { %v5358_v4 = vadd.f32 %v3080_v2, %v7850_v62  ;;  %v5486_v5 = vadd.f32 %v4139_v3, %v7852_v63  ;;  %v3082_v6 = vpop.f32.mrb[1].mxu0  ;;  %v4141_v7 = vpop.f32.mrb[1].mxu1 }
 0x317   :  { %v5359_v9 = vadd.f32 %v3082_v6, %v7854_v0  ;;  %v5487_v10 = vadd.f32 %v4141_v7, %v7856_v1  ;;  %v3084_v11 = vpop.f32.mrb[2].mxu0  ;;  %v4143_v12 = vpop.f32.mrb[2].mxu1 }
 0x318   :  { %v4458_v14 = vmax.f32 %v5358_v4, 0.0  ;;  %v4460_v15 = vmax.f32 %v5486_v5, 0.0  ;;  %v5360_v16 = vadd.f32 %v3084_v11, %v7850_v62  ;;  %v5488_v17 = vadd.f32 %v4143_v12, %v7852_v63  ;;  %v3086_v18 = vpop.f32.mrb[3].mxu0  ;;  %v4145_v19 = vpop.f32.mrb[3].mxu1  ;;  %v6696_v5 = vld [vmem:[%s8910_s0 + $0x5b4] ss:$24 sps:$4 sm:$0xff]  }
 0x319   :  { %v4459_v20 = vmax.f32 %v5359_v9, 0.0  ;;  %v4461_v21 = vmax.f32 %v5487_v10, 0.0  ;;  %v5361_v22 = vadd.f32 %v3086_v18, %v7854_v0  ;;  %v5489_v23 = vadd.f32 %v4145_v19, %v7856_v1 }
 0x31a   :  { %4714 = vst [vmem:[%s8912_s3] sm:$0xff] %v4458_v14  ;;  %4716 = vst [vmem:[%s8912_s3 + $0x10] sm:$0xff] %v4460_v15  ;;  %v4462_v24 = vmax.f32 %v5360_v16, 0.0  ;;  %v4464_v25 = vmax.f32 %v5488_v17, 0.0  ;;  %3349 = vmatmul.mubr.bf16.gmra.mrb[108].mxu0 %v6689_v8  ;;  %4408 = vmatmul.mubr.bf16.gmra.mrb[108].mxu1 %v6689_v8 }
 0x31b   :  { %4715 = vst [vmem:[%s8912_s3 + $0x8] sm:$0xff] %v4459_v20  ;;  %4717 = vst [vmem:[%s8912_s3 + $0x18] sm:$0xff] %v4461_v21  ;;  %v4463_v26 = vmax.f32 %v5361_v22, 0.0  ;;  %v4465_v27 = vmax.f32 %v5489_v23, 0.0  ;;  %3358 = vmatprep.mubr.bf16.mxu0 %v6690_v13  ;;  %4417 = vmatprep.mubr.bf16.mxu1 %v6690_v13 }
 0x31c   :  { %4718 = vst [vmem:[%s8912_s3 + $0x20] sm:$0xff] %v4462_v24  ;;  %4720 = vst [vmem:[%s8912_s3 + $0x30] sm:$0xff] %v4464_v25 }
 0x31d   :  { %4719 = vst [vmem:[%s8912_s3 + $0x28] sm:$0xff] %v4463_v26  ;;  %4721 = vst [vmem:[%s8912_s3 + $0x38] sm:$0xff] %v4465_v27  ;;  %v3090_v28 = vpop.f32.mrb[4].mxu0  ;;  %v4149_v29 = vpop.f32.mrb[4].mxu1  ;;  %v6698_v26 = vld [vmem:[%s8910_s0 + $0x5b0] ss:$24 sps:$4 sm:$0xff]  }
 0x31e   :  { %v5362_v30 = vadd.f32 %v3090_v28, %v7850_v62  ;;  %v5490_v31 = vadd.f32 %v4149_v29, %v7852_v63  ;;  %v3092_v32 = vpop.f32.mrb[5].mxu0  ;;  %v4151_v33 = vpop.f32.mrb[5].mxu1 }
 0x31f   :  { %v5363_v35 = vadd.f32 %v3092_v32, %v7854_v0  ;;  %v5491_v36 = vadd.f32 %v4151_v33, %v7856_v1  ;;  %v3094_v37 = vpop.f32.mrb[6].mxu0  ;;  %v4153_v38 = vpop.f32.mrb[6].mxu1 }
 0x320   :  { %v4466_v40 = vmax.f32 %v5362_v30, 0.0  ;;  %v4468_v41 = vmax.f32 %v5490_v31, 0.0  ;;  %v5364_v42 = vadd.f32 %v3094_v37, %v7850_v62  ;;  %v5492_v43 = vadd.f32 %v4153_v38, %v7852_v63  ;;  %v3096_v44 = vpop.f32.mrb[7].mxu0  ;;  %v4155_v45 = vpop.f32.mrb[7].mxu1  ;;  %v6699_v31 = vld [vmem:[%s8910_s0 + $0x5e4] ss:$24 sps:$4 sm:$0xff]  }
 0x321   :  { %v4467_v46 = vmax.f32 %v5363_v35, 0.0  ;;  %v4469_v47 = vmax.f32 %v5491_v36, 0.0  ;;  %v5365_v48 = vadd.f32 %v3096_v44, %v7854_v0  ;;  %v5493_v49 = vadd.f32 %v4155_v45, %v7856_v1 }
 0x322   :  { %4722 = vst [vmem:[%s8912_s3 + $0x40] sm:$0xff] %v4466_v40  ;;  %4724 = vst [vmem:[%s8912_s3 + $0x50] sm:$0xff] %v4468_v41  ;;  %v4470_v50 = vmax.f32 %v5364_v42, 0.0  ;;  %v4472_v51 = vmax.f32 %v5492_v43, 0.0  ;;  %3359 = vmatmul.mubr.bf16.gmra.mrb[112].mxu0 %v6692_v34  ;;  %4418 = vmatmul.mubr.bf16.gmra.mrb[112].mxu1 %v6692_v34 }
 0x323   :  { %4723 = vst [vmem:[%s8912_s3 + $0x48] sm:$0xff] %v4467_v46  ;;  %4725 = vst [vmem:[%s8912_s3 + $0x58] sm:$0xff] %v4469_v47  ;;  %v4471_v52 = vmax.f32 %v5365_v48, 0.0  ;;  %v4473_v53 = vmax.f32 %v5493_v49, 0.0  ;;  %3368 = vmatprep.mubr.bf16.mxu0 %v6693_v39  ;;  %4427 = vmatprep.mubr.bf16.mxu1 %v6693_v39 }
 0x324   :  { %4726 = vst [vmem:[%s8912_s3 + $0x60] sm:$0xff] %v4470_v50  ;;  %4728 = vst [vmem:[%s8912_s3 + $0x70] sm:$0xff] %v4472_v51 }
 0x325   :  { %4727 = vst [vmem:[%s8912_s3 + $0x68] sm:$0xff] %v4471_v52  ;;  %4729 = vst [vmem:[%s8912_s3 + $0x78] sm:$0xff] %v4473_v53  ;;  %v3100_v54 = vpop.f32.mrb[8].mxu0  ;;  %v4159_v55 = vpop.f32.mrb[8].mxu1  ;;  %v6701_v52 = vld [vmem:[%s8910_s0 + $0x5e0] ss:$24 sps:$4 sm:$0xff]  }
 0x326   :  { %v5366_v56 = vadd.f32 %v3100_v54, %v7850_v62  ;;  %v5494_v57 = vadd.f32 %v4159_v55, %v7852_v63  ;;  %v3102_v58 = vpop.f32.mrb[9].mxu0  ;;  %v4161_v59 = vpop.f32.mrb[9].mxu1 }
 0x327   :  { %v5367_v61 = vadd.f32 %v3102_v58, %v7854_v0  ;;  %v5495_v2 = vadd.f32 %v4161_v59, %v7856_v1  ;;  %v3104_v3 = vpop.f32.mrb[10].mxu0  ;;  %v4163_v4 = vpop.f32.mrb[10].mxu1 }
 0x328   :  { %v4474_v6 = vmax.f32 %v5366_v56, 0.0  ;;  %v4476_v7 = vmax.f32 %v5494_v57, 0.0  ;;  %v5368_v8 = vadd.f32 %v3104_v3, %v7850_v62  ;;  %v5496_v9 = vadd.f32 %v4163_v4, %v7852_v63  ;;  %v3106_v10 = vpop.f32.mrb[11].mxu0  ;;  %v4165_v11 = vpop.f32.mrb[11].mxu1 }
 0x329   :  { %v4475_v12 = vmax.f32 %v5367_v61, 0.0  ;;  %v4477_v13 = vmax.f32 %v5495_v2, 0.0  ;;  %v5369_v14 = vadd.f32 %v3106_v10, %v7854_v0  ;;  %v5497_v15 = vadd.f32 %v4165_v11, %v7856_v1 }
 0x32a   :  { %4730 = vst [vmem:[%s8912_s3 + $0x80] sm:$0xff] %v4474_v6  ;;  %4732 = vst [vmem:[%s8912_s3 + $0x90] sm:$0xff] %v4476_v7  ;;  %v4478_v16 = vmax.f32 %v5368_v8, 0.0  ;;  %v4480_v17 = vmax.f32 %v5496_v9, 0.0  ;;  %3369 = vmatmul.mubr.bf16.gmra.mrb[116].mxu0 %v6695_v60  ;;  %4428 = vmatmul.mubr.bf16.gmra.mrb[116].mxu1 %v6695_v60 }
 0x32b   :  { %4731 = vst [vmem:[%s8912_s3 + $0x88] sm:$0xff] %v4475_v12  ;;  %4733 = vst [vmem:[%s8912_s3 + $0x98] sm:$0xff] %v4477_v13  ;;  %v4479_v18 = vmax.f32 %v5369_v14, 0.0  ;;  %v4481_v19 = vmax.f32 %v5497_v15, 0.0  ;;  %3378 = vmatprep.mubr.bf16.mxu0 %v6696_v5  ;;  %4437 = vmatprep.mubr.bf16.mxu1 %v6696_v5 }
 0x32c   :  { %4734 = vst [vmem:[%s8912_s3 + $0xa0] sm:$0xff] %v4478_v16  ;;  %4736 = vst [vmem:[%s8912_s3 + $0xb0] sm:$0xff] %v4480_v17 }
 0x32d   :  { %4735 = vst [vmem:[%s8912_s3 + $0xa8] sm:$0xff] %v4479_v18  ;;  %4737 = vst [vmem:[%s8912_s3 + $0xb8] sm:$0xff] %v4481_v19  ;;  %v3110_v20 = vpop.f32.mrb[12].mxu0  ;;  %v4169_v21 = vpop.f32.mrb[12].mxu1 }
 0x32e   :  { %v5370_v22 = vadd.f32 %v3110_v20, %v7850_v62  ;;  %v5498_v23 = vadd.f32 %v4169_v21, %v7852_v63  ;;  %v3112_v24 = vpop.f32.mrb[13].mxu0  ;;  %v4171_v25 = vpop.f32.mrb[13].mxu1 }
 0x32f   :  { %v5371_v27 = vadd.f32 %v3112_v24, %v7854_v0  ;;  %v5499_v28 = vadd.f32 %v4171_v25, %v7856_v1  ;;  %v3114_v29 = vpop.f32.mrb[14].mxu0  ;;  %v4173_v30 = vpop.f32.mrb[14].mxu1 }
 0x330   :  { %v4482_v32 = vmax.f32 %v5370_v22, 0.0  ;;  %v4484_v33 = vmax.f32 %v5498_v23, 0.0  ;;  %v5372_v34 = vadd.f32 %v3114_v29, %v7850_v62  ;;  %v5500_v35 = vadd.f32 %v4173_v30, %v7852_v63  ;;  %v3116_v36 = vpop.f32.mrb[15].mxu0  ;;  %v4175_v37 = vpop.f32.mrb[15].mxu1 }
 0x331   :  { %v4483_v38 = vmax.f32 %v5371_v27, 0.0  ;;  %v4485_v39 = vmax.f32 %v5499_v28, 0.0  ;;  %v5373_v40 = vadd.f32 %v3116_v36, %v7854_v0  ;;  %v5501_v41 = vadd.f32 %v4175_v37, %v7856_v1 }
 0x332   :  { %4738 = vst [vmem:[%s8912_s3 + $0xc0] sm:$0xff] %v4482_v32  ;;  %4740 = vst [vmem:[%s8912_s3 + $0xd0] sm:$0xff] %v4484_v33  ;;  %v4486_v42 = vmax.f32 %v5372_v34, 0.0  ;;  %v4488_v43 = vmax.f32 %v5500_v35, 0.0  ;;  %3379 = vmatmul.mubr.bf16.gmra.mrb[120].mxu0 %v6698_v26  ;;  %4438 = vmatmul.mubr.bf16.gmra.mrb[120].mxu1 %v6698_v26 }
 0x333   :  { %4739 = vst [vmem:[%s8912_s3 + $0xc8] sm:$0xff] %v4483_v38  ;;  %4741 = vst [vmem:[%s8912_s3 + $0xd8] sm:$0xff] %v4485_v39  ;;  %v4487_v44 = vmax.f32 %v5373_v40, 0.0  ;;  %v4489_v45 = vmax.f32 %v5501_v41, 0.0  ;;  %3388 = vmatprep.mubr.bf16.mxu0 %v6699_v31  ;;  %4447 = vmatprep.mubr.bf16.mxu1 %v6699_v31 }
 0x334   :  { %4742 = vst [vmem:[%s8912_s3 + $0xe0] sm:$0xff] %v4486_v42  ;;  %4744 = vst [vmem:[%s8912_s3 + $0xf0] sm:$0xff] %v4488_v43 }
 0x335   :  { %4743 = vst [vmem:[%s8912_s3 + $0xe8] sm:$0xff] %v4487_v44  ;;  %4745 = vst [vmem:[%s8912_s3 + $0xf8] sm:$0xff] %v4489_v45  ;;  %v3120_v46 = vpop.f32.mrb[16].mxu0  ;;  %v4179_v47 = vpop.f32.mrb[16].mxu1 }
 0x336   :  { %v5374_v48 = vadd.f32 %v3120_v46, %v7850_v62  ;;  %v5502_v49 = vadd.f32 %v4179_v47, %v7852_v63  ;;  %v3122_v50 = vpop.f32.mrb[17].mxu0  ;;  %v4181_v51 = vpop.f32.mrb[17].mxu1 }
 0x337   :  { %v5375_v53 = vadd.f32 %v3122_v50, %v7854_v0  ;;  %v5503_v54 = vadd.f32 %v4181_v51, %v7856_v1  ;;  %v3124_v55 = vpop.f32.mrb[18].mxu0  ;;  %v4183_v56 = vpop.f32.mrb[18].mxu1 }
 0x338   :  { %v4490_v57 = vmax.f32 %v5374_v48, 0.0  ;;  %v4492_v58 = vmax.f32 %v5502_v49, 0.0  ;;  %v5376_v59 = vadd.f32 %v3124_v55, %v7850_v62  ;;  %v5504_v60 = vadd.f32 %v4183_v56, %v7852_v63  ;;  %v3126_v61 = vpop.f32.mrb[19].mxu0  ;;  %v4185_v2 = vpop.f32.mrb[19].mxu1 }
 0x339   :  { %v4491_v3 = vmax.f32 %v5375_v53, 0.0  ;;  %v4493_v4 = vmax.f32 %v5503_v54, 0.0  ;;  %v5377_v5 = vadd.f32 %v3126_v61, %v7854_v0  ;;  %v5505_v6 = vadd.f32 %v4185_v2, %v7856_v1 }
 0x33a   :  { %4746 = vst [vmem:[%s8912_s3 + $0x100] sm:$0xff] %v4490_v57  ;;  %4748 = vst [vmem:[%s8912_s3 + $0x110] sm:$0xff] %v4492_v58  ;;  %v4494_v7 = vmax.f32 %v5376_v59, 0.0  ;;  %v4496_v8 = vmax.f32 %v5504_v60, 0.0  ;;  %3389 = vmatmul.mubr.bf16.gmra.mrb[124].mxu0 %v6701_v52  ;;  %4448 = vmatmul.mubr.bf16.gmra.mrb[124].mxu1 %v6701_v52 }
 0x33b   :  { %4747 = vst [vmem:[%s8912_s3 + $0x108] sm:$0xff] %v4491_v3  ;;  %4749 = vst [vmem:[%s8912_s3 + $0x118] sm:$0xff] %v4493_v4  ;;  %v4495_v9 = vmax.f32 %v5377_v5, 0.0  ;;  %v4497_v10 = vmax.f32 %v5505_v6, 0.0 }
 0x33c   :  { %4750 = vst [vmem:[%s8912_s3 + $0x120] sm:$0xff] %v4494_v7  ;;  %4752 = vst [vmem:[%s8912_s3 + $0x130] sm:$0xff] %v4496_v8 }
 0x33d   :  { %4751 = vst [vmem:[%s8912_s3 + $0x128] sm:$0xff] %v4495_v9  ;;  %4753 = vst [vmem:[%s8912_s3 + $0x138] sm:$0xff] %v4497_v10  ;;  %v3130_v11 = vpop.f32.mrb[20].mxu0  ;;  %v4189_v12 = vpop.f32.mrb[20].mxu1 }
 0x33e   :  { %v5378_v13 = vadd.f32 %v3130_v11, %v7850_v62  ;;  %v5506_v14 = vadd.f32 %v4189_v12, %v7852_v63  ;;  %v3132_v15 = vpop.f32.mrb[21].mxu0  ;;  %v4191_v16 = vpop.f32.mrb[21].mxu1 }
 0x33f   :  { %v5379_v17 = vadd.f32 %v3132_v15, %v7854_v0  ;;  %v5507_v18 = vadd.f32 %v4191_v16, %v7856_v1  ;;  %v3134_v19 = vpop.f32.mrb[22].mxu0  ;;  %v4193_v20 = vpop.f32.mrb[22].mxu1 }
 0x340   :  { %v4498_v21 = vmax.f32 %v5378_v13, 0.0  ;;  %v4500_v22 = vmax.f32 %v5506_v14, 0.0  ;;  %v5380_v23 = vadd.f32 %v3134_v19, %v7850_v62  ;;  %v5508_v24 = vadd.f32 %v4193_v20, %v7852_v63  ;;  %v3136_v25 = vpop.f32.mrb[23].mxu0  ;;  %v4195_v26 = vpop.f32.mrb[23].mxu1 }
 0x341   :  { %v4499_v27 = vmax.f32 %v5379_v17, 0.0  ;;  %v4501_v28 = vmax.f32 %v5507_v18, 0.0  ;;  %v5381_v29 = vadd.f32 %v3136_v25, %v7854_v0  ;;  %v5509_v30 = vadd.f32 %v4195_v26, %v7856_v1 }
 0x342   :  { %4754 = vst [vmem:[%s8912_s3 + $0x140] sm:$0xff] %v4498_v21  ;;  %4756 = vst [vmem:[%s8912_s3 + $0x150] sm:$0xff] %v4500_v22  ;;  %v4502_v31 = vmax.f32 %v5380_v23, 0.0  ;;  %v4504_v32 = vmax.f32 %v5508_v24, 0.0 }
 0x343   :  { %4755 = vst [vmem:[%s8912_s3 + $0x148] sm:$0xff] %v4499_v27  ;;  %4757 = vst [vmem:[%s8912_s3 + $0x158] sm:$0xff] %v4501_v28  ;;  %v4503_v33 = vmax.f32 %v5381_v29, 0.0  ;;  %v4505_v34 = vmax.f32 %v5509_v30, 0.0 }
 0x344   :  { %4758 = vst [vmem:[%s8912_s3 + $0x160] sm:$0xff] %v4502_v31  ;;  %4760 = vst [vmem:[%s8912_s3 + $0x170] sm:$0xff] %v4504_v32 }
 0x345   :  { %4759 = vst [vmem:[%s8912_s3 + $0x168] sm:$0xff] %v4503_v33  ;;  %4761 = vst [vmem:[%s8912_s3 + $0x178] sm:$0xff] %v4505_v34  ;;  %v3140_v35 = vpop.f32.mrb[24].mxu0  ;;  %v4199_v36 = vpop.f32.mrb[24].mxu1 }
 0x346   :  { %v5382_v37 = vadd.f32 %v3140_v35, %v7850_v62  ;;  %v5510_v38 = vadd.f32 %v4199_v36, %v7852_v63  ;;  %v3142_v39 = vpop.f32.mrb[25].mxu0  ;;  %v4201_v40 = vpop.f32.mrb[25].mxu1 }
 0x347   :  { %v5383_v41 = vadd.f32 %v3142_v39, %v7854_v0  ;;  %v5511_v42 = vadd.f32 %v4201_v40, %v7856_v1  ;;  %v3144_v43 = vpop.f32.mrb[26].mxu0  ;;  %v4203_v44 = vpop.f32.mrb[26].mxu1 }
 0x348   :  { %v4506_v45 = vmax.f32 %v5382_v37, 0.0  ;;  %v4508_v46 = vmax.f32 %v5510_v38, 0.0  ;;  %v5384_v47 = vadd.f32 %v3144_v43, %v7850_v62  ;;  %v5512_v48 = vadd.f32 %v4203_v44, %v7852_v63  ;;  %v3146_v49 = vpop.f32.mrb[27].mxu0  ;;  %v4205_v50 = vpop.f32.mrb[27].mxu1 }
 0x349   :  { %v4507_v51 = vmax.f32 %v5383_v41, 0.0  ;;  %v4509_v52 = vmax.f32 %v5511_v42, 0.0  ;;  %v5385_v53 = vadd.f32 %v3146_v49, %v7854_v0  ;;  %v5513_v54 = vadd.f32 %v4205_v50, %v7856_v1 }
 0x34a   :  { %4762 = vst [vmem:[%s8912_s3 + $0x180] sm:$0xff] %v4506_v45  ;;  %4764 = vst [vmem:[%s8912_s3 + $0x190] sm:$0xff] %v4508_v46  ;;  %v4510_v55 = vmax.f32 %v5384_v47, 0.0  ;;  %v4512_v56 = vmax.f32 %v5512_v48, 0.0 }
 0x34b   :  { %4763 = vst [vmem:[%s8912_s3 + $0x188] sm:$0xff] %v4507_v51  ;;  %4765 = vst [vmem:[%s8912_s3 + $0x198] sm:$0xff] %v4509_v52  ;;  %v4511_v57 = vmax.f32 %v5385_v53, 0.0  ;;  %v4513_v58 = vmax.f32 %v5513_v54, 0.0 }
 0x34c   :  { %4766 = vst [vmem:[%s8912_s3 + $0x1a0] sm:$0xff] %v4510_v55  ;;  %4768 = vst [vmem:[%s8912_s3 + $0x1b0] sm:$0xff] %v4512_v56 }
 0x34d   :  { %4767 = vst [vmem:[%s8912_s3 + $0x1a8] sm:$0xff] %v4511_v57  ;;  %4769 = vst [vmem:[%s8912_s3 + $0x1b8] sm:$0xff] %v4513_v58  ;;  %v3150_v59 = vpop.f32.mrb[28].mxu0  ;;  %v4209_v60 = vpop.f32.mrb[28].mxu1 }
 0x34e   :  { %v5386_v61 = vadd.f32 %v3150_v59, %v7850_v62  ;;  %v5514_v2 = vadd.f32 %v4209_v60, %v7852_v63  ;;  %v3152_v3 = vpop.f32.mrb[29].mxu0  ;;  %v4211_v4 = vpop.f32.mrb[29].mxu1 }
 0x34f   :  { %v5387_v5 = vadd.f32 %v3152_v3, %v7854_v0  ;;  %v5515_v6 = vadd.f32 %v4211_v4, %v7856_v1  ;;  %v3154_v7 = vpop.f32.mrb[30].mxu0  ;;  %v4213_v8 = vpop.f32.mrb[30].mxu1 }
 0x350   :  { %v4514_v9 = vmax.f32 %v5386_v61, 0.0  ;;  %v4516_v10 = vmax.f32 %v5514_v2, 0.0  ;;  %v5388_v11 = vadd.f32 %v3154_v7, %v7850_v62  ;;  %v5516_v12 = vadd.f32 %v4213_v8, %v7852_v63  ;;  %v3156_v13 = vpop.f32.mrb[31].mxu0  ;;  %v4215_v14 = vpop.f32.mrb[31].mxu1 }
 0x351   :  { %v4515_v15 = vmax.f32 %v5387_v5, 0.0  ;;  %v4517_v16 = vmax.f32 %v5515_v6, 0.0  ;;  %v5389_v17 = vadd.f32 %v3156_v13, %v7854_v0  ;;  %v5517_v18 = vadd.f32 %v4215_v14, %v7856_v1 }
 0x352   :  { %4770 = vst [vmem:[%s8912_s3 + $0x1c0] sm:$0xff] %v4514_v9  ;;  %4772 = vst [vmem:[%s8912_s3 + $0x1d0] sm:$0xff] %v4516_v10  ;;  %v4518_v19 = vmax.f32 %v5388_v11, 0.0  ;;  %v4520_v20 = vmax.f32 %v5516_v12, 0.0 }
 0x353   :  { %4771 = vst [vmem:[%s8912_s3 + $0x1c8] sm:$0xff] %v4515_v15  ;;  %4773 = vst [vmem:[%s8912_s3 + $0x1d8] sm:$0xff] %v4517_v16  ;;  %v4519_v21 = vmax.f32 %v5389_v17, 0.0  ;;  %v4521_v22 = vmax.f32 %v5517_v18, 0.0 }
 0x354   :  { %4774 = vst [vmem:[%s8912_s3 + $0x1e0] sm:$0xff] %v4518_v19  ;;  %4776 = vst [vmem:[%s8912_s3 + $0x1f0] sm:$0xff] %v4520_v20 }
 0x355   :  { %4775 = vst [vmem:[%s8912_s3 + $0x1e8] sm:$0xff] %v4519_v21  ;;  %4777 = vst [vmem:[%s8912_s3 + $0x1f8] sm:$0xff] %v4521_v22  ;;  %v3160_v23 = vpop.f32.mrb[32].mxu0  ;;  %v4219_v24 = vpop.f32.mrb[32].mxu1 }
 0x356   :  { %v5390_v25 = vadd.f32 %v3160_v23, %v7850_v62  ;;  %v5518_v26 = vadd.f32 %v4219_v24, %v7852_v63  ;;  %v3162_v27 = vpop.f32.mrb[33].mxu0  ;;  %v4221_v28 = vpop.f32.mrb[33].mxu1 }
 0x357   :  { %v5391_v29 = vadd.f32 %v3162_v27, %v7854_v0  ;;  %v5519_v30 = vadd.f32 %v4221_v28, %v7856_v1  ;;  %v3164_v31 = vpop.f32.mrb[34].mxu0  ;;  %v4223_v32 = vpop.f32.mrb[34].mxu1 }
 0x358   :  { %v4522_v33 = vmax.f32 %v5390_v25, 0.0  ;;  %v4524_v34 = vmax.f32 %v5518_v26, 0.0  ;;  %v5392_v35 = vadd.f32 %v3164_v31, %v7850_v62  ;;  %v5520_v36 = vadd.f32 %v4223_v32, %v7852_v63  ;;  %v3166_v37 = vpop.f32.mrb[35].mxu0  ;;  %v4225_v38 = vpop.f32.mrb[35].mxu1 }
 0x359   :  { %v4523_v39 = vmax.f32 %v5391_v29, 0.0  ;;  %v4525_v40 = vmax.f32 %v5519_v30, 0.0  ;;  %v5393_v41 = vadd.f32 %v3166_v37, %v7854_v0  ;;  %v5521_v42 = vadd.f32 %v4225_v38, %v7856_v1 }
 0x35a   :  { %4778 = vst [vmem:[%s8912_s3 + $0x200] sm:$0xff] %v4522_v33  ;;  %4780 = vst [vmem:[%s8912_s3 + $0x210] sm:$0xff] %v4524_v34  ;;  %v4526_v43 = vmax.f32 %v5392_v35, 0.0  ;;  %v4528_v44 = vmax.f32 %v5520_v36, 0.0 }
 0x35b   :  { %4779 = vst [vmem:[%s8912_s3 + $0x208] sm:$0xff] %v4523_v39  ;;  %4781 = vst [vmem:[%s8912_s3 + $0x218] sm:$0xff] %v4525_v40  ;;  %v4527_v45 = vmax.f32 %v5393_v41, 0.0  ;;  %v4529_v46 = vmax.f32 %v5521_v42, 0.0 }
 0x35c   :  { %4782 = vst [vmem:[%s8912_s3 + $0x220] sm:$0xff] %v4526_v43  ;;  %4784 = vst [vmem:[%s8912_s3 + $0x230] sm:$0xff] %v4528_v44 }
 0x35d   :  { %4783 = vst [vmem:[%s8912_s3 + $0x228] sm:$0xff] %v4527_v45  ;;  %4785 = vst [vmem:[%s8912_s3 + $0x238] sm:$0xff] %v4529_v46  ;;  %v3170_v47 = vpop.f32.mrb[36].mxu0  ;;  %v4229_v48 = vpop.f32.mrb[36].mxu1 }
 0x35e   :  { %v5394_v49 = vadd.f32 %v3170_v47, %v7850_v62  ;;  %v5522_v50 = vadd.f32 %v4229_v48, %v7852_v63  ;;  %v3172_v51 = vpop.f32.mrb[37].mxu0  ;;  %v4231_v52 = vpop.f32.mrb[37].mxu1 }
 0x35f   :  { %v5395_v53 = vadd.f32 %v3172_v51, %v7854_v0  ;;  %v5523_v54 = vadd.f32 %v4231_v52, %v7856_v1  ;;  %v3174_v55 = vpop.f32.mrb[38].mxu0  ;;  %v4233_v56 = vpop.f32.mrb[38].mxu1 }
 0x360   :  { %v4530_v57 = vmax.f32 %v5394_v49, 0.0  ;;  %v4532_v58 = vmax.f32 %v5522_v50, 0.0  ;;  %v5396_v59 = vadd.f32 %v3174_v55, %v7850_v62  ;;  %v5524_v60 = vadd.f32 %v4233_v56, %v7852_v63  ;;  %v3176_v61 = vpop.f32.mrb[39].mxu0  ;;  %v4235_v2 = vpop.f32.mrb[39].mxu1 }
 0x361   :  { %v4531_v3 = vmax.f32 %v5395_v53, 0.0  ;;  %v4533_v4 = vmax.f32 %v5523_v54, 0.0  ;;  %v5397_v5 = vadd.f32 %v3176_v61, %v7854_v0  ;;  %v5525_v6 = vadd.f32 %v4235_v2, %v7856_v1 }
 0x362   :  { %4786 = vst [vmem:[%s8912_s3 + $0x240] sm:$0xff] %v4530_v57  ;;  %4788 = vst [vmem:[%s8912_s3 + $0x250] sm:$0xff] %v4532_v58  ;;  %v4534_v7 = vmax.f32 %v5396_v59, 0.0  ;;  %v4536_v8 = vmax.f32 %v5524_v60, 0.0 }
 0x363   :  { %4787 = vst [vmem:[%s8912_s3 + $0x248] sm:$0xff] %v4531_v3  ;;  %4789 = vst [vmem:[%s8912_s3 + $0x258] sm:$0xff] %v4533_v4  ;;  %v4535_v9 = vmax.f32 %v5397_v5, 0.0  ;;  %v4537_v10 = vmax.f32 %v5525_v6, 0.0 }
 0x364   :  { %4790 = vst [vmem:[%s8912_s3 + $0x260] sm:$0xff] %v4534_v7  ;;  %4792 = vst [vmem:[%s8912_s3 + $0x270] sm:$0xff] %v4536_v8 }
 0x365   :  { %4791 = vst [vmem:[%s8912_s3 + $0x268] sm:$0xff] %v4535_v9  ;;  %4793 = vst [vmem:[%s8912_s3 + $0x278] sm:$0xff] %v4537_v10  ;;  %v3180_v11 = vpop.f32.mrb[40].mxu0  ;;  %v4239_v12 = vpop.f32.mrb[40].mxu1 }
 0x366   :  { %v5398_v13 = vadd.f32 %v3180_v11, %v7850_v62  ;;  %v5526_v14 = vadd.f32 %v4239_v12, %v7852_v63  ;;  %v3182_v15 = vpop.f32.mrb[41].mxu0  ;;  %v4241_v16 = vpop.f32.mrb[41].mxu1 }
 0x367   :  { %v5399_v17 = vadd.f32 %v3182_v15, %v7854_v0  ;;  %v5527_v18 = vadd.f32 %v4241_v16, %v7856_v1  ;;  %v3184_v19 = vpop.f32.mrb[42].mxu0  ;;  %v4243_v20 = vpop.f32.mrb[42].mxu1 }
 0x368   :  { %v4538_v21 = vmax.f32 %v5398_v13, 0.0  ;;  %v4540_v22 = vmax.f32 %v5526_v14, 0.0  ;;  %v5400_v23 = vadd.f32 %v3184_v19, %v7850_v62  ;;  %v5528_v24 = vadd.f32 %v4243_v20, %v7852_v63  ;;  %v3186_v25 = vpop.f32.mrb[43].mxu0  ;;  %v4245_v26 = vpop.f32.mrb[43].mxu1 }
 0x369   :  { %v4539_v27 = vmax.f32 %v5399_v17, 0.0  ;;  %v4541_v28 = vmax.f32 %v5527_v18, 0.0  ;;  %v5401_v29 = vadd.f32 %v3186_v25, %v7854_v0  ;;  %v5529_v30 = vadd.f32 %v4245_v26, %v7856_v1 }
 0x36a   :  { %4794 = vst [vmem:[%s8912_s3 + $0x280] sm:$0xff] %v4538_v21  ;;  %4796 = vst [vmem:[%s8912_s3 + $0x290] sm:$0xff] %v4540_v22  ;;  %v4542_v31 = vmax.f32 %v5400_v23, 0.0  ;;  %v4544_v32 = vmax.f32 %v5528_v24, 0.0 }
 0x36b   :  { %4795 = vst [vmem:[%s8912_s3 + $0x288] sm:$0xff] %v4539_v27  ;;  %4797 = vst [vmem:[%s8912_s3 + $0x298] sm:$0xff] %v4541_v28  ;;  %v4543_v33 = vmax.f32 %v5401_v29, 0.0  ;;  %v4545_v34 = vmax.f32 %v5529_v30, 0.0 }
 0x36c   :  { %4798 = vst [vmem:[%s8912_s3 + $0x2a0] sm:$0xff] %v4542_v31  ;;  %4800 = vst [vmem:[%s8912_s3 + $0x2b0] sm:$0xff] %v4544_v32 }
 0x36d   :  { %4799 = vst [vmem:[%s8912_s3 + $0x2a8] sm:$0xff] %v4543_v33  ;;  %4801 = vst [vmem:[%s8912_s3 + $0x2b8] sm:$0xff] %v4545_v34  ;;  %v3190_v35 = vpop.f32.mrb[44].mxu0  ;;  %v4249_v36 = vpop.f32.mrb[44].mxu1 }
 0x36e   :  { %v5402_v37 = vadd.f32 %v3190_v35, %v7850_v62  ;;  %v5530_v38 = vadd.f32 %v4249_v36, %v7852_v63  ;;  %v3192_v39 = vpop.f32.mrb[45].mxu0  ;;  %v4251_v40 = vpop.f32.mrb[45].mxu1 }
 0x36f   :  { %v5403_v41 = vadd.f32 %v3192_v39, %v7854_v0  ;;  %v5531_v42 = vadd.f32 %v4251_v40, %v7856_v1  ;;  %v3194_v43 = vpop.f32.mrb[46].mxu0  ;;  %v4253_v44 = vpop.f32.mrb[46].mxu1 }
 0x370   :  { %v4546_v45 = vmax.f32 %v5402_v37, 0.0  ;;  %v4548_v46 = vmax.f32 %v5530_v38, 0.0  ;;  %v5404_v47 = vadd.f32 %v3194_v43, %v7850_v62  ;;  %v5532_v48 = vadd.f32 %v4253_v44, %v7852_v63  ;;  %v3196_v49 = vpop.f32.mrb[47].mxu0  ;;  %v4255_v50 = vpop.f32.mrb[47].mxu1 }
 0x371   :  { %v4547_v51 = vmax.f32 %v5403_v41, 0.0  ;;  %v4549_v52 = vmax.f32 %v5531_v42, 0.0  ;;  %v5405_v53 = vadd.f32 %v3196_v49, %v7854_v0  ;;  %v5533_v54 = vadd.f32 %v4255_v50, %v7856_v1 }
 0x372   :  { %4802 = vst [vmem:[%s8912_s3 + $0x2c0] sm:$0xff] %v4546_v45  ;;  %4804 = vst [vmem:[%s8912_s3 + $0x2d0] sm:$0xff] %v4548_v46  ;;  %v4550_v55 = vmax.f32 %v5404_v47, 0.0  ;;  %v4552_v56 = vmax.f32 %v5532_v48, 0.0 }
 0x373   :  { %4803 = vst [vmem:[%s8912_s3 + $0x2c8] sm:$0xff] %v4547_v51  ;;  %4805 = vst [vmem:[%s8912_s3 + $0x2d8] sm:$0xff] %v4549_v52  ;;  %v4551_v57 = vmax.f32 %v5405_v53, 0.0  ;;  %v4553_v58 = vmax.f32 %v5533_v54, 0.0 }
 0x374   :  { %4806 = vst [vmem:[%s8912_s3 + $0x2e0] sm:$0xff] %v4550_v55  ;;  %4808 = vst [vmem:[%s8912_s3 + $0x2f0] sm:$0xff] %v4552_v56 }
 0x375   :  { %4807 = vst [vmem:[%s8912_s3 + $0x2e8] sm:$0xff] %v4551_v57  ;;  %4809 = vst [vmem:[%s8912_s3 + $0x2f8] sm:$0xff] %v4553_v58  ;;  %v3200_v59 = vpop.f32.mrb[48].mxu0  ;;  %v4259_v60 = vpop.f32.mrb[48].mxu1 }
 0x376   :  { %v5406_v61 = vadd.f32 %v3200_v59, %v7850_v62  ;;  %v5534_v2 = vadd.f32 %v4259_v60, %v7852_v63  ;;  %v3202_v3 = vpop.f32.mrb[49].mxu0  ;;  %v4261_v4 = vpop.f32.mrb[49].mxu1 }
 0x377   :  { %v5407_v5 = vadd.f32 %v3202_v3, %v7854_v0  ;;  %v5535_v6 = vadd.f32 %v4261_v4, %v7856_v1  ;;  %v3204_v7 = vpop.f32.mrb[50].mxu0  ;;  %v4263_v8 = vpop.f32.mrb[50].mxu1 }
 0x378   :  { %v4554_v9 = vmax.f32 %v5406_v61, 0.0  ;;  %v4556_v10 = vmax.f32 %v5534_v2, 0.0  ;;  %v5408_v11 = vadd.f32 %v3204_v7, %v7850_v62  ;;  %v5536_v12 = vadd.f32 %v4263_v8, %v7852_v63  ;;  %v3206_v13 = vpop.f32.mrb[51].mxu0  ;;  %v4265_v14 = vpop.f32.mrb[51].mxu1 }
 0x379   :  { %v4555_v15 = vmax.f32 %v5407_v5, 0.0  ;;  %v4557_v16 = vmax.f32 %v5535_v6, 0.0  ;;  %v5409_v17 = vadd.f32 %v3206_v13, %v7854_v0  ;;  %v5537_v18 = vadd.f32 %v4265_v14, %v7856_v1 }
 0x37a   :  { %4810 = vst [vmem:[%s8912_s3 + $0x300] sm:$0xff] %v4554_v9  ;;  %4812 = vst [vmem:[%s8912_s3 + $0x310] sm:$0xff] %v4556_v10  ;;  %v4558_v19 = vmax.f32 %v5408_v11, 0.0  ;;  %v4560_v20 = vmax.f32 %v5536_v12, 0.0 }
 0x37b   :  { %4811 = vst [vmem:[%s8912_s3 + $0x308] sm:$0xff] %v4555_v15  ;;  %4813 = vst [vmem:[%s8912_s3 + $0x318] sm:$0xff] %v4557_v16  ;;  %v4559_v21 = vmax.f32 %v5409_v17, 0.0  ;;  %v4561_v22 = vmax.f32 %v5537_v18, 0.0 }
 0x37c   :  { %4814 = vst [vmem:[%s8912_s3 + $0x320] sm:$0xff] %v4558_v19  ;;  %4816 = vst [vmem:[%s8912_s3 + $0x330] sm:$0xff] %v4560_v20 }
 0x37d   :  { %4815 = vst [vmem:[%s8912_s3 + $0x328] sm:$0xff] %v4559_v21  ;;  %4817 = vst [vmem:[%s8912_s3 + $0x338] sm:$0xff] %v4561_v22  ;;  %v3210_v23 = vpop.f32.mrb[52].mxu0  ;;  %v4269_v24 = vpop.f32.mrb[52].mxu1 }
 0x37e   :  { %v5410_v25 = vadd.f32 %v3210_v23, %v7850_v62  ;;  %v5538_v26 = vadd.f32 %v4269_v24, %v7852_v63  ;;  %v3212_v27 = vpop.f32.mrb[53].mxu0  ;;  %v4271_v28 = vpop.f32.mrb[53].mxu1 }
 0x37f   :  { %v5411_v29 = vadd.f32 %v3212_v27, %v7854_v0  ;;  %v5539_v30 = vadd.f32 %v4271_v28, %v7856_v1  ;;  %v3214_v31 = vpop.f32.mrb[54].mxu0  ;;  %v4273_v32 = vpop.f32.mrb[54].mxu1 }
 0x380   :  { %v4562_v33 = vmax.f32 %v5410_v25, 0.0  ;;  %v4564_v34 = vmax.f32 %v5538_v26, 0.0  ;;  %v5412_v35 = vadd.f32 %v3214_v31, %v7850_v62  ;;  %v5540_v36 = vadd.f32 %v4273_v32, %v7852_v63  ;;  %v3216_v37 = vpop.f32.mrb[55].mxu0  ;;  %v4275_v38 = vpop.f32.mrb[55].mxu1 }
 0x381   :  { %v4563_v39 = vmax.f32 %v5411_v29, 0.0  ;;  %v4565_v40 = vmax.f32 %v5539_v30, 0.0  ;;  %v5413_v41 = vadd.f32 %v3216_v37, %v7854_v0  ;;  %v5541_v42 = vadd.f32 %v4275_v38, %v7856_v1 }
 0x382   :  { %4818 = vst [vmem:[%s8912_s3 + $0x340] sm:$0xff] %v4562_v33  ;;  %4820 = vst [vmem:[%s8912_s3 + $0x350] sm:$0xff] %v4564_v34  ;;  %v4566_v43 = vmax.f32 %v5412_v35, 0.0  ;;  %v4568_v44 = vmax.f32 %v5540_v36, 0.0 }
 0x383   :  { %4819 = vst [vmem:[%s8912_s3 + $0x348] sm:$0xff] %v4563_v39  ;;  %4821 = vst [vmem:[%s8912_s3 + $0x358] sm:$0xff] %v4565_v40  ;;  %v4567_v45 = vmax.f32 %v5413_v41, 0.0  ;;  %v4569_v46 = vmax.f32 %v5541_v42, 0.0 }
 0x384   :  { %4822 = vst [vmem:[%s8912_s3 + $0x360] sm:$0xff] %v4566_v43  ;;  %4824 = vst [vmem:[%s8912_s3 + $0x370] sm:$0xff] %v4568_v44 }
 0x385   :  { %4823 = vst [vmem:[%s8912_s3 + $0x368] sm:$0xff] %v4567_v45  ;;  %4825 = vst [vmem:[%s8912_s3 + $0x378] sm:$0xff] %v4569_v46  ;;  %v3220_v47 = vpop.f32.mrb[56].mxu0  ;;  %v4279_v48 = vpop.f32.mrb[56].mxu1 }
 0x386   :  { %v5414_v49 = vadd.f32 %v3220_v47, %v7850_v62  ;;  %v5542_v50 = vadd.f32 %v4279_v48, %v7852_v63  ;;  %v3222_v51 = vpop.f32.mrb[57].mxu0  ;;  %v4281_v52 = vpop.f32.mrb[57].mxu1 }
 0x387   :  { %v5415_v53 = vadd.f32 %v3222_v51, %v7854_v0  ;;  %v5543_v54 = vadd.f32 %v4281_v52, %v7856_v1  ;;  %v3224_v55 = vpop.f32.mrb[58].mxu0  ;;  %v4283_v56 = vpop.f32.mrb[58].mxu1 }
 0x388   :  { %v4570_v57 = vmax.f32 %v5414_v49, 0.0  ;;  %v4572_v58 = vmax.f32 %v5542_v50, 0.0  ;;  %v5416_v59 = vadd.f32 %v3224_v55, %v7850_v62  ;;  %v5544_v60 = vadd.f32 %v4283_v56, %v7852_v63  ;;  %v3226_v61 = vpop.f32.mrb[59].mxu0  ;;  %v4285_v2 = vpop.f32.mrb[59].mxu1 }
 0x389   :  { %v4571_v3 = vmax.f32 %v5415_v53, 0.0  ;;  %v4573_v4 = vmax.f32 %v5543_v54, 0.0  ;;  %v5417_v5 = vadd.f32 %v3226_v61, %v7854_v0  ;;  %v5545_v6 = vadd.f32 %v4285_v2, %v7856_v1 }
 0x38a   :  { %4826 = vst [vmem:[%s8912_s3 + $0x380] sm:$0xff] %v4570_v57  ;;  %4828 = vst [vmem:[%s8912_s3 + $0x390] sm:$0xff] %v4572_v58  ;;  %v4574_v7 = vmax.f32 %v5416_v59, 0.0  ;;  %v4576_v8 = vmax.f32 %v5544_v60, 0.0 }
 0x38b   :  { %4827 = vst [vmem:[%s8912_s3 + $0x388] sm:$0xff] %v4571_v3  ;;  %4829 = vst [vmem:[%s8912_s3 + $0x398] sm:$0xff] %v4573_v4  ;;  %v4575_v9 = vmax.f32 %v5417_v5, 0.0  ;;  %v4577_v10 = vmax.f32 %v5545_v6, 0.0 }
 0x38c   :  { %4830 = vst [vmem:[%s8912_s3 + $0x3a0] sm:$0xff] %v4574_v7  ;;  %4832 = vst [vmem:[%s8912_s3 + $0x3b0] sm:$0xff] %v4576_v8 }
 0x38d   :  { %4831 = vst [vmem:[%s8912_s3 + $0x3a8] sm:$0xff] %v4575_v9  ;;  %4833 = vst [vmem:[%s8912_s3 + $0x3b8] sm:$0xff] %v4577_v10  ;;  %v3230_v11 = vpop.f32.mrb[60].mxu0  ;;  %v4289_v12 = vpop.f32.mrb[60].mxu1 }
 0x38e   :  { %v5418_v13 = vadd.f32 %v3230_v11, %v7850_v62  ;;  %v5546_v14 = vadd.f32 %v4289_v12, %v7852_v63  ;;  %v3232_v15 = vpop.f32.mrb[61].mxu0  ;;  %v4291_v16 = vpop.f32.mrb[61].mxu1 }
 0x38f   :  { %v5419_v17 = vadd.f32 %v3232_v15, %v7854_v0  ;;  %v5547_v18 = vadd.f32 %v4291_v16, %v7856_v1  ;;  %v3234_v19 = vpop.f32.mrb[62].mxu0  ;;  %v4293_v20 = vpop.f32.mrb[62].mxu1 }
 0x390   :  { %v4578_v21 = vmax.f32 %v5418_v13, 0.0  ;;  %v4580_v22 = vmax.f32 %v5546_v14, 0.0  ;;  %v5420_v23 = vadd.f32 %v3234_v19, %v7850_v62  ;;  %v5548_v24 = vadd.f32 %v4293_v20, %v7852_v63  ;;  %v3236_v25 = vpop.f32.mrb[63].mxu0  ;;  %v4295_v26 = vpop.f32.mrb[63].mxu1 }
 0x391   :  { %v4579_v27 = vmax.f32 %v5419_v17, 0.0  ;;  %v4581_v28 = vmax.f32 %v5547_v18, 0.0  ;;  %v5421_v29 = vadd.f32 %v3236_v25, %v7854_v0  ;;  %v5549_v30 = vadd.f32 %v4295_v26, %v7856_v1 }
 0x392   :  { %4834 = vst [vmem:[%s8912_s3 + $0x3c0] sm:$0xff] %v4578_v21  ;;  %4836 = vst [vmem:[%s8912_s3 + $0x3d0] sm:$0xff] %v4580_v22  ;;  %v4582_v31 = vmax.f32 %v5420_v23, 0.0  ;;  %v4584_v32 = vmax.f32 %v5548_v24, 0.0 }
 0x393   :  { %4835 = vst [vmem:[%s8912_s3 + $0x3c8] sm:$0xff] %v4579_v27  ;;  %4837 = vst [vmem:[%s8912_s3 + $0x3d8] sm:$0xff] %v4581_v28  ;;  %v4583_v33 = vmax.f32 %v5421_v29, 0.0  ;;  %v4585_v34 = vmax.f32 %v5549_v30, 0.0 }
 0x394   :  { %4838 = vst [vmem:[%s8912_s3 + $0x3e0] sm:$0xff] %v4582_v31  ;;  %4840 = vst [vmem:[%s8912_s3 + $0x3f0] sm:$0xff] %v4584_v32 }
 0x395   :  { %4839 = vst [vmem:[%s8912_s3 + $0x3e8] sm:$0xff] %v4583_v33  ;;  %4841 = vst [vmem:[%s8912_s3 + $0x3f8] sm:$0xff] %v4585_v34  ;;  %v3240_v35 = vpop.f32.mrb[64].mxu0  ;;  %v4299_v36 = vpop.f32.mrb[64].mxu1 }
 0x396   :  { %v5422_v37 = vadd.f32 %v3240_v35, %v7850_v62  ;;  %v5550_v38 = vadd.f32 %v4299_v36, %v7852_v63  ;;  %v3242_v39 = vpop.f32.mrb[65].mxu0  ;;  %v4301_v40 = vpop.f32.mrb[65].mxu1 }
 0x397   :  { %v5423_v41 = vadd.f32 %v3242_v39, %v7854_v0  ;;  %v5551_v42 = vadd.f32 %v4301_v40, %v7856_v1  ;;  %v3244_v43 = vpop.f32.mrb[66].mxu0  ;;  %v4303_v44 = vpop.f32.mrb[66].mxu1 }
 0x398   :  { %v4586_v45 = vmax.f32 %v5422_v37, 0.0  ;;  %v4588_v46 = vmax.f32 %v5550_v38, 0.0  ;;  %v5424_v47 = vadd.f32 %v3244_v43, %v7850_v62  ;;  %v5552_v48 = vadd.f32 %v4303_v44, %v7852_v63  ;;  %v3246_v49 = vpop.f32.mrb[67].mxu0  ;;  %v4305_v50 = vpop.f32.mrb[67].mxu1 }
 0x399   :  { %v4587_v51 = vmax.f32 %v5423_v41, 0.0  ;;  %v4589_v52 = vmax.f32 %v5551_v42, 0.0  ;;  %v5425_v53 = vadd.f32 %v3246_v49, %v7854_v0  ;;  %v5553_v54 = vadd.f32 %v4305_v50, %v7856_v1 }
 0x39a   :  { %4842 = vst [vmem:[%s8912_s3 + $0x400] sm:$0xff] %v4586_v45  ;;  %4844 = vst [vmem:[%s8912_s3 + $0x410] sm:$0xff] %v4588_v46  ;;  %v4590_v55 = vmax.f32 %v5424_v47, 0.0  ;;  %v4592_v56 = vmax.f32 %v5552_v48, 0.0 }
 0x39b   :  { %4843 = vst [vmem:[%s8912_s3 + $0x408] sm:$0xff] %v4587_v51  ;;  %4845 = vst [vmem:[%s8912_s3 + $0x418] sm:$0xff] %v4589_v52  ;;  %v4591_v57 = vmax.f32 %v5425_v53, 0.0  ;;  %v4593_v58 = vmax.f32 %v5553_v54, 0.0 }
 0x39c   :  { %4846 = vst [vmem:[%s8912_s3 + $0x420] sm:$0xff] %v4590_v55  ;;  %4848 = vst [vmem:[%s8912_s3 + $0x430] sm:$0xff] %v4592_v56 }
 0x39d   :  { %4847 = vst [vmem:[%s8912_s3 + $0x428] sm:$0xff] %v4591_v57  ;;  %4849 = vst [vmem:[%s8912_s3 + $0x438] sm:$0xff] %v4593_v58  ;;  %v3250_v59 = vpop.f32.mrb[68].mxu0  ;;  %v4309_v60 = vpop.f32.mrb[68].mxu1 }
 0x39e   :  { %v5426_v61 = vadd.f32 %v3250_v59, %v7850_v62  ;;  %v5554_v2 = vadd.f32 %v4309_v60, %v7852_v63  ;;  %v3252_v3 = vpop.f32.mrb[69].mxu0  ;;  %v4311_v4 = vpop.f32.mrb[69].mxu1 }
 0x39f   :  { %v5427_v5 = vadd.f32 %v3252_v3, %v7854_v0  ;;  %v5555_v6 = vadd.f32 %v4311_v4, %v7856_v1  ;;  %v3254_v7 = vpop.f32.mrb[70].mxu0  ;;  %v4313_v8 = vpop.f32.mrb[70].mxu1 }
 0x3a0   :  { %v4594_v9 = vmax.f32 %v5426_v61, 0.0  ;;  %v4596_v10 = vmax.f32 %v5554_v2, 0.0  ;;  %v5428_v11 = vadd.f32 %v3254_v7, %v7850_v62  ;;  %v5556_v12 = vadd.f32 %v4313_v8, %v7852_v63  ;;  %v3256_v13 = vpop.f32.mrb[71].mxu0  ;;  %v4315_v14 = vpop.f32.mrb[71].mxu1 }
 0x3a1   :  { %v4595_v15 = vmax.f32 %v5427_v5, 0.0  ;;  %v4597_v16 = vmax.f32 %v5555_v6, 0.0  ;;  %v5429_v17 = vadd.f32 %v3256_v13, %v7854_v0  ;;  %v5557_v18 = vadd.f32 %v4315_v14, %v7856_v1 }
 0x3a2   :  { %4850 = vst [vmem:[%s8912_s3 + $0x440] sm:$0xff] %v4594_v9  ;;  %4852 = vst [vmem:[%s8912_s3 + $0x450] sm:$0xff] %v4596_v10  ;;  %v4598_v19 = vmax.f32 %v5428_v11, 0.0  ;;  %v4600_v20 = vmax.f32 %v5556_v12, 0.0 }
 0x3a3   :  { %4851 = vst [vmem:[%s8912_s3 + $0x448] sm:$0xff] %v4595_v15  ;;  %4853 = vst [vmem:[%s8912_s3 + $0x458] sm:$0xff] %v4597_v16  ;;  %v4599_v21 = vmax.f32 %v5429_v17, 0.0  ;;  %v4601_v22 = vmax.f32 %v5557_v18, 0.0 }
 0x3a4   :  { %4854 = vst [vmem:[%s8912_s3 + $0x460] sm:$0xff] %v4598_v19  ;;  %4856 = vst [vmem:[%s8912_s3 + $0x470] sm:$0xff] %v4600_v20 }
 0x3a5   :  { %4855 = vst [vmem:[%s8912_s3 + $0x468] sm:$0xff] %v4599_v21  ;;  %4857 = vst [vmem:[%s8912_s3 + $0x478] sm:$0xff] %v4601_v22  ;;  %v3260_v23 = vpop.f32.mrb[72].mxu0  ;;  %v4319_v24 = vpop.f32.mrb[72].mxu1 }
 0x3a6   :  { %v5430_v25 = vadd.f32 %v3260_v23, %v7850_v62  ;;  %v5558_v26 = vadd.f32 %v4319_v24, %v7852_v63  ;;  %v3262_v27 = vpop.f32.mrb[73].mxu0  ;;  %v4321_v28 = vpop.f32.mrb[73].mxu1 }
 0x3a7   :  { %v5431_v29 = vadd.f32 %v3262_v27, %v7854_v0  ;;  %v5559_v30 = vadd.f32 %v4321_v28, %v7856_v1  ;;  %v3264_v31 = vpop.f32.mrb[74].mxu0  ;;  %v4323_v32 = vpop.f32.mrb[74].mxu1 }
 0x3a8   :  { %v4602_v33 = vmax.f32 %v5430_v25, 0.0  ;;  %v4604_v34 = vmax.f32 %v5558_v26, 0.0  ;;  %v5432_v35 = vadd.f32 %v3264_v31, %v7850_v62  ;;  %v5560_v36 = vadd.f32 %v4323_v32, %v7852_v63  ;;  %v3266_v37 = vpop.f32.mrb[75].mxu0  ;;  %v4325_v38 = vpop.f32.mrb[75].mxu1 }
 0x3a9   :  { %v4603_v39 = vmax.f32 %v5431_v29, 0.0  ;;  %v4605_v40 = vmax.f32 %v5559_v30, 0.0  ;;  %v5433_v41 = vadd.f32 %v3266_v37, %v7854_v0  ;;  %v5561_v42 = vadd.f32 %v4325_v38, %v7856_v1 }
 0x3aa   :  { %4858 = vst [vmem:[%s8912_s3 + $0x480] sm:$0xff] %v4602_v33  ;;  %4860 = vst [vmem:[%s8912_s3 + $0x490] sm:$0xff] %v4604_v34  ;;  %v4606_v43 = vmax.f32 %v5432_v35, 0.0  ;;  %v4608_v44 = vmax.f32 %v5560_v36, 0.0 }
 0x3ab   :  { %4859 = vst [vmem:[%s8912_s3 + $0x488] sm:$0xff] %v4603_v39  ;;  %4861 = vst [vmem:[%s8912_s3 + $0x498] sm:$0xff] %v4605_v40  ;;  %v4607_v45 = vmax.f32 %v5433_v41, 0.0  ;;  %v4609_v46 = vmax.f32 %v5561_v42, 0.0 }
 0x3ac   :  { %4862 = vst [vmem:[%s8912_s3 + $0x4a0] sm:$0xff] %v4606_v43  ;;  %4864 = vst [vmem:[%s8912_s3 + $0x4b0] sm:$0xff] %v4608_v44 }
 0x3ad   :  { %4863 = vst [vmem:[%s8912_s3 + $0x4a8] sm:$0xff] %v4607_v45  ;;  %4865 = vst [vmem:[%s8912_s3 + $0x4b8] sm:$0xff] %v4609_v46  ;;  %v3270_v47 = vpop.f32.mrb[76].mxu0  ;;  %v4329_v48 = vpop.f32.mrb[76].mxu1 }
 0x3ae   :  { %v5434_v49 = vadd.f32 %v3270_v47, %v7850_v62  ;;  %v5562_v50 = vadd.f32 %v4329_v48, %v7852_v63  ;;  %v3272_v51 = vpop.f32.mrb[77].mxu0  ;;  %v4331_v52 = vpop.f32.mrb[77].mxu1 }
 0x3af   :  { %v5435_v53 = vadd.f32 %v3272_v51, %v7854_v0  ;;  %v5563_v54 = vadd.f32 %v4331_v52, %v7856_v1  ;;  %v3274_v55 = vpop.f32.mrb[78].mxu0  ;;  %v4333_v56 = vpop.f32.mrb[78].mxu1 }
 0x3b0   :  { %v4610_v57 = vmax.f32 %v5434_v49, 0.0  ;;  %v4612_v58 = vmax.f32 %v5562_v50, 0.0  ;;  %v5436_v59 = vadd.f32 %v3274_v55, %v7850_v62  ;;  %v5564_v60 = vadd.f32 %v4333_v56, %v7852_v63  ;;  %v3276_v61 = vpop.f32.mrb[79].mxu0  ;;  %v4335_v2 = vpop.f32.mrb[79].mxu1 }
 0x3b1   :  { %v4611_v3 = vmax.f32 %v5435_v53, 0.0  ;;  %v4613_v4 = vmax.f32 %v5563_v54, 0.0  ;;  %v5437_v5 = vadd.f32 %v3276_v61, %v7854_v0  ;;  %v5565_v6 = vadd.f32 %v4335_v2, %v7856_v1 }
 0x3b2   :  { %4866 = vst [vmem:[%s8912_s3 + $0x4c0] sm:$0xff] %v4610_v57  ;;  %4868 = vst [vmem:[%s8912_s3 + $0x4d0] sm:$0xff] %v4612_v58  ;;  %v4614_v7 = vmax.f32 %v5436_v59, 0.0  ;;  %v4616_v8 = vmax.f32 %v5564_v60, 0.0 }
 0x3b3   :  { %4867 = vst [vmem:[%s8912_s3 + $0x4c8] sm:$0xff] %v4611_v3  ;;  %4869 = vst [vmem:[%s8912_s3 + $0x4d8] sm:$0xff] %v4613_v4  ;;  %v4615_v9 = vmax.f32 %v5437_v5, 0.0  ;;  %v4617_v10 = vmax.f32 %v5565_v6, 0.0 }
 0x3b4   :  { %4870 = vst [vmem:[%s8912_s3 + $0x4e0] sm:$0xff] %v4614_v7  ;;  %4872 = vst [vmem:[%s8912_s3 + $0x4f0] sm:$0xff] %v4616_v8 }
 0x3b5   :  { %4871 = vst [vmem:[%s8912_s3 + $0x4e8] sm:$0xff] %v4615_v9  ;;  %4873 = vst [vmem:[%s8912_s3 + $0x4f8] sm:$0xff] %v4617_v10  ;;  %v3280_v11 = vpop.f32.mrb[80].mxu0  ;;  %v4339_v12 = vpop.f32.mrb[80].mxu1 }
 0x3b6   :  { %v5438_v13 = vadd.f32 %v3280_v11, %v7850_v62  ;;  %v5566_v14 = vadd.f32 %v4339_v12, %v7852_v63  ;;  %v3282_v15 = vpop.f32.mrb[81].mxu0  ;;  %v4341_v16 = vpop.f32.mrb[81].mxu1 }
 0x3b7   :  { %v5439_v17 = vadd.f32 %v3282_v15, %v7854_v0  ;;  %v5567_v18 = vadd.f32 %v4341_v16, %v7856_v1  ;;  %v3284_v19 = vpop.f32.mrb[82].mxu0  ;;  %v4343_v20 = vpop.f32.mrb[82].mxu1 }
 0x3b8   :  { %v4618_v21 = vmax.f32 %v5438_v13, 0.0  ;;  %v4620_v22 = vmax.f32 %v5566_v14, 0.0  ;;  %v5440_v23 = vadd.f32 %v3284_v19, %v7850_v62  ;;  %v5568_v24 = vadd.f32 %v4343_v20, %v7852_v63  ;;  %v3286_v25 = vpop.f32.mrb[83].mxu0  ;;  %v4345_v26 = vpop.f32.mrb[83].mxu1 }
 0x3b9   :  { %v4619_v27 = vmax.f32 %v5439_v17, 0.0  ;;  %v4621_v28 = vmax.f32 %v5567_v18, 0.0  ;;  %v5441_v29 = vadd.f32 %v3286_v25, %v7854_v0  ;;  %v5569_v30 = vadd.f32 %v4345_v26, %v7856_v1 }
 0x3ba   :  { %4874 = vst [vmem:[%s8912_s3 + $0x500] sm:$0xff] %v4618_v21  ;;  %4876 = vst [vmem:[%s8912_s3 + $0x510] sm:$0xff] %v4620_v22  ;;  %v4622_v31 = vmax.f32 %v5440_v23, 0.0  ;;  %v4624_v32 = vmax.f32 %v5568_v24, 0.0 }
 0x3bb   :  { %4875 = vst [vmem:[%s8912_s3 + $0x508] sm:$0xff] %v4619_v27  ;;  %4877 = vst [vmem:[%s8912_s3 + $0x518] sm:$0xff] %v4621_v28  ;;  %v4623_v33 = vmax.f32 %v5441_v29, 0.0  ;;  %v4625_v34 = vmax.f32 %v5569_v30, 0.0 }
 0x3bc   :  { %4878 = vst [vmem:[%s8912_s3 + $0x520] sm:$0xff] %v4622_v31  ;;  %4880 = vst [vmem:[%s8912_s3 + $0x530] sm:$0xff] %v4624_v32 }
 0x3bd   :  { %4879 = vst [vmem:[%s8912_s3 + $0x528] sm:$0xff] %v4623_v33  ;;  %4881 = vst [vmem:[%s8912_s3 + $0x538] sm:$0xff] %v4625_v34  ;;  %v3290_v35 = vpop.f32.mrb[84].mxu0  ;;  %v4349_v36 = vpop.f32.mrb[84].mxu1 }
 0x3be   :  { %v5442_v37 = vadd.f32 %v3290_v35, %v7850_v62  ;;  %v5570_v38 = vadd.f32 %v4349_v36, %v7852_v63  ;;  %v3292_v39 = vpop.f32.mrb[85].mxu0  ;;  %v4351_v40 = vpop.f32.mrb[85].mxu1 }
 0x3bf   :  { %v5443_v41 = vadd.f32 %v3292_v39, %v7854_v0  ;;  %v5571_v42 = vadd.f32 %v4351_v40, %v7856_v1  ;;  %v3294_v43 = vpop.f32.mrb[86].mxu0  ;;  %v4353_v44 = vpop.f32.mrb[86].mxu1 }
 0x3c0   :  { %v4626_v45 = vmax.f32 %v5442_v37, 0.0  ;;  %v4628_v46 = vmax.f32 %v5570_v38, 0.0  ;;  %v5444_v47 = vadd.f32 %v3294_v43, %v7850_v62  ;;  %v5572_v48 = vadd.f32 %v4353_v44, %v7852_v63  ;;  %v3296_v49 = vpop.f32.mrb[87].mxu0  ;;  %v4355_v50 = vpop.f32.mrb[87].mxu1 }
 0x3c1   :  { %v4627_v51 = vmax.f32 %v5443_v41, 0.0  ;;  %v4629_v52 = vmax.f32 %v5571_v42, 0.0  ;;  %v5445_v53 = vadd.f32 %v3296_v49, %v7854_v0  ;;  %v5573_v54 = vadd.f32 %v4355_v50, %v7856_v1 }
 0x3c2   :  { %4882 = vst [vmem:[%s8912_s3 + $0x540] sm:$0xff] %v4626_v45  ;;  %4884 = vst [vmem:[%s8912_s3 + $0x550] sm:$0xff] %v4628_v46  ;;  %v4630_v55 = vmax.f32 %v5444_v47, 0.0  ;;  %v4632_v56 = vmax.f32 %v5572_v48, 0.0 }
 0x3c3   :  { %4883 = vst [vmem:[%s8912_s3 + $0x548] sm:$0xff] %v4627_v51  ;;  %4885 = vst [vmem:[%s8912_s3 + $0x558] sm:$0xff] %v4629_v52  ;;  %v4631_v57 = vmax.f32 %v5445_v53, 0.0  ;;  %v4633_v58 = vmax.f32 %v5573_v54, 0.0 }
 0x3c4   :  { %4886 = vst [vmem:[%s8912_s3 + $0x560] sm:$0xff] %v4630_v55  ;;  %4888 = vst [vmem:[%s8912_s3 + $0x570] sm:$0xff] %v4632_v56 }
 0x3c5   :  { %4887 = vst [vmem:[%s8912_s3 + $0x568] sm:$0xff] %v4631_v57  ;;  %4889 = vst [vmem:[%s8912_s3 + $0x578] sm:$0xff] %v4633_v58  ;;  %v3300_v59 = vpop.f32.mrb[88].mxu0  ;;  %v4359_v60 = vpop.f32.mrb[88].mxu1 }
 0x3c6   :  { %v5446_v61 = vadd.f32 %v3300_v59, %v7850_v62  ;;  %v5574_v2 = vadd.f32 %v4359_v60, %v7852_v63  ;;  %v3302_v3 = vpop.f32.mrb[89].mxu0  ;;  %v4361_v4 = vpop.f32.mrb[89].mxu1 }
 0x3c7   :  { %v5447_v5 = vadd.f32 %v3302_v3, %v7854_v0  ;;  %v5575_v6 = vadd.f32 %v4361_v4, %v7856_v1  ;;  %v3304_v7 = vpop.f32.mrb[90].mxu0  ;;  %v4363_v8 = vpop.f32.mrb[90].mxu1 }
 0x3c8   :  { %v4634_v9 = vmax.f32 %v5446_v61, 0.0  ;;  %v4636_v10 = vmax.f32 %v5574_v2, 0.0  ;;  %v5448_v11 = vadd.f32 %v3304_v7, %v7850_v62  ;;  %v5576_v12 = vadd.f32 %v4363_v8, %v7852_v63  ;;  %v3306_v13 = vpop.f32.mrb[91].mxu0  ;;  %v4365_v14 = vpop.f32.mrb[91].mxu1 }
 0x3c9   :  { %v4635_v15 = vmax.f32 %v5447_v5, 0.0  ;;  %v4637_v16 = vmax.f32 %v5575_v6, 0.0  ;;  %v5449_v17 = vadd.f32 %v3306_v13, %v7854_v0  ;;  %v5577_v18 = vadd.f32 %v4365_v14, %v7856_v1 }
 0x3ca   :  { %4890 = vst [vmem:[%s8912_s3 + $0x580] sm:$0xff] %v4634_v9  ;;  %4892 = vst [vmem:[%s8912_s3 + $0x590] sm:$0xff] %v4636_v10  ;;  %v4638_v19 = vmax.f32 %v5448_v11, 0.0  ;;  %v4640_v20 = vmax.f32 %v5576_v12, 0.0 }
 0x3cb   :  { %4891 = vst [vmem:[%s8912_s3 + $0x588] sm:$0xff] %v4635_v15  ;;  %4893 = vst [vmem:[%s8912_s3 + $0x598] sm:$0xff] %v4637_v16  ;;  %v4639_v21 = vmax.f32 %v5449_v17, 0.0  ;;  %v4641_v22 = vmax.f32 %v5577_v18, 0.0 }
 0x3cc   :  { %4894 = vst [vmem:[%s8912_s3 + $0x5a0] sm:$0xff] %v4638_v19  ;;  %4896 = vst [vmem:[%s8912_s3 + $0x5b0] sm:$0xff] %v4640_v20 }
 0x3cd   :  { %4895 = vst [vmem:[%s8912_s3 + $0x5a8] sm:$0xff] %v4639_v21  ;;  %4897 = vst [vmem:[%s8912_s3 + $0x5b8] sm:$0xff] %v4641_v22  ;;  %v3310_v23 = vpop.f32.mrb[92].mxu0  ;;  %v4369_v24 = vpop.f32.mrb[92].mxu1 }
 0x3ce   :  { %v5450_v25 = vadd.f32 %v3310_v23, %v7850_v62  ;;  %v5578_v26 = vadd.f32 %v4369_v24, %v7852_v63  ;;  %v3312_v27 = vpop.f32.mrb[93].mxu0  ;;  %v4371_v28 = vpop.f32.mrb[93].mxu1 }
 0x3cf   :  { %v5451_v29 = vadd.f32 %v3312_v27, %v7854_v0  ;;  %v5579_v30 = vadd.f32 %v4371_v28, %v7856_v1  ;;  %v3314_v31 = vpop.f32.mrb[94].mxu0  ;;  %v4373_v32 = vpop.f32.mrb[94].mxu1 }
 0x3d0   :  { %v4642_v33 = vmax.f32 %v5450_v25, 0.0  ;;  %v4644_v34 = vmax.f32 %v5578_v26, 0.0  ;;  %v5452_v35 = vadd.f32 %v3314_v31, %v7850_v62  ;;  %v5580_v36 = vadd.f32 %v4373_v32, %v7852_v63  ;;  %v3316_v37 = vpop.f32.mrb[95].mxu0  ;;  %v4375_v38 = vpop.f32.mrb[95].mxu1 }
 0x3d1   :  { %v4643_v39 = vmax.f32 %v5451_v29, 0.0  ;;  %v4645_v40 = vmax.f32 %v5579_v30, 0.0  ;;  %v5453_v41 = vadd.f32 %v3316_v37, %v7854_v0  ;;  %v5581_v42 = vadd.f32 %v4375_v38, %v7856_v1 }
 0x3d2   :  { %4898 = vst [vmem:[%s8912_s3 + $0x5c0] sm:$0xff] %v4642_v33  ;;  %4900 = vst [vmem:[%s8912_s3 + $0x5d0] sm:$0xff] %v4644_v34  ;;  %v4646_v43 = vmax.f32 %v5452_v35, 0.0  ;;  %v4648_v44 = vmax.f32 %v5580_v36, 0.0 }
 0x3d3   :  { %4899 = vst [vmem:[%s8912_s3 + $0x5c8] sm:$0xff] %v4643_v39  ;;  %4901 = vst [vmem:[%s8912_s3 + $0x5d8] sm:$0xff] %v4645_v40  ;;  %v4647_v45 = vmax.f32 %v5453_v41, 0.0  ;;  %v4649_v46 = vmax.f32 %v5581_v42, 0.0 }
 0x3d4   :  { %4902 = vst [vmem:[%s8912_s3 + $0x5e0] sm:$0xff] %v4646_v43  ;;  %4904 = vst [vmem:[%s8912_s3 + $0x5f0] sm:$0xff] %v4648_v44 }
 0x3d5   :  { %4903 = vst [vmem:[%s8912_s3 + $0x5e8] sm:$0xff] %v4647_v45  ;;  %4905 = vst [vmem:[%s8912_s3 + $0x5f8] sm:$0xff] %v4649_v46  ;;  %v3320_v47 = vpop.f32.mrb[96].mxu0  ;;  %v4379_v48 = vpop.f32.mrb[96].mxu1 }
 0x3d6   :  { %v5454_v49 = vadd.f32 %v3320_v47, %v7850_v62  ;;  %v5582_v50 = vadd.f32 %v4379_v48, %v7852_v63  ;;  %v3322_v51 = vpop.f32.mrb[97].mxu0  ;;  %v4381_v52 = vpop.f32.mrb[97].mxu1 }
 0x3d7   :  { %v5455_v53 = vadd.f32 %v3322_v51, %v7854_v0  ;;  %v5583_v54 = vadd.f32 %v4381_v52, %v7856_v1  ;;  %v3324_v55 = vpop.f32.mrb[98].mxu0  ;;  %v4383_v56 = vpop.f32.mrb[98].mxu1 }
 0x3d8   :  { %v4650_v57 = vmax.f32 %v5454_v49, 0.0  ;;  %v4652_v58 = vmax.f32 %v5582_v50, 0.0  ;;  %v5456_v59 = vadd.f32 %v3324_v55, %v7850_v62  ;;  %v5584_v60 = vadd.f32 %v4383_v56, %v7852_v63  ;;  %v3326_v61 = vpop.f32.mrb[99].mxu0  ;;  %v4385_v2 = vpop.f32.mrb[99].mxu1 }
 0x3d9   :  { %v4651_v3 = vmax.f32 %v5455_v53, 0.0  ;;  %v4653_v4 = vmax.f32 %v5583_v54, 0.0  ;;  %v5457_v5 = vadd.f32 %v3326_v61, %v7854_v0  ;;  %v5585_v6 = vadd.f32 %v4385_v2, %v7856_v1 }
 0x3da   :  { %4906 = vst [vmem:[%s8912_s3 + $0x600] sm:$0xff] %v4650_v57  ;;  %4908 = vst [vmem:[%s8912_s3 + $0x610] sm:$0xff] %v4652_v58  ;;  %v4654_v7 = vmax.f32 %v5456_v59, 0.0  ;;  %v4656_v8 = vmax.f32 %v5584_v60, 0.0 }
 0x3db   :  { %4907 = vst [vmem:[%s8912_s3 + $0x608] sm:$0xff] %v4651_v3  ;;  %4909 = vst [vmem:[%s8912_s3 + $0x618] sm:$0xff] %v4653_v4  ;;  %v4655_v9 = vmax.f32 %v5457_v5, 0.0  ;;  %v4657_v10 = vmax.f32 %v5585_v6, 0.0 }
 0x3dc   :  { %4910 = vst [vmem:[%s8912_s3 + $0x620] sm:$0xff] %v4654_v7  ;;  %4912 = vst [vmem:[%s8912_s3 + $0x630] sm:$0xff] %v4656_v8 }
 0x3dd   :  { %4911 = vst [vmem:[%s8912_s3 + $0x628] sm:$0xff] %v4655_v9  ;;  %4913 = vst [vmem:[%s8912_s3 + $0x638] sm:$0xff] %v4657_v10  ;;  %v3330_v11 = vpop.f32.mrb[100].mxu0  ;;  %v4389_v12 = vpop.f32.mrb[100].mxu1 }
 0x3de   :  { %v5458_v13 = vadd.f32 %v3330_v11, %v7850_v62  ;;  %v5586_v14 = vadd.f32 %v4389_v12, %v7852_v63  ;;  %v3332_v15 = vpop.f32.mrb[101].mxu0  ;;  %v4391_v16 = vpop.f32.mrb[101].mxu1 }
 0x3df   :  { %v5459_v17 = vadd.f32 %v3332_v15, %v7854_v0  ;;  %v5587_v18 = vadd.f32 %v4391_v16, %v7856_v1  ;;  %v3334_v19 = vpop.f32.mrb[102].mxu0  ;;  %v4393_v20 = vpop.f32.mrb[102].mxu1 }
 0x3e0   :  { %v4658_v21 = vmax.f32 %v5458_v13, 0.0  ;;  %v4660_v22 = vmax.f32 %v5586_v14, 0.0  ;;  %v5460_v23 = vadd.f32 %v3334_v19, %v7850_v62  ;;  %v5588_v24 = vadd.f32 %v4393_v20, %v7852_v63  ;;  %v3336_v25 = vpop.f32.mrb[103].mxu0  ;;  %v4395_v26 = vpop.f32.mrb[103].mxu1 }
 0x3e1   :  { %v4659_v27 = vmax.f32 %v5459_v17, 0.0  ;;  %v4661_v28 = vmax.f32 %v5587_v18, 0.0  ;;  %v5461_v29 = vadd.f32 %v3336_v25, %v7854_v0  ;;  %v5589_v30 = vadd.f32 %v4395_v26, %v7856_v1 }
 0x3e2   :  { %4914 = vst [vmem:[%s8912_s3 + $0x640] sm:$0xff] %v4658_v21  ;;  %4916 = vst [vmem:[%s8912_s3 + $0x650] sm:$0xff] %v4660_v22  ;;  %v4662_v31 = vmax.f32 %v5460_v23, 0.0  ;;  %v4664_v32 = vmax.f32 %v5588_v24, 0.0 }
 0x3e3   :  { %4915 = vst [vmem:[%s8912_s3 + $0x648] sm:$0xff] %v4659_v27  ;;  %4917 = vst [vmem:[%s8912_s3 + $0x658] sm:$0xff] %v4661_v28  ;;  %v4663_v33 = vmax.f32 %v5461_v29, 0.0  ;;  %v4665_v34 = vmax.f32 %v5589_v30, 0.0 }
 0x3e4   :  { %4918 = vst [vmem:[%s8912_s3 + $0x660] sm:$0xff] %v4662_v31  ;;  %4920 = vst [vmem:[%s8912_s3 + $0x670] sm:$0xff] %v4664_v32 }
 0x3e5   :  { %4919 = vst [vmem:[%s8912_s3 + $0x668] sm:$0xff] %v4663_v33  ;;  %4921 = vst [vmem:[%s8912_s3 + $0x678] sm:$0xff] %v4665_v34  ;;  %v3340_v35 = vpop.f32.mrb[104].mxu0  ;;  %v4399_v36 = vpop.f32.mrb[104].mxu1 }
 0x3e6   :  { %v5462_v37 = vadd.f32 %v3340_v35, %v7850_v62  ;;  %v5590_v38 = vadd.f32 %v4399_v36, %v7852_v63  ;;  %v3342_v39 = vpop.f32.mrb[105].mxu0  ;;  %v4401_v40 = vpop.f32.mrb[105].mxu1 }
 0x3e7   :  { %v5463_v41 = vadd.f32 %v3342_v39, %v7854_v0  ;;  %v5591_v42 = vadd.f32 %v4401_v40, %v7856_v1  ;;  %v3344_v43 = vpop.f32.mrb[106].mxu0  ;;  %v4403_v44 = vpop.f32.mrb[106].mxu1 }
 0x3e8   :  { %v4666_v45 = vmax.f32 %v5462_v37, 0.0  ;;  %v4668_v46 = vmax.f32 %v5590_v38, 0.0  ;;  %v5464_v47 = vadd.f32 %v3344_v43, %v7850_v62  ;;  %v5592_v48 = vadd.f32 %v4403_v44, %v7852_v63  ;;  %v3346_v49 = vpop.f32.mrb[107].mxu0  ;;  %v4405_v50 = vpop.f32.mrb[107].mxu1 }
 0x3e9   :  { %v4667_v51 = vmax.f32 %v5463_v41, 0.0  ;;  %v4669_v52 = vmax.f32 %v5591_v42, 0.0  ;;  %v5465_v53 = vadd.f32 %v3346_v49, %v7854_v0  ;;  %v5593_v54 = vadd.f32 %v4405_v50, %v7856_v1 }
 0x3ea   :  { %4922 = vst [vmem:[%s8912_s3 + $0x680] sm:$0xff] %v4666_v45  ;;  %4924 = vst [vmem:[%s8912_s3 + $0x690] sm:$0xff] %v4668_v46  ;;  %v4670_v55 = vmax.f32 %v5464_v47, 0.0  ;;  %v4672_v56 = vmax.f32 %v5592_v48, 0.0 }
 0x3eb   :  { %4923 = vst [vmem:[%s8912_s3 + $0x688] sm:$0xff] %v4667_v51  ;;  %4925 = vst [vmem:[%s8912_s3 + $0x698] sm:$0xff] %v4669_v52  ;;  %v4671_v57 = vmax.f32 %v5465_v53, 0.0  ;;  %v4673_v58 = vmax.f32 %v5593_v54, 0.0 }
 0x3ec   :  { %4926 = vst [vmem:[%s8912_s3 + $0x6a0] sm:$0xff] %v4670_v55  ;;  %4928 = vst [vmem:[%s8912_s3 + $0x6b0] sm:$0xff] %v4672_v56 }
 0x3ed   :  { %4927 = vst [vmem:[%s8912_s3 + $0x6a8] sm:$0xff] %v4671_v57  ;;  %4929 = vst [vmem:[%s8912_s3 + $0x6b8] sm:$0xff] %v4673_v58  ;;  %v3350_v59 = vpop.f32.mrb[108].mxu0  ;;  %v4409_v60 = vpop.f32.mrb[108].mxu1 }
 0x3ee   :  { %v5466_v61 = vadd.f32 %v3350_v59, %v7850_v62  ;;  %v5594_v2 = vadd.f32 %v4409_v60, %v7852_v63  ;;  %v3352_v3 = vpop.f32.mrb[109].mxu0  ;;  %v4411_v4 = vpop.f32.mrb[109].mxu1 }
 0x3ef   :  { %v5467_v5 = vadd.f32 %v3352_v3, %v7854_v0  ;;  %v5595_v6 = vadd.f32 %v4411_v4, %v7856_v1  ;;  %v3354_v7 = vpop.f32.mrb[110].mxu0  ;;  %v4413_v8 = vpop.f32.mrb[110].mxu1 }
 0x3f0   :  { %v4674_v9 = vmax.f32 %v5466_v61, 0.0  ;;  %v4676_v10 = vmax.f32 %v5594_v2, 0.0  ;;  %v5468_v11 = vadd.f32 %v3354_v7, %v7850_v62  ;;  %v5596_v12 = vadd.f32 %v4413_v8, %v7852_v63  ;;  %v3356_v13 = vpop.f32.mrb[111].mxu0  ;;  %v4415_v14 = vpop.f32.mrb[111].mxu1 }
 0x3f1   :  { %v4675_v15 = vmax.f32 %v5467_v5, 0.0  ;;  %v4677_v16 = vmax.f32 %v5595_v6, 0.0  ;;  %v5469_v17 = vadd.f32 %v3356_v13, %v7854_v0  ;;  %v5597_v18 = vadd.f32 %v4415_v14, %v7856_v1 }
 0x3f2   :  { %4930 = vst [vmem:[%s8912_s3 + $0x6c0] sm:$0xff] %v4674_v9  ;;  %4932 = vst [vmem:[%s8912_s3 + $0x6d0] sm:$0xff] %v4676_v10  ;;  %v4678_v19 = vmax.f32 %v5468_v11, 0.0  ;;  %v4680_v20 = vmax.f32 %v5596_v12, 0.0 }
 0x3f3   :  { %4931 = vst [vmem:[%s8912_s3 + $0x6c8] sm:$0xff] %v4675_v15  ;;  %4933 = vst [vmem:[%s8912_s3 + $0x6d8] sm:$0xff] %v4677_v16  ;;  %v4679_v21 = vmax.f32 %v5469_v17, 0.0  ;;  %v4681_v22 = vmax.f32 %v5597_v18, 0.0 }
 0x3f4   :  { %4934 = vst [vmem:[%s8912_s3 + $0x6e0] sm:$0xff] %v4678_v19  ;;  %4936 = vst [vmem:[%s8912_s3 + $0x6f0] sm:$0xff] %v4680_v20 }
 0x3f5   :  { %4935 = vst [vmem:[%s8912_s3 + $0x6e8] sm:$0xff] %v4679_v21  ;;  %4937 = vst [vmem:[%s8912_s3 + $0x6f8] sm:$0xff] %v4681_v22  ;;  %v3360_v23 = vpop.f32.mrb[112].mxu0  ;;  %v4419_v24 = vpop.f32.mrb[112].mxu1 }
 0x3f6   :  { %v5470_v25 = vadd.f32 %v3360_v23, %v7850_v62  ;;  %v5598_v26 = vadd.f32 %v4419_v24, %v7852_v63  ;;  %v3362_v27 = vpop.f32.mrb[113].mxu0  ;;  %v4421_v28 = vpop.f32.mrb[113].mxu1 }
 0x3f7   :  { %v5471_v29 = vadd.f32 %v3362_v27, %v7854_v0  ;;  %v5599_v30 = vadd.f32 %v4421_v28, %v7856_v1  ;;  %v3364_v31 = vpop.f32.mrb[114].mxu0  ;;  %v4423_v32 = vpop.f32.mrb[114].mxu1 }
 0x3f8   :  { %v4682_v33 = vmax.f32 %v5470_v25, 0.0  ;;  %v4684_v34 = vmax.f32 %v5598_v26, 0.0  ;;  %v5472_v35 = vadd.f32 %v3364_v31, %v7850_v62  ;;  %v5600_v36 = vadd.f32 %v4423_v32, %v7852_v63  ;;  %v3366_v37 = vpop.f32.mrb[115].mxu0  ;;  %v4425_v38 = vpop.f32.mrb[115].mxu1 }
 0x3f9   :  { %v4683_v39 = vmax.f32 %v5471_v29, 0.0  ;;  %v4685_v40 = vmax.f32 %v5599_v30, 0.0  ;;  %v5473_v41 = vadd.f32 %v3366_v37, %v7854_v0  ;;  %v5601_v42 = vadd.f32 %v4425_v38, %v7856_v1 }
 0x3fa   :  { %4938 = vst [vmem:[%s8912_s3 + $0x700] sm:$0xff] %v4682_v33  ;;  %4940 = vst [vmem:[%s8912_s3 + $0x710] sm:$0xff] %v4684_v34  ;;  %v4686_v43 = vmax.f32 %v5472_v35, 0.0  ;;  %v4688_v44 = vmax.f32 %v5600_v36, 0.0 }
 0x3fb   :  { %4939 = vst [vmem:[%s8912_s3 + $0x708] sm:$0xff] %v4683_v39  ;;  %4941 = vst [vmem:[%s8912_s3 + $0x718] sm:$0xff] %v4685_v40  ;;  %v4687_v45 = vmax.f32 %v5473_v41, 0.0  ;;  %v4689_v46 = vmax.f32 %v5601_v42, 0.0 }
 0x3fc   :  { %4942 = vst [vmem:[%s8912_s3 + $0x720] sm:$0xff] %v4686_v43  ;;  %4944 = vst [vmem:[%s8912_s3 + $0x730] sm:$0xff] %v4688_v44 }
 0x3fd   :  { %4943 = vst [vmem:[%s8912_s3 + $0x728] sm:$0xff] %v4687_v45  ;;  %4945 = vst [vmem:[%s8912_s3 + $0x738] sm:$0xff] %v4689_v46  ;;  %v3370_v47 = vpop.f32.mrb[116].mxu0  ;;  %v4429_v48 = vpop.f32.mrb[116].mxu1 }
 0x3fe   :  { %v5474_v49 = vadd.f32 %v3370_v47, %v7850_v62  ;;  %v5602_v50 = vadd.f32 %v4429_v48, %v7852_v63  ;;  %v3372_v51 = vpop.f32.mrb[117].mxu0  ;;  %v4431_v52 = vpop.f32.mrb[117].mxu1 }
 0x3ff   :  { %v5475_v53 = vadd.f32 %v3372_v51, %v7854_v0  ;;  %v5603_v54 = vadd.f32 %v4431_v52, %v7856_v1  ;;  %v3374_v55 = vpop.f32.mrb[118].mxu0  ;;  %v4433_v56 = vpop.f32.mrb[118].mxu1 }
 0x400   :  { %v4690_v57 = vmax.f32 %v5474_v49, 0.0  ;;  %v4692_v58 = vmax.f32 %v5602_v50, 0.0  ;;  %v5476_v59 = vadd.f32 %v3374_v55, %v7850_v62  ;;  %v5604_v60 = vadd.f32 %v4433_v56, %v7852_v63  ;;  %v3376_v61 = vpop.f32.mrb[119].mxu0  ;;  %v4435_v2 = vpop.f32.mrb[119].mxu1 }
 0x401   :  { %v4691_v3 = vmax.f32 %v5475_v53, 0.0  ;;  %v4693_v4 = vmax.f32 %v5603_v54, 0.0  ;;  %v5477_v5 = vadd.f32 %v3376_v61, %v7854_v0  ;;  %v5605_v6 = vadd.f32 %v4435_v2, %v7856_v1 }
 0x402   :  { %4946 = vst [vmem:[%s8912_s3 + $0x740] sm:$0xff] %v4690_v57  ;;  %4948 = vst [vmem:[%s8912_s3 + $0x750] sm:$0xff] %v4692_v58  ;;  %v4694_v7 = vmax.f32 %v5476_v59, 0.0  ;;  %v4696_v8 = vmax.f32 %v5604_v60, 0.0 }
 0x403   :  { %4947 = vst [vmem:[%s8912_s3 + $0x748] sm:$0xff] %v4691_v3  ;;  %4949 = vst [vmem:[%s8912_s3 + $0x758] sm:$0xff] %v4693_v4  ;;  %v4695_v9 = vmax.f32 %v5477_v5, 0.0  ;;  %v4697_v10 = vmax.f32 %v5605_v6, 0.0 }
 0x404   :  { %4950 = vst [vmem:[%s8912_s3 + $0x760] sm:$0xff] %v4694_v7  ;;  %4952 = vst [vmem:[%s8912_s3 + $0x770] sm:$0xff] %v4696_v8 }
 0x405   :  { %4951 = vst [vmem:[%s8912_s3 + $0x768] sm:$0xff] %v4695_v9  ;;  %4953 = vst [vmem:[%s8912_s3 + $0x778] sm:$0xff] %v4697_v10  ;;  %v3380_v11 = vpop.f32.mrb[120].mxu0  ;;  %v4439_v12 = vpop.f32.mrb[120].mxu1 }
 0x406   :  { %v5478_v13 = vadd.f32 %v3380_v11, %v7850_v62  ;;  %v5606_v14 = vadd.f32 %v4439_v12, %v7852_v63  ;;  %v3382_v15 = vpop.f32.mrb[121].mxu0  ;;  %v4441_v16 = vpop.f32.mrb[121].mxu1 }
 0x407   :  { %v5479_v17 = vadd.f32 %v3382_v15, %v7854_v0  ;;  %v5607_v18 = vadd.f32 %v4441_v16, %v7856_v1  ;;  %v3384_v19 = vpop.f32.mrb[122].mxu0  ;;  %v4443_v20 = vpop.f32.mrb[122].mxu1 }
 0x408   :  { %v4698_v21 = vmax.f32 %v5478_v13, 0.0  ;;  %v4700_v22 = vmax.f32 %v5606_v14, 0.0  ;;  %v5480_v23 = vadd.f32 %v3384_v19, %v7850_v62  ;;  %v5608_v24 = vadd.f32 %v4443_v20, %v7852_v63  ;;  %v3386_v25 = vpop.f32.mrb[123].mxu0  ;;  %v4445_v26 = vpop.f32.mrb[123].mxu1 }
 0x409   :  { %v4699_v27 = vmax.f32 %v5479_v17, 0.0  ;;  %v4701_v28 = vmax.f32 %v5607_v18, 0.0  ;;  %v5481_v29 = vadd.f32 %v3386_v25, %v7854_v0  ;;  %v5609_v30 = vadd.f32 %v4445_v26, %v7856_v1 }
 0x40a   :  { %4954 = vst [vmem:[%s8912_s3 + $0x780] sm:$0xff] %v4698_v21  ;;  %4956 = vst [vmem:[%s8912_s3 + $0x790] sm:$0xff] %v4700_v22  ;;  %v4702_v31 = vmax.f32 %v5480_v23, 0.0  ;;  %v4704_v32 = vmax.f32 %v5608_v24, 0.0 }
 0x40b   :  { %4955 = vst [vmem:[%s8912_s3 + $0x788] sm:$0xff] %v4699_v27  ;;  %4957 = vst [vmem:[%s8912_s3 + $0x798] sm:$0xff] %v4701_v28  ;;  %v4703_v33 = vmax.f32 %v5481_v29, 0.0  ;;  %v4705_v34 = vmax.f32 %v5609_v30, 0.0 }
 0x40c   :  { %4958 = vst [vmem:[%s8912_s3 + $0x7a0] sm:$0xff] %v4702_v31  ;;  %4960 = vst [vmem:[%s8912_s3 + $0x7b0] sm:$0xff] %v4704_v32 }
 0x40d   :  { %4959 = vst [vmem:[%s8912_s3 + $0x7a8] sm:$0xff] %v4703_v33  ;;  %4961 = vst [vmem:[%s8912_s3 + $0x7b8] sm:$0xff] %v4705_v34  ;;  %v3390_v35 = vpop.f32.mrb[124].mxu0  ;;  %v4449_v36 = vpop.f32.mrb[124].mxu1 }
 0x40e   :  { %v5482_v37 = vadd.f32 %v3390_v35, %v7850_v62  ;;  %v5610_v38 = vadd.f32 %v4449_v36, %v7852_v63  ;;  %v3392_v39 = vpop.f32.mrb[125].mxu0  ;;  %v4451_v40 = vpop.f32.mrb[125].mxu1 }
 0x40f   :  { %v5483_v41 = vadd.f32 %v3392_v39, %v7854_v0  ;;  %v5611_v42 = vadd.f32 %v4451_v40, %v7856_v1  ;;  %v3394_v43 = vpop.f32.mrb[126].mxu0  ;;  %v4453_v44 = vpop.f32.mrb[126].mxu1 }
 0x410   :  { %v4706_v45 = vmax.f32 %v5482_v37, 0.0  ;;  %v4708_v46 = vmax.f32 %v5610_v38, 0.0  ;;  %v5484_v47 = vadd.f32 %v3394_v43, %v7850_v62  ;;  %v5612_v48 = vadd.f32 %v4453_v44, %v7852_v63  ;;  %v3396_v49 = vpop.f32.mrb[127].mxu0  ;;  %v4455_v50 = vpop.f32.mrb[127].mxu1 }
 0x411   :  { %v4707_v51 = vmax.f32 %v5483_v41, 0.0  ;;  %v4709_v52 = vmax.f32 %v5611_v42, 0.0  ;;  %v5485_v53 = vadd.f32 %v3396_v49, %v7854_v0  ;;  %v5613_v54 = vadd.f32 %v4455_v50, %v7856_v1 }
 0x412   :  { %4962 = vst [vmem:[%s8912_s3 + $0x7c0] sm:$0xff] %v4706_v45  ;;  %4964 = vst [vmem:[%s8912_s3 + $0x7d0] sm:$0xff] %v4708_v46  ;;  %v4710_v55 = vmax.f32 %v5484_v47, 0.0  ;;  %v4712_v62 = vmax.f32 %v5612_v48, 0.0 }
 0x413   :  { %4963 = vst [vmem:[%s8912_s3 + $0x7c8] sm:$0xff] %v4707_v51  ;;  %4965 = vst [vmem:[%s8912_s3 + $0x7d8] sm:$0xff] %v4709_v52  ;;  %v4711_v63 = vmax.f32 %v5485_v53, 0.0  ;;  %v4713_v0 = vmax.f32 %v5613_v54, 0.0 }
 0x414   :  { %4966 = vst [vmem:[%s8912_s3 + $0x7e0] sm:$0xff] %v4710_v55  ;;  %4968 = vst [vmem:[%s8912_s3 + $0x7f0] sm:$0xff] %v4712_v62 }
 0x415   :  { %4967 = vst [vmem:[%s8912_s3 + $0x7e8] sm:$0xff] %v4711_v63  ;;  %4969 = vst [vmem:[%s8912_s3 + $0x7f8] sm:$0xff] %v4713_v0 }

// kernel: autoencoder_forward.13
= control target key start
LH: loop header
LB: loop body
LE: loop exit
PB: predicated region body
PF: predicated region fallthrough
CT: control target
= control target key end

     0   :  { %s3800_s12 = smov 0   ;;  %s5182_s0 = inlined_call_operand.vmem [shape: bf16[2048,256], index: 0, kind: input, shape index: {}]   ;;  %s5183_s1 = inlined_call_operand.vmem [shape: bf16[256,512], index: 1, kind: input, shape index: {}]   ;;  %s5184_s2 = inlined_call_operand.vmem [shape: f32[1,512], index: 2, kind: input, shape index: {}]   ;;  %s5185_s3 = inlined_call_operand.vmem [shape: f32[2048,512], index: 3, kind: output, shape index: {}]  }
   0x1 LB: > { %s3269_s13 = sadd.s32 4294967295, %s3778_s12   ;;  %p3273_p0 = scmp.ge.s32.totalorder %s3778_s12, 1  ;;  %s3778_s12 = sphi %s3800_s12, %s13_s12  }
   0x2   : > { %p139_p1 = scmp.lt.s32.totalorder %s3778_s12, 3 }
   0x4   : > { %p140_p2 = pnand %p3273_p0, %p139_p1 }
   0x5   : > { %v3484_v0 = vld [vmem:[%s5183_s1 + $0x4] ss:$16 sps:$4 sm:$0xff] (!%p140_p2)   ;;  %v3486_v1 = vld [vmem:[%s5183_s1 + $0xc] ss:$16 sps:$4 sm:$0xff] (!%p140_p2)   ;;  %v3488_v2 = vld [vmem:[%s5183_s1] ss:$16 sps:$4 sm:$0xff] (!%p140_p2)  }
   0x6   : > { %143 = sbr.rel (%p140_p2) target bundleno = 792 (0x318), region = 32  ;;  %1353 = vmatprep.subr.bf16.mxu0 (!%p140_p2), %v3484_v0  ;;  %v3489_v3 = vld [vmem:[%s5183_s1 + $0x8] ss:$16 sps:$4 sm:$0xff] (!%p140_p2)   ;;  %2026 = vmatprep.subr.bf16.mxu1 (!%p140_p2), %v3486_v1  ;;  %v3490_v4 = vld [vmem:[%s5183_s1 + $0x24] ss:$16 sps:$4 sm:$0xff] (!%p140_p2)   ;;  %s3274_s24 = sshll.u32 (!%p140_p2), %s3269_s13, 7 }
   0x7   : > { %1354 = vmatpush1.bf16.msra.mxu0 (!%p140_p2), %v3488_v2  ;;  %2027 = vmatpush1.bf16.msra.mxu1 (!%p140_p2), %v3489_v3  ;;  %v3492_v5 = vld [vmem:[%s5183_s1 + $0x2c] ss:$16 sps:$4 sm:$0xff] (!%p140_p2)   ;;  %v3494_v6 = vld [vmem:[%s5183_s1 + $0x20] ss:$16 sps:$4 sm:$0xff] (!%p140_p2)   ;;  %v3495_v7 = vld [vmem:[%s5183_s1 + $0x28] ss:$16 sps:$4 sm:$0xff] (!%p140_p2)  }
   0x8   : > { %1355 = vmatprep.subr.bf16.mxu0 (!%p140_p2), %v3490_v4  ;;  %2028 = vmatprep.subr.bf16.mxu1 (!%p140_p2), %v3492_v5  ;;  %v3496_v8 = vld [vmem:[%s5183_s1 + $0x44] ss:$16 sps:$4 sm:$0xff] (!%p140_p2)   ;;  %v3498_v9 = vld [vmem:[%s5183_s1 + $0x4c] ss:$16 sps:$4 sm:$0xff] (!%p140_p2)   ;;  %v3500_v10 = vld [vmem:[%s5183_s1 + $0x40] ss:$16 sps:$4 sm:$0xff] (!%p140_p2)  }
   0x9   : > { %v3501_v11 = vld [vmem:[%s5183_s1 + $0x48] ss:$16 sps:$4 sm:$0xff] (!%p140_p2)   ;;  %v3502_v12 = vld [vmem:[%s5183_s1 + $0x64] ss:$16 sps:$4 sm:$0xff] (!%p140_p2)   ;;  %v3504_v13 = vld [vmem:[%s5183_s1 + $0x6c] ss:$16 sps:$4 sm:$0xff] (!%p140_p2)  }
   0xa   : > { %v3506_v14 = vld [vmem:[%s5183_s1 + $0x60] ss:$16 sps:$4 sm:$0xff] (!%p140_p2)   ;;  %v3507_v15 = vld [vmem:[%s5183_s1 + $0x68] ss:$16 sps:$4 sm:$0xff] (!%p140_p2)   ;;  %v3508_v16 = vld [vmem:[%s5183_s1 + $0x84] ss:$16 sps:$4 sm:$0xff] (!%p140_p2)  }
   0xb   : > { %1356 = vmatpush1.bf16.msra.mxu0 (!%p140_p2), %v3494_v6  ;;  %2029 = vmatpush1.bf16.msra.mxu1 (!%p140_p2), %v3495_v7  ;;  %v3510_v17 = vld [vmem:[%s5183_s1 + $0x8c] ss:$16 sps:$4 sm:$0xff] (!%p140_p2)   ;;  %v3512_v18 = vld [vmem:[%s5183_s1 + $0x80] ss:$16 sps:$4 sm:$0xff] (!%p140_p2)   ;;  %v3513_v19 = vld [vmem:[%s5183_s1 + $0x88] ss:$16 sps:$4 sm:$0xff] (!%p140_p2)  }
   0xc   : > { %1357 = vmatprep.subr.bf16.mxu0 (!%p140_p2), %v3496_v8  ;;  %2030 = vmatprep.subr.bf16.mxu1 (!%p140_p2), %v3498_v9  ;;  %v3514_v20 = vld [vmem:[%s5183_s1 + $0xa4] ss:$16 sps:$4 sm:$0xff] (!%p140_p2)   ;;  %v3516_v21 = vld [vmem:[%s5183_s1 + $0xac] ss:$16 sps:$4 sm:$0xff] (!%p140_p2)   ;;  %v3518_v22 = vld [vmem:[%s5183_s1 + $0xa0] ss:$16 sps:$4 sm:$0xff] (!%p140_p2)  }
   0xd   : > { %v3519_v23 = vld [vmem:[%s5183_s1 + $0xa8] ss:$16 sps:$4 sm:$0xff]   ;;  %v3520_v24 = vld [vmem:[%s5183_s1 + $0xc4] ss:$16 sps:$4 sm:$0xff]   ;;  %v3522_v25 = vld [vmem:[%s5183_s1 + $0xcc] ss:$16 sps:$4 sm:$0xff]  }
   0xe   : > { %v3524_v26 = vld [vmem:[%s5183_s1 + $0xc0] ss:$16 sps:$4 sm:$0xff]   ;;  %v3525_v27 = vld [vmem:[%s5183_s1 + $0xc8] ss:$16 sps:$4 sm:$0xff]   ;;  %v3526_v28 = vld [vmem:[%s5183_s1 + $0xe4] ss:$16 sps:$4 sm:$0xff]  }
   0xf   : > { %1358 = vmatpush1.bf16.msra.mxu0 %v3500_v10  ;;  %2031 = vmatpush1.bf16.msra.mxu1 %v3501_v11  ;;  %v3528_v29 = vld [vmem:[%s5183_s1 + $0xec] ss:$16 sps:$4 sm:$0xff]   ;;  %v3530_v30 = vld [vmem:[%s5183_s1 + $0xe0] ss:$16 sps:$4 sm:$0xff]   ;;  %v3531_v31 = vld [vmem:[%s5183_s1 + $0xe8] ss:$16 sps:$4 sm:$0xff]  }
  0x10   : > { %1359 = vmatprep.subr.bf16.mxu0 %v3502_v12  ;;  %2032 = vmatprep.subr.bf16.mxu1 %v3504_v13  ;;  %v3532_v32 = vld [vmem:[%s5183_s1 + $0x104] ss:$16 sps:$4 sm:$0xff]   ;;  %v3534_v33 = vld [vmem:[%s5183_s1 + $0x10c] ss:$16 sps:$4 sm:$0xff]   ;;  %p166_p3 = scmp.lt.s32.totalorder %s3274_s24, 255 }
  0x11   : > { %v3536_v34 = vld [vmem:[%s5183_s1 + $0x100] ss:$16 sps:$4 sm:$0xff]   ;;  %v3537_v35 = vld [vmem:[%s5183_s1 + $0x108] ss:$16 sps:$4 sm:$0xff]   ;;  %v3538_v36 = vld [vmem:[%s5183_s1 + $0x124] ss:$16 sps:$4 sm:$0xff]  }
  0x12   : > { %v3540_v37 = vld [vmem:[%s5183_s1 + $0x12c] ss:$16 sps:$4 sm:$0xff]   ;;  %s5187_s24 = smov (!%p166_p3, %s3274_s24), 255  ;;  %v3542_v38 = vld [vmem:[%s5183_s1 + $0x120] ss:$16 sps:$4 sm:$0xff]  }
  0x13   : > { %1360 = vmatpush1.bf16.msra.mxu0 %v3506_v14  ;;  %2033 = vmatpush1.bf16.msra.mxu1 %v3507_v15  ;;  %v3543_v39 = vld [vmem:[%s5183_s1 + $0x128] ss:$16 sps:$4 sm:$0xff]   ;;  %v3544_v40 = vld [vmem:[%s5183_s1 + $0x144] ss:$16 sps:$4 sm:$0xff]   ;;  %v3546_v41 = vld [vmem:[%s5183_s1 + $0x14c] ss:$16 sps:$4 sm:$0xff]  }
  0x14   : > { %1361 = vmatprep.subr.bf16.mxu0 %v3508_v16  ;;  %2034 = vmatprep.subr.bf16.mxu1 %v3510_v17  ;;  %s3474_s23 = sshll.u32 %s5187_s24, 3  ;;  %v3548_v42 = vld [vmem:[%s5183_s1 + $0x140] ss:$16 sps:$4 sm:$0xff]   ;;  %v3549_v43 = vld [vmem:[%s5183_s1 + $0x148] ss:$16 sps:$4 sm:$0xff]   ;;  %s3475_s25 = sshll.u32 %s5187_s24, 5 }
  0x15   : > { %v3550_v44 = vld [vmem:[%s5183_s1 + $0x164] ss:$16 sps:$4 sm:$0xff]   ;;  %s3951_s13 = scalar_lea.vmem %s5182_s0, %s3474_s23  ;;  %v3552_v45 = vld [vmem:[%s5183_s1 + $0x16c] ss:$16 sps:$4 sm:$0xff]   ;;  %v3554_v46 = vld [vmem:[%s5183_s1 + $0x160] ss:$16 sps:$4 sm:$0xff]   ;;  %s4080_s28 = scalar_lea.vmem %s5185_s3, %s3475_s25 }
  0x16   : > { %v3555_v47 = vld [vmem:[%s5183_s1 + $0x168] ss:$16 sps:$4 sm:$0xff]   ;;  %v3582_v48 = vld [vmem:[%s3951_s13 + $0x4] ss:$8 sps:$4 sm:$0xff]   ;;  %v3560_v51 = vld [vmem:[%s5183_s1 + $0x180] ss:$16 sps:$4 sm:$0xff]  }
  0x17   : > { %1362 = vmatpush1.bf16.msra.mxu0 %v3512_v18  ;;  %2035 = vmatpush1.bf16.msra.mxu1 %v3513_v19  ;;  %v3556_v49 = vld [vmem:[%s5183_s1 + $0x184] ss:$16 sps:$4 sm:$0xff]   ;;  %v3558_v50 = vld [vmem:[%s5183_s1 + $0x18c] ss:$16 sps:$4 sm:$0xff]   ;;  %v3561_v52 = vld [vmem:[%s5183_s1 + $0x188] ss:$16 sps:$4 sm:$0xff]  }
  0x18   : > { %1363 = vmatprep.subr.bf16.mxu0 %v3514_v20  ;;  %2036 = vmatprep.subr.bf16.mxu1 %v3516_v21  ;;  %v3562_v53 = vld [vmem:[%s5183_s1 + $0x1a4] ss:$16 sps:$4 sm:$0xff]   ;;  %v3564_v54 = vld [vmem:[%s5183_s1 + $0x1ac] ss:$16 sps:$4 sm:$0xff]   ;;  %v3566_v55 = vld [vmem:[%s5183_s1 + $0x1a0] ss:$16 sps:$4 sm:$0xff]  }
  0x19   : > { %1385 = vmatprep.mubr.bf16.mxu0 %v3582_v48  ;;  %2058 = vmatprep.mubr.bf16.mxu1 %v3582_v48  ;;  %v3567_v56 = vld [vmem:[%s5183_s1 + $0x1a8] ss:$16 sps:$4 sm:$0xff]   ;;  %v3568_v57 = vld [vmem:[%s5183_s1 + $0x1c4] ss:$16 sps:$4 sm:$0xff]   ;;  %v3570_v58 = vld [vmem:[%s5183_s1 + $0x1cc] ss:$16 sps:$4 sm:$0xff]  }
  0x1a   : > { %v3572_v59 = vld [vmem:[%s5183_s1 + $0x1c0] ss:$16 sps:$4 sm:$0xff]   ;;  %v3573_v60 = vld [vmem:[%s5183_s1 + $0x1c8] ss:$16 sps:$4 sm:$0xff]   ;;  %v3574_v61 = vld [vmem:[%s5183_s1 + $0x1e4] ss:$16 sps:$4 sm:$0xff]  }
  0x1b   : > { %1364 = vmatpush1.bf16.msra.mxu0 %v3518_v22  ;;  %2037 = vmatpush1.bf16.msra.mxu1 %v3519_v23  ;;  %v3576_v62 = vld [vmem:[%s5183_s1 + $0x1ec] ss:$16 sps:$4 sm:$0xff]   ;;  %v3578_v63 = vld [vmem:[%s5183_s1 + $0x1e0] ss:$16 sps:$4 sm:$0xff]   ;;  %v3579_v0 = vld [vmem:[%s5183_s1 + $0x1e8] ss:$16 sps:$4 sm:$0xff]  }
  0x1c   : > { %1365 = vmatprep.subr.bf16.mxu0 %v3520_v24  ;;  %2038 = vmatprep.subr.bf16.mxu1 %v3522_v25  ;;  %v3580_v1 = vld [vmem:[%s3951_s13] ss:$8 sps:$4 sm:$0xff]   ;;  %v3583_v2 = vld [vmem:[%s3951_s13 + $0x14] ss:$8 sps:$4 sm:$0xff]   ;;  %v3585_v3 = vld [vmem:[%s3951_s13 + $0x10] ss:$8 sps:$4 sm:$0xff]  }
  0x1d   : > { %v3586_v4 = vld [vmem:[%s3951_s13 + $0x24] ss:$8 sps:$4 sm:$0xff]   ;;  %v3588_v5 = vld [vmem:[%s3951_s13 + $0x20] ss:$8 sps:$4 sm:$0xff]   ;;  %v3589_v6 = vld [vmem:[%s3951_s13 + $0x34] ss:$8 sps:$4 sm:$0xff]  }
  0x1e   : > { %v3591_v7 = vld [vmem:[%s3951_s13 + $0x30] ss:$8 sps:$4 sm:$0xff]   ;;  %v3592_v8 = vld [vmem:[%s3951_s13 + $0x44] ss:$8 sps:$4 sm:$0xff]   ;;  %v3594_v9 = vld [vmem:[%s3951_s13 + $0x40] ss:$8 sps:$4 sm:$0xff]  }
  0x1f   : > { %1366 = vmatpush1.bf16.msra.mxu0 %v3524_v26  ;;  %2039 = vmatpush1.bf16.msra.mxu1 %v3525_v27  ;;  %v3595_v10 = vld [vmem:[%s3951_s13 + $0x54] ss:$8 sps:$4 sm:$0xff]   ;;  %v3597_v11 = vld [vmem:[%s3951_s13 + $0x50] ss:$8 sps:$4 sm:$0xff]   ;;  %v3598_v12 = vld [vmem:[%s3951_s13 + $0x64] ss:$8 sps:$4 sm:$0xff]  }
  0x20   : > { %1367 = vmatprep.subr.bf16.mxu0 %v3526_v28  ;;  %2040 = vmatprep.subr.bf16.mxu1 %v3528_v29  ;;  %v3600_v13 = vld [vmem:[%s3951_s13 + $0x60] ss:$8 sps:$4 sm:$0xff]   ;;  %v3601_v14 = vld [vmem:[%s3951_s13 + $0x74] ss:$8 sps:$4 sm:$0xff]   ;;  %v3603_v15 = vld [vmem:[%s3951_s13 + $0x70] ss:$8 sps:$4 sm:$0xff]  }
  0x21   : > { %v3604_v16 = vld [vmem:[%s3951_s13 + $0x84] ss:$8 sps:$4 sm:$0xff]   ;;  %v3606_v17 = vld [vmem:[%s3951_s13 + $0x80] ss:$8 sps:$4 sm:$0xff]   ;;  %v3607_v18 = vld [vmem:[%s3951_s13 + $0x94] ss:$8 sps:$4 sm:$0xff]  }
  0x22   : > { %v3609_v19 = vld [vmem:[%s3951_s13 + $0x90] ss:$8 sps:$4 sm:$0xff]   ;;  %v3610_v20 = vld [vmem:[%s3951_s13 + $0xa4] ss:$8 sps:$4 sm:$0xff]   ;;  %v3612_v21 = vld [vmem:[%s3951_s13 + $0xa0] ss:$8 sps:$4 sm:$0xff]  }
  0x23   : > { %1368 = vmatpush1.bf16.msra.mxu0 %v3530_v30  ;;  %2041 = vmatpush1.bf16.msra.mxu1 %v3531_v31  ;;  %v3613_v22 = vld [vmem:[%s3951_s13 + $0xb4] ss:$8 sps:$4 sm:$0xff]   ;;  %v3615_v23 = vld [vmem:[%s3951_s13 + $0xb0] ss:$8 sps:$4 sm:$0xff]   ;;  %v3616_v24 = vld [vmem:[%s3951_s13 + $0xc4] ss:$8 sps:$4 sm:$0xff]  }
  0x24   : > { %1369 = vmatprep.subr.bf16.mxu0 %v3532_v32  ;;  %2042 = vmatprep.subr.bf16.mxu1 %v3534_v33  ;;  %v3618_v25 = vld [vmem:[%s3951_s13 + $0xc0] ss:$8 sps:$4 sm:$0xff]   ;;  %v3619_v26 = vld [vmem:[%s3951_s13 + $0xd4] ss:$8 sps:$4 sm:$0xff]   ;;  %v3621_v27 = vld [vmem:[%s3951_s13 + $0xd0] ss:$8 sps:$4 sm:$0xff]  }
  0x25   : > { %v3622_v28 = vld [vmem:[%s3951_s13 + $0xe4] ss:$8 sps:$4 sm:$0xff]   ;;  %v3624_v29 = vld [vmem:[%s3951_s13 + $0xe0] ss:$8 sps:$4 sm:$0xff]   ;;  %v3625_v30 = vld [vmem:[%s3951_s13 + $0xf4] ss:$8 sps:$4 sm:$0xff]  }
  0x26   : > { %v3627_v31 = vld [vmem:[%s3951_s13 + $0xf0] ss:$8 sps:$4 sm:$0xff]   ;;  %v3628_v32 = vld [vmem:[%s3951_s13 + $0x104] ss:$8 sps:$4 sm:$0xff]   ;;  %v3630_v33 = vld [vmem:[%s3951_s13 + $0x100] ss:$8 sps:$4 sm:$0xff]  }
  0x27   : > { %1370 = vmatpush1.bf16.msra.mxu0 %v3536_v34  ;;  %2043 = vmatpush1.bf16.msra.mxu1 %v3537_v35  ;;  %v3631_v34 = vld [vmem:[%s3951_s13 + $0x114] ss:$8 sps:$4 sm:$0xff]   ;;  %v3633_v35 = vld [vmem:[%s3951_s13 + $0x110] ss:$8 sps:$4 sm:$0xff]   ;;  %v3652_v48 = vld [vmem:[%s3951_s13 + $0x184] ss:$8 sps:$4 sm:$0xff]  }
  0x28   : > { %1371 = vmatprep.subr.bf16.mxu0 %v3538_v36  ;;  %2044 = vmatprep.subr.bf16.mxu1 %v3540_v37  ;;  %v3634_v36 = vld [vmem:[%s3951_s13 + $0x124] ss:$8 sps:$4 sm:$0xff]   ;;  %v3636_v37 = vld [vmem:[%s3951_s13 + $0x120] ss:$8 sps:$4 sm:$0xff]  }
  0x2b   : > { %1372 = vmatpush1.bf16.msra.mxu0 %v3542_v38  ;;  %2045 = vmatpush1.bf16.msra.mxu1 %v3543_v39  ;;  %v3637_v38 = vld [vmem:[%s3951_s13 + $0x134] ss:$8 sps:$4 sm:$0xff]   ;;  %v3639_v39 = vld [vmem:[%s3951_s13 + $0x130] ss:$8 sps:$4 sm:$0xff]  }
  0x2c   : > { %1373 = vmatprep.subr.bf16.mxu0 %v3544_v40  ;;  %2046 = vmatprep.subr.bf16.mxu1 %v3546_v41  ;;  %v3640_v40 = vld [vmem:[%s3951_s13 + $0x144] ss:$8 sps:$4 sm:$0xff]   ;;  %v3642_v41 = vld [vmem:[%s3951_s13 + $0x140] ss:$8 sps:$4 sm:$0xff]  }
  0x2f   : > { %1374 = vmatpush1.bf16.msra.mxu0 %v3548_v42  ;;  %2047 = vmatpush1.bf16.msra.mxu1 %v3549_v43  ;;  %v3643_v42 = vld [vmem:[%s3951_s13 + $0x154] ss:$8 sps:$4 sm:$0xff]   ;;  %v3645_v43 = vld [vmem:[%s3951_s13 + $0x150] ss:$8 sps:$4 sm:$0xff]  }
  0x30   : > { %1375 = vmatprep.subr.bf16.mxu0 %v3550_v44  ;;  %2048 = vmatprep.subr.bf16.mxu1 %v3552_v45  ;;  %v3646_v44 = vld [vmem:[%s3951_s13 + $0x164] ss:$8 sps:$4 sm:$0xff]   ;;  %v3648_v45 = vld [vmem:[%s3951_s13 + $0x160] ss:$8 sps:$4 sm:$0xff]  }
  0x33   : > { %1376 = vmatpush1.bf16.msra.mxu0 %v3554_v46  ;;  %2049 = vmatpush1.bf16.msra.mxu1 %v3555_v47  ;;  %v3649_v46 = vld [vmem:[%s3951_s13 + $0x174] ss:$8 sps:$4 sm:$0xff]   ;;  %v3651_v47 = vld [vmem:[%s3951_s13 + $0x170] ss:$8 sps:$4 sm:$0xff]  }
  0x34   : > { %1377 = vmatprep.subr.bf16.mxu0 %v3556_v49  ;;  %2050 = vmatprep.subr.bf16.mxu1 %v3558_v50  ;;  %v3654_v49 = vld [vmem:[%s3951_s13 + $0x180] ss:$8 sps:$4 sm:$0xff]   ;;  %v3655_v50 = vld [vmem:[%s3951_s13 + $0x194] ss:$8 sps:$4 sm:$0xff]  }
  0x37   : > { %1378 = vmatpush1.bf16.msra.mxu0 %v3560_v51  ;;  %2051 = vmatpush1.bf16.msra.mxu1 %v3561_v52  ;;  %v3657_v51 = vld [vmem:[%s3951_s13 + $0x190] ss:$8 sps:$4 sm:$0xff]   ;;  %v373_v52 = vlaneseq }
  0x38   : > { %1379 = vmatprep.subr.bf16.mxu0 %v3562_v53  ;;  %2052 = vmatprep.subr.bf16.mxu1 %v3564_v54  ;;  %v3658_v53 = vld [vmem:[%s3951_s13 + $0x1a4] ss:$8 sps:$4 sm:$0xff]  }
  0x39   : > { %v374_v54 = vshrl.u32 %v373_v52, 7 }
  0x3b   : > { %1380 = vmatpush1.bf16.msra.mxu0 %v3566_v55  ;;  %2053 = vmatpush1.bf16.msra.mxu1 %v3567_v56  ;;  %v3660_v55 = vld [vmem:[%s3951_s13 + $0x1a0] ss:$8 sps:$4 sm:$0xff]   ;;  %v375_v56 = vsub.s32 0, %v374_v54 }
  0x3c   : > { %1381 = vmatprep.subr.bf16.mxu0 %v3568_v57  ;;  %2054 = vmatprep.subr.bf16.mxu1 %v3570_v58  ;;  %v383_v57 = vsub.s32 2, %v374_v54  ;;  %v371_v58 = vld [vmem:[%s5184_s2] sm:$0xf] }
  0x3f   : > { %1382 = vmatpush1.bf16.msra.mxu0 %v3572_v59  ;;  %2055 = vmatpush1.bf16.msra.mxu1 %v3573_v60  ;;  %v379_v59 = vsub.s32 1, %v374_v54  ;;  %v387_v60 = vsub.s32 3, %v374_v54 }
  0x40   : > { %1383 = vmatprep.subr.bf16.mxu0 %v3574_v61  ;;  %2056 = vmatprep.subr.bf16.mxu1 %v3576_v62  ;;  %v3661_v61 = vld [vmem:[%s3951_s13 + $0x1b4] ss:$8 sps:$4 sm:$0xff]   ;;  %v4069_v62 = vrot.slane %v371_v58, %v375_v56 }
  0x43   : > { %1384 = vmatpush1.bf16.msra.mxu0 %v3578_v63  ;;  %2057 = vmatpush1.bf16.msra.mxu1 %v3579_v0  ;;  %v4071_v63 = vrot.slane %v371_v58, %v383_v57  ;;  %v4073_v0 = vrot.slane %v371_v58, %v379_v59 }
  0x46   : > { %1386 = vmatmul.mubr.bf16.vlgmr.msra.gmra.mrb[0].mxu0 %v3580_v1  ;;  %2059 = vmatmul.mubr.bf16.vlgmr.msra.gmra.mrb[0].mxu1 %v3580_v1  ;;  %v4075_v1 = vrot.slane %v371_v58, %v387_v60 }
  0x47   : > { %1395 = vmatprep.mubr.bf16.mxu0 %v3583_v2  ;;  %2068 = vmatprep.mubr.bf16.mxu1 %v3583_v2 }
  0x4e   : > { %1396 = vmatmul.mubr.bf16.gmra.mrb[4].mxu0 %v3585_v3  ;;  %2069 = vmatmul.mubr.bf16.gmra.mrb[4].mxu1 %v3585_v3 }
  0x4f   : > { %1405 = vmatprep.mubr.bf16.mxu0 %v3586_v4  ;;  %2078 = vmatprep.mubr.bf16.mxu1 %v3586_v4 }
  0x56   : > { %1406 = vmatmul.mubr.bf16.gmra.mrb[8].mxu0 %v3588_v5  ;;  %2079 = vmatmul.mubr.bf16.gmra.mrb[8].mxu1 %v3588_v5 }
  0x57   : > { %1415 = vmatprep.mubr.bf16.mxu0 %v3589_v6  ;;  %2088 = vmatprep.mubr.bf16.mxu1 %v3589_v6 }
  0x5e   : > { %1416 = vmatmul.mubr.bf16.gmra.mrb[12].mxu0 %v3591_v7  ;;  %2089 = vmatmul.mubr.bf16.gmra.mrb[12].mxu1 %v3591_v7 }
  0x5f   : > { %1425 = vmatprep.mubr.bf16.mxu0 %v3592_v8  ;;  %2098 = vmatprep.mubr.bf16.mxu1 %v3592_v8  ;;  %v3663_v8 = vld [vmem:[%s3951_s13 + $0x1b0] ss:$8 sps:$4 sm:$0xff]  }
  0x66   : > { %1426 = vmatmul.mubr.bf16.gmra.mrb[16].mxu0 %v3594_v9  ;;  %2099 = vmatmul.mubr.bf16.gmra.mrb[16].mxu1 %v3594_v9 }
  0x67   : > { %1435 = vmatprep.mubr.bf16.mxu0 %v3595_v10  ;;  %2108 = vmatprep.mubr.bf16.mxu1 %v3595_v10 }
  0x6e   : > { %1436 = vmatmul.mubr.bf16.gmra.mrb[20].mxu0 %v3597_v11  ;;  %2109 = vmatmul.mubr.bf16.gmra.mrb[20].mxu1 %v3597_v11 }
  0x6f   : > { %1445 = vmatprep.mubr.bf16.mxu0 %v3598_v12  ;;  %2118 = vmatprep.mubr.bf16.mxu1 %v3598_v12 }
  0x76   : > { %1446 = vmatmul.mubr.bf16.gmra.mrb[24].mxu0 %v3600_v13  ;;  %2119 = vmatmul.mubr.bf16.gmra.mrb[24].mxu1 %v3600_v13  ;;  %v3664_v13 = vld [vmem:[%s3951_s13 + $0x1c4] ss:$8 sps:$4 sm:$0xff]  }
  0x77   : > { %1455 = vmatprep.mubr.bf16.mxu0 %v3601_v14  ;;  %2128 = vmatprep.mubr.bf16.mxu1 %v3601_v14 }
  0x7e   : > { %1456 = vmatmul.mubr.bf16.gmra.mrb[28].mxu0 %v3603_v15  ;;  %2129 = vmatmul.mubr.bf16.gmra.mrb[28].mxu1 %v3603_v15 }
  0x7f   : > { %1465 = vmatprep.mubr.bf16.mxu0 %v3604_v16  ;;  %2138 = vmatprep.mubr.bf16.mxu1 %v3604_v16 }
  0x86   : > { %1466 = vmatmul.mubr.bf16.gmra.mrb[32].mxu0 %v3606_v17  ;;  %2139 = vmatmul.mubr.bf16.gmra.mrb[32].mxu1 %v3606_v17 }
  0x87   : > { %1475 = vmatprep.mubr.bf16.mxu0 %v3607_v18  ;;  %2148 = vmatprep.mubr.bf16.mxu1 %v3607_v18 }
  0x8e   : > { %1476 = vmatmul.mubr.bf16.gmra.mrb[36].mxu0 %v3609_v19  ;;  %2149 = vmatmul.mubr.bf16.gmra.mrb[36].mxu1 %v3609_v19 }
  0x8f   : > { %1485 = vmatprep.mubr.bf16.mxu0 %v3610_v20  ;;  %2158 = vmatprep.mubr.bf16.mxu1 %v3610_v20 }
  0x96   : > { %1486 = vmatmul.mubr.bf16.gmra.mrb[40].mxu0 %v3612_v21  ;;  %2159 = vmatmul.mubr.bf16.gmra.mrb[40].mxu1 %v3612_v21 }
  0x97   : > { %1495 = vmatprep.mubr.bf16.mxu0 %v3613_v22  ;;  %2168 = vmatprep.mubr.bf16.mxu1 %v3613_v22 }
  0x9e   : > { %1496 = vmatmul.mubr.bf16.gmra.mrb[44].mxu0 %v3615_v23  ;;  %2169 = vmatmul.mubr.bf16.gmra.mrb[44].mxu1 %v3615_v23 }
  0x9f   : > { %1505 = vmatprep.mubr.bf16.mxu0 %v3616_v24  ;;  %2178 = vmatprep.mubr.bf16.mxu1 %v3616_v24 }
  0xa6   : > { %1506 = vmatmul.mubr.bf16.gmra.mrb[48].mxu0 %v3618_v25  ;;  %2179 = vmatmul.mubr.bf16.gmra.mrb[48].mxu1 %v3618_v25 }
  0xa7   : > { %1515 = vmatprep.mubr.bf16.mxu0 %v3619_v26  ;;  %2188 = vmatprep.mubr.bf16.mxu1 %v3619_v26  ;;  %v3666_v26 = vld [vmem:[%s3951_s13 + $0x1c0] ss:$8 sps:$4 sm:$0xff]  }
  0xae   : > { %1516 = vmatmul.mubr.bf16.gmra.mrb[52].mxu0 %v3621_v27  ;;  %2189 = vmatmul.mubr.bf16.gmra.mrb[52].mxu1 %v3621_v27 }
  0xaf   : > { %1525 = vmatprep.mubr.bf16.mxu0 %v3622_v28  ;;  %2198 = vmatprep.mubr.bf16.mxu1 %v3622_v28 }
  0xb6   : > { %1526 = vmatmul.mubr.bf16.gmra.mrb[56].mxu0 %v3624_v29  ;;  %2199 = vmatmul.mubr.bf16.gmra.mrb[56].mxu1 %v3624_v29 }
  0xb7   : > { %1535 = vmatprep.mubr.bf16.mxu0 %v3625_v30  ;;  %2208 = vmatprep.mubr.bf16.mxu1 %v3625_v30 }
  0xbe   : > { %1536 = vmatmul.mubr.bf16.gmra.mrb[60].mxu0 %v3627_v31  ;;  %2209 = vmatmul.mubr.bf16.gmra.mrb[60].mxu1 %v3627_v31  ;;  %v3667_v31 = vld [vmem:[%s3951_s13 + $0x1d4] ss:$8 sps:$4 sm:$0xff]  }
  0xbf   : > { %1545 = vmatprep.mubr.bf16.mxu0 %v3628_v32  ;;  %2218 = vmatprep.mubr.bf16.mxu1 %v3628_v32 }
  0xc6   : > { %1546 = vmatmul.mubr.bf16.gmra.mrb[64].mxu0 %v3630_v33  ;;  %2219 = vmatmul.mubr.bf16.gmra.mrb[64].mxu1 %v3630_v33 }
  0xc7   : > { %1555 = vmatprep.mubr.bf16.mxu0 %v3631_v34  ;;  %2228 = vmatprep.mubr.bf16.mxu1 %v3631_v34 }
  0xce   : > { %1556 = vmatmul.mubr.bf16.gmra.mrb[68].mxu0 %v3633_v35  ;;  %2229 = vmatmul.mubr.bf16.gmra.mrb[68].mxu1 %v3633_v35 }
  0xcf   : > { %1565 = vmatprep.mubr.bf16.mxu0 %v3634_v36  ;;  %2238 = vmatprep.mubr.bf16.mxu1 %v3634_v36 }
  0xd6   : > { %1566 = vmatmul.mubr.bf16.gmra.mrb[72].mxu0 %v3636_v37  ;;  %2239 = vmatmul.mubr.bf16.gmra.mrb[72].mxu1 %v3636_v37 }
  0xd7   : > { %1575 = vmatprep.mubr.bf16.mxu0 %v3637_v38  ;;  %2248 = vmatprep.mubr.bf16.mxu1 %v3637_v38 }
  0xde   : > { %1576 = vmatmul.mubr.bf16.gmra.mrb[76].mxu0 %v3639_v39  ;;  %2249 = vmatmul.mubr.bf16.gmra.mrb[76].mxu1 %v3639_v39 }
  0xdf   : > { %1585 = vmatprep.mubr.bf16.mxu0 %v3640_v40  ;;  %2258 = vmatprep.mubr.bf16.mxu1 %v3640_v40 }
  0xe6   : > { %1586 = vmatmul.mubr.bf16.gmra.mrb[80].mxu0 %v3642_v41  ;;  %2259 = vmatmul.mubr.bf16.gmra.mrb[80].mxu1 %v3642_v41 }
  0xe7   : > { %1595 = vmatprep.mubr.bf16.mxu0 %v3643_v42  ;;  %2268 = vmatprep.mubr.bf16.mxu1 %v3643_v42 }
  0xee   : > { %1596 = vmatmul.mubr.bf16.gmra.mrb[84].mxu0 %v3645_v43  ;;  %2269 = vmatmul.mubr.bf16.gmra.mrb[84].mxu1 %v3645_v43 }
  0xef   : > { %1605 = vmatprep.mubr.bf16.mxu0 %v3646_v44  ;;  %2278 = vmatprep.mubr.bf16.mxu1 %v3646_v44  ;;  %v3669_v44 = vld [vmem:[%s3951_s13 + $0x1d0] ss:$8 sps:$4 sm:$0xff]  }
  0xf6   : > { %1606 = vmatmul.mubr.bf16.gmra.mrb[88].mxu0 %v3648_v45  ;;  %2279 = vmatmul.mubr.bf16.gmra.mrb[88].mxu1 %v3648_v45 }
  0xf7   : > { %1615 = vmatprep.mubr.bf16.mxu0 %v3649_v46  ;;  %2288 = vmatprep.mubr.bf16.mxu1 %v3649_v46 }
  0xfe   : > { %1616 = vmatmul.mubr.bf16.gmra.mrb[92].mxu0 %v3651_v47  ;;  %2289 = vmatmul.mubr.bf16.gmra.mrb[92].mxu1 %v3651_v47 }
  0xff   : > { %1625 = vmatprep.mubr.bf16.mxu0 %v3652_v48  ;;  %2298 = vmatprep.mubr.bf16.mxu1 %v3652_v48 }
 0x106   : > { %1626 = vmatmul.mubr.bf16.gmra.mrb[96].mxu0 %v3654_v49  ;;  %2299 = vmatmul.mubr.bf16.gmra.mrb[96].mxu1 %v3654_v49  ;;  %v3670_v49 = vld [vmem:[%s3951_s13 + $0x1e4] ss:$8 sps:$4 sm:$0xff]  }
 0x107   : > { %1635 = vmatprep.mubr.bf16.mxu0 %v3655_v50  ;;  %2308 = vmatprep.mubr.bf16.mxu1 %v3655_v50 }
 0x10e   : > { %1636 = vmatmul.mubr.bf16.gmra.mrb[100].mxu0 %v3657_v51  ;;  %2309 = vmatmul.mubr.bf16.gmra.mrb[100].mxu1 %v3657_v51 }
 0x10f   : > { %1645 = vmatprep.mubr.bf16.mxu0 %v3658_v53  ;;  %2318 = vmatprep.mubr.bf16.mxu1 %v3658_v53 }
 0x116   : > { %1646 = vmatmul.mubr.bf16.gmra.mrb[104].mxu0 %v3660_v55  ;;  %2319 = vmatmul.mubr.bf16.gmra.mrb[104].mxu1 %v3660_v55 }
 0x117   : > { %1655 = vmatprep.mubr.bf16.mxu0 %v3661_v61  ;;  %2328 = vmatprep.mubr.bf16.mxu1 %v3661_v61 }
 0x119   : > { %v1387_v2 = vpop.f32.mrb[0].mxu0  ;;  %v2060_v3 = vpop.f32.mrb[0].mxu1 }
 0x11a   : > { %v1388_v4 = vadd.f32 %v1387_v2, %v4069_v62  ;;  %v2061_v5 = vadd.f32 %v2060_v3, %v4071_v63  ;;  %v1389_v6 = vpop.f32.mrb[1].mxu0  ;;  %v2062_v7 = vpop.f32.mrb[1].mxu1  ;;  %v3672_v2 = vld [vmem:[%s3951_s13 + $0x1e0] ss:$8 sps:$4 sm:$0xff]  }
 0x11b   : > { %v1390_v9 = vadd.f32 %v1389_v6, %v4073_v0  ;;  %v2063_v10 = vadd.f32 %v2062_v7, %v4075_v1  ;;  %v1391_v11 = vpop.f32.mrb[2].mxu0  ;;  %v2064_v12 = vpop.f32.mrb[2].mxu1  ;;  %v3673_v7 = vld [vmem:[%s3951_s13 + $0x1f4] ss:$8 sps:$4 sm:$0xff]  }
 0x11c   : > { %2699 = vst [vmem:[%s4080_s28] sm:$0xff] %v1388_v4  ;;  %2701 = vst [vmem:[%s4080_s28 + $0x10] sm:$0xff] %v2061_v5  ;;  %v1392_v14 = vadd.f32 %v1391_v11, %v4069_v62  ;;  %v2065_v15 = vadd.f32 %v2064_v12, %v4071_v63  ;;  %v1393_v16 = vpop.f32.mrb[3].mxu0  ;;  %v2066_v17 = vpop.f32.mrb[3].mxu1 }
 0x11d   : > { %2700 = vst [vmem:[%s4080_s28 + $0x8] sm:$0xff] %v1390_v9  ;;  %2702 = vst [vmem:[%s4080_s28 + $0x18] sm:$0xff] %v2063_v10  ;;  %v1394_v18 = vadd.f32 %v1393_v16, %v4073_v0  ;;  %v2067_v19 = vadd.f32 %v2066_v17, %v4075_v1 }
 0x11e   : > { %2703 = vst [vmem:[%s4080_s28 + $0x20] sm:$0xff] %v1392_v14  ;;  %2705 = vst [vmem:[%s4080_s28 + $0x30] sm:$0xff] %v2065_v15  ;;  %1656 = vmatmul.mubr.bf16.gmra.mrb[108].mxu0 %v3663_v8  ;;  %2329 = vmatmul.mubr.bf16.gmra.mrb[108].mxu1 %v3663_v8 }
 0x11f   : > { %2704 = vst [vmem:[%s4080_s28 + $0x28] sm:$0xff] %v1394_v18  ;;  %2706 = vst [vmem:[%s4080_s28 + $0x38] sm:$0xff] %v2067_v19  ;;  %1665 = vmatprep.mubr.bf16.mxu0 %v3664_v13  ;;  %2338 = vmatprep.mubr.bf16.mxu1 %v3664_v13 }
 0x121   : > { %v1397_v20 = vpop.f32.mrb[4].mxu0  ;;  %v2070_v21 = vpop.f32.mrb[4].mxu1 }
 0x122   : > { %v1398_v22 = vadd.f32 %v1397_v20, %v4069_v62  ;;  %v2071_v23 = vadd.f32 %v2070_v21, %v4071_v63  ;;  %v1399_v24 = vpop.f32.mrb[5].mxu0  ;;  %v2072_v25 = vpop.f32.mrb[5].mxu1  ;;  %v3675_v20 = vld [vmem:[%s3951_s13 + $0x1f0] ss:$8 sps:$4 sm:$0xff]  }
 0x123   : > { %v1400_v27 = vadd.f32 %v1399_v24, %v4073_v0  ;;  %v2073_v28 = vadd.f32 %v2072_v25, %v4075_v1  ;;  %v1401_v29 = vpop.f32.mrb[6].mxu0  ;;  %v2074_v30 = vpop.f32.mrb[6].mxu1  ;;  %v3676_v25 = vld [vmem:[%s3951_s13 + $0x204] ss:$8 sps:$4 sm:$0xff]  }
 0x124   : > { %2707 = vst [vmem:[%s4080_s28 + $0x40] sm:$0xff] %v1398_v22  ;;  %2709 = vst [vmem:[%s4080_s28 + $0x50] sm:$0xff] %v2071_v23  ;;  %v1402_v32 = vadd.f32 %v1401_v29, %v4069_v62  ;;  %v2075_v33 = vadd.f32 %v2074_v30, %v4071_v63  ;;  %v1403_v34 = vpop.f32.mrb[7].mxu0  ;;  %v2076_v35 = vpop.f32.mrb[7].mxu1 }
 0x125   : > { %2708 = vst [vmem:[%s4080_s28 + $0x48] sm:$0xff] %v1400_v27  ;;  %2710 = vst [vmem:[%s4080_s28 + $0x58] sm:$0xff] %v2073_v28  ;;  %v1404_v36 = vadd.f32 %v1403_v34, %v4073_v0  ;;  %v2077_v37 = vadd.f32 %v2076_v35, %v4075_v1 }
 0x126   : > { %2711 = vst [vmem:[%s4080_s28 + $0x60] sm:$0xff] %v1402_v32  ;;  %2713 = vst [vmem:[%s4080_s28 + $0x70] sm:$0xff] %v2075_v33  ;;  %1666 = vmatmul.mubr.bf16.gmra.mrb[112].mxu0 %v3666_v26  ;;  %2339 = vmatmul.mubr.bf16.gmra.mrb[112].mxu1 %v3666_v26 }
 0x127   : > { %2712 = vst [vmem:[%s4080_s28 + $0x68] sm:$0xff] %v1404_v36  ;;  %2714 = vst [vmem:[%s4080_s28 + $0x78] sm:$0xff] %v2077_v37  ;;  %1675 = vmatprep.mubr.bf16.mxu0 %v3667_v31  ;;  %2348 = vmatprep.mubr.bf16.mxu1 %v3667_v31 }
 0x129   : > { %v1407_v38 = vpop.f32.mrb[8].mxu0  ;;  %v2080_v39 = vpop.f32.mrb[8].mxu1 }
 0x12a   : > { %v1408_v40 = vadd.f32 %v1407_v38, %v4069_v62  ;;  %v2081_v41 = vadd.f32 %v2080_v39, %v4071_v63  ;;  %v1409_v42 = vpop.f32.mrb[9].mxu0  ;;  %v2082_v43 = vpop.f32.mrb[9].mxu1  ;;  %v3678_v38 = vld [vmem:[%s3951_s13 + $0x200] ss:$8 sps:$4 sm:$0xff]  }
 0x12b   : > { %v1410_v45 = vadd.f32 %v1409_v42, %v4073_v0  ;;  %v2083_v46 = vadd.f32 %v2082_v43, %v4075_v1  ;;  %v1411_v47 = vpop.f32.mrb[10].mxu0  ;;  %v2084_v48 = vpop.f32.mrb[10].mxu1  ;;  %v3679_v43 = vld [vmem:[%s3951_s13 + $0x214] ss:$8 sps:$4 sm:$0xff]  }
 0x12c   : > { %2715 = vst [vmem:[%s4080_s28 + $0x80] sm:$0xff] %v1408_v40  ;;  %2717 = vst [vmem:[%s4080_s28 + $0x90] sm:$0xff] %v2081_v41  ;;  %v1412_v50 = vadd.f32 %v1411_v47, %v4069_v62  ;;  %v2085_v51 = vadd.f32 %v2084_v48, %v4071_v63  ;;  %v1413_v52 = vpop.f32.mrb[11].mxu0  ;;  %v2086_v53 = vpop.f32.mrb[11].mxu1 }
 0x12d   : > { %2716 = vst [vmem:[%s4080_s28 + $0x88] sm:$0xff] %v1410_v45  ;;  %2718 = vst [vmem:[%s4080_s28 + $0x98] sm:$0xff] %v2083_v46  ;;  %v1414_v54 = vadd.f32 %v1413_v52, %v4073_v0  ;;  %v2087_v55 = vadd.f32 %v2086_v53, %v4075_v1 }
 0x12e   : > { %2719 = vst [vmem:[%s4080_s28 + $0xa0] sm:$0xff] %v1412_v50  ;;  %2721 = vst [vmem:[%s4080_s28 + $0xb0] sm:$0xff] %v2085_v51  ;;  %1676 = vmatmul.mubr.bf16.gmra.mrb[116].mxu0 %v3669_v44  ;;  %2349 = vmatmul.mubr.bf16.gmra.mrb[116].mxu1 %v3669_v44 }
 0x12f   : > { %2720 = vst [vmem:[%s4080_s28 + $0xa8] sm:$0xff] %v1414_v54  ;;  %2722 = vst [vmem:[%s4080_s28 + $0xb8] sm:$0xff] %v2087_v55  ;;  %1685 = vmatprep.mubr.bf16.mxu0 %v3670_v49  ;;  %2358 = vmatprep.mubr.bf16.mxu1 %v3670_v49 }
 0x131   : > { %v1417_v56 = vpop.f32.mrb[12].mxu0  ;;  %v2090_v57 = vpop.f32.mrb[12].mxu1 }
 0x132   : > { %v1418_v58 = vadd.f32 %v1417_v56, %v4069_v62  ;;  %v2091_v59 = vadd.f32 %v2090_v57, %v4071_v63  ;;  %v1419_v60 = vpop.f32.mrb[13].mxu0  ;;  %v2092_v61 = vpop.f32.mrb[13].mxu1  ;;  %v3681_v56 = vld [vmem:[%s3951_s13 + $0x210] ss:$8 sps:$4 sm:$0xff]  }
 0x133   : > { %v1420_v3 = vadd.f32 %v1419_v60, %v4073_v0  ;;  %v2093_v4 = vadd.f32 %v2092_v61, %v4075_v1  ;;  %v1421_v5 = vpop.f32.mrb[14].mxu0  ;;  %v2094_v6 = vpop.f32.mrb[14].mxu1  ;;  %v3682_v61 = vld [vmem:[%s3951_s13 + $0x224] ss:$8 sps:$4 sm:$0xff]  }
 0x134   : > { %2723 = vst [vmem:[%s4080_s28 + $0xc0] sm:$0xff] %v1418_v58  ;;  %2725 = vst [vmem:[%s4080_s28 + $0xd0] sm:$0xff] %v2091_v59  ;;  %v1422_v8 = vadd.f32 %v1421_v5, %v4069_v62  ;;  %v2095_v9 = vadd.f32 %v2094_v6, %v4071_v63  ;;  %v1423_v10 = vpop.f32.mrb[15].mxu0  ;;  %v2096_v11 = vpop.f32.mrb[15].mxu1 }
 0x135   : > { %2724 = vst [vmem:[%s4080_s28 + $0xc8] sm:$0xff] %v1420_v3  ;;  %2726 = vst [vmem:[%s4080_s28 + $0xd8] sm:$0xff] %v2093_v4  ;;  %v1424_v12 = vadd.f32 %v1423_v10, %v4073_v0  ;;  %v2097_v13 = vadd.f32 %v2096_v11, %v4075_v1 }
 0x136   : > { %2727 = vst [vmem:[%s4080_s28 + $0xe0] sm:$0xff] %v1422_v8  ;;  %2729 = vst [vmem:[%s4080_s28 + $0xf0] sm:$0xff] %v2095_v9  ;;  %1686 = vmatmul.mubr.bf16.gmra.mrb[120].mxu0 %v3672_v2  ;;  %2359 = vmatmul.mubr.bf16.gmra.mrb[120].mxu1 %v3672_v2 }
 0x137   : > { %2728 = vst [vmem:[%s4080_s28 + $0xe8] sm:$0xff] %v1424_v12  ;;  %2730 = vst [vmem:[%s4080_s28 + $0xf8] sm:$0xff] %v2097_v13  ;;  %1695 = vmatprep.mubr.bf16.mxu0 %v3673_v7  ;;  %2368 = vmatprep.mubr.bf16.mxu1 %v3673_v7 }
 0x139   : > { %v1427_v14 = vpop.f32.mrb[16].mxu0  ;;  %v2100_v15 = vpop.f32.mrb[16].mxu1 }
 0x13a   : > { %v1428_v16 = vadd.f32 %v1427_v14, %v4069_v62  ;;  %v2101_v17 = vadd.f32 %v2100_v15, %v4071_v63  ;;  %v1429_v18 = vpop.f32.mrb[17].mxu0  ;;  %v2102_v19 = vpop.f32.mrb[17].mxu1  ;;  %v3684_v14 = vld [vmem:[%s3951_s13 + $0x220] ss:$8 sps:$4 sm:$0xff]  }
 0x13b   : > { %v1430_v21 = vadd.f32 %v1429_v18, %v4073_v0  ;;  %v2103_v22 = vadd.f32 %v2102_v19, %v4075_v1  ;;  %v1431_v23 = vpop.f32.mrb[18].mxu0  ;;  %v2104_v24 = vpop.f32.mrb[18].mxu1  ;;  %v3685_v19 = vld [vmem:[%s3951_s13 + $0x234] ss:$8 sps:$4 sm:$0xff]  }
 0x13c   : > { %2731 = vst [vmem:[%s4080_s28 + $0x100] sm:$0xff] %v1428_v16  ;;  %2733 = vst [vmem:[%s4080_s28 + $0x110] sm:$0xff] %v2101_v17  ;;  %v1432_v26 = vadd.f32 %v1431_v23, %v4069_v62  ;;  %v2105_v27 = vadd.f32 %v2104_v24, %v4071_v63  ;;  %v1433_v28 = vpop.f32.mrb[19].mxu0  ;;  %v2106_v29 = vpop.f32.mrb[19].mxu1 }
 0x13d   : > { %2732 = vst [vmem:[%s4080_s28 + $0x108] sm:$0xff] %v1430_v21  ;;  %2734 = vst [vmem:[%s4080_s28 + $0x118] sm:$0xff] %v2103_v22  ;;  %v1434_v30 = vadd.f32 %v1433_v28, %v4073_v0  ;;  %v2107_v31 = vadd.f32 %v2106_v29, %v4075_v1 }
 0x13e   : > { %2735 = vst [vmem:[%s4080_s28 + $0x120] sm:$0xff] %v1432_v26  ;;  %2737 = vst [vmem:[%s4080_s28 + $0x130] sm:$0xff] %v2105_v27  ;;  %1696 = vmatmul.mubr.bf16.gmra.mrb[124].mxu0 %v3675_v20  ;;  %2369 = vmatmul.mubr.bf16.gmra.mrb[124].mxu1 %v3675_v20 }
 0x13f   : > { %2736 = vst [vmem:[%s4080_s28 + $0x128] sm:$0xff] %v1434_v30  ;;  %2738 = vst [vmem:[%s4080_s28 + $0x138] sm:$0xff] %v2107_v31  ;;  %1705 = vmatprep.mubr.bf16.mxu0 %v3676_v25  ;;  %2378 = vmatprep.mubr.bf16.mxu1 %v3676_v25 }
 0x141   : > { %v1437_v32 = vpop.f32.mrb[20].mxu0  ;;  %v2110_v33 = vpop.f32.mrb[20].mxu1 }
 0x142   : > { %v1438_v34 = vadd.f32 %v1437_v32, %v4069_v62  ;;  %v2111_v35 = vadd.f32 %v2110_v33, %v4071_v63  ;;  %v1439_v36 = vpop.f32.mrb[21].mxu0  ;;  %v2112_v37 = vpop.f32.mrb[21].mxu1  ;;  %v3687_v32 = vld [vmem:[%s3951_s13 + $0x230] ss:$8 sps:$4 sm:$0xff]  }
 0x143   : > { %v1440_v39 = vadd.f32 %v1439_v36, %v4073_v0  ;;  %v2113_v40 = vadd.f32 %v2112_v37, %v4075_v1  ;;  %v1441_v41 = vpop.f32.mrb[22].mxu0  ;;  %v2114_v42 = vpop.f32.mrb[22].mxu1  ;;  %v3688_v37 = vld [vmem:[%s3951_s13 + $0x244] ss:$8 sps:$4 sm:$0xff]  }
 0x144   : > { %2739 = vst [vmem:[%s4080_s28 + $0x140] sm:$0xff] %v1438_v34  ;;  %2741 = vst [vmem:[%s4080_s28 + $0x150] sm:$0xff] %v2111_v35  ;;  %v1442_v44 = vadd.f32 %v1441_v41, %v4069_v62  ;;  %v2115_v45 = vadd.f32 %v2114_v42, %v4071_v63  ;;  %v1443_v46 = vpop.f32.mrb[23].mxu0  ;;  %v2116_v47 = vpop.f32.mrb[23].mxu1 }
 0x145   : > { %2740 = vst [vmem:[%s4080_s28 + $0x148] sm:$0xff] %v1440_v39  ;;  %2742 = vst [vmem:[%s4080_s28 + $0x158] sm:$0xff] %v2113_v40  ;;  %v1444_v48 = vadd.f32 %v1443_v46, %v4073_v0  ;;  %v2117_v49 = vadd.f32 %v2116_v47, %v4075_v1 }
 0x146   : > { %2743 = vst [vmem:[%s4080_s28 + $0x160] sm:$0xff] %v1442_v44  ;;  %2745 = vst [vmem:[%s4080_s28 + $0x170] sm:$0xff] %v2115_v45  ;;  %1706 = vmatmul.mubr.bf16.gmra.mrb[128].mxu0 %v3678_v38  ;;  %2379 = vmatmul.mubr.bf16.gmra.mrb[128].mxu1 %v3678_v38 }
 0x147   : > { %2744 = vst [vmem:[%s4080_s28 + $0x168] sm:$0xff] %v1444_v48  ;;  %2746 = vst [vmem:[%s4080_s28 + $0x178] sm:$0xff] %v2117_v49  ;;  %1715 = vmatprep.mubr.bf16.mxu0 %v3679_v43  ;;  %2388 = vmatprep.mubr.bf16.mxu1 %v3679_v43 }
 0x149   : > { %v1447_v50 = vpop.f32.mrb[24].mxu0  ;;  %v2120_v51 = vpop.f32.mrb[24].mxu1 }
 0x14a   : > { %v1448_v52 = vadd.f32 %v1447_v50, %v4069_v62  ;;  %v2121_v53 = vadd.f32 %v2120_v51, %v4071_v63  ;;  %v1449_v54 = vpop.f32.mrb[25].mxu0  ;;  %v2122_v55 = vpop.f32.mrb[25].mxu1  ;;  %v3690_v50 = vld [vmem:[%s3951_s13 + $0x240] ss:$8 sps:$4 sm:$0xff]  }
 0x14b   : > { %v1450_v57 = vadd.f32 %v1449_v54, %v4073_v0  ;;  %v2123_v58 = vadd.f32 %v2122_v55, %v4075_v1  ;;  %v1451_v59 = vpop.f32.mrb[26].mxu0  ;;  %v2124_v60 = vpop.f32.mrb[26].mxu1  ;;  %v3691_v55 = vld [vmem:[%s3951_s13 + $0x254] ss:$8 sps:$4 sm:$0xff]  }
 0x14c   : > { %2747 = vst [vmem:[%s4080_s28 + $0x180] sm:$0xff] %v1448_v52  ;;  %2749 = vst [vmem:[%s4080_s28 + $0x190] sm:$0xff] %v2121_v53  ;;  %v1452_v2 = vadd.f32 %v1451_v59, %v4069_v62  ;;  %v2125_v3 = vadd.f32 %v2124_v60, %v4071_v63  ;;  %v1453_v4 = vpop.f32.mrb[27].mxu0  ;;  %v2126_v5 = vpop.f32.mrb[27].mxu1 }
 0x14d   : > { %2748 = vst [vmem:[%s4080_s28 + $0x188] sm:$0xff] %v1450_v57  ;;  %2750 = vst [vmem:[%s4080_s28 + $0x198] sm:$0xff] %v2123_v58  ;;  %v1454_v6 = vadd.f32 %v1453_v4, %v4073_v0  ;;  %v2127_v7 = vadd.f32 %v2126_v5, %v4075_v1 }
 0x14e   : > { %2751 = vst [vmem:[%s4080_s28 + $0x1a0] sm:$0xff] %v1452_v2  ;;  %2753 = vst [vmem:[%s4080_s28 + $0x1b0] sm:$0xff] %v2125_v3  ;;  %1716 = vmatmul.mubr.bf16.gmra.mrb[132].mxu0 %v3681_v56  ;;  %2389 = vmatmul.mubr.bf16.gmra.mrb[132].mxu1 %v3681_v56 }
 0x14f   : > { %2752 = vst [vmem:[%s4080_s28 + $0x1a8] sm:$0xff] %v1454_v6  ;;  %2754 = vst [vmem:[%s4080_s28 + $0x1b8] sm:$0xff] %v2127_v7  ;;  %1725 = vmatprep.mubr.bf16.mxu0 %v3682_v61  ;;  %2398 = vmatprep.mubr.bf16.mxu1 %v3682_v61 }
 0x151   : > { %v1457_v8 = vpop.f32.mrb[28].mxu0  ;;  %v2130_v9 = vpop.f32.mrb[28].mxu1 }
 0x152   : > { %v1458_v10 = vadd.f32 %v1457_v8, %v4069_v62  ;;  %v2131_v11 = vadd.f32 %v2130_v9, %v4071_v63  ;;  %v1459_v12 = vpop.f32.mrb[29].mxu0  ;;  %v2132_v13 = vpop.f32.mrb[29].mxu1  ;;  %v3693_v8 = vld [vmem:[%s3951_s13 + $0x250] ss:$8 sps:$4 sm:$0xff]  }
 0x153   : > { %v1460_v15 = vadd.f32 %v1459_v12, %v4073_v0  ;;  %v2133_v16 = vadd.f32 %v2132_v13, %v4075_v1  ;;  %v1461_v17 = vpop.f32.mrb[30].mxu0  ;;  %v2134_v18 = vpop.f32.mrb[30].mxu1  ;;  %v3694_v13 = vld [vmem:[%s3951_s13 + $0x264] ss:$8 sps:$4 sm:$0xff]  }
 0x154   : > { %2755 = vst [vmem:[%s4080_s28 + $0x1c0] sm:$0xff] %v1458_v10  ;;  %2757 = vst [vmem:[%s4080_s28 + $0x1d0] sm:$0xff] %v2131_v11  ;;  %v1462_v20 = vadd.f32 %v1461_v17, %v4069_v62  ;;  %v2135_v21 = vadd.f32 %v2134_v18, %v4071_v63  ;;  %v1463_v22 = vpop.f32.mrb[31].mxu0  ;;  %v2136_v23 = vpop.f32.mrb[31].mxu1 }
 0x155   : > { %2756 = vst [vmem:[%s4080_s28 + $0x1c8] sm:$0xff] %v1460_v15  ;;  %2758 = vst [vmem:[%s4080_s28 + $0x1d8] sm:$0xff] %v2133_v16  ;;  %v1464_v24 = vadd.f32 %v1463_v22, %v4073_v0  ;;  %v2137_v25 = vadd.f32 %v2136_v23, %v4075_v1 }
 0x156   : > { %2759 = vst [vmem:[%s4080_s28 + $0x1e0] sm:$0xff] %v1462_v20  ;;  %2761 = vst [vmem:[%s4080_s28 + $0x1f0] sm:$0xff] %v2135_v21  ;;  %1726 = vmatmul.mubr.bf16.gmra.mrb[136].mxu0 %v3684_v14  ;;  %2399 = vmatmul.mubr.bf16.gmra.mrb[136].mxu1 %v3684_v14 }
 0x157   : > { %2760 = vst [vmem:[%s4080_s28 + $0x1e8] sm:$0xff] %v1464_v24  ;;  %2762 = vst [vmem:[%s4080_s28 + $0x1f8] sm:$0xff] %v2137_v25  ;;  %1735 = vmatprep.mubr.bf16.mxu0 %v3685_v19  ;;  %2408 = vmatprep.mubr.bf16.mxu1 %v3685_v19 }
 0x159   : > { %v1467_v26 = vpop.f32.mrb[32].mxu0  ;;  %v2140_v27 = vpop.f32.mrb[32].mxu1 }
 0x15a   : > { %v1468_v28 = vadd.f32 %v1467_v26, %v4069_v62  ;;  %v2141_v29 = vadd.f32 %v2140_v27, %v4071_v63  ;;  %v1469_v30 = vpop.f32.mrb[33].mxu0  ;;  %v2142_v31 = vpop.f32.mrb[33].mxu1  ;;  %v3696_v26 = vld [vmem:[%s3951_s13 + $0x260] ss:$8 sps:$4 sm:$0xff]  }
 0x15b   : > { %v1470_v33 = vadd.f32 %v1469_v30, %v4073_v0  ;;  %v2143_v34 = vadd.f32 %v2142_v31, %v4075_v1  ;;  %v1471_v35 = vpop.f32.mrb[34].mxu0  ;;  %v2144_v36 = vpop.f32.mrb[34].mxu1  ;;  %v3697_v31 = vld [vmem:[%s3951_s13 + $0x274] ss:$8 sps:$4 sm:$0xff]  }
 0x15c   : > { %2763 = vst [vmem:[%s4080_s28 + $0x200] sm:$0xff] %v1468_v28  ;;  %2765 = vst [vmem:[%s4080_s28 + $0x210] sm:$0xff] %v2141_v29  ;;  %v1472_v38 = vadd.f32 %v1471_v35, %v4069_v62  ;;  %v2145_v39 = vadd.f32 %v2144_v36, %v4071_v63  ;;  %v1473_v40 = vpop.f32.mrb[35].mxu0  ;;  %v2146_v41 = vpop.f32.mrb[35].mxu1 }
 0x15d   : > { %2764 = vst [vmem:[%s4080_s28 + $0x208] sm:$0xff] %v1470_v33  ;;  %2766 = vst [vmem:[%s4080_s28 + $0x218] sm:$0xff] %v2143_v34  ;;  %v1474_v42 = vadd.f32 %v1473_v40, %v4073_v0  ;;  %v2147_v43 = vadd.f32 %v2146_v41, %v4075_v1 }
 0x15e   : > { %2767 = vst [vmem:[%s4080_s28 + $0x220] sm:$0xff] %v1472_v38  ;;  %2769 = vst [vmem:[%s4080_s28 + $0x230] sm:$0xff] %v2145_v39  ;;  %1736 = vmatmul.mubr.bf16.gmra.mrb[140].mxu0 %v3687_v32  ;;  %2409 = vmatmul.mubr.bf16.gmra.mrb[140].mxu1 %v3687_v32 }
 0x15f   : > { %2768 = vst [vmem:[%s4080_s28 + $0x228] sm:$0xff] %v1474_v42  ;;  %2770 = vst [vmem:[%s4080_s28 + $0x238] sm:$0xff] %v2147_v43  ;;  %1745 = vmatprep.mubr.bf16.mxu0 %v3688_v37  ;;  %2418 = vmatprep.mubr.bf16.mxu1 %v3688_v37 }
 0x161   : > { %v1477_v44 = vpop.f32.mrb[36].mxu0  ;;  %v2150_v45 = vpop.f32.mrb[36].mxu1 }
 0x162   : > { %v1478_v46 = vadd.f32 %v1477_v44, %v4069_v62  ;;  %v2151_v47 = vadd.f32 %v2150_v45, %v4071_v63  ;;  %v1479_v48 = vpop.f32.mrb[37].mxu0  ;;  %v2152_v49 = vpop.f32.mrb[37].mxu1  ;;  %v3699_v44 = vld [vmem:[%s3951_s13 + $0x270] ss:$8 sps:$4 sm:$0xff]  }
 0x163   : > { %v1480_v51 = vadd.f32 %v1479_v48, %v4073_v0  ;;  %v2153_v52 = vadd.f32 %v2152_v49, %v4075_v1  ;;  %v1481_v53 = vpop.f32.mrb[38].mxu0  ;;  %v2154_v54 = vpop.f32.mrb[38].mxu1  ;;  %v3700_v49 = vld [vmem:[%s3951_s13 + $0x284] ss:$8 sps:$4 sm:$0xff]  }
 0x164   : > { %2771 = vst [vmem:[%s4080_s28 + $0x240] sm:$0xff] %v1478_v46  ;;  %2773 = vst [vmem:[%s4080_s28 + $0x250] sm:$0xff] %v2151_v47  ;;  %v1482_v56 = vadd.f32 %v1481_v53, %v4069_v62  ;;  %v2155_v57 = vadd.f32 %v2154_v54, %v4071_v63  ;;  %v1483_v58 = vpop.f32.mrb[39].mxu0  ;;  %v2156_v59 = vpop.f32.mrb[39].mxu1 }
 0x165   : > { %2772 = vst [vmem:[%s4080_s28 + $0x248] sm:$0xff] %v1480_v51  ;;  %2774 = vst [vmem:[%s4080_s28 + $0x258] sm:$0xff] %v2153_v52  ;;  %v1484_v60 = vadd.f32 %v1483_v58, %v4073_v0  ;;  %v2157_v61 = vadd.f32 %v2156_v59, %v4075_v1 }
 0x166   : > { %2775 = vst [vmem:[%s4080_s28 + $0x260] sm:$0xff] %v1482_v56  ;;  %2777 = vst [vmem:[%s4080_s28 + $0x270] sm:$0xff] %v2155_v57  ;;  %1746 = vmatmul.mubr.bf16.gmra.mrb[144].mxu0 %v3690_v50  ;;  %2419 = vmatmul.mubr.bf16.gmra.mrb[144].mxu1 %v3690_v50 }
 0x167   : > { %2776 = vst [vmem:[%s4080_s28 + $0x268] sm:$0xff] %v1484_v60  ;;  %2778 = vst [vmem:[%s4080_s28 + $0x278] sm:$0xff] %v2157_v61  ;;  %1755 = vmatprep.mubr.bf16.mxu0 %v3691_v55  ;;  %2428 = vmatprep.mubr.bf16.mxu1 %v3691_v55 }
 0x169   : > { %v1487_v2 = vpop.f32.mrb[40].mxu0  ;;  %v2160_v3 = vpop.f32.mrb[40].mxu1 }
 0x16a   : > { %v1488_v4 = vadd.f32 %v1487_v2, %v4069_v62  ;;  %v2161_v5 = vadd.f32 %v2160_v3, %v4071_v63  ;;  %v1489_v6 = vpop.f32.mrb[41].mxu0  ;;  %v2162_v7 = vpop.f32.mrb[41].mxu1  ;;  %v3702_v2 = vld [vmem:[%s3951_s13 + $0x280] ss:$8 sps:$4 sm:$0xff]  }
 0x16b   : > { %v1490_v9 = vadd.f32 %v1489_v6, %v4073_v0  ;;  %v2163_v10 = vadd.f32 %v2162_v7, %v4075_v1  ;;  %v1491_v11 = vpop.f32.mrb[42].mxu0  ;;  %v2164_v12 = vpop.f32.mrb[42].mxu1  ;;  %v3703_v7 = vld [vmem:[%s3951_s13 + $0x294] ss:$8 sps:$4 sm:$0xff]  }
 0x16c   : > { %2779 = vst [vmem:[%s4080_s28 + $0x280] sm:$0xff] %v1488_v4  ;;  %2781 = vst [vmem:[%s4080_s28 + $0x290] sm:$0xff] %v2161_v5  ;;  %v1492_v14 = vadd.f32 %v1491_v11, %v4069_v62  ;;  %v2165_v15 = vadd.f32 %v2164_v12, %v4071_v63  ;;  %v1493_v16 = vpop.f32.mrb[43].mxu0  ;;  %v2166_v17 = vpop.f32.mrb[43].mxu1 }
 0x16d   : > { %2780 = vst [vmem:[%s4080_s28 + $0x288] sm:$0xff] %v1490_v9  ;;  %2782 = vst [vmem:[%s4080_s28 + $0x298] sm:$0xff] %v2163_v10  ;;  %v1494_v18 = vadd.f32 %v1493_v16, %v4073_v0  ;;  %v2167_v19 = vadd.f32 %v2166_v17, %v4075_v1 }
 0x16e   : > { %2783 = vst [vmem:[%s4080_s28 + $0x2a0] sm:$0xff] %v1492_v14  ;;  %2785 = vst [vmem:[%s4080_s28 + $0x2b0] sm:$0xff] %v2165_v15  ;;  %1756 = vmatmul.mubr.bf16.gmra.mrb[148].mxu0 %v3693_v8  ;;  %2429 = vmatmul.mubr.bf16.gmra.mrb[148].mxu1 %v3693_v8 }
 0x16f   : > { %2784 = vst [vmem:[%s4080_s28 + $0x2a8] sm:$0xff] %v1494_v18  ;;  %2786 = vst [vmem:[%s4080_s28 + $0x2b8] sm:$0xff] %v2167_v19  ;;  %1765 = vmatprep.mubr.bf16.mxu0 %v3694_v13  ;;  %2438 = vmatprep.mubr.bf16.mxu1 %v3694_v13 }
 0x171   : > { %v1497_v20 = vpop.f32.mrb[44].mxu0  ;;  %v2170_v21 = vpop.f32.mrb[44].mxu1 }
 0x172   : > { %v1498_v22 = vadd.f32 %v1497_v20, %v4069_v62  ;;  %v2171_v23 = vadd.f32 %v2170_v21, %v4071_v63  ;;  %v1499_v24 = vpop.f32.mrb[45].mxu0  ;;  %v2172_v25 = vpop.f32.mrb[45].mxu1  ;;  %v3705_v20 = vld [vmem:[%s3951_s13 + $0x290] ss:$8 sps:$4 sm:$0xff]  }
 0x173   : > { %v1500_v27 = vadd.f32 %v1499_v24, %v4073_v0  ;;  %v2173_v28 = vadd.f32 %v2172_v25, %v4075_v1  ;;  %v1501_v29 = vpop.f32.mrb[46].mxu0  ;;  %v2174_v30 = vpop.f32.mrb[46].mxu1  ;;  %v3706_v25 = vld [vmem:[%s3951_s13 + $0x2a4] ss:$8 sps:$4 sm:$0xff]  }
 0x174   : > { %2787 = vst [vmem:[%s4080_s28 + $0x2c0] sm:$0xff] %v1498_v22  ;;  %2789 = vst [vmem:[%s4080_s28 + $0x2d0] sm:$0xff] %v2171_v23  ;;  %v1502_v32 = vadd.f32 %v1501_v29, %v4069_v62  ;;  %v2175_v33 = vadd.f32 %v2174_v30, %v4071_v63  ;;  %v1503_v34 = vpop.f32.mrb[47].mxu0  ;;  %v2176_v35 = vpop.f32.mrb[47].mxu1 }
 0x175   : > { %2788 = vst [vmem:[%s4080_s28 + $0x2c8] sm:$0xff] %v1500_v27  ;;  %2790 = vst [vmem:[%s4080_s28 + $0x2d8] sm:$0xff] %v2173_v28  ;;  %v1504_v36 = vadd.f32 %v1503_v34, %v4073_v0  ;;  %v2177_v37 = vadd.f32 %v2176_v35, %v4075_v1 }
 0x176   : > { %2791 = vst [vmem:[%s4080_s28 + $0x2e0] sm:$0xff] %v1502_v32  ;;  %2793 = vst [vmem:[%s4080_s28 + $0x2f0] sm:$0xff] %v2175_v33  ;;  %1766 = vmatmul.mubr.bf16.gmra.mrb[152].mxu0 %v3696_v26  ;;  %2439 = vmatmul.mubr.bf16.gmra.mrb[152].mxu1 %v3696_v26 }
 0x177   : > { %2792 = vst [vmem:[%s4080_s28 + $0x2e8] sm:$0xff] %v1504_v36  ;;  %2794 = vst [vmem:[%s4080_s28 + $0x2f8] sm:$0xff] %v2177_v37  ;;  %1775 = vmatprep.mubr.bf16.mxu0 %v3697_v31  ;;  %2448 = vmatprep.mubr.bf16.mxu1 %v3697_v31 }
 0x179   : > { %v1507_v38 = vpop.f32.mrb[48].mxu0  ;;  %v2180_v39 = vpop.f32.mrb[48].mxu1 }
 0x17a   : > { %v1508_v40 = vadd.f32 %v1507_v38, %v4069_v62  ;;  %v2181_v41 = vadd.f32 %v2180_v39, %v4071_v63  ;;  %v1509_v42 = vpop.f32.mrb[49].mxu0  ;;  %v2182_v43 = vpop.f32.mrb[49].mxu1  ;;  %v3708_v38 = vld [vmem:[%s3951_s13 + $0x2a0] ss:$8 sps:$4 sm:$0xff]  }
 0x17b   : > { %v1510_v45 = vadd.f32 %v1509_v42, %v4073_v0  ;;  %v2183_v46 = vadd.f32 %v2182_v43, %v4075_v1  ;;  %v1511_v47 = vpop.f32.mrb[50].mxu0  ;;  %v2184_v48 = vpop.f32.mrb[50].mxu1  ;;  %v3709_v43 = vld [vmem:[%s3951_s13 + $0x2b4] ss:$8 sps:$4 sm:$0xff]  }
 0x17c   : > { %2795 = vst [vmem:[%s4080_s28 + $0x300] sm:$0xff] %v1508_v40  ;;  %2797 = vst [vmem:[%s4080_s28 + $0x310] sm:$0xff] %v2181_v41  ;;  %v1512_v50 = vadd.f32 %v1511_v47, %v4069_v62  ;;  %v2185_v51 = vadd.f32 %v2184_v48, %v4071_v63  ;;  %v1513_v52 = vpop.f32.mrb[51].mxu0  ;;  %v2186_v53 = vpop.f32.mrb[51].mxu1 }
 0x17d   : > { %2796 = vst [vmem:[%s4080_s28 + $0x308] sm:$0xff] %v1510_v45  ;;  %2798 = vst [vmem:[%s4080_s28 + $0x318] sm:$0xff] %v2183_v46  ;;  %v1514_v54 = vadd.f32 %v1513_v52, %v4073_v0  ;;  %v2187_v55 = vadd.f32 %v2186_v53, %v4075_v1 }
 0x17e   : > { %2799 = vst [vmem:[%s4080_s28 + $0x320] sm:$0xff] %v1512_v50  ;;  %2801 = vst [vmem:[%s4080_s28 + $0x330] sm:$0xff] %v2185_v51  ;;  %1776 = vmatmul.mubr.bf16.gmra.mrb[156].mxu0 %v3699_v44  ;;  %2449 = vmatmul.mubr.bf16.gmra.mrb[156].mxu1 %v3699_v44 }
 0x17f   : > { %2800 = vst [vmem:[%s4080_s28 + $0x328] sm:$0xff] %v1514_v54  ;;  %2802 = vst [vmem:[%s4080_s28 + $0x338] sm:$0xff] %v2187_v55  ;;  %1785 = vmatprep.mubr.bf16.mxu0 %v3700_v49  ;;  %2458 = vmatprep.mubr.bf16.mxu1 %v3700_v49 }
 0x181   : > { %v1517_v56 = vpop.f32.mrb[52].mxu0  ;;  %v2190_v57 = vpop.f32.mrb[52].mxu1 }
 0x182   : > { %v1518_v58 = vadd.f32 %v1517_v56, %v4069_v62  ;;  %v2191_v59 = vadd.f32 %v2190_v57, %v4071_v63  ;;  %v1519_v60 = vpop.f32.mrb[53].mxu0  ;;  %v2192_v61 = vpop.f32.mrb[53].mxu1  ;;  %v3711_v56 = vld [vmem:[%s3951_s13 + $0x2b0] ss:$8 sps:$4 sm:$0xff]  }
 0x183   : > { %v1520_v3 = vadd.f32 %v1519_v60, %v4073_v0  ;;  %v2193_v4 = vadd.f32 %v2192_v61, %v4075_v1  ;;  %v1521_v5 = vpop.f32.mrb[54].mxu0  ;;  %v2194_v6 = vpop.f32.mrb[54].mxu1  ;;  %v3712_v61 = vld [vmem:[%s3951_s13 + $0x2c4] ss:$8 sps:$4 sm:$0xff]  }
 0x184   : > { %2803 = vst [vmem:[%s4080_s28 + $0x340] sm:$0xff] %v1518_v58  ;;  %2805 = vst [vmem:[%s4080_s28 + $0x350] sm:$0xff] %v2191_v59  ;;  %v1522_v8 = vadd.f32 %v1521_v5, %v4069_v62  ;;  %v2195_v9 = vadd.f32 %v2194_v6, %v4071_v63  ;;  %v1523_v10 = vpop.f32.mrb[55].mxu0  ;;  %v2196_v11 = vpop.f32.mrb[55].mxu1 }
 0x185   : > { %2804 = vst [vmem:[%s4080_s28 + $0x348] sm:$0xff] %v1520_v3  ;;  %2806 = vst [vmem:[%s4080_s28 + $0x358] sm:$0xff] %v2193_v4  ;;  %v1524_v12 = vadd.f32 %v1523_v10, %v4073_v0  ;;  %v2197_v13 = vadd.f32 %v2196_v11, %v4075_v1 }
 0x186   : > { %2807 = vst [vmem:[%s4080_s28 + $0x360] sm:$0xff] %v1522_v8  ;;  %2809 = vst [vmem:[%s4080_s28 + $0x370] sm:$0xff] %v2195_v9  ;;  %1786 = vmatmul.mubr.bf16.gmra.mrb[160].mxu0 %v3702_v2  ;;  %2459 = vmatmul.mubr.bf16.gmra.mrb[160].mxu1 %v3702_v2 }
 0x187   : > { %2808 = vst [vmem:[%s4080_s28 + $0x368] sm:$0xff] %v1524_v12  ;;  %2810 = vst [vmem:[%s4080_s28 + $0x378] sm:$0xff] %v2197_v13  ;;  %1795 = vmatprep.mubr.bf16.mxu0 %v3703_v7  ;;  %2468 = vmatprep.mubr.bf16.mxu1 %v3703_v7 }
 0x189   : > { %v1527_v14 = vpop.f32.mrb[56].mxu0  ;;  %v2200_v15 = vpop.f32.mrb[56].mxu1 }
 0x18a   : > { %v1528_v16 = vadd.f32 %v1527_v14, %v4069_v62  ;;  %v2201_v17 = vadd.f32 %v2200_v15, %v4071_v63  ;;  %v1529_v18 = vpop.f32.mrb[57].mxu0  ;;  %v2202_v19 = vpop.f32.mrb[57].mxu1  ;;  %v3714_v14 = vld [vmem:[%s3951_s13 + $0x2c0] ss:$8 sps:$4 sm:$0xff]  }
 0x18b   : > { %v1530_v21 = vadd.f32 %v1529_v18, %v4073_v0  ;;  %v2203_v22 = vadd.f32 %v2202_v19, %v4075_v1  ;;  %v1531_v23 = vpop.f32.mrb[58].mxu0  ;;  %v2204_v24 = vpop.f32.mrb[58].mxu1  ;;  %v3715_v19 = vld [vmem:[%s3951_s13 + $0x2d4] ss:$8 sps:$4 sm:$0xff]  }
 0x18c   : > { %2811 = vst [vmem:[%s4080_s28 + $0x380] sm:$0xff] %v1528_v16  ;;  %2813 = vst [vmem:[%s4080_s28 + $0x390] sm:$0xff] %v2201_v17  ;;  %v1532_v26 = vadd.f32 %v1531_v23, %v4069_v62  ;;  %v2205_v27 = vadd.f32 %v2204_v24, %v4071_v63  ;;  %v1533_v28 = vpop.f32.mrb[59].mxu0  ;;  %v2206_v29 = vpop.f32.mrb[59].mxu1 }
 0x18d   : > { %2812 = vst [vmem:[%s4080_s28 + $0x388] sm:$0xff] %v1530_v21  ;;  %2814 = vst [vmem:[%s4080_s28 + $0x398] sm:$0xff] %v2203_v22  ;;  %v1534_v30 = vadd.f32 %v1533_v28, %v4073_v0  ;;  %v2207_v31 = vadd.f32 %v2206_v29, %v4075_v1 }
 0x18e   : > { %2815 = vst [vmem:[%s4080_s28 + $0x3a0] sm:$0xff] %v1532_v26  ;;  %2817 = vst [vmem:[%s4080_s28 + $0x3b0] sm:$0xff] %v2205_v27  ;;  %1796 = vmatmul.mubr.bf16.gmra.mrb[164].mxu0 %v3705_v20  ;;  %2469 = vmatmul.mubr.bf16.gmra.mrb[164].mxu1 %v3705_v20 }
 0x18f   : > { %2816 = vst [vmem:[%s4080_s28 + $0x3a8] sm:$0xff] %v1534_v30  ;;  %2818 = vst [vmem:[%s4080_s28 + $0x3b8] sm:$0xff] %v2207_v31  ;;  %1805 = vmatprep.mubr.bf16.mxu0 %v3706_v25  ;;  %2478 = vmatprep.mubr.bf16.mxu1 %v3706_v25 }
 0x191   : > { %v1537_v32 = vpop.f32.mrb[60].mxu0  ;;  %v2210_v33 = vpop.f32.mrb[60].mxu1 }
 0x192   : > { %v1538_v34 = vadd.f32 %v1537_v32, %v4069_v62  ;;  %v2211_v35 = vadd.f32 %v2210_v33, %v4071_v63  ;;  %v1539_v36 = vpop.f32.mrb[61].mxu0  ;;  %v2212_v37 = vpop.f32.mrb[61].mxu1  ;;  %v3717_v32 = vld [vmem:[%s3951_s13 + $0x2d0] ss:$8 sps:$4 sm:$0xff]  }
 0x193   : > { %v1540_v39 = vadd.f32 %v1539_v36, %v4073_v0  ;;  %v2213_v40 = vadd.f32 %v2212_v37, %v4075_v1  ;;  %v1541_v41 = vpop.f32.mrb[62].mxu0  ;;  %v2214_v42 = vpop.f32.mrb[62].mxu1  ;;  %v3718_v37 = vld [vmem:[%s3951_s13 + $0x2e4] ss:$8 sps:$4 sm:$0xff]  }
 0x194   : > { %2819 = vst [vmem:[%s4080_s28 + $0x3c0] sm:$0xff] %v1538_v34  ;;  %2821 = vst [vmem:[%s4080_s28 + $0x3d0] sm:$0xff] %v2211_v35  ;;  %v1542_v44 = vadd.f32 %v1541_v41, %v4069_v62  ;;  %v2215_v45 = vadd.f32 %v2214_v42, %v4071_v63  ;;  %v1543_v46 = vpop.f32.mrb[63].mxu0  ;;  %v2216_v47 = vpop.f32.mrb[63].mxu1 }
 0x195   : > { %2820 = vst [vmem:[%s4080_s28 + $0x3c8] sm:$0xff] %v1540_v39  ;;  %2822 = vst [vmem:[%s4080_s28 + $0x3d8] sm:$0xff] %v2213_v40  ;;  %v1544_v48 = vadd.f32 %v1543_v46, %v4073_v0  ;;  %v2217_v49 = vadd.f32 %v2216_v47, %v4075_v1 }
 0x196   : > { %2823 = vst [vmem:[%s4080_s28 + $0x3e0] sm:$0xff] %v1542_v44  ;;  %2825 = vst [vmem:[%s4080_s28 + $0x3f0] sm:$0xff] %v2215_v45  ;;  %1806 = vmatmul.mubr.bf16.gmra.mrb[168].mxu0 %v3708_v38  ;;  %2479 = vmatmul.mubr.bf16.gmra.mrb[168].mxu1 %v3708_v38 }
 0x197   : > { %2824 = vst [vmem:[%s4080_s28 + $0x3e8] sm:$0xff] %v1544_v48  ;;  %2826 = vst [vmem:[%s4080_s28 + $0x3f8] sm:$0xff] %v2217_v49  ;;  %1815 = vmatprep.mubr.bf16.mxu0 %v3709_v43  ;;  %2488 = vmatprep.mubr.bf16.mxu1 %v3709_v43 }
 0x199   : > { %v1547_v50 = vpop.f32.mrb[64].mxu0  ;;  %v2220_v51 = vpop.f32.mrb[64].mxu1 }
 0x19a   : > { %v1548_v52 = vadd.f32 %v1547_v50, %v4069_v62  ;;  %v2221_v53 = vadd.f32 %v2220_v51, %v4071_v63  ;;  %v1549_v54 = vpop.f32.mrb[65].mxu0  ;;  %v2222_v55 = vpop.f32.mrb[65].mxu1  ;;  %v3720_v50 = vld [vmem:[%s3951_s13 + $0x2e0] ss:$8 sps:$4 sm:$0xff]  }
 0x19b   : > { %v1550_v57 = vadd.f32 %v1549_v54, %v4073_v0  ;;  %v2223_v58 = vadd.f32 %v2222_v55, %v4075_v1  ;;  %v1551_v59 = vpop.f32.mrb[66].mxu0  ;;  %v2224_v60 = vpop.f32.mrb[66].mxu1  ;;  %v3721_v55 = vld [vmem:[%s3951_s13 + $0x2f4] ss:$8 sps:$4 sm:$0xff]  }
 0x19c   : > { %2827 = vst [vmem:[%s4080_s28 + $0x400] sm:$0xff] %v1548_v52  ;;  %2829 = vst [vmem:[%s4080_s28 + $0x410] sm:$0xff] %v2221_v53  ;;  %v1552_v2 = vadd.f32 %v1551_v59, %v4069_v62  ;;  %v2225_v3 = vadd.f32 %v2224_v60, %v4071_v63  ;;  %v1553_v4 = vpop.f32.mrb[67].mxu0  ;;  %v2226_v5 = vpop.f32.mrb[67].mxu1 }
 0x19d   : > { %2828 = vst [vmem:[%s4080_s28 + $0x408] sm:$0xff] %v1550_v57  ;;  %2830 = vst [vmem:[%s4080_s28 + $0x418] sm:$0xff] %v2223_v58  ;;  %v1554_v6 = vadd.f32 %v1553_v4, %v4073_v0  ;;  %v2227_v7 = vadd.f32 %v2226_v5, %v4075_v1 }
 0x19e   : > { %2831 = vst [vmem:[%s4080_s28 + $0x420] sm:$0xff] %v1552_v2  ;;  %2833 = vst [vmem:[%s4080_s28 + $0x430] sm:$0xff] %v2225_v3  ;;  %1816 = vmatmul.mubr.bf16.gmra.mrb[172].mxu0 %v3711_v56  ;;  %2489 = vmatmul.mubr.bf16.gmra.mrb[172].mxu1 %v3711_v56 }
 0x19f   : > { %2832 = vst [vmem:[%s4080_s28 + $0x428] sm:$0xff] %v1554_v6  ;;  %2834 = vst [vmem:[%s4080_s28 + $0x438] sm:$0xff] %v2227_v7  ;;  %1825 = vmatprep.mubr.bf16.mxu0 %v3712_v61  ;;  %2498 = vmatprep.mubr.bf16.mxu1 %v3712_v61 }
 0x1a1   : > { %v1557_v8 = vpop.f32.mrb[68].mxu0  ;;  %v2230_v9 = vpop.f32.mrb[68].mxu1 }
 0x1a2   : > { %v1558_v10 = vadd.f32 %v1557_v8, %v4069_v62  ;;  %v2231_v11 = vadd.f32 %v2230_v9, %v4071_v63  ;;  %v1559_v12 = vpop.f32.mrb[69].mxu0  ;;  %v2232_v13 = vpop.f32.mrb[69].mxu1  ;;  %v3723_v8 = vld [vmem:[%s3951_s13 + $0x2f0] ss:$8 sps:$4 sm:$0xff]  }
 0x1a3   : > { %v1560_v15 = vadd.f32 %v1559_v12, %v4073_v0  ;;  %v2233_v16 = vadd.f32 %v2232_v13, %v4075_v1  ;;  %v1561_v17 = vpop.f32.mrb[70].mxu0  ;;  %v2234_v18 = vpop.f32.mrb[70].mxu1  ;;  %v3724_v13 = vld [vmem:[%s3951_s13 + $0x304] ss:$8 sps:$4 sm:$0xff]  }
 0x1a4   : > { %2835 = vst [vmem:[%s4080_s28 + $0x440] sm:$0xff] %v1558_v10  ;;  %2837 = vst [vmem:[%s4080_s28 + $0x450] sm:$0xff] %v2231_v11  ;;  %v1562_v20 = vadd.f32 %v1561_v17, %v4069_v62  ;;  %v2235_v21 = vadd.f32 %v2234_v18, %v4071_v63  ;;  %v1563_v22 = vpop.f32.mrb[71].mxu0  ;;  %v2236_v23 = vpop.f32.mrb[71].mxu1 }
 0x1a5   : > { %2836 = vst [vmem:[%s4080_s28 + $0x448] sm:$0xff] %v1560_v15  ;;  %2838 = vst [vmem:[%s4080_s28 + $0x458] sm:$0xff] %v2233_v16  ;;  %v1564_v24 = vadd.f32 %v1563_v22, %v4073_v0  ;;  %v2237_v25 = vadd.f32 %v2236_v23, %v4075_v1 }
 0x1a6   : > { %2839 = vst [vmem:[%s4080_s28 + $0x460] sm:$0xff] %v1562_v20  ;;  %2841 = vst [vmem:[%s4080_s28 + $0x470] sm:$0xff] %v2235_v21  ;;  %1826 = vmatmul.mubr.bf16.gmra.mrb[176].mxu0 %v3714_v14  ;;  %2499 = vmatmul.mubr.bf16.gmra.mrb[176].mxu1 %v3714_v14 }
 0x1a7   : > { %2840 = vst [vmem:[%s4080_s28 + $0x468] sm:$0xff] %v1564_v24  ;;  %2842 = vst [vmem:[%s4080_s28 + $0x478] sm:$0xff] %v2237_v25  ;;  %1835 = vmatprep.mubr.bf16.mxu0 %v3715_v19  ;;  %2508 = vmatprep.mubr.bf16.mxu1 %v3715_v19 }
 0x1a9   : > { %v1567_v26 = vpop.f32.mrb[72].mxu0  ;;  %v2240_v27 = vpop.f32.mrb[72].mxu1 }
 0x1aa   : > { %v1568_v28 = vadd.f32 %v1567_v26, %v4069_v62  ;;  %v2241_v29 = vadd.f32 %v2240_v27, %v4071_v63  ;;  %v1569_v30 = vpop.f32.mrb[73].mxu0  ;;  %v2242_v31 = vpop.f32.mrb[73].mxu1  ;;  %v3726_v26 = vld [vmem:[%s3951_s13 + $0x300] ss:$8 sps:$4 sm:$0xff]  }
 0x1ab   : > { %v1570_v33 = vadd.f32 %v1569_v30, %v4073_v0  ;;  %v2243_v34 = vadd.f32 %v2242_v31, %v4075_v1  ;;  %v1571_v35 = vpop.f32.mrb[74].mxu0  ;;  %v2244_v36 = vpop.f32.mrb[74].mxu1  ;;  %v3727_v31 = vld [vmem:[%s3951_s13 + $0x314] ss:$8 sps:$4 sm:$0xff]  }
 0x1ac   : > { %2843 = vst [vmem:[%s4080_s28 + $0x480] sm:$0xff] %v1568_v28  ;;  %2845 = vst [vmem:[%s4080_s28 + $0x490] sm:$0xff] %v2241_v29  ;;  %v1572_v38 = vadd.f32 %v1571_v35, %v4069_v62  ;;  %v2245_v39 = vadd.f32 %v2244_v36, %v4071_v63  ;;  %v1573_v40 = vpop.f32.mrb[75].mxu0  ;;  %v2246_v41 = vpop.f32.mrb[75].mxu1 }
 0x1ad   : > { %2844 = vst [vmem:[%s4080_s28 + $0x488] sm:$0xff] %v1570_v33  ;;  %2846 = vst [vmem:[%s4080_s28 + $0x498] sm:$0xff] %v2243_v34  ;;  %v1574_v42 = vadd.f32 %v1573_v40, %v4073_v0  ;;  %v2247_v43 = vadd.f32 %v2246_v41, %v4075_v1 }
 0x1ae   : > { %2847 = vst [vmem:[%s4080_s28 + $0x4a0] sm:$0xff] %v1572_v38  ;;  %2849 = vst [vmem:[%s4080_s28 + $0x4b0] sm:$0xff] %v2245_v39  ;;  %1836 = vmatmul.mubr.bf16.gmra.mrb[180].mxu0 %v3717_v32  ;;  %2509 = vmatmul.mubr.bf16.gmra.mrb[180].mxu1 %v3717_v32 }
 0x1af   : > { %2848 = vst [vmem:[%s4080_s28 + $0x4a8] sm:$0xff] %v1574_v42  ;;  %2850 = vst [vmem:[%s4080_s28 + $0x4b8] sm:$0xff] %v2247_v43  ;;  %1845 = vmatprep.mubr.bf16.mxu0 %v3718_v37  ;;  %2518 = vmatprep.mubr.bf16.mxu1 %v3718_v37 }
 0x1b1   : > { %v1577_v44 = vpop.f32.mrb[76].mxu0  ;;  %v2250_v45 = vpop.f32.mrb[76].mxu1 }
 0x1b2   : > { %v1578_v46 = vadd.f32 %v1577_v44, %v4069_v62  ;;  %v2251_v47 = vadd.f32 %v2250_v45, %v4071_v63  ;;  %v1579_v48 = vpop.f32.mrb[77].mxu0  ;;  %v2252_v49 = vpop.f32.mrb[77].mxu1  ;;  %v3729_v44 = vld [vmem:[%s3951_s13 + $0x310] ss:$8 sps:$4 sm:$0xff]  }
 0x1b3   : > { %v1580_v51 = vadd.f32 %v1579_v48, %v4073_v0  ;;  %v2253_v52 = vadd.f32 %v2252_v49, %v4075_v1  ;;  %v1581_v53 = vpop.f32.mrb[78].mxu0  ;;  %v2254_v54 = vpop.f32.mrb[78].mxu1  ;;  %v3730_v49 = vld [vmem:[%s3951_s13 + $0x324] ss:$8 sps:$4 sm:$0xff]  }
 0x1b4   : > { %2851 = vst [vmem:[%s4080_s28 + $0x4c0] sm:$0xff] %v1578_v46  ;;  %2853 = vst [vmem:[%s4080_s28 + $0x4d0] sm:$0xff] %v2251_v47  ;;  %v1582_v56 = vadd.f32 %v1581_v53, %v4069_v62  ;;  %v2255_v57 = vadd.f32 %v2254_v54, %v4071_v63  ;;  %v1583_v58 = vpop.f32.mrb[79].mxu0  ;;  %v2256_v59 = vpop.f32.mrb[79].mxu1 }
 0x1b5   : > { %2852 = vst [vmem:[%s4080_s28 + $0x4c8] sm:$0xff] %v1580_v51  ;;  %2854 = vst [vmem:[%s4080_s28 + $0x4d8] sm:$0xff] %v2253_v52  ;;  %v1584_v60 = vadd.f32 %v1583_v58, %v4073_v0  ;;  %v2257_v61 = vadd.f32 %v2256_v59, %v4075_v1 }
 0x1b6   : > { %2855 = vst [vmem:[%s4080_s28 + $0x4e0] sm:$0xff] %v1582_v56  ;;  %2857 = vst [vmem:[%s4080_s28 + $0x4f0] sm:$0xff] %v2255_v57  ;;  %1846 = vmatmul.mubr.bf16.gmra.mrb[184].mxu0 %v3720_v50  ;;  %2519 = vmatmul.mubr.bf16.gmra.mrb[184].mxu1 %v3720_v50 }
 0x1b7   : > { %2856 = vst [vmem:[%s4080_s28 + $0x4e8] sm:$0xff] %v1584_v60  ;;  %2858 = vst [vmem:[%s4080_s28 + $0x4f8] sm:$0xff] %v2257_v61  ;;  %1855 = vmatprep.mubr.bf16.mxu0 %v3721_v55  ;;  %2528 = vmatprep.mubr.bf16.mxu1 %v3721_v55 }
 0x1b9   : > { %v1587_v2 = vpop.f32.mrb[80].mxu0  ;;  %v2260_v3 = vpop.f32.mrb[80].mxu1 }
 0x1ba   : > { %v1588_v4 = vadd.f32 %v1587_v2, %v4069_v62  ;;  %v2261_v5 = vadd.f32 %v2260_v3, %v4071_v63  ;;  %v1589_v6 = vpop.f32.mrb[81].mxu0  ;;  %v2262_v7 = vpop.f32.mrb[81].mxu1  ;;  %v3732_v2 = vld [vmem:[%s3951_s13 + $0x320] ss:$8 sps:$4 sm:$0xff]  }
 0x1bb   : > { %v1590_v9 = vadd.f32 %v1589_v6, %v4073_v0  ;;  %v2263_v10 = vadd.f32 %v2262_v7, %v4075_v1  ;;  %v1591_v11 = vpop.f32.mrb[82].mxu0  ;;  %v2264_v12 = vpop.f32.mrb[82].mxu1  ;;  %v3733_v7 = vld [vmem:[%s3951_s13 + $0x334] ss:$8 sps:$4 sm:$0xff]  }
 0x1bc   : > { %2859 = vst [vmem:[%s4080_s28 + $0x500] sm:$0xff] %v1588_v4  ;;  %2861 = vst [vmem:[%s4080_s28 + $0x510] sm:$0xff] %v2261_v5  ;;  %v1592_v14 = vadd.f32 %v1591_v11, %v4069_v62  ;;  %v2265_v15 = vadd.f32 %v2264_v12, %v4071_v63  ;;  %v1593_v16 = vpop.f32.mrb[83].mxu0  ;;  %v2266_v17 = vpop.f32.mrb[83].mxu1 }
 0x1bd   : > { %2860 = vst [vmem:[%s4080_s28 + $0x508] sm:$0xff] %v1590_v9  ;;  %2862 = vst [vmem:[%s4080_s28 + $0x518] sm:$0xff] %v2263_v10  ;;  %v1594_v18 = vadd.f32 %v1593_v16, %v4073_v0  ;;  %v2267_v19 = vadd.f32 %v2266_v17, %v4075_v1 }
 0x1be   : > { %2863 = vst [vmem:[%s4080_s28 + $0x520] sm:$0xff] %v1592_v14  ;;  %2865 = vst [vmem:[%s4080_s28 + $0x530] sm:$0xff] %v2265_v15  ;;  %1856 = vmatmul.mubr.bf16.gmra.mrb[188].mxu0 %v3723_v8  ;;  %2529 = vmatmul.mubr.bf16.gmra.mrb[188].mxu1 %v3723_v8 }
 0x1bf   : > { %2864 = vst [vmem:[%s4080_s28 + $0x528] sm:$0xff] %v1594_v18  ;;  %2866 = vst [vmem:[%s4080_s28 + $0x538] sm:$0xff] %v2267_v19  ;;  %1865 = vmatprep.mubr.bf16.mxu0 %v3724_v13  ;;  %2538 = vmatprep.mubr.bf16.mxu1 %v3724_v13 }
 0x1c1   : > { %v1597_v20 = vpop.f32.mrb[84].mxu0  ;;  %v2270_v21 = vpop.f32.mrb[84].mxu1 }
 0x1c2   : > { %v1598_v22 = vadd.f32 %v1597_v20, %v4069_v62  ;;  %v2271_v23 = vadd.f32 %v2270_v21, %v4071_v63  ;;  %v1599_v24 = vpop.f32.mrb[85].mxu0  ;;  %v2272_v25 = vpop.f32.mrb[85].mxu1  ;;  %v3735_v20 = vld [vmem:[%s3951_s13 + $0x330] ss:$8 sps:$4 sm:$0xff]  }
 0x1c3   : > { %v1600_v27 = vadd.f32 %v1599_v24, %v4073_v0  ;;  %v2273_v28 = vadd.f32 %v2272_v25, %v4075_v1  ;;  %v1601_v29 = vpop.f32.mrb[86].mxu0  ;;  %v2274_v30 = vpop.f32.mrb[86].mxu1  ;;  %v3736_v25 = vld [vmem:[%s3951_s13 + $0x344] ss:$8 sps:$4 sm:$0xff]  }
 0x1c4   : > { %2867 = vst [vmem:[%s4080_s28 + $0x540] sm:$0xff] %v1598_v22  ;;  %2869 = vst [vmem:[%s4080_s28 + $0x550] sm:$0xff] %v2271_v23  ;;  %v1602_v32 = vadd.f32 %v1601_v29, %v4069_v62  ;;  %v2275_v33 = vadd.f32 %v2274_v30, %v4071_v63  ;;  %v1603_v34 = vpop.f32.mrb[87].mxu0  ;;  %v2276_v35 = vpop.f32.mrb[87].mxu1 }
 0x1c5   : > { %2868 = vst [vmem:[%s4080_s28 + $0x548] sm:$0xff] %v1600_v27  ;;  %2870 = vst [vmem:[%s4080_s28 + $0x558] sm:$0xff] %v2273_v28  ;;  %v1604_v36 = vadd.f32 %v1603_v34, %v4073_v0  ;;  %v2277_v37 = vadd.f32 %v2276_v35, %v4075_v1 }
 0x1c6   : > { %2871 = vst [vmem:[%s4080_s28 + $0x560] sm:$0xff] %v1602_v32  ;;  %2873 = vst [vmem:[%s4080_s28 + $0x570] sm:$0xff] %v2275_v33  ;;  %1866 = vmatmul.mubr.bf16.gmra.mrb[192].mxu0 %v3726_v26  ;;  %2539 = vmatmul.mubr.bf16.gmra.mrb[192].mxu1 %v3726_v26 }
 0x1c7   : > { %2872 = vst [vmem:[%s4080_s28 + $0x568] sm:$0xff] %v1604_v36  ;;  %2874 = vst [vmem:[%s4080_s28 + $0x578] sm:$0xff] %v2277_v37  ;;  %1875 = vmatprep.mubr.bf16.mxu0 %v3727_v31  ;;  %2548 = vmatprep.mubr.bf16.mxu1 %v3727_v31 }
 0x1c9   : > { %v1607_v38 = vpop.f32.mrb[88].mxu0  ;;  %v2280_v39 = vpop.f32.mrb[88].mxu1 }
 0x1ca   : > { %v1608_v40 = vadd.f32 %v1607_v38, %v4069_v62  ;;  %v2281_v41 = vadd.f32 %v2280_v39, %v4071_v63  ;;  %v1609_v42 = vpop.f32.mrb[89].mxu0  ;;  %v2282_v43 = vpop.f32.mrb[89].mxu1  ;;  %v3738_v38 = vld [vmem:[%s3951_s13 + $0x340] ss:$8 sps:$4 sm:$0xff]  }
 0x1cb   : > { %v1610_v45 = vadd.f32 %v1609_v42, %v4073_v0  ;;  %v2283_v46 = vadd.f32 %v2282_v43, %v4075_v1  ;;  %v1611_v47 = vpop.f32.mrb[90].mxu0  ;;  %v2284_v48 = vpop.f32.mrb[90].mxu1  ;;  %v3739_v43 = vld [vmem:[%s3951_s13 + $0x354] ss:$8 sps:$4 sm:$0xff]  }
 0x1cc   : > { %2875 = vst [vmem:[%s4080_s28 + $0x580] sm:$0xff] %v1608_v40  ;;  %2877 = vst [vmem:[%s4080_s28 + $0x590] sm:$0xff] %v2281_v41  ;;  %v1612_v50 = vadd.f32 %v1611_v47, %v4069_v62  ;;  %v2285_v51 = vadd.f32 %v2284_v48, %v4071_v63  ;;  %v1613_v52 = vpop.f32.mrb[91].mxu0  ;;  %v2286_v53 = vpop.f32.mrb[91].mxu1 }
 0x1cd   : > { %2876 = vst [vmem:[%s4080_s28 + $0x588] sm:$0xff] %v1610_v45  ;;  %2878 = vst [vmem:[%s4080_s28 + $0x598] sm:$0xff] %v2283_v46  ;;  %v1614_v54 = vadd.f32 %v1613_v52, %v4073_v0  ;;  %v2287_v55 = vadd.f32 %v2286_v53, %v4075_v1 }
 0x1ce   : > { %2879 = vst [vmem:[%s4080_s28 + $0x5a0] sm:$0xff] %v1612_v50  ;;  %2881 = vst [vmem:[%s4080_s28 + $0x5b0] sm:$0xff] %v2285_v51  ;;  %1876 = vmatmul.mubr.bf16.gmra.mrb[196].mxu0 %v3729_v44  ;;  %2549 = vmatmul.mubr.bf16.gmra.mrb[196].mxu1 %v3729_v44 }
 0x1cf   : > { %2880 = vst [vmem:[%s4080_s28 + $0x5a8] sm:$0xff] %v1614_v54  ;;  %2882 = vst [vmem:[%s4080_s28 + $0x5b8] sm:$0xff] %v2287_v55  ;;  %1885 = vmatprep.mubr.bf16.mxu0 %v3730_v49  ;;  %2558 = vmatprep.mubr.bf16.mxu1 %v3730_v49 }
 0x1d1   : > { %v1617_v56 = vpop.f32.mrb[92].mxu0  ;;  %v2290_v57 = vpop.f32.mrb[92].mxu1 }
 0x1d2   : > { %v1618_v58 = vadd.f32 %v1617_v56, %v4069_v62  ;;  %v2291_v59 = vadd.f32 %v2290_v57, %v4071_v63  ;;  %v1619_v60 = vpop.f32.mrb[93].mxu0  ;;  %v2292_v61 = vpop.f32.mrb[93].mxu1  ;;  %v3741_v56 = vld [vmem:[%s3951_s13 + $0x350] ss:$8 sps:$4 sm:$0xff]  }
 0x1d3   : > { %v1620_v3 = vadd.f32 %v1619_v60, %v4073_v0  ;;  %v2293_v4 = vadd.f32 %v2292_v61, %v4075_v1  ;;  %v1621_v5 = vpop.f32.mrb[94].mxu0  ;;  %v2294_v6 = vpop.f32.mrb[94].mxu1  ;;  %v3742_v61 = vld [vmem:[%s3951_s13 + $0x364] ss:$8 sps:$4 sm:$0xff]  }
 0x1d4   : > { %2883 = vst [vmem:[%s4080_s28 + $0x5c0] sm:$0xff] %v1618_v58  ;;  %2885 = vst [vmem:[%s4080_s28 + $0x5d0] sm:$0xff] %v2291_v59  ;;  %v1622_v8 = vadd.f32 %v1621_v5, %v4069_v62  ;;  %v2295_v9 = vadd.f32 %v2294_v6, %v4071_v63  ;;  %v1623_v10 = vpop.f32.mrb[95].mxu0  ;;  %v2296_v11 = vpop.f32.mrb[95].mxu1 }
 0x1d5   : > { %2884 = vst [vmem:[%s4080_s28 + $0x5c8] sm:$0xff] %v1620_v3  ;;  %2886 = vst [vmem:[%s4080_s28 + $0x5d8] sm:$0xff] %v2293_v4  ;;  %v1624_v12 = vadd.f32 %v1623_v10, %v4073_v0  ;;  %v2297_v13 = vadd.f32 %v2296_v11, %v4075_v1 }
 0x1d6   : > { %2887 = vst [vmem:[%s4080_s28 + $0x5e0] sm:$0xff] %v1622_v8  ;;  %2889 = vst [vmem:[%s4080_s28 + $0x5f0] sm:$0xff] %v2295_v9  ;;  %1886 = vmatmul.mubr.bf16.gmra.mrb[200].mxu0 %v3732_v2  ;;  %2559 = vmatmul.mubr.bf16.gmra.mrb[200].mxu1 %v3732_v2 }
 0x1d7   : > { %2888 = vst [vmem:[%s4080_s28 + $0x5e8] sm:$0xff] %v1624_v12  ;;  %2890 = vst [vmem:[%s4080_s28 + $0x5f8] sm:$0xff] %v2297_v13  ;;  %1895 = vmatprep.mubr.bf16.mxu0 %v3733_v7  ;;  %2568 = vmatprep.mubr.bf16.mxu1 %v3733_v7 }
 0x1d9   : > { %v1627_v14 = vpop.f32.mrb[96].mxu0  ;;  %v2300_v15 = vpop.f32.mrb[96].mxu1 }
 0x1da   : > { %v1628_v16 = vadd.f32 %v1627_v14, %v4069_v62  ;;  %v2301_v17 = vadd.f32 %v2300_v15, %v4071_v63  ;;  %v1629_v18 = vpop.f32.mrb[97].mxu0  ;;  %v2302_v19 = vpop.f32.mrb[97].mxu1  ;;  %v3744_v14 = vld [vmem:[%s3951_s13 + $0x360] ss:$8 sps:$4 sm:$0xff]  }
 0x1db   : > { %v1630_v21 = vadd.f32 %v1629_v18, %v4073_v0  ;;  %v2303_v22 = vadd.f32 %v2302_v19, %v4075_v1  ;;  %v1631_v23 = vpop.f32.mrb[98].mxu0  ;;  %v2304_v24 = vpop.f32.mrb[98].mxu1  ;;  %v3745_v19 = vld [vmem:[%s3951_s13 + $0x374] ss:$8 sps:$4 sm:$0xff]  }
 0x1dc   : > { %2891 = vst [vmem:[%s4080_s28 + $0x600] sm:$0xff] %v1628_v16  ;;  %2893 = vst [vmem:[%s4080_s28 + $0x610] sm:$0xff] %v2301_v17  ;;  %v1632_v26 = vadd.f32 %v1631_v23, %v4069_v62  ;;  %v2305_v27 = vadd.f32 %v2304_v24, %v4071_v63  ;;  %v1633_v28 = vpop.f32.mrb[99].mxu0  ;;  %v2306_v29 = vpop.f32.mrb[99].mxu1 }
 0x1dd   : > { %2892 = vst [vmem:[%s4080_s28 + $0x608] sm:$0xff] %v1630_v21  ;;  %2894 = vst [vmem:[%s4080_s28 + $0x618] sm:$0xff] %v2303_v22  ;;  %v1634_v30 = vadd.f32 %v1633_v28, %v4073_v0  ;;  %v2307_v31 = vadd.f32 %v2306_v29, %v4075_v1 }
 0x1de   : > { %2895 = vst [vmem:[%s4080_s28 + $0x620] sm:$0xff] %v1632_v26  ;;  %2897 = vst [vmem:[%s4080_s28 + $0x630] sm:$0xff] %v2305_v27  ;;  %1896 = vmatmul.mubr.bf16.gmra.mrb[204].mxu0 %v3735_v20  ;;  %2569 = vmatmul.mubr.bf16.gmra.mrb[204].mxu1 %v3735_v20 }
 0x1df   : > { %2896 = vst [vmem:[%s4080_s28 + $0x628] sm:$0xff] %v1634_v30  ;;  %2898 = vst [vmem:[%s4080_s28 + $0x638] sm:$0xff] %v2307_v31  ;;  %1905 = vmatprep.mubr.bf16.mxu0 %v3736_v25  ;;  %2578 = vmatprep.mubr.bf16.mxu1 %v3736_v25 }
 0x1e1   : > { %v1637_v32 = vpop.f32.mrb[100].mxu0  ;;  %v2310_v33 = vpop.f32.mrb[100].mxu1 }
 0x1e2   : > { %v1638_v34 = vadd.f32 %v1637_v32, %v4069_v62  ;;  %v2311_v35 = vadd.f32 %v2310_v33, %v4071_v63  ;;  %v1639_v36 = vpop.f32.mrb[101].mxu0  ;;  %v2312_v37 = vpop.f32.mrb[101].mxu1  ;;  %v3747_v32 = vld [vmem:[%s3951_s13 + $0x370] ss:$8 sps:$4 sm:$0xff]  }
 0x1e3   : > { %v1640_v39 = vadd.f32 %v1639_v36, %v4073_v0  ;;  %v2313_v40 = vadd.f32 %v2312_v37, %v4075_v1  ;;  %v1641_v41 = vpop.f32.mrb[102].mxu0  ;;  %v2314_v42 = vpop.f32.mrb[102].mxu1  ;;  %v3748_v37 = vld [vmem:[%s3951_s13 + $0x384] ss:$8 sps:$4 sm:$0xff]  }
 0x1e4   : > { %2899 = vst [vmem:[%s4080_s28 + $0x640] sm:$0xff] %v1638_v34  ;;  %2901 = vst [vmem:[%s4080_s28 + $0x650] sm:$0xff] %v2311_v35  ;;  %v1642_v44 = vadd.f32 %v1641_v41, %v4069_v62  ;;  %v2315_v45 = vadd.f32 %v2314_v42, %v4071_v63  ;;  %v1643_v46 = vpop.f32.mrb[103].mxu0  ;;  %v2316_v47 = vpop.f32.mrb[103].mxu1 }
 0x1e5   : > { %2900 = vst [vmem:[%s4080_s28 + $0x648] sm:$0xff] %v1640_v39  ;;  %2902 = vst [vmem:[%s4080_s28 + $0x658] sm:$0xff] %v2313_v40  ;;  %v1644_v48 = vadd.f32 %v1643_v46, %v4073_v0  ;;  %v2317_v49 = vadd.f32 %v2316_v47, %v4075_v1 }
 0x1e6   : > { %2903 = vst [vmem:[%s4080_s28 + $0x660] sm:$0xff] %v1642_v44  ;;  %2905 = vst [vmem:[%s4080_s28 + $0x670] sm:$0xff] %v2315_v45  ;;  %1906 = vmatmul.mubr.bf16.gmra.mrb[208].mxu0 %v3738_v38  ;;  %2579 = vmatmul.mubr.bf16.gmra.mrb[208].mxu1 %v3738_v38 }
 0x1e7   : > { %2904 = vst [vmem:[%s4080_s28 + $0x668] sm:$0xff] %v1644_v48  ;;  %2906 = vst [vmem:[%s4080_s28 + $0x678] sm:$0xff] %v2317_v49  ;;  %1915 = vmatprep.mubr.bf16.mxu0 %v3739_v43  ;;  %2588 = vmatprep.mubr.bf16.mxu1 %v3739_v43 }
 0x1e9   : > { %v1647_v50 = vpop.f32.mrb[104].mxu0  ;;  %v2320_v51 = vpop.f32.mrb[104].mxu1 }
 0x1ea   : > { %v1648_v52 = vadd.f32 %v1647_v50, %v4069_v62  ;;  %v2321_v53 = vadd.f32 %v2320_v51, %v4071_v63  ;;  %v1649_v54 = vpop.f32.mrb[105].mxu0  ;;  %v2322_v55 = vpop.f32.mrb[105].mxu1  ;;  %v3750_v50 = vld [vmem:[%s3951_s13 + $0x380] ss:$8 sps:$4 sm:$0xff]  }
 0x1eb   : > { %v1650_v57 = vadd.f32 %v1649_v54, %v4073_v0  ;;  %v2323_v58 = vadd.f32 %v2322_v55, %v4075_v1  ;;  %v1651_v59 = vpop.f32.mrb[106].mxu0  ;;  %v2324_v60 = vpop.f32.mrb[106].mxu1  ;;  %v3751_v55 = vld [vmem:[%s3951_s13 + $0x394] ss:$8 sps:$4 sm:$0xff]  }
 0x1ec   : > { %2907 = vst [vmem:[%s4080_s28 + $0x680] sm:$0xff] %v1648_v52  ;;  %2909 = vst [vmem:[%s4080_s28 + $0x690] sm:$0xff] %v2321_v53  ;;  %v1652_v2 = vadd.f32 %v1651_v59, %v4069_v62  ;;  %v2325_v3 = vadd.f32 %v2324_v60, %v4071_v63  ;;  %v1653_v4 = vpop.f32.mrb[107].mxu0  ;;  %v2326_v5 = vpop.f32.mrb[107].mxu1 }
 0x1ed   : > { %2908 = vst [vmem:[%s4080_s28 + $0x688] sm:$0xff] %v1650_v57  ;;  %2910 = vst [vmem:[%s4080_s28 + $0x698] sm:$0xff] %v2323_v58  ;;  %v1654_v6 = vadd.f32 %v1653_v4, %v4073_v0  ;;  %v2327_v7 = vadd.f32 %v2326_v5, %v4075_v1 }
 0x1ee   : > { %2911 = vst [vmem:[%s4080_s28 + $0x6a0] sm:$0xff] %v1652_v2  ;;  %2913 = vst [vmem:[%s4080_s28 + $0x6b0] sm:$0xff] %v2325_v3  ;;  %1916 = vmatmul.mubr.bf16.gmra.mrb[212].mxu0 %v3741_v56  ;;  %2589 = vmatmul.mubr.bf16.gmra.mrb[212].mxu1 %v3741_v56 }
 0x1ef   : > { %2912 = vst [vmem:[%s4080_s28 + $0x6a8] sm:$0xff] %v1654_v6  ;;  %2914 = vst [vmem:[%s4080_s28 + $0x6b8] sm:$0xff] %v2327_v7  ;;  %1925 = vmatprep.mubr.bf16.mxu0 %v3742_v61  ;;  %2598 = vmatprep.mubr.bf16.mxu1 %v3742_v61 }
 0x1f1   : > { %v1657_v8 = vpop.f32.mrb[108].mxu0  ;;  %v2330_v9 = vpop.f32.mrb[108].mxu1 }
 0x1f2   : > { %v1658_v10 = vadd.f32 %v1657_v8, %v4069_v62  ;;  %v2331_v11 = vadd.f32 %v2330_v9, %v4071_v63  ;;  %v1659_v12 = vpop.f32.mrb[109].mxu0  ;;  %v2332_v13 = vpop.f32.mrb[109].mxu1  ;;  %v3753_v8 = vld [vmem:[%s3951_s13 + $0x390] ss:$8 sps:$4 sm:$0xff]  }
 0x1f3   : > { %v1660_v15 = vadd.f32 %v1659_v12, %v4073_v0  ;;  %v2333_v16 = vadd.f32 %v2332_v13, %v4075_v1  ;;  %v1661_v17 = vpop.f32.mrb[110].mxu0  ;;  %v2334_v18 = vpop.f32.mrb[110].mxu1  ;;  %v3754_v13 = vld [vmem:[%s3951_s13 + $0x3a4] ss:$8 sps:$4 sm:$0xff]  }
 0x1f4   : > { %2915 = vst [vmem:[%s4080_s28 + $0x6c0] sm:$0xff] %v1658_v10  ;;  %2917 = vst [vmem:[%s4080_s28 + $0x6d0] sm:$0xff] %v2331_v11  ;;  %v1662_v20 = vadd.f32 %v1661_v17, %v4069_v62  ;;  %v2335_v21 = vadd.f32 %v2334_v18, %v4071_v63  ;;  %v1663_v22 = vpop.f32.mrb[111].mxu0  ;;  %v2336_v23 = vpop.f32.mrb[111].mxu1 }
 0x1f5   : > { %2916 = vst [vmem:[%s4080_s28 + $0x6c8] sm:$0xff] %v1660_v15  ;;  %2918 = vst [vmem:[%s4080_s28 + $0x6d8] sm:$0xff] %v2333_v16  ;;  %v1664_v24 = vadd.f32 %v1663_v22, %v4073_v0  ;;  %v2337_v25 = vadd.f32 %v2336_v23, %v4075_v1 }
 0x1f6   : > { %2919 = vst [vmem:[%s4080_s28 + $0x6e0] sm:$0xff] %v1662_v20  ;;  %2921 = vst [vmem:[%s4080_s28 + $0x6f0] sm:$0xff] %v2335_v21  ;;  %1926 = vmatmul.mubr.bf16.gmra.mrb[216].mxu0 %v3744_v14  ;;  %2599 = vmatmul.mubr.bf16.gmra.mrb[216].mxu1 %v3744_v14 }
 0x1f7   : > { %2920 = vst [vmem:[%s4080_s28 + $0x6e8] sm:$0xff] %v1664_v24  ;;  %2922 = vst [vmem:[%s4080_s28 + $0x6f8] sm:$0xff] %v2337_v25  ;;  %1935 = vmatprep.mubr.bf16.mxu0 %v3745_v19  ;;  %2608 = vmatprep.mubr.bf16.mxu1 %v3745_v19 }
 0x1f9   : > { %v1667_v26 = vpop.f32.mrb[112].mxu0  ;;  %v2340_v27 = vpop.f32.mrb[112].mxu1 }
 0x1fa   : > { %v1668_v28 = vadd.f32 %v1667_v26, %v4069_v62  ;;  %v2341_v29 = vadd.f32 %v2340_v27, %v4071_v63  ;;  %v1669_v30 = vpop.f32.mrb[113].mxu0  ;;  %v2342_v31 = vpop.f32.mrb[113].mxu1  ;;  %v3756_v26 = vld [vmem:[%s3951_s13 + $0x3a0] ss:$8 sps:$4 sm:$0xff]  }
 0x1fb   : > { %v1670_v33 = vadd.f32 %v1669_v30, %v4073_v0  ;;  %v2343_v34 = vadd.f32 %v2342_v31, %v4075_v1  ;;  %v1671_v35 = vpop.f32.mrb[114].mxu0  ;;  %v2344_v36 = vpop.f32.mrb[114].mxu1  ;;  %v3757_v31 = vld [vmem:[%s3951_s13 + $0x3b4] ss:$8 sps:$4 sm:$0xff]  }
 0x1fc   : > { %2923 = vst [vmem:[%s4080_s28 + $0x700] sm:$0xff] %v1668_v28  ;;  %2925 = vst [vmem:[%s4080_s28 + $0x710] sm:$0xff] %v2341_v29  ;;  %v1672_v38 = vadd.f32 %v1671_v35, %v4069_v62  ;;  %v2345_v39 = vadd.f32 %v2344_v36, %v4071_v63  ;;  %v1673_v40 = vpop.f32.mrb[115].mxu0  ;;  %v2346_v41 = vpop.f32.mrb[115].mxu1 }
 0x1fd   : > { %2924 = vst [vmem:[%s4080_s28 + $0x708] sm:$0xff] %v1670_v33  ;;  %2926 = vst [vmem:[%s4080_s28 + $0x718] sm:$0xff] %v2343_v34  ;;  %v1674_v42 = vadd.f32 %v1673_v40, %v4073_v0  ;;  %v2347_v43 = vadd.f32 %v2346_v41, %v4075_v1 }
 0x1fe   : > { %2927 = vst [vmem:[%s4080_s28 + $0x720] sm:$0xff] %v1672_v38  ;;  %2929 = vst [vmem:[%s4080_s28 + $0x730] sm:$0xff] %v2345_v39  ;;  %1936 = vmatmul.mubr.bf16.gmra.mrb[220].mxu0 %v3747_v32  ;;  %2609 = vmatmul.mubr.bf16.gmra.mrb[220].mxu1 %v3747_v32 }
 0x1ff   : > { %2928 = vst [vmem:[%s4080_s28 + $0x728] sm:$0xff] %v1674_v42  ;;  %2930 = vst [vmem:[%s4080_s28 + $0x738] sm:$0xff] %v2347_v43  ;;  %1945 = vmatprep.mubr.bf16.mxu0 %v3748_v37  ;;  %2618 = vmatprep.mubr.bf16.mxu1 %v3748_v37 }
 0x201   : > { %v1677_v44 = vpop.f32.mrb[116].mxu0  ;;  %v2350_v45 = vpop.f32.mrb[116].mxu1 }
 0x202   : > { %v1678_v46 = vadd.f32 %v1677_v44, %v4069_v62  ;;  %v2351_v47 = vadd.f32 %v2350_v45, %v4071_v63  ;;  %v1679_v48 = vpop.f32.mrb[117].mxu0  ;;  %v2352_v49 = vpop.f32.mrb[117].mxu1  ;;  %v3759_v44 = vld [vmem:[%s3951_s13 + $0x3b0] ss:$8 sps:$4 sm:$0xff]  }
 0x203   : > { %v1680_v51 = vadd.f32 %v1679_v48, %v4073_v0  ;;  %v2353_v52 = vadd.f32 %v2352_v49, %v4075_v1  ;;  %v1681_v53 = vpop.f32.mrb[118].mxu0  ;;  %v2354_v54 = vpop.f32.mrb[118].mxu1  ;;  %v3760_v49 = vld [vmem:[%s3951_s13 + $0x3c4] ss:$8 sps:$4 sm:$0xff]  }
 0x204   : > { %2931 = vst [vmem:[%s4080_s28 + $0x740] sm:$0xff] %v1678_v46  ;;  %2933 = vst [vmem:[%s4080_s28 + $0x750] sm:$0xff] %v2351_v47  ;;  %v1682_v56 = vadd.f32 %v1681_v53, %v4069_v62  ;;  %v2355_v57 = vadd.f32 %v2354_v54, %v4071_v63  ;;  %v1683_v58 = vpop.f32.mrb[119].mxu0  ;;  %v2356_v59 = vpop.f32.mrb[119].mxu1 }
 0x205   : > { %2932 = vst [vmem:[%s4080_s28 + $0x748] sm:$0xff] %v1680_v51  ;;  %2934 = vst [vmem:[%s4080_s28 + $0x758] sm:$0xff] %v2353_v52  ;;  %v1684_v60 = vadd.f32 %v1683_v58, %v4073_v0  ;;  %v2357_v61 = vadd.f32 %v2356_v59, %v4075_v1 }
 0x206   : > { %2935 = vst [vmem:[%s4080_s28 + $0x760] sm:$0xff] %v1682_v56  ;;  %2937 = vst [vmem:[%s4080_s28 + $0x770] sm:$0xff] %v2355_v57  ;;  %1946 = vmatmul.mubr.bf16.gmra.mrb[224].mxu0 %v3750_v50  ;;  %2619 = vmatmul.mubr.bf16.gmra.mrb[224].mxu1 %v3750_v50 }
 0x207   : > { %2936 = vst [vmem:[%s4080_s28 + $0x768] sm:$0xff] %v1684_v60  ;;  %2938 = vst [vmem:[%s4080_s28 + $0x778] sm:$0xff] %v2357_v61  ;;  %1955 = vmatprep.mubr.bf16.mxu0 %v3751_v55  ;;  %2628 = vmatprep.mubr.bf16.mxu1 %v3751_v55 }
 0x209   : > { %v1687_v2 = vpop.f32.mrb[120].mxu0  ;;  %v2360_v3 = vpop.f32.mrb[120].mxu1 }
 0x20a   : > { %v1688_v4 = vadd.f32 %v1687_v2, %v4069_v62  ;;  %v2361_v5 = vadd.f32 %v2360_v3, %v4071_v63  ;;  %v1689_v6 = vpop.f32.mrb[121].mxu0  ;;  %v2362_v7 = vpop.f32.mrb[121].mxu1  ;;  %v3762_v2 = vld [vmem:[%s3951_s13 + $0x3c0] ss:$8 sps:$4 sm:$0xff]  }
 0x20b   : > { %v1690_v9 = vadd.f32 %v1689_v6, %v4073_v0  ;;  %v2363_v10 = vadd.f32 %v2362_v7, %v4075_v1  ;;  %v1691_v11 = vpop.f32.mrb[122].mxu0  ;;  %v2364_v12 = vpop.f32.mrb[122].mxu1  ;;  %v3763_v7 = vld [vmem:[%s3951_s13 + $0x3d4] ss:$8 sps:$4 sm:$0xff]  }
 0x20c   : > { %2939 = vst [vmem:[%s4080_s28 + $0x780] sm:$0xff] %v1688_v4  ;;  %2941 = vst [vmem:[%s4080_s28 + $0x790] sm:$0xff] %v2361_v5  ;;  %v1692_v14 = vadd.f32 %v1691_v11, %v4069_v62  ;;  %v2365_v15 = vadd.f32 %v2364_v12, %v4071_v63  ;;  %v1693_v16 = vpop.f32.mrb[123].mxu0  ;;  %v2366_v17 = vpop.f32.mrb[123].mxu1 }
 0x20d   : > { %2940 = vst [vmem:[%s4080_s28 + $0x788] sm:$0xff] %v1690_v9  ;;  %2942 = vst [vmem:[%s4080_s28 + $0x798] sm:$0xff] %v2363_v10  ;;  %v1694_v18 = vadd.f32 %v1693_v16, %v4073_v0  ;;  %v2367_v19 = vadd.f32 %v2366_v17, %v4075_v1 }
 0x20e   : > { %2943 = vst [vmem:[%s4080_s28 + $0x7a0] sm:$0xff] %v1692_v14  ;;  %2945 = vst [vmem:[%s4080_s28 + $0x7b0] sm:$0xff] %v2365_v15  ;;  %1956 = vmatmul.mubr.bf16.gmra.mrb[228].mxu0 %v3753_v8  ;;  %2629 = vmatmul.mubr.bf16.gmra.mrb[228].mxu1 %v3753_v8 }
 0x20f   : > { %2944 = vst [vmem:[%s4080_s28 + $0x7a8] sm:$0xff] %v1694_v18  ;;  %2946 = vst [vmem:[%s4080_s28 + $0x7b8] sm:$0xff] %v2367_v19  ;;  %1965 = vmatprep.mubr.bf16.mxu0 %v3754_v13  ;;  %2638 = vmatprep.mubr.bf16.mxu1 %v3754_v13 }
 0x211   : > { %v1697_v20 = vpop.f32.mrb[124].mxu0  ;;  %v2370_v21 = vpop.f32.mrb[124].mxu1 }
 0x212   : > { %v1698_v22 = vadd.f32 %v1697_v20, %v4069_v62  ;;  %v2371_v23 = vadd.f32 %v2370_v21, %v4071_v63  ;;  %v1699_v24 = vpop.f32.mrb[125].mxu0  ;;  %v2372_v25 = vpop.f32.mrb[125].mxu1  ;;  %v3765_v20 = vld [vmem:[%s3951_s13 + $0x3d0] ss:$8 sps:$4 sm:$0xff]  }
 0x213   : > { %v1700_v27 = vadd.f32 %v1699_v24, %v4073_v0  ;;  %v2373_v28 = vadd.f32 %v2372_v25, %v4075_v1  ;;  %v1701_v29 = vpop.f32.mrb[126].mxu0  ;;  %v2374_v30 = vpop.f32.mrb[126].mxu1  ;;  %v3766_v25 = vld [vmem:[%s3951_s13 + $0x3e4] ss:$8 sps:$4 sm:$0xff]  }
 0x214   : > { %2947 = vst [vmem:[%s4080_s28 + $0x7c0] sm:$0xff] %v1698_v22  ;;  %2949 = vst [vmem:[%s4080_s28 + $0x7d0] sm:$0xff] %v2371_v23  ;;  %v1702_v32 = vadd.f32 %v1701_v29, %v4069_v62  ;;  %v2375_v33 = vadd.f32 %v2374_v30, %v4071_v63  ;;  %v1703_v34 = vpop.f32.mrb[127].mxu0  ;;  %v2376_v35 = vpop.f32.mrb[127].mxu1 }
 0x215   : > { %2948 = vst [vmem:[%s4080_s28 + $0x7c8] sm:$0xff] %v1700_v27  ;;  %2950 = vst [vmem:[%s4080_s28 + $0x7d8] sm:$0xff] %v2373_v28  ;;  %v1704_v36 = vadd.f32 %v1703_v34, %v4073_v0  ;;  %v2377_v37 = vadd.f32 %v2376_v35, %v4075_v1 }
 0x216   : > { %2951 = vst [vmem:[%s4080_s28 + $0x7e0] sm:$0xff] %v1702_v32  ;;  %2953 = vst [vmem:[%s4080_s28 + $0x7f0] sm:$0xff] %v2375_v33  ;;  %1966 = vmatmul.mubr.bf16.gmra.mrb[232].mxu0 %v3756_v26  ;;  %2639 = vmatmul.mubr.bf16.gmra.mrb[232].mxu1 %v3756_v26 }
 0x217   : > { %2952 = vst [vmem:[%s4080_s28 + $0x7e8] sm:$0xff] %v1704_v36  ;;  %2954 = vst [vmem:[%s4080_s28 + $0x7f8] sm:$0xff] %v2377_v37  ;;  %1975 = vmatprep.mubr.bf16.mxu0 %v3757_v31  ;;  %2648 = vmatprep.mubr.bf16.mxu1 %v3757_v31 }
 0x219   : > { %v1707_v38 = vpop.f32.mrb[128].mxu0  ;;  %v2380_v39 = vpop.f32.mrb[128].mxu1 }
 0x21a   : > { %v1708_v40 = vadd.f32 %v1707_v38, %v4069_v62  ;;  %v2381_v41 = vadd.f32 %v2380_v39, %v4071_v63  ;;  %v1709_v42 = vpop.f32.mrb[129].mxu0  ;;  %v2382_v43 = vpop.f32.mrb[129].mxu1  ;;  %v3768_v38 = vld [vmem:[%s3951_s13 + $0x3e0] ss:$8 sps:$4 sm:$0xff]  }
 0x21b   : > { %v1710_v45 = vadd.f32 %v1709_v42, %v4073_v0  ;;  %v2383_v46 = vadd.f32 %v2382_v43, %v4075_v1  ;;  %v1711_v47 = vpop.f32.mrb[130].mxu0  ;;  %v2384_v48 = vpop.f32.mrb[130].mxu1  ;;  %v3769_v43 = vld [vmem:[%s3951_s13 + $0x3f4] ss:$8 sps:$4 sm:$0xff]  }
 0x21c   : > { %2955 = vst [vmem:[%s4080_s28 + $0x800] sm:$0xff] %v1708_v40  ;;  %2957 = vst [vmem:[%s4080_s28 + $0x810] sm:$0xff] %v2381_v41  ;;  %v1712_v50 = vadd.f32 %v1711_v47, %v4069_v62  ;;  %v2385_v51 = vadd.f32 %v2384_v48, %v4071_v63  ;;  %v1713_v52 = vpop.f32.mrb[131].mxu0  ;;  %v2386_v53 = vpop.f32.mrb[131].mxu1 }
 0x21d   : > { %2956 = vst [vmem:[%s4080_s28 + $0x808] sm:$0xff] %v1710_v45  ;;  %2958 = vst [vmem:[%s4080_s28 + $0x818] sm:$0xff] %v2383_v46  ;;  %v1714_v54 = vadd.f32 %v1713_v52, %v4073_v0  ;;  %v2387_v55 = vadd.f32 %v2386_v53, %v4075_v1 }
 0x21e   : > { %2959 = vst [vmem:[%s4080_s28 + $0x820] sm:$0xff] %v1712_v50  ;;  %2961 = vst [vmem:[%s4080_s28 + $0x830] sm:$0xff] %v2385_v51  ;;  %1976 = vmatmul.mubr.bf16.gmra.mrb[236].mxu0 %v3759_v44  ;;  %2649 = vmatmul.mubr.bf16.gmra.mrb[236].mxu1 %v3759_v44 }
 0x21f   : > { %2960 = vst [vmem:[%s4080_s28 + $0x828] sm:$0xff] %v1714_v54  ;;  %2962 = vst [vmem:[%s4080_s28 + $0x838] sm:$0xff] %v2387_v55  ;;  %1985 = vmatprep.mubr.bf16.mxu0 %v3760_v49  ;;  %2658 = vmatprep.mubr.bf16.mxu1 %v3760_v49 }
 0x221   : > { %v1717_v56 = vpop.f32.mrb[132].mxu0  ;;  %v2390_v57 = vpop.f32.mrb[132].mxu1 }
 0x222   : > { %v1718_v58 = vadd.f32 %v1717_v56, %v4069_v62  ;;  %v2391_v59 = vadd.f32 %v2390_v57, %v4071_v63  ;;  %v1719_v60 = vpop.f32.mrb[133].mxu0  ;;  %v2392_v61 = vpop.f32.mrb[133].mxu1  ;;  %v3771_v56 = vld [vmem:[%s3951_s13 + $0x3f0] ss:$8 sps:$4 sm:$0xff]  }
 0x223   : > { %v1720_v3 = vadd.f32 %v1719_v60, %v4073_v0  ;;  %v2393_v4 = vadd.f32 %v2392_v61, %v4075_v1  ;;  %v1721_v5 = vpop.f32.mrb[134].mxu0  ;;  %v2394_v6 = vpop.f32.mrb[134].mxu1 }
 0x224   : > { %2963 = vst [vmem:[%s4080_s28 + $0x840] sm:$0xff] %v1718_v58  ;;  %2965 = vst [vmem:[%s4080_s28 + $0x850] sm:$0xff] %v2391_v59  ;;  %v1722_v8 = vadd.f32 %v1721_v5, %v4069_v62  ;;  %v2395_v9 = vadd.f32 %v2394_v6, %v4071_v63  ;;  %v1723_v10 = vpop.f32.mrb[135].mxu0  ;;  %v2396_v11 = vpop.f32.mrb[135].mxu1 }
 0x225   : > { %2964 = vst [vmem:[%s4080_s28 + $0x848] sm:$0xff] %v1720_v3  ;;  %2966 = vst [vmem:[%s4080_s28 + $0x858] sm:$0xff] %v2393_v4  ;;  %v1724_v12 = vadd.f32 %v1723_v10, %v4073_v0  ;;  %v2397_v13 = vadd.f32 %v2396_v11, %v4075_v1 }
 0x226   : > { %2967 = vst [vmem:[%s4080_s28 + $0x860] sm:$0xff] %v1722_v8  ;;  %2969 = vst [vmem:[%s4080_s28 + $0x870] sm:$0xff] %v2395_v9  ;;  %1986 = vmatmul.mubr.bf16.gmra.mrb[240].mxu0 %v3762_v2  ;;  %2659 = vmatmul.mubr.bf16.gmra.mrb[240].mxu1 %v3762_v2 }
 0x227   : > { %2968 = vst [vmem:[%s4080_s28 + $0x868] sm:$0xff] %v1724_v12  ;;  %2970 = vst [vmem:[%s4080_s28 + $0x878] sm:$0xff] %v2397_v13  ;;  %1995 = vmatprep.mubr.bf16.mxu0 %v3763_v7  ;;  %2668 = vmatprep.mubr.bf16.mxu1 %v3763_v7 }
 0x229   : > { %v1727_v14 = vpop.f32.mrb[136].mxu0  ;;  %v2400_v15 = vpop.f32.mrb[136].mxu1 }
 0x22a   : > { %v1728_v16 = vadd.f32 %v1727_v14, %v4069_v62  ;;  %v2401_v17 = vadd.f32 %v2400_v15, %v4071_v63  ;;  %v1729_v18 = vpop.f32.mrb[137].mxu0  ;;  %v2402_v19 = vpop.f32.mrb[137].mxu1 }
 0x22b   : > { %v1730_v21 = vadd.f32 %v1729_v18, %v4073_v0  ;;  %v2403_v22 = vadd.f32 %v2402_v19, %v4075_v1  ;;  %v1731_v23 = vpop.f32.mrb[138].mxu0  ;;  %v2404_v24 = vpop.f32.mrb[138].mxu1 }
 0x22c   : > { %2971 = vst [vmem:[%s4080_s28 + $0x880] sm:$0xff] %v1728_v16  ;;  %2973 = vst [vmem:[%s4080_s28 + $0x890] sm:$0xff] %v2401_v17  ;;  %v1732_v26 = vadd.f32 %v1731_v23, %v4069_v62  ;;  %v2405_v27 = vadd.f32 %v2404_v24, %v4071_v63  ;;  %v1733_v28 = vpop.f32.mrb[139].mxu0  ;;  %v2406_v29 = vpop.f32.mrb[139].mxu1 }
 0x22d   : > { %2972 = vst [vmem:[%s4080_s28 + $0x888] sm:$0xff] %v1730_v21  ;;  %2974 = vst [vmem:[%s4080_s28 + $0x898] sm:$0xff] %v2403_v22  ;;  %v1734_v30 = vadd.f32 %v1733_v28, %v4073_v0  ;;  %v2407_v31 = vadd.f32 %v2406_v29, %v4075_v1 }
 0x22e   : > { %2975 = vst [vmem:[%s4080_s28 + $0x8a0] sm:$0xff] %v1732_v26  ;;  %2977 = vst [vmem:[%s4080_s28 + $0x8b0] sm:$0xff] %v2405_v27  ;;  %1996 = vmatmul.mubr.bf16.gmra.mrb[244].mxu0 %v3765_v20  ;;  %2669 = vmatmul.mubr.bf16.gmra.mrb[244].mxu1 %v3765_v20 }
 0x22f   : > { %2976 = vst [vmem:[%s4080_s28 + $0x8a8] sm:$0xff] %v1734_v30  ;;  %2978 = vst [vmem:[%s4080_s28 + $0x8b8] sm:$0xff] %v2407_v31  ;;  %2005 = vmatprep.mubr.bf16.mxu0 %v3766_v25  ;;  %2678 = vmatprep.mubr.bf16.mxu1 %v3766_v25 }
 0x231   : > { %v1737_v32 = vpop.f32.mrb[140].mxu0  ;;  %v2410_v33 = vpop.f32.mrb[140].mxu1 }
 0x232   : > { %v1738_v34 = vadd.f32 %v1737_v32, %v4069_v62  ;;  %v2411_v35 = vadd.f32 %v2410_v33, %v4071_v63  ;;  %v1739_v36 = vpop.f32.mrb[141].mxu0  ;;  %v2412_v37 = vpop.f32.mrb[141].mxu1 }
 0x233   : > { %v1740_v39 = vadd.f32 %v1739_v36, %v4073_v0  ;;  %v2413_v40 = vadd.f32 %v2412_v37, %v4075_v1  ;;  %v1741_v41 = vpop.f32.mrb[142].mxu0  ;;  %v2414_v42 = vpop.f32.mrb[142].mxu1 }
 0x234   : > { %2979 = vst [vmem:[%s4080_s28 + $0x8c0] sm:$0xff] %v1738_v34  ;;  %2981 = vst [vmem:[%s4080_s28 + $0x8d0] sm:$0xff] %v2411_v35  ;;  %v1742_v44 = vadd.f32 %v1741_v41, %v4069_v62  ;;  %v2415_v45 = vadd.f32 %v2414_v42, %v4071_v63  ;;  %v1743_v46 = vpop.f32.mrb[143].mxu0  ;;  %v2416_v47 = vpop.f32.mrb[143].mxu1 }
 0x235   : > { %2980 = vst [vmem:[%s4080_s28 + $0x8c8] sm:$0xff] %v1740_v39  ;;  %2982 = vst [vmem:[%s4080_s28 + $0x8d8] sm:$0xff] %v2413_v40  ;;  %v1744_v48 = vadd.f32 %v1743_v46, %v4073_v0  ;;  %v2417_v49 = vadd.f32 %v2416_v47, %v4075_v1 }
 0x236   : > { %2983 = vst [vmem:[%s4080_s28 + $0x8e0] sm:$0xff] %v1742_v44  ;;  %2985 = vst [vmem:[%s4080_s28 + $0x8f0] sm:$0xff] %v2415_v45  ;;  %2006 = vmatmul.mubr.bf16.gmra.mrb[248].mxu0 %v3768_v38  ;;  %2679 = vmatmul.mubr.bf16.gmra.mrb[248].mxu1 %v3768_v38 }
 0x237   : > { %2984 = vst [vmem:[%s4080_s28 + $0x8e8] sm:$0xff] %v1744_v48  ;;  %2986 = vst [vmem:[%s4080_s28 + $0x8f8] sm:$0xff] %v2417_v49  ;;  %2015 = vmatprep.mubr.bf16.mxu0 %v3769_v43  ;;  %2688 = vmatprep.mubr.bf16.mxu1 %v3769_v43 }
 0x239   : > { %v1747_v50 = vpop.f32.mrb[144].mxu0  ;;  %v2420_v51 = vpop.f32.mrb[144].mxu1 }
 0x23a   : > { %v1748_v52 = vadd.f32 %v1747_v50, %v4069_v62  ;;  %v2421_v53 = vadd.f32 %v2420_v51, %v4071_v63  ;;  %v1749_v54 = vpop.f32.mrb[145].mxu0  ;;  %v2422_v55 = vpop.f32.mrb[145].mxu1 }
 0x23b   : > { %v1750_v57 = vadd.f32 %v1749_v54, %v4073_v0  ;;  %v2423_v58 = vadd.f32 %v2422_v55, %v4075_v1  ;;  %v1751_v59 = vpop.f32.mrb[146].mxu0  ;;  %v2424_v60 = vpop.f32.mrb[146].mxu1 }
 0x23c   : > { %2987 = vst [vmem:[%s4080_s28 + $0x900] sm:$0xff] %v1748_v52  ;;  %2989 = vst [vmem:[%s4080_s28 + $0x910] sm:$0xff] %v2421_v53  ;;  %v1752_v61 = vadd.f32 %v1751_v59, %v4069_v62  ;;  %v2425_v2 = vadd.f32 %v2424_v60, %v4071_v63  ;;  %v1753_v3 = vpop.f32.mrb[147].mxu0  ;;  %v2426_v4 = vpop.f32.mrb[147].mxu1 }
 0x23d   : > { %2988 = vst [vmem:[%s4080_s28 + $0x908] sm:$0xff] %v1750_v57  ;;  %2990 = vst [vmem:[%s4080_s28 + $0x918] sm:$0xff] %v2423_v58  ;;  %v1754_v5 = vadd.f32 %v1753_v3, %v4073_v0  ;;  %v2427_v6 = vadd.f32 %v2426_v4, %v4075_v1 }
 0x23e   : > { %2991 = vst [vmem:[%s4080_s28 + $0x920] sm:$0xff] %v1752_v61  ;;  %2993 = vst [vmem:[%s4080_s28 + $0x930] sm:$0xff] %v2425_v2  ;;  %2016 = vmatmul.mubr.bf16.gmra.mrb[252].mxu0 %v3771_v56  ;;  %2689 = vmatmul.mubr.bf16.gmra.mrb[252].mxu1 %v3771_v56 }
 0x23f   : > { %2992 = vst [vmem:[%s4080_s28 + $0x928] sm:$0xff] %v1754_v5  ;;  %2994 = vst [vmem:[%s4080_s28 + $0x938] sm:$0xff] %v2427_v6 }
 0x241   : > { %v1757_v7 = vpop.f32.mrb[148].mxu0  ;;  %v2430_v8 = vpop.f32.mrb[148].mxu1 }
 0x242   : > { %v1758_v9 = vadd.f32 %v1757_v7, %v4069_v62  ;;  %v2431_v10 = vadd.f32 %v2430_v8, %v4071_v63  ;;  %v1759_v11 = vpop.f32.mrb[149].mxu0  ;;  %v2432_v12 = vpop.f32.mrb[149].mxu1 }
 0x243   : > { %v1760_v13 = vadd.f32 %v1759_v11, %v4073_v0  ;;  %v2433_v14 = vadd.f32 %v2432_v12, %v4075_v1  ;;  %v1761_v15 = vpop.f32.mrb[150].mxu0  ;;  %v2434_v16 = vpop.f32.mrb[150].mxu1 }
 0x244   : > { %2995 = vst [vmem:[%s4080_s28 + $0x940] sm:$0xff] %v1758_v9  ;;  %2997 = vst [vmem:[%s4080_s28 + $0x950] sm:$0xff] %v2431_v10  ;;  %v1762_v17 = vadd.f32 %v1761_v15, %v4069_v62  ;;  %v2435_v18 = vadd.f32 %v2434_v16, %v4071_v63  ;;  %v1763_v19 = vpop.f32.mrb[151].mxu0  ;;  %v2436_v20 = vpop.f32.mrb[151].mxu1 }
 0x245   : > { %2996 = vst [vmem:[%s4080_s28 + $0x948] sm:$0xff] %v1760_v13  ;;  %2998 = vst [vmem:[%s4080_s28 + $0x958] sm:$0xff] %v2433_v14  ;;  %v1764_v21 = vadd.f32 %v1763_v19, %v4073_v0  ;;  %v2437_v22 = vadd.f32 %v2436_v20, %v4075_v1 }
 0x246   : > { %2999 = vst [vmem:[%s4080_s28 + $0x960] sm:$0xff] %v1762_v17  ;;  %3001 = vst [vmem:[%s4080_s28 + $0x970] sm:$0xff] %v2435_v18 }
 0x247   : > { %3000 = vst [vmem:[%s4080_s28 + $0x968] sm:$0xff] %v1764_v21  ;;  %3002 = vst [vmem:[%s4080_s28 + $0x978] sm:$0xff] %v2437_v22 }
 0x249   : > { %v1767_v23 = vpop.f32.mrb[152].mxu0  ;;  %v2440_v24 = vpop.f32.mrb[152].mxu1 }
 0x24a   : > { %v1768_v25 = vadd.f32 %v1767_v23, %v4069_v62  ;;  %v2441_v26 = vadd.f32 %v2440_v24, %v4071_v63  ;;  %v1769_v27 = vpop.f32.mrb[153].mxu0  ;;  %v2442_v28 = vpop.f32.mrb[153].mxu1 }
 0x24b   : > { %v1770_v29 = vadd.f32 %v1769_v27, %v4073_v0  ;;  %v2443_v30 = vadd.f32 %v2442_v28, %v4075_v1  ;;  %v1771_v31 = vpop.f32.mrb[154].mxu0  ;;  %v2444_v32 = vpop.f32.mrb[154].mxu1 }
 0x24c   : > { %3003 = vst [vmem:[%s4080_s28 + $0x980] sm:$0xff] %v1768_v25  ;;  %3005 = vst [vmem:[%s4080_s28 + $0x990] sm:$0xff] %v2441_v26  ;;  %v1772_v33 = vadd.f32 %v1771_v31, %v4069_v62  ;;  %v2445_v34 = vadd.f32 %v2444_v32, %v4071_v63  ;;  %v1773_v35 = vpop.f32.mrb[155].mxu0  ;;  %v2446_v36 = vpop.f32.mrb[155].mxu1 }
 0x24d   : > { %3004 = vst [vmem:[%s4080_s28 + $0x988] sm:$0xff] %v1770_v29  ;;  %3006 = vst [vmem:[%s4080_s28 + $0x998] sm:$0xff] %v2443_v30  ;;  %v1774_v37 = vadd.f32 %v1773_v35, %v4073_v0  ;;  %v2447_v38 = vadd.f32 %v2446_v36, %v4075_v1 }
 0x24e   : > { %3007 = vst [vmem:[%s4080_s28 + $0x9a0] sm:$0xff] %v1772_v33  ;;  %3009 = vst [vmem:[%s4080_s28 + $0x9b0] sm:$0xff] %v2445_v34 }
 0x24f   : > { %3008 = vst [vmem:[%s4080_s28 + $0x9a8] sm:$0xff] %v1774_v37  ;;  %3010 = vst [vmem:[%s4080_s28 + $0x9b8] sm:$0xff] %v2447_v38 }
 0x251   : > { %v1777_v39 = vpop.f32.mrb[156].mxu0  ;;  %v2450_v40 = vpop.f32.mrb[156].mxu1 }
 0x252   : > { %v1778_v41 = vadd.f32 %v1777_v39, %v4069_v62  ;;  %v2451_v42 = vadd.f32 %v2450_v40, %v4071_v63  ;;  %v1779_v43 = vpop.f32.mrb[157].mxu0  ;;  %v2452_v44 = vpop.f32.mrb[157].mxu1 }
 0x253   : > { %v1780_v45 = vadd.f32 %v1779_v43, %v4073_v0  ;;  %v2453_v46 = vadd.f32 %v2452_v44, %v4075_v1  ;;  %v1781_v47 = vpop.f32.mrb[158].mxu0  ;;  %v2454_v48 = vpop.f32.mrb[158].mxu1 }
 0x254   : > { %3011 = vst [vmem:[%s4080_s28 + $0x9c0] sm:$0xff] %v1778_v41  ;;  %3013 = vst [vmem:[%s4080_s28 + $0x9d0] sm:$0xff] %v2451_v42  ;;  %v1782_v49 = vadd.f32 %v1781_v47, %v4069_v62  ;;  %v2455_v50 = vadd.f32 %v2454_v48, %v4071_v63  ;;  %v1783_v51 = vpop.f32.mrb[159].mxu0  ;;  %v2456_v52 = vpop.f32.mrb[159].mxu1 }
 0x255   : > { %3012 = vst [vmem:[%s4080_s28 + $0x9c8] sm:$0xff] %v1780_v45  ;;  %3014 = vst [vmem:[%s4080_s28 + $0x9d8] sm:$0xff] %v2453_v46  ;;  %v1784_v53 = vadd.f32 %v1783_v51, %v4073_v0  ;;  %v2457_v54 = vadd.f32 %v2456_v52, %v4075_v1 }
 0x256   : > { %3015 = vst [vmem:[%s4080_s28 + $0x9e0] sm:$0xff] %v1782_v49  ;;  %3017 = vst [vmem:[%s4080_s28 + $0x9f0] sm:$0xff] %v2455_v50 }
 0x257   : > { %3016 = vst [vmem:[%s4080_s28 + $0x9e8] sm:$0xff] %v1784_v53  ;;  %3018 = vst [vmem:[%s4080_s28 + $0x9f8] sm:$0xff] %v2457_v54 }
 0x259   : > { %v1787_v55 = vpop.f32.mrb[160].mxu0  ;;  %v2460_v56 = vpop.f32.mrb[160].mxu1 }
 0x25a   : > { %v1788_v57 = vadd.f32 %v1787_v55, %v4069_v62  ;;  %v2461_v58 = vadd.f32 %v2460_v56, %v4071_v63  ;;  %v1789_v59 = vpop.f32.mrb[161].mxu0  ;;  %v2462_v60 = vpop.f32.mrb[161].mxu1 }
 0x25b   : > { %v1790_v61 = vadd.f32 %v1789_v59, %v4073_v0  ;;  %v2463_v2 = vadd.f32 %v2462_v60, %v4075_v1  ;;  %v1791_v3 = vpop.f32.mrb[162].mxu0  ;;  %v2464_v4 = vpop.f32.mrb[162].mxu1 }
 0x25c   : > { %3019 = vst [vmem:[%s4080_s28 + $0xa00] sm:$0xff] %v1788_v57  ;;  %3021 = vst [vmem:[%s4080_s28 + $0xa10] sm:$0xff] %v2461_v58  ;;  %v1792_v5 = vadd.f32 %v1791_v3, %v4069_v62  ;;  %v2465_v6 = vadd.f32 %v2464_v4, %v4071_v63  ;;  %v1793_v7 = vpop.f32.mrb[163].mxu0  ;;  %v2466_v8 = vpop.f32.mrb[163].mxu1 }
 0x25d   : > { %3020 = vst [vmem:[%s4080_s28 + $0xa08] sm:$0xff] %v1790_v61  ;;  %3022 = vst [vmem:[%s4080_s28 + $0xa18] sm:$0xff] %v2463_v2  ;;  %v1794_v9 = vadd.f32 %v1793_v7, %v4073_v0  ;;  %v2467_v10 = vadd.f32 %v2466_v8, %v4075_v1 }
 0x25e   : > { %3023 = vst [vmem:[%s4080_s28 + $0xa20] sm:$0xff] %v1792_v5  ;;  %3025 = vst [vmem:[%s4080_s28 + $0xa30] sm:$0xff] %v2465_v6 }
 0x25f   : > { %3024 = vst [vmem:[%s4080_s28 + $0xa28] sm:$0xff] %v1794_v9  ;;  %3026 = vst [vmem:[%s4080_s28 + $0xa38] sm:$0xff] %v2467_v10 }
 0x261   : > { %v1797_v11 = vpop.f32.mrb[164].mxu0  ;;  %v2470_v12 = vpop.f32.mrb[164].mxu1 }
 0x262   : > { %v1798_v13 = vadd.f32 %v1797_v11, %v4069_v62  ;;  %v2471_v14 = vadd.f32 %v2470_v12, %v4071_v63  ;;  %v1799_v15 = vpop.f32.mrb[165].mxu0  ;;  %v2472_v16 = vpop.f32.mrb[165].mxu1 }
 0x263   : > { %v1800_v17 = vadd.f32 %v1799_v15, %v4073_v0  ;;  %v2473_v18 = vadd.f32 %v2472_v16, %v4075_v1  ;;  %v1801_v19 = vpop.f32.mrb[166].mxu0  ;;  %v2474_v20 = vpop.f32.mrb[166].mxu1 }
 0x264   : > { %3027 = vst [vmem:[%s4080_s28 + $0xa40] sm:$0xff] %v1798_v13  ;;  %3029 = vst [vmem:[%s4080_s28 + $0xa50] sm:$0xff] %v2471_v14  ;;  %v1802_v21 = vadd.f32 %v1801_v19, %v4069_v62  ;;  %v2475_v22 = vadd.f32 %v2474_v20, %v4071_v63  ;;  %v1803_v23 = vpop.f32.mrb[167].mxu0  ;;  %v2476_v24 = vpop.f32.mrb[167].mxu1 }
 0x265   : > { %3028 = vst [vmem:[%s4080_s28 + $0xa48] sm:$0xff] %v1800_v17  ;;  %3030 = vst [vmem:[%s4080_s28 + $0xa58] sm:$0xff] %v2473_v18  ;;  %v1804_v25 = vadd.f32 %v1803_v23, %v4073_v0  ;;  %v2477_v26 = vadd.f32 %v2476_v24, %v4075_v1 }
 0x266   : > { %3031 = vst [vmem:[%s4080_s28 + $0xa60] sm:$0xff] %v1802_v21  ;;  %3033 = vst [vmem:[%s4080_s28 + $0xa70] sm:$0xff] %v2475_v22 }
 0x267   : > { %3032 = vst [vmem:[%s4080_s28 + $0xa68] sm:$0xff] %v1804_v25  ;;  %3034 = vst [vmem:[%s4080_s28 + $0xa78] sm:$0xff] %v2477_v26 }
 0x269   : > { %v1807_v27 = vpop.f32.mrb[168].mxu0  ;;  %v2480_v28 = vpop.f32.mrb[168].mxu1 }
 0x26a   : > { %v1808_v29 = vadd.f32 %v1807_v27, %v4069_v62  ;;  %v2481_v30 = vadd.f32 %v2480_v28, %v4071_v63  ;;  %v1809_v31 = vpop.f32.mrb[169].mxu0  ;;  %v2482_v32 = vpop.f32.mrb[169].mxu1 }
 0x26b   : > { %v1810_v33 = vadd.f32 %v1809_v31, %v4073_v0  ;;  %v2483_v34 = vadd.f32 %v2482_v32, %v4075_v1  ;;  %v1811_v35 = vpop.f32.mrb[170].mxu0  ;;  %v2484_v36 = vpop.f32.mrb[170].mxu1 }
 0x26c   : > { %3035 = vst [vmem:[%s4080_s28 + $0xa80] sm:$0xff] %v1808_v29  ;;  %3037 = vst [vmem:[%s4080_s28 + $0xa90] sm:$0xff] %v2481_v30  ;;  %v1812_v37 = vadd.f32 %v1811_v35, %v4069_v62  ;;  %v2485_v38 = vadd.f32 %v2484_v36, %v4071_v63  ;;  %v1813_v39 = vpop.f32.mrb[171].mxu0  ;;  %v2486_v40 = vpop.f32.mrb[171].mxu1 }
 0x26d   : > { %3036 = vst [vmem:[%s4080_s28 + $0xa88] sm:$0xff] %v1810_v33  ;;  %3038 = vst [vmem:[%s4080_s28 + $0xa98] sm:$0xff] %v2483_v34  ;;  %v1814_v41 = vadd.f32 %v1813_v39, %v4073_v0  ;;  %v2487_v42 = vadd.f32 %v2486_v40, %v4075_v1 }
 0x26e   : > { %3039 = vst [vmem:[%s4080_s28 + $0xaa0] sm:$0xff] %v1812_v37  ;;  %3041 = vst [vmem:[%s4080_s28 + $0xab0] sm:$0xff] %v2485_v38 }
 0x26f   : > { %3040 = vst [vmem:[%s4080_s28 + $0xaa8] sm:$0xff] %v1814_v41  ;;  %3042 = vst [vmem:[%s4080_s28 + $0xab8] sm:$0xff] %v2487_v42 }
 0x271   : > { %v1817_v43 = vpop.f32.mrb[172].mxu0  ;;  %v2490_v44 = vpop.f32.mrb[172].mxu1 }
 0x272   : > { %v1818_v45 = vadd.f32 %v1817_v43, %v4069_v62  ;;  %v2491_v46 = vadd.f32 %v2490_v44, %v4071_v63  ;;  %v1819_v47 = vpop.f32.mrb[173].mxu0  ;;  %v2492_v48 = vpop.f32.mrb[173].mxu1 }
 0x273   : > { %v1820_v49 = vadd.f32 %v1819_v47, %v4073_v0  ;;  %v2493_v50 = vadd.f32 %v2492_v48, %v4075_v1  ;;  %v1821_v51 = vpop.f32.mrb[174].mxu0  ;;  %v2494_v52 = vpop.f32.mrb[174].mxu1 }
 0x274   : > { %3043 = vst [vmem:[%s4080_s28 + $0xac0] sm:$0xff] %v1818_v45  ;;  %3045 = vst [vmem:[%s4080_s28 + $0xad0] sm:$0xff] %v2491_v46  ;;  %v1822_v53 = vadd.f32 %v1821_v51, %v4069_v62  ;;  %v2495_v54 = vadd.f32 %v2494_v52, %v4071_v63  ;;  %v1823_v55 = vpop.f32.mrb[175].mxu0  ;;  %v2496_v56 = vpop.f32.mrb[175].mxu1 }
 0x275   : > { %3044 = vst [vmem:[%s4080_s28 + $0xac8] sm:$0xff] %v1820_v49  ;;  %3046 = vst [vmem:[%s4080_s28 + $0xad8] sm:$0xff] %v2493_v50  ;;  %v1824_v57 = vadd.f32 %v1823_v55, %v4073_v0  ;;  %v2497_v58 = vadd.f32 %v2496_v56, %v4075_v1 }
 0x276   : > { %3047 = vst [vmem:[%s4080_s28 + $0xae0] sm:$0xff] %v1822_v53  ;;  %3049 = vst [vmem:[%s4080_s28 + $0xaf0] sm:$0xff] %v2495_v54 }
 0x277   : > { %3048 = vst [vmem:[%s4080_s28 + $0xae8] sm:$0xff] %v1824_v57  ;;  %3050 = vst [vmem:[%s4080_s28 + $0xaf8] sm:$0xff] %v2497_v58 }
 0x279   : > { %v1827_v59 = vpop.f32.mrb[176].mxu0  ;;  %v2500_v60 = vpop.f32.mrb[176].mxu1 }
 0x27a   : > { %v1828_v61 = vadd.f32 %v1827_v59, %v4069_v62  ;;  %v2501_v2 = vadd.f32 %v2500_v60, %v4071_v63  ;;  %v1829_v3 = vpop.f32.mrb[177].mxu0  ;;  %v2502_v4 = vpop.f32.mrb[177].mxu1 }
 0x27b   : > { %v1830_v5 = vadd.f32 %v1829_v3, %v4073_v0  ;;  %v2503_v6 = vadd.f32 %v2502_v4, %v4075_v1  ;;  %v1831_v7 = vpop.f32.mrb[178].mxu0  ;;  %v2504_v8 = vpop.f32.mrb[178].mxu1 }
 0x27c   : > { %3051 = vst [vmem:[%s4080_s28 + $0xb00] sm:$0xff] %v1828_v61  ;;  %3053 = vst [vmem:[%s4080_s28 + $0xb10] sm:$0xff] %v2501_v2  ;;  %v1832_v9 = vadd.f32 %v1831_v7, %v4069_v62  ;;  %v2505_v10 = vadd.f32 %v2504_v8, %v4071_v63  ;;  %v1833_v11 = vpop.f32.mrb[179].mxu0  ;;  %v2506_v12 = vpop.f32.mrb[179].mxu1 }
 0x27d   : > { %3052 = vst [vmem:[%s4080_s28 + $0xb08] sm:$0xff] %v1830_v5  ;;  %3054 = vst [vmem:[%s4080_s28 + $0xb18] sm:$0xff] %v2503_v6  ;;  %v1834_v13 = vadd.f32 %v1833_v11, %v4073_v0  ;;  %v2507_v14 = vadd.f32 %v2506_v12, %v4075_v1 }
 0x27e   : > { %3055 = vst [vmem:[%s4080_s28 + $0xb20] sm:$0xff] %v1832_v9  ;;  %3057 = vst [vmem:[%s4080_s28 + $0xb30] sm:$0xff] %v2505_v10 }
 0x27f   : > { %3056 = vst [vmem:[%s4080_s28 + $0xb28] sm:$0xff] %v1834_v13  ;;  %3058 = vst [vmem:[%s4080_s28 + $0xb38] sm:$0xff] %v2507_v14 }
 0x281   : > { %v1837_v15 = vpop.f32.mrb[180].mxu0  ;;  %v2510_v16 = vpop.f32.mrb[180].mxu1 }
 0x282   : > { %v1838_v17 = vadd.f32 %v1837_v15, %v4069_v62  ;;  %v2511_v18 = vadd.f32 %v2510_v16, %v4071_v63  ;;  %v1839_v19 = vpop.f32.mrb[181].mxu0  ;;  %v2512_v20 = vpop.f32.mrb[181].mxu1 }
 0x283   : > { %v1840_v21 = vadd.f32 %v1839_v19, %v4073_v0  ;;  %v2513_v22 = vadd.f32 %v2512_v20, %v4075_v1  ;;  %v1841_v23 = vpop.f32.mrb[182].mxu0  ;;  %v2514_v24 = vpop.f32.mrb[182].mxu1 }
 0x284   : > { %3059 = vst [vmem:[%s4080_s28 + $0xb40] sm:$0xff] %v1838_v17  ;;  %3061 = vst [vmem:[%s4080_s28 + $0xb50] sm:$0xff] %v2511_v18  ;;  %v1842_v25 = vadd.f32 %v1841_v23, %v4069_v62  ;;  %v2515_v26 = vadd.f32 %v2514_v24, %v4071_v63  ;;  %v1843_v27 = vpop.f32.mrb[183].mxu0  ;;  %v2516_v28 = vpop.f32.mrb[183].mxu1 }
 0x285   : > { %3060 = vst [vmem:[%s4080_s28 + $0xb48] sm:$0xff] %v1840_v21  ;;  %3062 = vst [vmem:[%s4080_s28 + $0xb58] sm:$0xff] %v2513_v22  ;;  %v1844_v29 = vadd.f32 %v1843_v27, %v4073_v0  ;;  %v2517_v30 = vadd.f32 %v2516_v28, %v4075_v1 }
 0x286   : > { %3063 = vst [vmem:[%s4080_s28 + $0xb60] sm:$0xff] %v1842_v25  ;;  %3065 = vst [vmem:[%s4080_s28 + $0xb70] sm:$0xff] %v2515_v26 }
 0x287   : > { %3064 = vst [vmem:[%s4080_s28 + $0xb68] sm:$0xff] %v1844_v29  ;;  %3066 = vst [vmem:[%s4080_s28 + $0xb78] sm:$0xff] %v2517_v30 }
 0x289   : > { %v1847_v31 = vpop.f32.mrb[184].mxu0  ;;  %v2520_v32 = vpop.f32.mrb[184].mxu1 }
 0x28a   : > { %v1848_v33 = vadd.f32 %v1847_v31, %v4069_v62  ;;  %v2521_v34 = vadd.f32 %v2520_v32, %v4071_v63  ;;  %v1849_v35 = vpop.f32.mrb[185].mxu0  ;;  %v2522_v36 = vpop.f32.mrb[185].mxu1 }
 0x28b   : > { %v1850_v37 = vadd.f32 %v1849_v35, %v4073_v0  ;;  %v2523_v38 = vadd.f32 %v2522_v36, %v4075_v1  ;;  %v1851_v39 = vpop.f32.mrb[186].mxu0  ;;  %v2524_v40 = vpop.f32.mrb[186].mxu1 }
 0x28c   : > { %3067 = vst [vmem:[%s4080_s28 + $0xb80] sm:$0xff] %v1848_v33  ;;  %3069 = vst [vmem:[%s4080_s28 + $0xb90] sm:$0xff] %v2521_v34  ;;  %v1852_v41 = vadd.f32 %v1851_v39, %v4069_v62  ;;  %v2525_v42 = vadd.f32 %v2524_v40, %v4071_v63  ;;  %v1853_v43 = vpop.f32.mrb[187].mxu0  ;;  %v2526_v44 = vpop.f32.mrb[187].mxu1 }
 0x28d   : > { %3068 = vst [vmem:[%s4080_s28 + $0xb88] sm:$0xff] %v1850_v37  ;;  %3070 = vst [vmem:[%s4080_s28 + $0xb98] sm:$0xff] %v2523_v38  ;;  %v1854_v45 = vadd.f32 %v1853_v43, %v4073_v0  ;;  %v2527_v46 = vadd.f32 %v2526_v44, %v4075_v1 }
 0x28e   : > { %3071 = vst [vmem:[%s4080_s28 + $0xba0] sm:$0xff] %v1852_v41  ;;  %3073 = vst [vmem:[%s4080_s28 + $0xbb0] sm:$0xff] %v2525_v42 }
 0x28f   : > { %3072 = vst [vmem:[%s4080_s28 + $0xba8] sm:$0xff] %v1854_v45  ;;  %3074 = vst [vmem:[%s4080_s28 + $0xbb8] sm:$0xff] %v2527_v46 }
 0x291   : > { %v1857_v47 = vpop.f32.mrb[188].mxu0  ;;  %v2530_v48 = vpop.f32.mrb[188].mxu1 }
 0x292   : > { %v1858_v49 = vadd.f32 %v1857_v47, %v4069_v62  ;;  %v2531_v50 = vadd.f32 %v2530_v48, %v4071_v63  ;;  %v1859_v51 = vpop.f32.mrb[189].mxu0  ;;  %v2532_v52 = vpop.f32.mrb[189].mxu1 }
 0x293   : > { %v1860_v53 = vadd.f32 %v1859_v51, %v4073_v0  ;;  %v2533_v54 = vadd.f32 %v2532_v52, %v4075_v1  ;;  %v1861_v55 = vpop.f32.mrb[190].mxu0  ;;  %v2534_v56 = vpop.f32.mrb[190].mxu1 }
 0x294   : > { %3075 = vst [vmem:[%s4080_s28 + $0xbc0] sm:$0xff] %v1858_v49  ;;  %3077 = vst [vmem:[%s4080_s28 + $0xbd0] sm:$0xff] %v2531_v50  ;;  %v1862_v57 = vadd.f32 %v1861_v55, %v4069_v62  ;;  %v2535_v58 = vadd.f32 %v2534_v56, %v4071_v63  ;;  %v1863_v59 = vpop.f32.mrb[191].mxu0  ;;  %v2536_v60 = vpop.f32.mrb[191].mxu1 }
 0x295   : > { %3076 = vst [vmem:[%s4080_s28 + $0xbc8] sm:$0xff] %v1860_v53  ;;  %3078 = vst [vmem:[%s4080_s28 + $0xbd8] sm:$0xff] %v2533_v54  ;;  %v1864_v61 = vadd.f32 %v1863_v59, %v4073_v0  ;;  %v2537_v2 = vadd.f32 %v2536_v60, %v4075_v1 }
 0x296   : > { %3079 = vst [vmem:[%s4080_s28 + $0xbe0] sm:$0xff] %v1862_v57  ;;  %3081 = vst [vmem:[%s4080_s28 + $0xbf0] sm:$0xff] %v2535_v58 }
 0x297   : > { %3080 = vst [vmem:[%s4080_s28 + $0xbe8] sm:$0xff] %v1864_v61  ;;  %3082 = vst [vmem:[%s4080_s28 + $0xbf8] sm:$0xff] %v2537_v2 }
 0x299   : > { %v1867_v3 = vpop.f32.mrb[192].mxu0  ;;  %v2540_v4 = vpop.f32.mrb[192].mxu1 }
 0x29a   : > { %v1868_v5 = vadd.f32 %v1867_v3, %v4069_v62  ;;  %v2541_v6 = vadd.f32 %v2540_v4, %v4071_v63  ;;  %v1869_v7 = vpop.f32.mrb[193].mxu0  ;;  %v2542_v8 = vpop.f32.mrb[193].mxu1 }
 0x29b   : > { %v1870_v9 = vadd.f32 %v1869_v7, %v4073_v0  ;;  %v2543_v10 = vadd.f32 %v2542_v8, %v4075_v1  ;;  %v1871_v11 = vpop.f32.mrb[194].mxu0  ;;  %v2544_v12 = vpop.f32.mrb[194].mxu1 }
 0x29c   : > { %3083 = vst [vmem:[%s4080_s28 + $0xc00] sm:$0xff] %v1868_v5  ;;  %3085 = vst [vmem:[%s4080_s28 + $0xc10] sm:$0xff] %v2541_v6  ;;  %v1872_v13 = vadd.f32 %v1871_v11, %v4069_v62  ;;  %v2545_v14 = vadd.f32 %v2544_v12, %v4071_v63  ;;  %v1873_v15 = vpop.f32.mrb[195].mxu0  ;;  %v2546_v16 = vpop.f32.mrb[195].mxu1 }
 0x29d   : > { %3084 = vst [vmem:[%s4080_s28 + $0xc08] sm:$0xff] %v1870_v9  ;;  %3086 = vst [vmem:[%s4080_s28 + $0xc18] sm:$0xff] %v2543_v10  ;;  %v1874_v17 = vadd.f32 %v1873_v15, %v4073_v0  ;;  %v2547_v18 = vadd.f32 %v2546_v16, %v4075_v1 }
 0x29e   : > { %3087 = vst [vmem:[%s4080_s28 + $0xc20] sm:$0xff] %v1872_v13  ;;  %3089 = vst [vmem:[%s4080_s28 + $0xc30] sm:$0xff] %v2545_v14 }
 0x29f   : > { %3088 = vst [vmem:[%s4080_s28 + $0xc28] sm:$0xff] %v1874_v17  ;;  %3090 = vst [vmem:[%s4080_s28 + $0xc38] sm:$0xff] %v2547_v18 }
 0x2a1   : > { %v1877_v19 = vpop.f32.mrb[196].mxu0  ;;  %v2550_v20 = vpop.f32.mrb[196].mxu1 }
 0x2a2   : > { %v1878_v21 = vadd.f32 %v1877_v19, %v4069_v62  ;;  %v2551_v22 = vadd.f32 %v2550_v20, %v4071_v63  ;;  %v1879_v23 = vpop.f32.mrb[197].mxu0  ;;  %v2552_v24 = vpop.f32.mrb[197].mxu1 }
 0x2a3   : > { %v1880_v25 = vadd.f32 %v1879_v23, %v4073_v0  ;;  %v2553_v26 = vadd.f32 %v2552_v24, %v4075_v1  ;;  %v1881_v27 = vpop.f32.mrb[198].mxu0  ;;  %v2554_v28 = vpop.f32.mrb[198].mxu1 }
 0x2a4   : > { %3091 = vst [vmem:[%s4080_s28 + $0xc40] sm:$0xff] %v1878_v21  ;;  %3093 = vst [vmem:[%s4080_s28 + $0xc50] sm:$0xff] %v2551_v22  ;;  %v1882_v29 = vadd.f32 %v1881_v27, %v4069_v62  ;;  %v2555_v30 = vadd.f32 %v2554_v28, %v4071_v63  ;;  %v1883_v31 = vpop.f32.mrb[199].mxu0  ;;  %v2556_v32 = vpop.f32.mrb[199].mxu1 }
 0x2a5   : > { %3092 = vst [vmem:[%s4080_s28 + $0xc48] sm:$0xff] %v1880_v25  ;;  %3094 = vst [vmem:[%s4080_s28 + $0xc58] sm:$0xff] %v2553_v26  ;;  %v1884_v33 = vadd.f32 %v1883_v31, %v4073_v0  ;;  %v2557_v34 = vadd.f32 %v2556_v32, %v4075_v1 }
 0x2a6   : > { %3095 = vst [vmem:[%s4080_s28 + $0xc60] sm:$0xff] %v1882_v29  ;;  %3097 = vst [vmem:[%s4080_s28 + $0xc70] sm:$0xff] %v2555_v30 }
 0x2a7   : > { %3096 = vst [vmem:[%s4080_s28 + $0xc68] sm:$0xff] %v1884_v33  ;;  %3098 = vst [vmem:[%s4080_s28 + $0xc78] sm:$0xff] %v2557_v34 }
 0x2a9   : > { %v1887_v35 = vpop.f32.mrb[200].mxu0  ;;  %v2560_v36 = vpop.f32.mrb[200].mxu1 }
 0x2aa   : > { %v1888_v37 = vadd.f32 %v1887_v35, %v4069_v62  ;;  %v2561_v38 = vadd.f32 %v2560_v36, %v4071_v63  ;;  %v1889_v39 = vpop.f32.mrb[201].mxu0  ;;  %v2562_v40 = vpop.f32.mrb[201].mxu1 }
 0x2ab   : > { %v1890_v41 = vadd.f32 %v1889_v39, %v4073_v0  ;;  %v2563_v42 = vadd.f32 %v2562_v40, %v4075_v1  ;;  %v1891_v43 = vpop.f32.mrb[202].mxu0  ;;  %v2564_v44 = vpop.f32.mrb[202].mxu1 }
 0x2ac   : > { %3099 = vst [vmem:[%s4080_s28 + $0xc80] sm:$0xff] %v1888_v37  ;;  %3101 = vst [vmem:[%s4080_s28 + $0xc90] sm:$0xff] %v2561_v38  ;;  %v1892_v45 = vadd.f32 %v1891_v43, %v4069_v62  ;;  %v2565_v46 = vadd.f32 %v2564_v44, %v4071_v63  ;;  %v1893_v47 = vpop.f32.mrb[203].mxu0  ;;  %v2566_v48 = vpop.f32.mrb[203].mxu1 }
 0x2ad   : > { %3100 = vst [vmem:[%s4080_s28 + $0xc88] sm:$0xff] %v1890_v41  ;;  %3102 = vst [vmem:[%s4080_s28 + $0xc98] sm:$0xff] %v2563_v42  ;;  %v1894_v49 = vadd.f32 %v1893_v47, %v4073_v0  ;;  %v2567_v50 = vadd.f32 %v2566_v48, %v4075_v1 }
 0x2ae   : > { %3103 = vst [vmem:[%s4080_s28 + $0xca0] sm:$0xff] %v1892_v45  ;;  %3105 = vst [vmem:[%s4080_s28 + $0xcb0] sm:$0xff] %v2565_v46 }
 0x2af   : > { %3104 = vst [vmem:[%s4080_s28 + $0xca8] sm:$0xff] %v1894_v49  ;;  %3106 = vst [vmem:[%s4080_s28 + $0xcb8] sm:$0xff] %v2567_v50 }
 0x2b1   : > { %v1897_v51 = vpop.f32.mrb[204].mxu0  ;;  %v2570_v52 = vpop.f32.mrb[204].mxu1 }
 0x2b2   : > { %v1898_v53 = vadd.f32 %v1897_v51, %v4069_v62  ;;  %v2571_v54 = vadd.f32 %v2570_v52, %v4071_v63  ;;  %v1899_v55 = vpop.f32.mrb[205].mxu0  ;;  %v2572_v56 = vpop.f32.mrb[205].mxu1 }
 0x2b3   : > { %v1900_v57 = vadd.f32 %v1899_v55, %v4073_v0  ;;  %v2573_v58 = vadd.f32 %v2572_v56, %v4075_v1  ;;  %v1901_v59 = vpop.f32.mrb[206].mxu0  ;;  %v2574_v60 = vpop.f32.mrb[206].mxu1 }
 0x2b4   : > { %3107 = vst [vmem:[%s4080_s28 + $0xcc0] sm:$0xff] %v1898_v53  ;;  %3109 = vst [vmem:[%s4080_s28 + $0xcd0] sm:$0xff] %v2571_v54  ;;  %v1902_v61 = vadd.f32 %v1901_v59, %v4069_v62  ;;  %v2575_v2 = vadd.f32 %v2574_v60, %v4071_v63  ;;  %v1903_v3 = vpop.f32.mrb[207].mxu0  ;;  %v2576_v4 = vpop.f32.mrb[207].mxu1 }
 0x2b5   : > { %3108 = vst [vmem:[%s4080_s28 + $0xcc8] sm:$0xff] %v1900_v57  ;;  %3110 = vst [vmem:[%s4080_s28 + $0xcd8] sm:$0xff] %v2573_v58  ;;  %v1904_v5 = vadd.f32 %v1903_v3, %v4073_v0  ;;  %v2577_v6 = vadd.f32 %v2576_v4, %v4075_v1 }
 0x2b6   : > { %3111 = vst [vmem:[%s4080_s28 + $0xce0] sm:$0xff] %v1902_v61  ;;  %3113 = vst [vmem:[%s4080_s28 + $0xcf0] sm:$0xff] %v2575_v2 }
 0x2b7   : > { %3112 = vst [vmem:[%s4080_s28 + $0xce8] sm:$0xff] %v1904_v5  ;;  %3114 = vst [vmem:[%s4080_s28 + $0xcf8] sm:$0xff] %v2577_v6 }
 0x2b9   : > { %v1907_v7 = vpop.f32.mrb[208].mxu0  ;;  %v2580_v8 = vpop.f32.mrb[208].mxu1 }
 0x2ba   : > { %v1908_v9 = vadd.f32 %v1907_v7, %v4069_v62  ;;  %v2581_v10 = vadd.f32 %v2580_v8, %v4071_v63  ;;  %v1909_v11 = vpop.f32.mrb[209].mxu0  ;;  %v2582_v12 = vpop.f32.mrb[209].mxu1 }
 0x2bb   : > { %v1910_v13 = vadd.f32 %v1909_v11, %v4073_v0  ;;  %v2583_v14 = vadd.f32 %v2582_v12, %v4075_v1  ;;  %v1911_v15 = vpop.f32.mrb[210].mxu0  ;;  %v2584_v16 = vpop.f32.mrb[210].mxu1 }
 0x2bc   : > { %3115 = vst [vmem:[%s4080_s28 + $0xd00] sm:$0xff] %v1908_v9  ;;  %3117 = vst [vmem:[%s4080_s28 + $0xd10] sm:$0xff] %v2581_v10  ;;  %v1912_v17 = vadd.f32 %v1911_v15, %v4069_v62  ;;  %v2585_v18 = vadd.f32 %v2584_v16, %v4071_v63  ;;  %v1913_v19 = vpop.f32.mrb[211].mxu0  ;;  %v2586_v20 = vpop.f32.mrb[211].mxu1 }
 0x2bd   : > { %3116 = vst [vmem:[%s4080_s28 + $0xd08] sm:$0xff] %v1910_v13  ;;  %3118 = vst [vmem:[%s4080_s28 + $0xd18] sm:$0xff] %v2583_v14  ;;  %v1914_v21 = vadd.f32 %v1913_v19, %v4073_v0  ;;  %v2587_v22 = vadd.f32 %v2586_v20, %v4075_v1 }
 0x2be   : > { %3119 = vst [vmem:[%s4080_s28 + $0xd20] sm:$0xff] %v1912_v17  ;;  %3121 = vst [vmem:[%s4080_s28 + $0xd30] sm:$0xff] %v2585_v18 }
 0x2bf   : > { %3120 = vst [vmem:[%s4080_s28 + $0xd28] sm:$0xff] %v1914_v21  ;;  %3122 = vst [vmem:[%s4080_s28 + $0xd38] sm:$0xff] %v2587_v22 }
 0x2c1   : > { %v1917_v23 = vpop.f32.mrb[212].mxu0  ;;  %v2590_v24 = vpop.f32.mrb[212].mxu1 }
 0x2c2   : > { %v1918_v25 = vadd.f32 %v1917_v23, %v4069_v62  ;;  %v2591_v26 = vadd.f32 %v2590_v24, %v4071_v63  ;;  %v1919_v27 = vpop.f32.mrb[213].mxu0  ;;  %v2592_v28 = vpop.f32.mrb[213].mxu1 }
 0x2c3   : > { %v1920_v29 = vadd.f32 %v1919_v27, %v4073_v0  ;;  %v2593_v30 = vadd.f32 %v2592_v28, %v4075_v1  ;;  %v1921_v31 = vpop.f32.mrb[214].mxu0  ;;  %v2594_v32 = vpop.f32.mrb[214].mxu1 }
 0x2c4   : > { %3123 = vst [vmem:[%s4080_s28 + $0xd40] sm:$0xff] %v1918_v25  ;;  %3125 = vst [vmem:[%s4080_s28 + $0xd50] sm:$0xff] %v2591_v26  ;;  %v1922_v33 = vadd.f32 %v1921_v31, %v4069_v62  ;;  %v2595_v34 = vadd.f32 %v2594_v32, %v4071_v63  ;;  %v1923_v35 = vpop.f32.mrb[215].mxu0  ;;  %v2596_v36 = vpop.f32.mrb[215].mxu1 }
 0x2c5   : > { %3124 = vst [vmem:[%s4080_s28 + $0xd48] sm:$0xff] %v1920_v29  ;;  %3126 = vst [vmem:[%s4080_s28 + $0xd58] sm:$0xff] %v2593_v30  ;;  %v1924_v37 = vadd.f32 %v1923_v35, %v4073_v0  ;;  %v2597_v38 = vadd.f32 %v2596_v36, %v4075_v1 }
 0x2c6   : > { %3127 = vst [vmem:[%s4080_s28 + $0xd60] sm:$0xff] %v1922_v33  ;;  %3129 = vst [vmem:[%s4080_s28 + $0xd70] sm:$0xff] %v2595_v34 }
 0x2c7   : > { %3128 = vst [vmem:[%s4080_s28 + $0xd68] sm:$0xff] %v1924_v37  ;;  %3130 = vst [vmem:[%s4080_s28 + $0xd78] sm:$0xff] %v2597_v38 }
 0x2c9   : > { %v1927_v39 = vpop.f32.mrb[216].mxu0  ;;  %v2600_v40 = vpop.f32.mrb[216].mxu1 }
 0x2ca   : > { %v1928_v41 = vadd.f32 %v1927_v39, %v4069_v62  ;;  %v2601_v42 = vadd.f32 %v2600_v40, %v4071_v63  ;;  %v1929_v43 = vpop.f32.mrb[217].mxu0  ;;  %v2602_v44 = vpop.f32.mrb[217].mxu1 }
 0x2cb   : > { %v1930_v45 = vadd.f32 %v1929_v43, %v4073_v0  ;;  %v2603_v46 = vadd.f32 %v2602_v44, %v4075_v1  ;;  %v1931_v47 = vpop.f32.mrb[218].mxu0  ;;  %v2604_v48 = vpop.f32.mrb[218].mxu1 }
 0x2cc   : > { %3131 = vst [vmem:[%s4080_s28 + $0xd80] sm:$0xff] %v1928_v41  ;;  %3133 = vst [vmem:[%s4080_s28 + $0xd90] sm:$0xff] %v2601_v42  ;;  %v1932_v49 = vadd.f32 %v1931_v47, %v4069_v62  ;;  %v2605_v50 = vadd.f32 %v2604_v48, %v4071_v63  ;;  %v1933_v51 = vpop.f32.mrb[219].mxu0  ;;  %v2606_v52 = vpop.f32.mrb[219].mxu1 }
 0x2cd   : > { %3132 = vst [vmem:[%s4080_s28 + $0xd88] sm:$0xff] %v1930_v45  ;;  %3134 = vst [vmem:[%s4080_s28 + $0xd98] sm:$0xff] %v2603_v46  ;;  %v1934_v53 = vadd.f32 %v1933_v51, %v4073_v0  ;;  %v2607_v54 = vadd.f32 %v2606_v52, %v4075_v1 }
 0x2ce   : > { %3135 = vst [vmem:[%s4080_s28 + $0xda0] sm:$0xff] %v1932_v49  ;;  %3137 = vst [vmem:[%s4080_s28 + $0xdb0] sm:$0xff] %v2605_v50 }
 0x2cf   : > { %3136 = vst [vmem:[%s4080_s28 + $0xda8] sm:$0xff] %v1934_v53  ;;  %3138 = vst [vmem:[%s4080_s28 + $0xdb8] sm:$0xff] %v2607_v54 }
 0x2d1   : > { %v1937_v55 = vpop.f32.mrb[220].mxu0  ;;  %v2610_v56 = vpop.f32.mrb[220].mxu1 }
 0x2d2   : > { %v1938_v57 = vadd.f32 %v1937_v55, %v4069_v62  ;;  %v2611_v58 = vadd.f32 %v2610_v56, %v4071_v63  ;;  %v1939_v59 = vpop.f32.mrb[221].mxu0  ;;  %v2612_v60 = vpop.f32.mrb[221].mxu1 }
 0x2d3   : > { %v1940_v61 = vadd.f32 %v1939_v59, %v4073_v0  ;;  %v2613_v2 = vadd.f32 %v2612_v60, %v4075_v1  ;;  %v1941_v3 = vpop.f32.mrb[222].mxu0  ;;  %v2614_v4 = vpop.f32.mrb[222].mxu1 }
 0x2d4   : > { %3139 = vst [vmem:[%s4080_s28 + $0xdc0] sm:$0xff] %v1938_v57  ;;  %3141 = vst [vmem:[%s4080_s28 + $0xdd0] sm:$0xff] %v2611_v58  ;;  %v1942_v5 = vadd.f32 %v1941_v3, %v4069_v62  ;;  %v2615_v6 = vadd.f32 %v2614_v4, %v4071_v63  ;;  %v1943_v7 = vpop.f32.mrb[223].mxu0  ;;  %v2616_v8 = vpop.f32.mrb[223].mxu1 }
 0x2d5   : > { %3140 = vst [vmem:[%s4080_s28 + $0xdc8] sm:$0xff] %v1940_v61  ;;  %3142 = vst [vmem:[%s4080_s28 + $0xdd8] sm:$0xff] %v2613_v2  ;;  %v1944_v9 = vadd.f32 %v1943_v7, %v4073_v0  ;;  %v2617_v10 = vadd.f32 %v2616_v8, %v4075_v1 }
 0x2d6   : > { %3143 = vst [vmem:[%s4080_s28 + $0xde0] sm:$0xff] %v1942_v5  ;;  %3145 = vst [vmem:[%s4080_s28 + $0xdf0] sm:$0xff] %v2615_v6 }
 0x2d7   : > { %3144 = vst [vmem:[%s4080_s28 + $0xde8] sm:$0xff] %v1944_v9  ;;  %3146 = vst [vmem:[%s4080_s28 + $0xdf8] sm:$0xff] %v2617_v10 }
 0x2d9   : > { %v1947_v11 = vpop.f32.mrb[224].mxu0  ;;  %v2620_v12 = vpop.f32.mrb[224].mxu1 }
 0x2da   : > { %v1948_v13 = vadd.f32 %v1947_v11, %v4069_v62  ;;  %v2621_v14 = vadd.f32 %v2620_v12, %v4071_v63  ;;  %v1949_v15 = vpop.f32.mrb[225].mxu0  ;;  %v2622_v16 = vpop.f32.mrb[225].mxu1 }
 0x2db   : > { %v1950_v17 = vadd.f32 %v1949_v15, %v4073_v0  ;;  %v2623_v18 = vadd.f32 %v2622_v16, %v4075_v1  ;;  %v1951_v19 = vpop.f32.mrb[226].mxu0  ;;  %v2624_v20 = vpop.f32.mrb[226].mxu1 }
 0x2dc   : > { %3147 = vst [vmem:[%s4080_s28 + $0xe00] sm:$0xff] %v1948_v13  ;;  %3149 = vst [vmem:[%s4080_s28 + $0xe10] sm:$0xff] %v2621_v14  ;;  %v1952_v21 = vadd.f32 %v1951_v19, %v4069_v62  ;;  %v2625_v22 = vadd.f32 %v2624_v20, %v4071_v63  ;;  %v1953_v23 = vpop.f32.mrb[227].mxu0  ;;  %v2626_v24 = vpop.f32.mrb[227].mxu1 }
 0x2dd   : > { %3148 = vst [vmem:[%s4080_s28 + $0xe08] sm:$0xff] %v1950_v17  ;;  %3150 = vst [vmem:[%s4080_s28 + $0xe18] sm:$0xff] %v2623_v18  ;;  %v1954_v25 = vadd.f32 %v1953_v23, %v4073_v0  ;;  %v2627_v26 = vadd.f32 %v2626_v24, %v4075_v1 }
 0x2de   : > { %3151 = vst [vmem:[%s4080_s28 + $0xe20] sm:$0xff] %v1952_v21  ;;  %3153 = vst [vmem:[%s4080_s28 + $0xe30] sm:$0xff] %v2625_v22 }
 0x2df   : > { %3152 = vst [vmem:[%s4080_s28 + $0xe28] sm:$0xff] %v1954_v25  ;;  %3154 = vst [vmem:[%s4080_s28 + $0xe38] sm:$0xff] %v2627_v26 }
 0x2e1   : > { %v1957_v27 = vpop.f32.mrb[228].mxu0  ;;  %v2630_v28 = vpop.f32.mrb[228].mxu1 }
 0x2e2   : > { %v1958_v29 = vadd.f32 %v1957_v27, %v4069_v62  ;;  %v2631_v30 = vadd.f32 %v2630_v28, %v4071_v63  ;;  %v1959_v31 = vpop.f32.mrb[229].mxu0  ;;  %v2632_v32 = vpop.f32.mrb[229].mxu1 }
 0x2e3   : > { %v1960_v33 = vadd.f32 %v1959_v31, %v4073_v0  ;;  %v2633_v34 = vadd.f32 %v2632_v32, %v4075_v1  ;;  %v1961_v35 = vpop.f32.mrb[230].mxu0  ;;  %v2634_v36 = vpop.f32.mrb[230].mxu1 }
 0x2e4   : > { %3155 = vst [vmem:[%s4080_s28 + $0xe40] sm:$0xff] %v1958_v29  ;;  %3157 = vst [vmem:[%s4080_s28 + $0xe50] sm:$0xff] %v2631_v30  ;;  %v1962_v37 = vadd.f32 %v1961_v35, %v4069_v62  ;;  %v2635_v38 = vadd.f32 %v2634_v36, %v4071_v63  ;;  %v1963_v39 = vpop.f32.mrb[231].mxu0  ;;  %v2636_v40 = vpop.f32.mrb[231].mxu1 }
 0x2e5   : > { %3156 = vst [vmem:[%s4080_s28 + $0xe48] sm:$0xff] %v1960_v33  ;;  %3158 = vst [vmem:[%s4080_s28 + $0xe58] sm:$0xff] %v2633_v34  ;;  %v1964_v41 = vadd.f32 %v1963_v39, %v4073_v0  ;;  %v2637_v42 = vadd.f32 %v2636_v40, %v4075_v1 }
 0x2e6   : > { %3159 = vst [vmem:[%s4080_s28 + $0xe60] sm:$0xff] %v1962_v37  ;;  %3161 = vst [vmem:[%s4080_s28 + $0xe70] sm:$0xff] %v2635_v38 }
 0x2e7   : > { %3160 = vst [vmem:[%s4080_s28 + $0xe68] sm:$0xff] %v1964_v41  ;;  %3162 = vst [vmem:[%s4080_s28 + $0xe78] sm:$0xff] %v2637_v42 }
 0x2e9   : > { %v1967_v43 = vpop.f32.mrb[232].mxu0  ;;  %v2640_v44 = vpop.f32.mrb[232].mxu1 }
 0x2ea   : > { %v1968_v45 = vadd.f32 %v1967_v43, %v4069_v62  ;;  %v2641_v46 = vadd.f32 %v2640_v44, %v4071_v63  ;;  %v1969_v47 = vpop.f32.mrb[233].mxu0  ;;  %v2642_v48 = vpop.f32.mrb[233].mxu1 }
 0x2eb   : > { %v1970_v49 = vadd.f32 %v1969_v47, %v4073_v0  ;;  %v2643_v50 = vadd.f32 %v2642_v48, %v4075_v1  ;;  %v1971_v51 = vpop.f32.mrb[234].mxu0  ;;  %v2644_v52 = vpop.f32.mrb[234].mxu1 }
 0x2ec   : > { %3163 = vst [vmem:[%s4080_s28 + $0xe80] sm:$0xff] %v1968_v45  ;;  %3165 = vst [vmem:[%s4080_s28 + $0xe90] sm:$0xff] %v2641_v46  ;;  %v1972_v53 = vadd.f32 %v1971_v51, %v4069_v62  ;;  %v2645_v54 = vadd.f32 %v2644_v52, %v4071_v63  ;;  %v1973_v55 = vpop.f32.mrb[235].mxu0  ;;  %v2646_v56 = vpop.f32.mrb[235].mxu1 }
 0x2ed   : > { %3164 = vst [vmem:[%s4080_s28 + $0xe88] sm:$0xff] %v1970_v49  ;;  %3166 = vst [vmem:[%s4080_s28 + $0xe98] sm:$0xff] %v2643_v50  ;;  %v1974_v57 = vadd.f32 %v1973_v55, %v4073_v0  ;;  %v2647_v58 = vadd.f32 %v2646_v56, %v4075_v1 }
 0x2ee   : > { %3167 = vst [vmem:[%s4080_s28 + $0xea0] sm:$0xff] %v1972_v53  ;;  %3169 = vst [vmem:[%s4080_s28 + $0xeb0] sm:$0xff] %v2645_v54 }
 0x2ef   : > { %3168 = vst [vmem:[%s4080_s28 + $0xea8] sm:$0xff] %v1974_v57  ;;  %3170 = vst [vmem:[%s4080_s28 + $0xeb8] sm:$0xff] %v2647_v58 }
 0x2f1   : > { %v1977_v59 = vpop.f32.mrb[236].mxu0  ;;  %v2650_v60 = vpop.f32.mrb[236].mxu1 }
 0x2f2   : > { %v1978_v61 = vadd.f32 %v1977_v59, %v4069_v62  ;;  %v2651_v2 = vadd.f32 %v2650_v60, %v4071_v63  ;;  %v1979_v3 = vpop.f32.mrb[237].mxu0  ;;  %v2652_v4 = vpop.f32.mrb[237].mxu1 }
 0x2f3   : > { %v1980_v5 = vadd.f32 %v1979_v3, %v4073_v0  ;;  %v2653_v6 = vadd.f32 %v2652_v4, %v4075_v1  ;;  %v1981_v7 = vpop.f32.mrb[238].mxu0  ;;  %v2654_v8 = vpop.f32.mrb[238].mxu1 }
 0x2f4   : > { %3171 = vst [vmem:[%s4080_s28 + $0xec0] sm:$0xff] %v1978_v61  ;;  %3173 = vst [vmem:[%s4080_s28 + $0xed0] sm:$0xff] %v2651_v2  ;;  %v1982_v9 = vadd.f32 %v1981_v7, %v4069_v62  ;;  %v2655_v10 = vadd.f32 %v2654_v8, %v4071_v63  ;;  %v1983_v11 = vpop.f32.mrb[239].mxu0  ;;  %v2656_v12 = vpop.f32.mrb[239].mxu1 }
 0x2f5   : > { %3172 = vst [vmem:[%s4080_s28 + $0xec8] sm:$0xff] %v1980_v5  ;;  %3174 = vst [vmem:[%s4080_s28 + $0xed8] sm:$0xff] %v2653_v6  ;;  %v1984_v13 = vadd.f32 %v1983_v11, %v4073_v0  ;;  %v2657_v14 = vadd.f32 %v2656_v12, %v4075_v1 }
 0x2f6   : > { %3175 = vst [vmem:[%s4080_s28 + $0xee0] sm:$0xff] %v1982_v9  ;;  %3177 = vst [vmem:[%s4080_s28 + $0xef0] sm:$0xff] %v2655_v10 }
 0x2f7   : > { %3176 = vst [vmem:[%s4080_s28 + $0xee8] sm:$0xff] %v1984_v13  ;;  %3178 = vst [vmem:[%s4080_s28 + $0xef8] sm:$0xff] %v2657_v14 }
 0x2f9   : > { %v1987_v15 = vpop.f32.mrb[240].mxu0  ;;  %v2660_v16 = vpop.f32.mrb[240].mxu1 }
 0x2fa   : > { %v1988_v17 = vadd.f32 %v1987_v15, %v4069_v62  ;;  %v2661_v18 = vadd.f32 %v2660_v16, %v4071_v63  ;;  %v1989_v19 = vpop.f32.mrb[241].mxu0  ;;  %v2662_v20 = vpop.f32.mrb[241].mxu1 }
 0x2fb   : > { %v1990_v21 = vadd.f32 %v1989_v19, %v4073_v0  ;;  %v2663_v22 = vadd.f32 %v2662_v20, %v4075_v1  ;;  %v1991_v23 = vpop.f32.mrb[242].mxu0  ;;  %v2664_v24 = vpop.f32.mrb[242].mxu1 }
 0x2fc   : > { %3179 = vst [vmem:[%s4080_s28 + $0xf00] sm:$0xff] %v1988_v17  ;;  %3181 = vst [vmem:[%s4080_s28 + $0xf10] sm:$0xff] %v2661_v18  ;;  %v1992_v25 = vadd.f32 %v1991_v23, %v4069_v62  ;;  %v2665_v26 = vadd.f32 %v2664_v24, %v4071_v63  ;;  %v1993_v27 = vpop.f32.mrb[243].mxu0  ;;  %v2666_v28 = vpop.f32.mrb[243].mxu1 }
 0x2fd   : > { %3180 = vst [vmem:[%s4080_s28 + $0xf08] sm:$0xff] %v1990_v21  ;;  %3182 = vst [vmem:[%s4080_s28 + $0xf18] sm:$0xff] %v2663_v22  ;;  %v1994_v29 = vadd.f32 %v1993_v27, %v4073_v0  ;;  %v2667_v30 = vadd.f32 %v2666_v28, %v4075_v1 }
 0x2fe   : > { %3183 = vst [vmem:[%s4080_s28 + $0xf20] sm:$0xff] %v1992_v25  ;;  %3185 = vst [vmem:[%s4080_s28 + $0xf30] sm:$0xff] %v2665_v26 }
 0x2ff   : > { %3184 = vst [vmem:[%s4080_s28 + $0xf28] sm:$0xff] %v1994_v29  ;;  %3186 = vst [vmem:[%s4080_s28 + $0xf38] sm:$0xff] %v2667_v30 }
 0x301   : > { %v1997_v31 = vpop.f32.mrb[244].mxu0  ;;  %v2670_v32 = vpop.f32.mrb[244].mxu1 }
 0x302   : > { %v1998_v33 = vadd.f32 %v1997_v31, %v4069_v62  ;;  %v2671_v34 = vadd.f32 %v2670_v32, %v4071_v63  ;;  %v1999_v35 = vpop.f32.mrb[245].mxu0  ;;  %v2672_v36 = vpop.f32.mrb[245].mxu1 }
 0x303   : > { %v2000_v37 = vadd.f32 %v1999_v35, %v4073_v0  ;;  %v2673_v38 = vadd.f32 %v2672_v36, %v4075_v1  ;;  %v2001_v39 = vpop.f32.mrb[246].mxu0  ;;  %v2674_v40 = vpop.f32.mrb[246].mxu1 }
 0x304   : > { %3187 = vst [vmem:[%s4080_s28 + $0xf40] sm:$0xff] %v1998_v33  ;;  %3189 = vst [vmem:[%s4080_s28 + $0xf50] sm:$0xff] %v2671_v34  ;;  %v2002_v41 = vadd.f32 %v2001_v39, %v4069_v62  ;;  %v2675_v42 = vadd.f32 %v2674_v40, %v4071_v63  ;;  %v2003_v43 = vpop.f32.mrb[247].mxu0  ;;  %v2676_v44 = vpop.f32.mrb[247].mxu1 }
 0x305   : > { %3188 = vst [vmem:[%s4080_s28 + $0xf48] sm:$0xff] %v2000_v37  ;;  %3190 = vst [vmem:[%s4080_s28 + $0xf58] sm:$0xff] %v2673_v38  ;;  %v2004_v45 = vadd.f32 %v2003_v43, %v4073_v0  ;;  %v2677_v46 = vadd.f32 %v2676_v44, %v4075_v1 }
 0x306   : > { %3191 = vst [vmem:[%s4080_s28 + $0xf60] sm:$0xff] %v2002_v41  ;;  %3193 = vst [vmem:[%s4080_s28 + $0xf70] sm:$0xff] %v2675_v42 }
 0x307   : > { %3192 = vst [vmem:[%s4080_s28 + $0xf68] sm:$0xff] %v2004_v45  ;;  %3194 = vst [vmem:[%s4080_s28 + $0xf78] sm:$0xff] %v2677_v46 }
 0x309   : > { %v2007_v47 = vpop.f32.mrb[248].mxu0  ;;  %v2680_v48 = vpop.f32.mrb[248].mxu1 }
 0x30a   : > { %v2008_v49 = vadd.f32 %v2007_v47, %v4069_v62  ;;  %v2681_v50 = vadd.f32 %v2680_v48, %v4071_v63  ;;  %v2009_v51 = vpop.f32.mrb[249].mxu0  ;;  %v2682_v52 = vpop.f32.mrb[249].mxu1 }
 0x30b   : > { %v2010_v53 = vadd.f32 %v2009_v51, %v4073_v0  ;;  %v2683_v54 = vadd.f32 %v2682_v52, %v4075_v1  ;;  %v2011_v55 = vpop.f32.mrb[250].mxu0  ;;  %v2684_v56 = vpop.f32.mrb[250].mxu1 }
 0x30c   : > { %3195 = vst [vmem:[%s4080_s28 + $0xf80] sm:$0xff] %v2008_v49  ;;  %3197 = vst [vmem:[%s4080_s28 + $0xf90] sm:$0xff] %v2681_v50  ;;  %v2012_v57 = vadd.f32 %v2011_v55, %v4069_v62  ;;  %v2685_v58 = vadd.f32 %v2684_v56, %v4071_v63  ;;  %v2013_v59 = vpop.f32.mrb[251].mxu0  ;;  %v2686_v60 = vpop.f32.mrb[251].mxu1 }
 0x30d   : > { %3196 = vst [vmem:[%s4080_s28 + $0xf88] sm:$0xff] %v2010_v53  ;;  %3198 = vst [vmem:[%s4080_s28 + $0xf98] sm:$0xff] %v2683_v54  ;;  %v2014_v61 = vadd.f32 %v2013_v59, %v4073_v0  ;;  %v2687_v2 = vadd.f32 %v2686_v60, %v4075_v1 }
 0x30e   : > { %3199 = vst [vmem:[%s4080_s28 + $0xfa0] sm:$0xff] %v2012_v57  ;;  %3201 = vst [vmem:[%s4080_s28 + $0xfb0] sm:$0xff] %v2685_v58 }
 0x30f   : > { %3200 = vst [vmem:[%s4080_s28 + $0xfa8] sm:$0xff] %v2014_v61  ;;  %3202 = vst [vmem:[%s4080_s28 + $0xfb8] sm:$0xff] %v2687_v2 }
 0x311   : > { %v2017_v3 = vpop.f32.mrb[252].mxu0  ;;  %v2690_v4 = vpop.f32.mrb[252].mxu1 }
 0x312   : > { %v2018_v5 = vadd.f32 %v2017_v3, %v4069_v62  ;;  %v2691_v6 = vadd.f32 %v2690_v4, %v4071_v63  ;;  %v2019_v7 = vpop.f32.mrb[253].mxu0  ;;  %v2692_v8 = vpop.f32.mrb[253].mxu1 }
 0x313   : > { %v2020_v9 = vadd.f32 %v2019_v7, %v4073_v0  ;;  %v2693_v10 = vadd.f32 %v2692_v8, %v4075_v1  ;;  %v2021_v11 = vpop.f32.mrb[254].mxu0  ;;  %v2694_v12 = vpop.f32.mrb[254].mxu1 }
 0x314   : > { %3203 = vst [vmem:[%s4080_s28 + $0xfc0] sm:$0xff] %v2018_v5  ;;  %3205 = vst [vmem:[%s4080_s28 + $0xfd0] sm:$0xff] %v2691_v6  ;;  %v2022_v13 = vadd.f32 %v2021_v11, %v4069_v62  ;;  %v2695_v14 = vadd.f32 %v2694_v12, %v4071_v63  ;;  %v2023_v15 = vpop.f32.mrb[255].mxu0  ;;  %v2696_v16 = vpop.f32.mrb[255].mxu1 }
 0x315   : > { %3204 = vst [vmem:[%s4080_s28 + $0xfc8] sm:$0xff] %v2020_v9  ;;  %3206 = vst [vmem:[%s4080_s28 + $0xfd8] sm:$0xff] %v2693_v10  ;;  %v2024_v17 = vadd.f32 %v2023_v15, %v4073_v0  ;;  %v2697_v18 = vadd.f32 %v2696_v16, %v4075_v1 }
 0x316   : > { %3207 = vst [vmem:[%s4080_s28 + $0xfe0] sm:$0xff] %v2022_v13  ;;  %3209 = vst [vmem:[%s4080_s28 + $0xff0] sm:$0xff] %v2695_v14 }
 0x317   : > { %3208 = vst [vmem:[%s4080_s28 + $0xfe8] sm:$0xff] %v2024_v17  ;;  %3210 = vst [vmem:[%s4080_s28 + $0xff8] sm:$0xff] %v2697_v18 }
 0x318 PF: > { %s13_s12 = sadd.s32 1, %s3778_s12  }
 0x319   : > { %p10_p4 = scmp.ge.s32.totalorder %s13_s12, 4  }
 0x31b   :  { %12 = sbr.rel (!%p10_p4) target bundleno = 1 (0x1), region = 62 }

</bundles_post_ra>
